<compile_context>
chip_gen: v7x
topology: tpu7x:2x2x1
jax: 0.10.0
libtpu: 0.0.40
codegen_flags: <defaults>
</compile_context>

<pallas_src>
import functools

import jax
import jax.numpy as jnp
from jax import lax
from jax.experimental import pallas as pl
from jax.experimental.pallas import tpu as pltpu


# ---------------------------------------------------------------------------
# In-kernel helpers (all VMEM-local; channels stay on the lane dimension).
# ---------------------------------------------------------------------------
def _upsample2x_nearest(x):
    """(H, W, C) -> (2H, 2W, C) nearest upsample via broadcast+reshape (no jnp.repeat)."""
    H, W, C = x.shape
    x = jnp.broadcast_to(x[:, :, None, :], (H, W, 2, C)).reshape(H, 2 * W, C)
    x = jnp.broadcast_to(x[:, None, :, :], (H, 2, 2 * W, C)).reshape(2 * H, 2 * W, C)
    return x


def _store_padded(xp_ref, x):
    """Write activation `x` (hh, ww, c) into scratch `xp_ref` (hh+2, ww+2, c) with a
    zero border. Every element of the scratch is written each call (no cross-step
    state), so this is correct regardless of how grid steps are split across cores."""
    hh, ww, c = x.shape
    dt = x.dtype
    xp_ref[0:1, :, :] = jnp.zeros((1, ww + 2, c), dt)            # top row
    xp_ref[hh + 1:hh + 2, :, :] = jnp.zeros((1, ww + 2, c), dt)  # bottom row
    xp_ref[:, 0:1, :] = jnp.zeros((hh + 2, 1, c), dt)            # left col (incl. corners)
    xp_ref[:, ww + 1:ww + 2, :] = jnp.zeros((hh + 2, 1, c), dt)  # right col (incl. corners)
    xp_ref[1:hh + 1, 1:ww + 1, :] = x                            # interior


def _conv3x3_from_padded(xp_ref, w_ref, hh, ww):
    """3x3 stride-1 'same' conv from a pre-padded VMEM scratch, natural orientation.

    xp_ref : (hh+2, ww+2, cin)  padded activation (HWC, channels on lanes)
    w_ref  : (9, cin, cout)     tap-stacked weights, tap index t = kh*3 + kw
    Returns (hh*ww, cout) f32, bias NOT added (9 accumulating matmuls, no im2col,
    no transposes — only strided sublane-row copies per tap).
    """
    cin = xp_ref.shape[-1]
    cout = w_ref.shape[-1]
    acc = jnp.zeros((hh * ww, cout), jnp.float32)
    for kh in range(3):
        for kw in range(3):
            tap = xp_ref[kh:kh + hh, kw:kw + ww, :].reshape(hh * ww, cin)
            acc += jnp.dot(tap, w_ref[kh * 3 + kw],
                           preferred_element_type=jnp.float32)
    return acc


# ---------------------------------------------------------------------------
# Fused kernel: one batch element per grid step.
# ---------------------------------------------------------------------------
def _fused_head_kernel(x_ref, w1_ref, b1_ref, w2_ref, b2_ref, o_ref,
                       xp1_ref, xp2_ref, *, H, W):
    """x_ref  : (1, H, W, Cin)            NHWC input tile
       w1_ref : (9, Cin, 64)              conv1 weights, tap-stacked
       b1_ref : (1, 64)
       w2_ref : (9, 64, num_classes)      conv2 weights, tap-stacked
       b2_ref : (num_classes, 1)
       o_ref  : (1, num_classes, 16*H*W)  NCHW-flattened output tile (lane-dense)
       xp1_ref: (2H+2, 2W+2, Cin)         VMEM scratch, padded stage-1 activation
       xp2_ref: (4H+2, 4W+2, 64)          VMEM scratch, padded stage-2 activation
    """
    H1, W1 = 2 * H, 2 * W
    H2, W2 = 4 * H, 4 * W
    c_mid = w1_ref.shape[-1]

    # ---- Stage 1: upsample x2 -> pad -> conv1 (Cin -> 64) ----
    x_up = _upsample2x_nearest(x_ref[0])                          # (H1, W1, Cin)
    _store_padded(xp1_ref, x_up)
    acc1 = _conv3x3_from_padded(xp1_ref, w1_ref, H1, W1)          # (H1*W1, 64)
    y1 = (acc1 + b1_ref[...]).reshape(H1, W1, c_mid)              # free-ish reshape

    # ---- Stage 2: upsample x2 -> pad -> conv2 (64 -> num_classes) -> sigmoid ----
    y1_up = _upsample2x_nearest(y1)                               # (H2, W2, 64)
    _store_padded(xp2_ref, y1_up)
    acc2 = _conv3x3_from_padded(xp2_ref, w2_ref, H2, W2)          # (H2*W2, ncls)

    # Single small transpose so the stored output is lane-dense (ncls, H2*W2).
    out_t = acc2.T + b2_ref[...]
    o_ref[0] = jax.nn.sigmoid(out_t).astype(o_ref.dtype)


# ---------------------------------------------------------------------------
# Wrapper: NCHW in, NCHW out (matches the PyTorch module).
# ---------------------------------------------------------------------------
@jax.jit
def conv_head_forward(x_nchw, params):
    N, C, H, W = x_nchw.shape
    c_mid = params["w1"].shape[-1]                     # 64
    num_classes = params["w2"].shape[-1]
    H2, W2 = 4 * H, 4 * W

    # Tap-stacked weights (free leading-dim reshape of HWIO) and 2-D biases.
    w1 = params["w1"].reshape(9, C, c_mid)             # (9, Cin, 64)
    w2 = params["w2"].reshape(9, c_mid, num_classes)   # (9, 64, ncls)
    b1 = params["b1"].reshape(1, c_mid)                # row bias for (HW, 64)
    b2 = params["b2"].reshape(num_classes, 1)          # col bias for (ncls, HW)

    x_nhwc = jnp.transpose(x_nchw, (0, 2, 3, 1))       # channels -> TPU lanes

    kernel = functools.partial(_fused_head_kernel, H=H, W=W)
    out_flat = pl.pallas_call(
        kernel,
        out_shape=jax.ShapeDtypeStruct((N, num_classes, H2 * W2), jnp.float32),
        grid=(N,),
        in_specs=[
            pl.BlockSpec((1, H, W, C), lambda n: (n, 0, 0, 0)),
            pl.BlockSpec((9, C, c_mid), lambda n: (0, 0, 0)),
            pl.BlockSpec((1, c_mid), lambda n: (0, 0)),
            pl.BlockSpec((9, c_mid, num_classes), lambda n: (0, 0, 0)),
            pl.BlockSpec((num_classes, 1), lambda n: (0, 0)),
        ],
        out_specs=pl.BlockSpec((1, num_classes, H2 * W2), lambda n: (n, 0, 0)),
        scratch_shapes=[
            pltpu.VMEM((2 * H + 2, 2 * W + 2, C), jnp.float32),
            pltpu.VMEM((4 * H + 2, 4 * W + 2, c_mid), jnp.float32),
        ],
        compiler_params=pltpu.CompilerParams(
            dimension_semantics=("parallel",),
            vmem_limit_bytes=32 * 1024 * 1024,
        ),
    )(x_nhwc, w1, b1, w2, b2)

    # (N, Cout, H2*W2) -> (N, Cout, H2, W2): free reshape, already NCHW.
    return out_flat.reshape(N, num_classes, H2, W2)


# ---------------------------------------------------------------------------
# Parameters / reference.
# ---------------------------------------------------------------------------
def init_params(key, embedding_size, num_classes):
    """Deterministic synthetic parameters (HWIO, shapes match the PyTorch module)."""
    k_w1, k_b1, k_w2, k_b2 = jax.random.split(key, 4)
    fan1 = embedding_size * 9
    fan2 = 64 * 9
    w1 = jax.random.normal(k_w1, (3, 3, embedding_size, 64), jnp.float32) / jnp.sqrt(fan1)
    b1 = jax.random.normal(k_b1, (64,), jnp.float32) * 0.01
    w2 = jax.random.normal(k_w2, (3, 3, 64, num_classes), jnp.float32) / jnp.sqrt(fan2)
    b2 = jax.random.normal(k_b2, (num_classes,), jnp.float32) * 0.01
    return {"w1": w1, "b1": b1, "w2": w2, "b2": b2}


def reference_forward(x_nchw, params):
    """Pure-JAX reference (lax.conv, full precision) for correctness checking."""
    dn = ("NHWC", "HWIO", "NHWC")
    x = jnp.transpose(x_nchw, (0, 2, 3, 1))
    x = jnp.repeat(jnp.repeat(x, 2, axis=1), 2, axis=2)
    x = lax.conv_general_dilated(x, params["w1"], (1, 1), ((1, 1), (1, 1)),
                                 dimension_numbers=dn,
                                 precision=lax.Precision.HIGHEST) + params["b1"]
    x = jnp.repeat(jnp.repeat(x, 2, axis=1), 2, axis=2)
    x = lax.conv_general_dilated(x, params["w2"], (1, 1), ((1, 1), (1, 1)),
                                 dimension_numbers=dn,
                                 precision=lax.Precision.HIGHEST) + params["b2"]
    x = jax.nn.sigmoid(x)
    return jnp.transpose(x, (0, 3, 1, 2))


if __name__ == "__main__":
    key = jax.random.PRNGKey(0)
    k_x, k_p = jax.random.split(key)

    # Small shapes consistent with the module: conv_head(embedding_size=32, num_classes=5)
    N, C, H, W = 2, 32, 8, 8
    num_classes = 5

    x = jax.random.normal(k_x, (N, C, H, W), jnp.float32)   # NCHW, like PyTorch
    params = init_params(k_p, embedding_size=C, num_classes=num_classes)

    out = conv_head_forward(x, params)
    out = jax.block_until_ready(out)

    assert out.shape == (N, num_classes, 4 * H, 4 * W), out.shape
    assert out.dtype == jnp.float32

    ref = reference_forward(x, params)
    if not jnp.allclose(out, ref, rtol=1e-4, atol=1e-4):
        raise AssertionError("Pallas kernel does not match JAX reference")

    print("KERNEL_OK")
</pallas_src>

<mosaic_0001>
module attributes {stable_mosaic.version = 11 : i64} {
  func.func @_fused_head_kernel(%arg0: i32, %arg1: memref<1x8x8x32xf32, #tpu.memory_space<vmem>>, %arg2: memref<9x32x64xf32, #tpu.memory_space<vmem>>, %arg3: memref<1x64xf32, #tpu.memory_space<vmem>>, %arg4: memref<9x64x5xf32, #tpu.memory_space<vmem>>, %arg5: memref<5x1xf32, #tpu.memory_space<vmem>>, %arg6: memref<1x5x1024xf32, #tpu.memory_space<vmem>>, %arg7: memref<18x18x32xf32, #tpu.memory_space<vmem>>, %arg8: memref<34x34x64xf32, #tpu.memory_space<vmem>>) attributes {dimension_semantics = [#tpu.dimension_semantics<parallel>], iteration_bounds = array<i64: 2>, scalar_prefetch = 0 : i64, scratch_operands = 2 : i64, tpu.core_type = #tpu.core_type<tc>, window_params = [{transform_indices = @transform_0, window_bounds = array<i64: 1, 8, 8, 32>}, {pipeline_mode = #tpu.pipeline_mode<synchronous>, transform_indices = @transform_1, window_bounds = array<i64: 9, 32, 64>}, {pipeline_mode = #tpu.pipeline_mode<synchronous>, transform_indices = @transform_2, window_bounds = array<i64: 1, 64>}, {pipeline_mode = #tpu.pipeline_mode<synchronous>, transform_indices = @transform_3, window_bounds = array<i64: 9, 64, 5>}, {pipeline_mode = #tpu.pipeline_mode<synchronous>, transform_indices = @transform_4, window_bounds = array<i64: 5, 1>}, {transform_indices = @transform_5, window_bounds = array<i64: 1, 5, 1024>}]} {
    %c0 = arith.constant 0 : index
    %c0_0 = arith.constant 0 : index
    %c0_1 = arith.constant 0 : index
    %c0_2 = arith.constant 0 : index
    %0 = vector.load %arg1[%c0, %c0_0, %c0_1, %c0_2] : memref<1x8x8x32xf32, #tpu.memory_space<vmem>>, vector<1x8x8x32xf32>
    %1 = vector.shape_cast %0 : vector<1x8x8x32xf32> to vector<8x8x32xf32>
    %2 = vector.shape_cast %1 : vector<8x8x32xf32> to vector<8x8x1x32xf32>
    %3 = vector.shape_cast %2 : vector<8x8x1x32xf32> to vector<8x8x1x32xf32>
    %4 = vector.broadcast %3 : vector<8x8x1x32xf32> to vector<8x8x2x32xf32>
    %5 = vector.shape_cast %4 : vector<8x8x2x32xf32> to vector<8x16x32xf32>
    %6 = vector.shape_cast %5 : vector<8x16x32xf32> to vector<8x1x16x32xf32>
    %7 = vector.shape_cast %6 : vector<8x1x16x32xf32> to vector<8x1x16x32xf32>
    %8 = vector.broadcast %7 : vector<8x1x16x32xf32> to vector<8x2x16x32xf32>
    %9 = vector.shape_cast %8 : vector<8x2x16x32xf32> to vector<16x16x32xf32>
    %cst = arith.constant 0.000000e+00 : f32
    %10 = vector.broadcast %cst : f32 to vector<1x18x32xf32>
    %c0_3 = arith.constant 0 : index
    %c0_4 = arith.constant 0 : index
    %c0_5 = arith.constant 0 : index
    %11 = vector.load %arg7[%c0_3, %c0_4, %c0_5] : memref<18x18x32xf32, #tpu.memory_space<vmem>>, vector<1x18x32xf32>
    tpu.vector_store %arg7[%c0_3, %c0_4, %c0_5], %10 {strides = array<i32>} : memref<18x18x32xf32, #tpu.memory_space<vmem>>, vector<1x18x32xf32>,
    %cst_6 = arith.constant 0.000000e+00 : f32
    %12 = vector.broadcast %cst_6 : f32 to vector<1x18x32xf32>
    %c17 = arith.constant 17 : index
    %c0_7 = arith.constant 0 : index
    %c0_8 = arith.constant 0 : index
    %13 = vector.load %arg7[%c17, %c0_7, %c0_8] : memref<18x18x32xf32, #tpu.memory_space<vmem>>, vector<1x18x32xf32>
    tpu.vector_store %arg7[%c17, %c0_7, %c0_8], %12 {strides = array<i32>} : memref<18x18x32xf32, #tpu.memory_space<vmem>>, vector<1x18x32xf32>,
    %cst_9 = arith.constant 0.000000e+00 : f32
    %14 = vector.broadcast %cst_9 : f32 to vector<18x1x32xf32>
    %c0_10 = arith.constant 0 : index
    %c0_11 = arith.constant 0 : index
    %c0_12 = arith.constant 0 : index
    %15 = vector.load %arg7[%c0_10, %c0_11, %c0_12] : memref<18x18x32xf32, #tpu.memory_space<vmem>>, vector<18x1x32xf32>
    tpu.vector_store %arg7[%c0_10, %c0_11, %c0_12], %14 {strides = array<i32>} : memref<18x18x32xf32, #tpu.memory_space<vmem>>, vector<18x1x32xf32>,
    %cst_13 = arith.constant 0.000000e+00 : f32
    %16 = vector.broadcast %cst_13 : f32 to vector<18x1x32xf32>
    %c0_14 = arith.constant 0 : index
    %c17_15 = arith.constant 17 : index
    %c0_16 = arith.constant 0 : index
    %17 = vector.load %arg7[%c0_14, %c17_15, %c0_16] : memref<18x18x32xf32, #tpu.memory_space<vmem>>, vector<18x1x32xf32>
    tpu.vector_store %arg7[%c0_14, %c17_15, %c0_16], %16 {strides = array<i32>} : memref<18x18x32xf32, #tpu.memory_space<vmem>>, vector<18x1x32xf32>,
    %c1 = arith.constant 1 : index
    %c1_17 = arith.constant 1 : index
    %c0_18 = arith.constant 0 : index
    %18 = vector.load %arg7[%c1, %c1_17, %c0_18] : memref<18x18x32xf32, #tpu.memory_space<vmem>>, vector<16x16x32xf32>
    tpu.vector_store %arg7[%c1, %c1_17, %c0_18], %9 {strides = array<i32>} : memref<18x18x32xf32, #tpu.memory_space<vmem>>, vector<16x16x32xf32>,
    %cst_19 = arith.constant 0.000000e+00 : f32
    %19 = vector.broadcast %cst_19 : f32 to vector<256x64xf32>
    %c0_20 = arith.constant 0 : index
    %c0_21 = arith.constant 0 : index
    %c0_22 = arith.constant 0 : index
    %20 = vector.load %arg7[%c0_20, %c0_21, %c0_22] : memref<18x18x32xf32, #tpu.memory_space<vmem>>, vector<16x16x32xf32>
    %21 = vector.shape_cast %20 : vector<16x16x32xf32> to vector<256x32xf32>
    %c0_23 = arith.constant 0 : index
    %c0_24 = arith.constant 0 : index
    %c0_25 = arith.constant 0 : index
    %22 = vector.load %arg2[%c0_23, %c0_24, %c0_25] : memref<9x32x64xf32, #tpu.memory_space<vmem>>, vector<1x32x64xf32>
    %23 = vector.shape_cast %22 : vector<1x32x64xf32> to vector<32x64xf32>
    %cst_26 = arith.constant dense<0.000000e+00> : vector<256x64xf32>
    %24 = tpu.matmul %21, %23, %cst_26 {dimension_numbers = #tpu.dot_dimension_numbers<[1], [0], [0], [1], [0, 0, 1, 1], [], []>} : vector<256x32xf32>, vector<32x64xf32>, vector<256x64xf32> -> vector<256x64xf32>
    %25 = arith.addf %19, %24 : vector<256x64xf32>
    %c0_27 = arith.constant 0 : index
    %c1_28 = arith.constant 1 : index
    %c0_29 = arith.constant 0 : index
    %26 = vector.load %arg7[%c0_27, %c1_28, %c0_29] : memref<18x18x32xf32, #tpu.memory_space<vmem>>, vector<16x16x32xf32>
    %27 = vector.shape_cast %26 : vector<16x16x32xf32> to vector<256x32xf32>
    %c1_30 = arith.constant 1 : index
    %c0_31 = arith.constant 0 : index
    %c0_32 = arith.constant 0 : index
    %28 = vector.load %arg2[%c1_30, %c0_31, %c0_32] : memref<9x32x64xf32, #tpu.memory_space<vmem>>, vector<1x32x64xf32>
    %29 = vector.shape_cast %28 : vector<1x32x64xf32> to vector<32x64xf32>
    %cst_33 = arith.constant dense<0.000000e+00> : vector<256x64xf32>
    %30 = tpu.matmul %27, %29, %cst_33 {dimension_numbers = #tpu.dot_dimension_numbers<[1], [0], [0], [1], [0, 0, 1, 1], [], []>} : vector<256x32xf32>, vector<32x64xf32>, vector<256x64xf32> -> vector<256x64xf32>
    %31 = arith.addf %25, %30 : vector<256x64xf32>
    %c0_34 = arith.constant 0 : index
    %c2 = arith.constant 2 : index
    %c0_35 = arith.constant 0 : index
    %32 = vector.load %arg7[%c0_34, %c2, %c0_35] : memref<18x18x32xf32, #tpu.memory_space<vmem>>, vector<16x16x32xf32>
    %33 = vector.shape_cast %32 : vector<16x16x32xf32> to vector<256x32xf32>
    %c2_36 = arith.constant 2 : index
    %c0_37 = arith.constant 0 : index
    %c0_38 = arith.constant 0 : index
    %34 = vector.load %arg2[%c2_36, %c0_37, %c0_38] : memref<9x32x64xf32, #tpu.memory_space<vmem>>, vector<1x32x64xf32>
    %35 = vector.shape_cast %34 : vector<1x32x64xf32> to vector<32x64xf32>
    %cst_39 = arith.constant dense<0.000000e+00> : vector<256x64xf32>
    %36 = tpu.matmul %33, %35, %cst_39 {dimension_numbers = #tpu.dot_dimension_numbers<[1], [0], [0], [1], [0, 0, 1, 1], [], []>} : vector<256x32xf32>, vector<32x64xf32>, vector<256x64xf32> -> vector<256x64xf32>
    %37 = arith.addf %31, %36 : vector<256x64xf32>
    %c1_40 = arith.constant 1 : index
    %c0_41 = arith.constant 0 : index
    %c0_42 = arith.constant 0 : index
    %38 = vector.load %arg7[%c1_40, %c0_41, %c0_42] : memref<18x18x32xf32, #tpu.memory_space<vmem>>, vector<16x16x32xf32>
    %39 = vector.shape_cast %38 : vector<16x16x32xf32> to vector<256x32xf32>
    %c3 = arith.constant 3 : index
    %c0_43 = arith.constant 0 : index
    %c0_44 = arith.constant 0 : index
    %40 = vector.load %arg2[%c3, %c0_43, %c0_44] : memref<9x32x64xf32, #tpu.memory_space<vmem>>, vector<1x32x64xf32>
    %41 = vector.shape_cast %40 : vector<1x32x64xf32> to vector<32x64xf32>
    %cst_45 = arith.constant dense<0.000000e+00> : vector<256x64xf32>
    %42 = tpu.matmul %39, %41, %cst_45 {dimension_numbers = #tpu.dot_dimension_numbers<[1], [0], [0], [1], [0, 0, 1, 1], [], []>} : vector<256x32xf32>, vector<32x64xf32>, vector<256x64xf32> -> vector<256x64xf32>
    %43 = arith.addf %37, %42 : vector<256x64xf32>
    %c1_46 = arith.constant 1 : index
    %c1_47 = arith.constant 1 : index
    %c0_48 = arith.constant 0 : index
    %44 = vector.load %arg7[%c1_46, %c1_47, %c0_48] : memref<18x18x32xf32, #tpu.memory_space<vmem>>, vector<16x16x32xf32>
    %45 = vector.shape_cast %44 : vector<16x16x32xf32> to vector<256x32xf32>
    %c4 = arith.constant 4 : index
    %c0_49 = arith.constant 0 : index
    %c0_50 = arith.constant 0 : index
    %46 = vector.load %arg2[%c4, %c0_49, %c0_50] : memref<9x32x64xf32, #tpu.memory_space<vmem>>, vector<1x32x64xf32>
    %47 = vector.shape_cast %46 : vector<1x32x64xf32> to vector<32x64xf32>
    %cst_51 = arith.constant dense<0.000000e+00> : vector<256x64xf32>
    %48 = tpu.matmul %45, %47, %cst_51 {dimension_numbers = #tpu.dot_dimension_numbers<[1], [0], [0], [1], [0, 0, 1, 1], [], []>} : vector<256x32xf32>, vector<32x64xf32>, vector<256x64xf32> -> vector<256x64xf32>
    %49 = arith.addf %43, %48 : vector<256x64xf32>
    %c1_52 = arith.constant 1 : index
    %c2_53 = arith.constant 2 : index
    %c0_54 = arith.constant 0 : index
    %50 = vector.load %arg7[%c1_52, %c2_53, %c0_54] : memref<18x18x32xf32, #tpu.memory_space<vmem>>, vector<16x16x32xf32>
    %51 = vector.shape_cast %50 : vector<16x16x32xf32> to vector<256x32xf32>
    %c5 = arith.constant 5 : index
    %c0_55 = arith.constant 0 : index
    %c0_56 = arith.constant 0 : index
    %52 = vector.load %arg2[%c5, %c0_55, %c0_56] : memref<9x32x64xf32, #tpu.memory_space<vmem>>, vector<1x32x64xf32>
    %53 = vector.shape_cast %52 : vector<1x32x64xf32> to vector<32x64xf32>
    %cst_57 = arith.constant dense<0.000000e+00> : vector<256x64xf32>
    %54 = tpu.matmul %51, %53, %cst_57 {dimension_numbers = #tpu.dot_dimension_numbers<[1], [0], [0], [1], [0, 0, 1, 1], [], []>} : vector<256x32xf32>, vector<32x64xf32>, vector<256x64xf32> -> vector<256x64xf32>
    %55 = arith.addf %49, %54 : vector<256x64xf32>
    %c2_58 = arith.constant 2 : index
    %c0_59 = arith.constant 0 : index
    %c0_60 = arith.constant 0 : index
    %56 = vector.load %arg7[%c2_58, %c0_59, %c0_60] : memref<18x18x32xf32, #tpu.memory_space<vmem>>, vector<16x16x32xf32>
    %57 = vector.shape_cast %56 : vector<16x16x32xf32> to vector<256x32xf32>
    %c6 = arith.constant 6 : index
    %c0_61 = arith.constant 0 : index
    %c0_62 = arith.constant 0 : index
    %58 = vector.load %arg2[%c6, %c0_61, %c0_62] : memref<9x32x64xf32, #tpu.memory_space<vmem>>, vector<1x32x64xf32>
    %59 = vector.shape_cast %58 : vector<1x32x64xf32> to vector<32x64xf32>
    %cst_63 = arith.constant dense<0.000000e+00> : vector<256x64xf32>
    %60 = tpu.matmul %57, %59, %cst_63 {dimension_numbers = #tpu.dot_dimension_numbers<[1], [0], [0], [1], [0, 0, 1, 1], [], []>} : vector<256x32xf32>, vector<32x64xf32>, vector<256x64xf32> -> vector<256x64xf32>
    %61 = arith.addf %55, %60 : vector<256x64xf32>
    %c2_64 = arith.constant 2 : index
    %c1_65 = arith.constant 1 : index
    %c0_66 = arith.constant 0 : index
    %62 = vector.load %arg7[%c2_64, %c1_65, %c0_66] : memref<18x18x32xf32, #tpu.memory_space<vmem>>, vector<16x16x32xf32>
    %63 = vector.shape_cast %62 : vector<16x16x32xf32> to vector<256x32xf32>
    %c7 = arith.constant 7 : index
    %c0_67 = arith.constant 0 : index
    %c0_68 = arith.constant 0 : index
    %64 = vector.load %arg2[%c7, %c0_67, %c0_68] : memref<9x32x64xf32, #tpu.memory_space<vmem>>, vector<1x32x64xf32>
    %65 = vector.shape_cast %64 : vector<1x32x64xf32> to vector<32x64xf32>
    %cst_69 = arith.constant dense<0.000000e+00> : vector<256x64xf32>
    %66 = tpu.matmul %63, %65, %cst_69 {dimension_numbers = #tpu.dot_dimension_numbers<[1], [0], [0], [1], [0, 0, 1, 1], [], []>} : vector<256x32xf32>, vector<32x64xf32>, vector<256x64xf32> -> vector<256x64xf32>
    %67 = arith.addf %61, %66 : vector<256x64xf32>
    %c2_70 = arith.constant 2 : index
    %c2_71 = arith.constant 2 : index
    %c0_72 = arith.constant 0 : index
    %68 = vector.load %arg7[%c2_70, %c2_71, %c0_72] : memref<18x18x32xf32, #tpu.memory_space<vmem>>, vector<16x16x32xf32>
    %69 = vector.shape_cast %68 : vector<16x16x32xf32> to vector<256x32xf32>
    %c8 = arith.constant 8 : index
    %c0_73 = arith.constant 0 : index
    %c0_74 = arith.constant 0 : index
    %70 = vector.load %arg2[%c8, %c0_73, %c0_74] : memref<9x32x64xf32, #tpu.memory_space<vmem>>, vector<1x32x64xf32>
    %71 = vector.shape_cast %70 : vector<1x32x64xf32> to vector<32x64xf32>
    %cst_75 = arith.constant dense<0.000000e+00> : vector<256x64xf32>
    %72 = tpu.matmul %69, %71, %cst_75 {dimension_numbers = #tpu.dot_dimension_numbers<[1], [0], [0], [1], [0, 0, 1, 1], [], []>} : vector<256x32xf32>, vector<32x64xf32>, vector<256x64xf32> -> vector<256x64xf32>
    %73 = arith.addf %67, %72 : vector<256x64xf32>
    %c0_76 = arith.constant 0 : index
    %c0_77 = arith.constant 0 : index
    %74 = vector.load %arg3[%c0_76, %c0_77] : memref<1x64xf32, #tpu.memory_space<vmem>>, vector<1x64xf32>
    %75 = vector.broadcast %74 : vector<1x64xf32> to vector<256x64xf32>
    %76 = arith.addf %73, %75 : vector<256x64xf32>
    %77 = vector.shape_cast %76 : vector<256x64xf32> to vector<16x16x64xf32>
    %78 = vector.shape_cast %77 : vector<16x16x64xf32> to vector<16x16x1x64xf32>
    %79 = vector.shape_cast %78 : vector<16x16x1x64xf32> to vector<16x16x1x64xf32>
    %80 = vector.broadcast %79 : vector<16x16x1x64xf32> to vector<16x16x2x64xf32>
    %81 = vector.shape_cast %80 : vector<16x16x2x64xf32> to vector<16x32x64xf32>
    %82 = vector.shape_cast %81 : vector<16x32x64xf32> to vector<16x1x32x64xf32>
    %83 = vector.shape_cast %82 : vector<16x1x32x64xf32> to vector<16x1x32x64xf32>
    %84 = vector.broadcast %83 : vector<16x1x32x64xf32> to vector<16x2x32x64xf32>
    %85 = vector.shape_cast %84 : vector<16x2x32x64xf32> to vector<32x32x64xf32>
    %cst_78 = arith.constant 0.000000e+00 : f32
    %86 = vector.broadcast %cst_78 : f32 to vector<1x34x64xf32>
    %c0_79 = arith.constant 0 : index
    %c0_80 = arith.constant 0 : index
    %c0_81 = arith.constant 0 : index
    %87 = vector.load %arg8[%c0_79, %c0_80, %c0_81] : memref<34x34x64xf32, #tpu.memory_space<vmem>>, vector<1x34x64xf32>
    tpu.vector_store %arg8[%c0_79, %c0_80, %c0_81], %86 {strides = array<i32>} : memref<34x34x64xf32, #tpu.memory_space<vmem>>, vector<1x34x64xf32>,
    %cst_82 = arith.constant 0.000000e+00 : f32
    %88 = vector.broadcast %cst_82 : f32 to vector<1x34x64xf32>
    %c33 = arith.constant 33 : index
    %c0_83 = arith.constant 0 : index
    %c0_84 = arith.constant 0 : index
    %89 = vector.load %arg8[%c33, %c0_83, %c0_84] : memref<34x34x64xf32, #tpu.memory_space<vmem>>, vector<1x34x64xf32>
    tpu.vector_store %arg8[%c33, %c0_83, %c0_84], %88 {strides = array<i32>} : memref<34x34x64xf32, #tpu.memory_space<vmem>>, vector<1x34x64xf32>,
    %cst_85 = arith.constant 0.000000e+00 : f32
    %90 = vector.broadcast %cst_85 : f32 to vector<34x1x64xf32>
    %c0_86 = arith.constant 0 : index
    %c0_87 = arith.constant 0 : index
    %c0_88 = arith.constant 0 : index
    %91 = vector.load %arg8[%c0_86, %c0_87, %c0_88] : memref<34x34x64xf32, #tpu.memory_space<vmem>>, vector<34x1x64xf32>
    tpu.vector_store %arg8[%c0_86, %c0_87, %c0_88], %90 {strides = array<i32>} : memref<34x34x64xf32, #tpu.memory_space<vmem>>, vector<34x1x64xf32>,
    %cst_89 = arith.constant 0.000000e+00 : f32
    %92 = vector.broadcast %cst_89 : f32 to vector<34x1x64xf32>
    %c0_90 = arith.constant 0 : index
    %c33_91 = arith.constant 33 : index
    %c0_92 = arith.constant 0 : index
    %93 = vector.load %arg8[%c0_90, %c33_91, %c0_92] : memref<34x34x64xf32, #tpu.memory_space<vmem>>, vector<34x1x64xf32>
    tpu.vector_store %arg8[%c0_90, %c33_91, %c0_92], %92 {strides = array<i32>} : memref<34x34x64xf32, #tpu.memory_space<vmem>>, vector<34x1x64xf32>,
    %c1_93 = arith.constant 1 : index
    %c1_94 = arith.constant 1 : index
    %c0_95 = arith.constant 0 : index
    %94 = vector.load %arg8[%c1_93, %c1_94, %c0_95] : memref<34x34x64xf32, #tpu.memory_space<vmem>>, vector<32x32x64xf32>
    tpu.vector_store %arg8[%c1_93, %c1_94, %c0_95], %85 {strides = array<i32>} : memref<34x34x64xf32, #tpu.memory_space<vmem>>, vector<32x32x64xf32>,
    %cst_96 = arith.constant 0.000000e+00 : f32
    %95 = vector.broadcast %cst_96 : f32 to vector<1024x5xf32>
    %c0_97 = arith.constant 0 : index
    %c0_98 = arith.constant 0 : index
    %c0_99 = arith.constant 0 : index
    %96 = vector.load %arg8[%c0_97, %c0_98, %c0_99] : memref<34x34x64xf32, #tpu.memory_space<vmem>>, vector<32x32x64xf32>
    %97 = vector.shape_cast %96 : vector<32x32x64xf32> to vector<1024x64xf32>
    %c0_100 = arith.constant 0 : index
    %c0_101 = arith.constant 0 : index
    %c0_102 = arith.constant 0 : index
    %98 = vector.load %arg4[%c0_100, %c0_101, %c0_102] : memref<9x64x5xf32, #tpu.memory_space<vmem>>, vector<1x64x5xf32>
    %99 = vector.shape_cast %98 : vector<1x64x5xf32> to vector<64x5xf32>
    %cst_103 = arith.constant dense<0.000000e+00> : vector<1024x5xf32>
    %100 = tpu.matmul %97, %99, %cst_103 {dimension_numbers = #tpu.dot_dimension_numbers<[1], [0], [0], [1], [0, 0, 1, 1], [], []>} : vector<1024x64xf32>, vector<64x5xf32>, vector<1024x5xf32> -> vector<1024x5xf32>
    %101 = arith.addf %95, %100 : vector<1024x5xf32>
    %c0_104 = arith.constant 0 : index
    %c1_105 = arith.constant 1 : index
    %c0_106 = arith.constant 0 : index
    %102 = vector.load %arg8[%c0_104, %c1_105, %c0_106] : memref<34x34x64xf32, #tpu.memory_space<vmem>>, vector<32x32x64xf32>
    %103 = vector.shape_cast %102 : vector<32x32x64xf32> to vector<1024x64xf32>
    %c1_107 = arith.constant 1 : index
    %c0_108 = arith.constant 0 : index
    %c0_109 = arith.constant 0 : index
    %104 = vector.load %arg4[%c1_107, %c0_108, %c0_109] : memref<9x64x5xf32, #tpu.memory_space<vmem>>, vector<1x64x5xf32>
    %105 = vector.shape_cast %104 : vector<1x64x5xf32> to vector<64x5xf32>
    %cst_110 = arith.constant dense<0.000000e+00> : vector<1024x5xf32>
    %106 = tpu.matmul %103, %105, %cst_110 {dimension_numbers = #tpu.dot_dimension_numbers<[1], [0], [0], [1], [0, 0, 1, 1], [], []>} : vector<1024x64xf32>, vector<64x5xf32>, vector<1024x5xf32> -> vector<1024x5xf32>
    %107 = arith.addf %101, %106 : vector<1024x5xf32>
    %c0_111 = arith.constant 0 : index
    %c2_112 = arith.constant 2 : index
    %c0_113 = arith.constant 0 : index
    %108 = vector.load %arg8[%c0_111, %c2_112, %c0_113] : memref<34x34x64xf32, #tpu.memory_space<vmem>>, vector<32x32x64xf32>
    %109 = vector.shape_cast %108 : vector<32x32x64xf32> to vector<1024x64xf32>
    %c2_114 = arith.constant 2 : index
    %c0_115 = arith.constant 0 : index
    %c0_116 = arith.constant 0 : index
    %110 = vector.load %arg4[%c2_114, %c0_115, %c0_116] : memref<9x64x5xf32, #tpu.memory_space<vmem>>, vector<1x64x5xf32>
    %111 = vector.shape_cast %110 : vector<1x64x5xf32> to vector<64x5xf32>
    %cst_117 = arith.constant dense<0.000000e+00> : vector<1024x5xf32>
    %112 = tpu.matmul %109, %111, %cst_117 {dimension_numbers = #tpu.dot_dimension_numbers<[1], [0], [0], [1], [0, 0, 1, 1], [], []>} : vector<1024x64xf32>, vector<64x5xf32>, vector<1024x5xf32> -> vector<1024x5xf32>
    %113 = arith.addf %107, %112 : vector<1024x5xf32>
    %c1_118 = arith.constant 1 : index
    %c0_119 = arith.constant 0 : index
    %c0_120 = arith.constant 0 : index
    %114 = vector.load %arg8[%c1_118, %c0_119, %c0_120] : memref<34x34x64xf32, #tpu.memory_space<vmem>>, vector<32x32x64xf32>
    %115 = vector.shape_cast %114 : vector<32x32x64xf32> to vector<1024x64xf32>
    %c3_121 = arith.constant 3 : index
    %c0_122 = arith.constant 0 : index
    %c0_123 = arith.constant 0 : index
    %116 = vector.load %arg4[%c3_121, %c0_122, %c0_123] : memref<9x64x5xf32, #tpu.memory_space<vmem>>, vector<1x64x5xf32>
    %117 = vector.shape_cast %116 : vector<1x64x5xf32> to vector<64x5xf32>
    %cst_124 = arith.constant dense<0.000000e+00> : vector<1024x5xf32>
    %118 = tpu.matmul %115, %117, %cst_124 {dimension_numbers = #tpu.dot_dimension_numbers<[1], [0], [0], [1], [0, 0, 1, 1], [], []>} : vector<1024x64xf32>, vector<64x5xf32>, vector<1024x5xf32> -> vector<1024x5xf32>
    %119 = arith.addf %113, %118 : vector<1024x5xf32>
    %c1_125 = arith.constant 1 : index
    %c1_126 = arith.constant 1 : index
    %c0_127 = arith.constant 0 : index
    %120 = vector.load %arg8[%c1_125, %c1_126, %c0_127] : memref<34x34x64xf32, #tpu.memory_space<vmem>>, vector<32x32x64xf32>
    %121 = vector.shape_cast %120 : vector<32x32x64xf32> to vector<1024x64xf32>
    %c4_128 = arith.constant 4 : index
    %c0_129 = arith.constant 0 : index
    %c0_130 = arith.constant 0 : index
    %122 = vector.load %arg4[%c4_128, %c0_129, %c0_130] : memref<9x64x5xf32, #tpu.memory_space<vmem>>, vector<1x64x5xf32>
    %123 = vector.shape_cast %122 : vector<1x64x5xf32> to vector<64x5xf32>
    %cst_131 = arith.constant dense<0.000000e+00> : vector<1024x5xf32>
    %124 = tpu.matmul %121, %123, %cst_131 {dimension_numbers = #tpu.dot_dimension_numbers<[1], [0], [0], [1], [0, 0, 1, 1], [], []>} : vector<1024x64xf32>, vector<64x5xf32>, vector<1024x5xf32> -> vector<1024x5xf32>
    %125 = arith.addf %119, %124 : vector<1024x5xf32>
    %c1_132 = arith.constant 1 : index
    %c2_133 = arith.constant 2 : index
    %c0_134 = arith.constant 0 : index
    %126 = vector.load %arg8[%c1_132, %c2_133, %c0_134] : memref<34x34x64xf32, #tpu.memory_space<vmem>>, vector<32x32x64xf32>
    %127 = vector.shape_cast %126 : vector<32x32x64xf32> to vector<1024x64xf32>
    %c5_135 = arith.constant 5 : index
    %c0_136 = arith.constant 0 : index
    %c0_137 = arith.constant 0 : index
    %128 = vector.load %arg4[%c5_135, %c0_136, %c0_137] : memref<9x64x5xf32, #tpu.memory_space<vmem>>, vector<1x64x5xf32>
    %129 = vector.shape_cast %128 : vector<1x64x5xf32> to vector<64x5xf32>
    %cst_138 = arith.constant dense<0.000000e+00> : vector<1024x5xf32>
    %130 = tpu.matmul %127, %129, %cst_138 {dimension_numbers = #tpu.dot_dimension_numbers<[1], [0], [0], [1], [0, 0, 1, 1], [], []>} : vector<1024x64xf32>, vector<64x5xf32>, vector<1024x5xf32> -> vector<1024x5xf32>
    %131 = arith.addf %125, %130 : vector<1024x5xf32>
    %c2_139 = arith.constant 2 : index
    %c0_140 = arith.constant 0 : index
    %c0_141 = arith.constant 0 : index
    %132 = vector.load %arg8[%c2_139, %c0_140, %c0_141] : memref<34x34x64xf32, #tpu.memory_space<vmem>>, vector<32x32x64xf32>
    %133 = vector.shape_cast %132 : vector<32x32x64xf32> to vector<1024x64xf32>
    %c6_142 = arith.constant 6 : index
    %c0_143 = arith.constant 0 : index
    %c0_144 = arith.constant 0 : index
    %134 = vector.load %arg4[%c6_142, %c0_143, %c0_144] : memref<9x64x5xf32, #tpu.memory_space<vmem>>, vector<1x64x5xf32>
    %135 = vector.shape_cast %134 : vector<1x64x5xf32> to vector<64x5xf32>
    %cst_145 = arith.constant dense<0.000000e+00> : vector<1024x5xf32>
    %136 = tpu.matmul %133, %135, %cst_145 {dimension_numbers = #tpu.dot_dimension_numbers<[1], [0], [0], [1], [0, 0, 1, 1], [], []>} : vector<1024x64xf32>, vector<64x5xf32>, vector<1024x5xf32> -> vector<1024x5xf32>
    %137 = arith.addf %131, %136 : vector<1024x5xf32>
    %c2_146 = arith.constant 2 : index
    %c1_147 = arith.constant 1 : index
    %c0_148 = arith.constant 0 : index
    %138 = vector.load %arg8[%c2_146, %c1_147, %c0_148] : memref<34x34x64xf32, #tpu.memory_space<vmem>>, vector<32x32x64xf32>
    %139 = vector.shape_cast %138 : vector<32x32x64xf32> to vector<1024x64xf32>
    %c7_149 = arith.constant 7 : index
    %c0_150 = arith.constant 0 : index
    %c0_151 = arith.constant 0 : index
    %140 = vector.load %arg4[%c7_149, %c0_150, %c0_151] : memref<9x64x5xf32, #tpu.memory_space<vmem>>, vector<1x64x5xf32>
    %141 = vector.shape_cast %140 : vector<1x64x5xf32> to vector<64x5xf32>
    %cst_152 = arith.constant dense<0.000000e+00> : vector<1024x5xf32>
    %142 = tpu.matmul %139, %141, %cst_152 {dimension_numbers = #tpu.dot_dimension_numbers<[1], [0], [0], [1], [0, 0, 1, 1], [], []>} : vector<1024x64xf32>, vector<64x5xf32>, vector<1024x5xf32> -> vector<1024x5xf32>
    %143 = arith.addf %137, %142 : vector<1024x5xf32>
    %c2_153 = arith.constant 2 : index
    %c2_154 = arith.constant 2 : index
    %c0_155 = arith.constant 0 : index
    %144 = vector.load %arg8[%c2_153, %c2_154, %c0_155] : memref<34x34x64xf32, #tpu.memory_space<vmem>>, vector<32x32x64xf32>
    %145 = vector.shape_cast %144 : vector<32x32x64xf32> to vector<1024x64xf32>
    %c8_156 = arith.constant 8 : index
    %c0_157 = arith.constant 0 : index
    %c0_158 = arith.constant 0 : index
    %146 = vector.load %arg4[%c8_156, %c0_157, %c0_158] : memref<9x64x5xf32, #tpu.memory_space<vmem>>, vector<1x64x5xf32>
    %147 = vector.shape_cast %146 : vector<1x64x5xf32> to vector<64x5xf32>
    %cst_159 = arith.constant dense<0.000000e+00> : vector<1024x5xf32>
    %148 = tpu.matmul %145, %147, %cst_159 {dimension_numbers = #tpu.dot_dimension_numbers<[1], [0], [0], [1], [0, 0, 1, 1], [], []>} : vector<1024x64xf32>, vector<64x5xf32>, vector<1024x5xf32> -> vector<1024x5xf32>
    %149 = arith.addf %143, %148 : vector<1024x5xf32>
    %150 = tpu.transpose %149, [1, 0] : vector<1024x5xf32> -> vector<5x1024xf32>
    %c0_160 = arith.constant 0 : index
    %c0_161 = arith.constant 0 : index
    %151 = vector.load %arg5[%c0_160, %c0_161] : memref<5x1xf32, #tpu.memory_space<vmem>>, vector<5x1xf32>
    %152 = vector.broadcast %151 : vector<5x1xf32> to vector<5x1024xf32>
    %153 = arith.addf %150, %152 : vector<5x1024xf32>
    %154 = arith.negf %153 : vector<5x1024xf32>
    %155 = math.exp %154 : vector<5x1024xf32>
    %cst_162 = arith.constant 1.000000e+00 : f32
    %156 = vector.broadcast %cst_162 : f32 to vector<5x1024xf32>
    %157 = arith.addf %156, %155 : vector<5x1024xf32>
    %158 = arith.divf %156, %157 : vector<5x1024xf32>
    %c0_163 = arith.constant 0 : index
    %c0_164 = arith.constant 0 : index
    %c0_165 = arith.constant 0 : index
    %159 = vector.load %arg6[%c0_163, %c0_164, %c0_165] : memref<1x5x1024xf32, #tpu.memory_space<vmem>>, vector<1x5x1024xf32>
    %160 = vector.shape_cast %159 : vector<1x5x1024xf32> to vector<5x1024xf32>
    %161 = vector.shape_cast %158 : vector<5x1024xf32> to vector<1x5x1024xf32>
    tpu.vector_store %arg6[%c0_163, %c0_164, %c0_165], %161 {strides = array<i32>} : memref<1x5x1024xf32, #tpu.memory_space<vmem>>, vector<1x5x1024xf32>,
    return
  }
  func.func @transform_0(%arg0: i32) -> (i32, i32, i32, i32) {
    %c0_i32 = arith.constant 0 : i32
    %c0_i32_0 = arith.constant 0 : i32
    %c0_i32_1 = arith.constant 0 : i32
    %c0_i32_2 = arith.constant 0 : i32
    return %arg0, %c0_i32, %c0_i32_0, %c0_i32_1 : i32, i32, i32, i32
  }
  func.func @transform_1(%arg0: i32) -> (i32, i32, i32) {
    %c0_i32 = arith.constant 0 : i32
    %c0_i32_0 = arith.constant 0 : i32
    %c0_i32_1 = arith.constant 0 : i32
    %c0_i32_2 = arith.constant 0 : i32
    return %c0_i32, %c0_i32_0, %c0_i32_1 : i32, i32, i32
  }
  func.func @transform_2(%arg0: i32) -> (i32, i32) {
    %c0_i32 = arith.constant 0 : i32
    %c0_i32_0 = arith.constant 0 : i32
    %c0_i32_1 = arith.constant 0 : i32
    return %c0_i32, %c0_i32_0 : i32, i32
  }
  func.func @transform_3(%arg0: i32) -> (i32, i32, i32) {
    %c0_i32 = arith.constant 0 : i32
    %c0_i32_0 = arith.constant 0 : i32
    %c0_i32_1 = arith.constant 0 : i32
    %c0_i32_2 = arith.constant 0 : i32
    return %c0_i32, %c0_i32_0, %c0_i32_1 : i32, i32, i32
  }
  func.func @transform_4(%arg0: i32) -> (i32, i32) {
    %c0_i32 = arith.constant 0 : i32
    %c0_i32_0 = arith.constant 0 : i32
    %c0_i32_1 = arith.constant 0 : i32
    return %c0_i32, %c0_i32_0 : i32, i32
  }
  func.func @transform_5(%arg0: i32) -> (i32, i32, i32) {
    %c0_i32 = arith.constant 0 : i32
    %c0_i32_0 = arith.constant 0 : i32
    %c0_i32_1 = arith.constant 0 : i32
    return %arg0, %c0_i32, %c0_i32_0 : i32, i32, i32
  }
}

</mosaic_0001>

<bundles_post_ra>
// kernel: conv_head_forward.1
= control target key start
LH: loop header
LB: loop body
LE: loop exit
PB: predicated region body
PF: predicated region fallthrough
CT: control target
= control target key end

     0   :  { %s28223_s18 = smov 0   ;;  %s32528_s0 = inlined_call_operand.vmem [shape: f32[2,8,8,32], index: 0, kind: input, shape index: {}]   ;;  %s32529_s1 = inlined_call_operand.vmem [shape: f32[9,32,64], index: 1, kind: input, shape index: {}]   ;;  %s32530_s2 = inlined_call_operand.vmem [shape: f32[1,64], index: 2, kind: input, shape index: {}]   ;;  %s32531_s3 = inlined_call_operand.vmem [shape: f32[9,64,5], index: 3, kind: input, shape index: {}]   ;;  %s32532_s4 = inlined_call_operand.vmem [shape: f32[5,1], index: 4, kind: input, shape index: {}]   ;;  %s32533_s5 = inlined_call_operand.vmem [shape: f32[2,5,1024], index: 5, kind: output, shape index: {}]  }
   0x1 LB: > { %s21039_s19 = sadd.s32 4294967295, %s28187_s18   ;;  %p21043_p0 = scmp.ge.s32.totalorder %s28187_s18, 1  ;;  %s28187_s18 = sphi %s28223_s18, %s15_s18  }
   0x2   : > { %p187_p1 = scmp.lt.s32.totalorder %s28187_s18, 3 }
   0x4   : > { %p188_p2 = pnand %p21043_p0, %p187_p1 }
   0x6   : > { %191 = sbr.rel (%p188_p2) target bundleno = 2796 (0xaec), region = 40 }
   0xd   : > { %v21048_v0 = vld [vmem:[%s32529_s1 + $0x20] sm:$0xff]  ;;  %v21049_v1 = vld [vmem:[%s32529_s1 + $0x28] sm:$0xff]  ;;  %v21050_v2 = vld [vmem:[%s32529_s1 + $0x30] sm:$0xff]  ;;  %vm889_vm0 = vcmask 261120   ;;  %vm892_vm1 = vcmask 254976   ;;  %v245_v3 = vlaneseq  ;;  %v32534_v6 = vmov 0.0  }
   0xe   : > { %v26521_v4 = vpack.c.bf16 %v21049_v1, %v21048_v0  ;;  %v21051_v5 = vld [vmem:[%s32529_s1 + $0x38] sm:$0xff]  ;;  %890 = vst.msk [vmem:[#allocation2] sm:$0xff] %vm889_vm0, %v32534_v6  ;;  %891 = vst.msk [vmem:[#allocation2 + $0x8] sm:$0xff] %vm889_vm0, %v32534_v6  ;;  %vm898_vm2 = vcmask 253952   ;;  %p28255_p3 = scmp.lt.s32.totalorder %s21039_s19, 1  ;;  %v1288_v8 = vld [vmem:[%s32529_s1] sm:$0xff] }
   0xf   : > { %895 = vst.msk [vmem:[#allocation2 + $0x198] sm:$0xff] %vm889_vm0, %v32534_v6  ;;  %896 = vst.msk [vmem:[#allocation2 + $0x1a0] sm:$0xff] %vm889_vm0, %v32534_v6  ;;  %v28259_v7 = vpack.c.bf16 %v21051_v5, %v21050_v2  ;;  %v1289_v9 = vld [vmem:[%s32529_s1 + $0x8] sm:$0xff]  ;;  %v28190_v10 = vmov 1966171168   ;;  %v246_v12 = vshrl.u32 %v245_v3, 7 }
  0x10   : > { %893 = vst.msk [vmem:[#allocation2 + $0x10] sm:$0x3] %vm892_vm1, %v32534_v6  ;;  %897 = vst.msk [vmem:[#allocation2 + $0x1a8] sm:$0x3] %vm892_vm1, %v32534_v6  ;;  %26522 = vmatprep.subr.bf16.mxu0 %v26521_v4  ;;  %s32834_s19 = smov (!%p28255_p3, %s21039_s19), 1  ;;  %v243_v11 = vunpack.c.l.s4 %v28190_v10  ;;  %v1290_v13 = vld [vmem:[%s32529_s1 + $0x10] sm:$0xff]  ;;  %v26529_v19 = vpack.c.bf16 %v1289_v9, %v1288_v8 }
  0x11   : > { %917 = vst.msk [vmem:[#allocation2 + $0x11] sm:$0x1] %vm898_vm2, %v32534_v6  ;;  %899 = vst.msk [vmem:[#allocation2] sm:$0x1] %vm898_vm2, %v32534_v6  ;;  %26524 = vmatpush3.bf16.msra.mxu0 %v26521_v4  ;;  %v28191_v14 = vmov 1983009808  }
  0x12   : > { %900 = vst.msk [vmem:[#allocation2 + $0x18] sm:$0x1] %vm898_vm2, %v32534_v6  ;;  %901 = vst.msk [vmem:[#allocation2 + $0x30] sm:$0x1] %vm898_vm2, %v32534_v6  ;;  %v938_v15 = vunpack.c.l.s4 %v28191_v14  ;;  %v1291_v16 = vld [vmem:[%s32529_s1 + $0x18] sm:$0xff]  ;;  %v21116_v17 = vld [vmem:[%s32529_s1 + $0x40] sm:$0xff]  ;;  %26526 = vmatprep.subr.bf16.mxu0 %v28259_v7  ;;  %v244_v20 = vunpack.c.0.s8 %v243_v11 }
  0x13   : > { %902 = vst.msk [vmem:[#allocation2 + $0x48] sm:$0x1] %vm898_vm2, %v32534_v6  ;;  %903 = vst.msk [vmem:[#allocation2 + $0x60] sm:$0x1] %vm898_vm2, %v32534_v6  ;;  %v21117_v18 = vld [vmem:[%s32529_s1 + $0x48] sm:$0xff]  ;;  %s22595_s16 = sshll.u32 %s32834_s19, 6  ;;  %v26533_v26 = vpack.c.bf16 %v1291_v16, %v1290_v13 }
  0x14   : > { %904 = vst.msk [vmem:[#allocation2 + $0x78] sm:$0x1] %vm898_vm2, %v32534_v6  ;;  %905 = vst.msk [vmem:[#allocation2 + $0x90] sm:$0x1] %vm898_vm2, %v32534_v6  ;;  %s28364_s21 = scalar_lea.vmem %s32528_s0, %s22595_s16  ;;  %v939_v21 = vunpack.c.0.s8 %v938_v15  ;;  %v28367_v23 = vsub.s32 %v244_v20, %v246_v12  ;;  %v28371_v27 = vpack.c.bf16 %v21117_v18, %v21116_v17  ;;  %v28381_v36 = vsub.s32 0, %v246_v12  ;;  %s32420_s30 = scalar_lea.vmem %s32533_s5, %s22595_s16 }
  0x15   : > { %906 = vst.msk [vmem:[#allocation2 + $0xa8] sm:$0x1] %vm898_vm2, %v32534_v6  ;;  %907 = vst.msk [vmem:[#allocation2 + $0xc0] sm:$0x1] %vm898_vm2, %v32534_v6  ;;  %v225_v22 = vld [vmem:[%s28364_s21] sm:$0xff]  ;;  %v226_v24 = vld [vmem:[%s28364_s21 + $0x8] sm:$0xff]  ;;  %26528 = vmatpush3.bf16.msra.mxu0 %v28259_v7 }
  0x16   : > { %908 = vst.msk [vmem:[#allocation2 + $0xd8] sm:$0x1] %vm898_vm2, %v32534_v6  ;;  %909 = vst.msk [vmem:[#allocation2 + $0xf0] sm:$0x1] %vm898_vm2, %v32534_v6  ;;  %v227_v25 = vld [vmem:[%s28364_s21 + $0x10] sm:$0xff]  ;;  %v1292_v28 = vld [vmem:[#allocation2 + $0x1] sm:$0xff]  ;;  %v28374_v30 = vsub.s32 %v939_v21, %v246_v12  ;;  %v241_v31 = vcombine.high %v225_v22, %v225_v22  ;;  %v290_v32 = vcombine.high %v226_v24, %v226_v24  ;;  %26530 = vmatprep.subr.bf16.mxu0 %v26529_v19 }
  0x17   : > { %910 = vst.msk [vmem:[#allocation2 + $0x108] sm:$0x1] %vm898_vm2, %v32534_v6  ;;  %911 = vst.msk [vmem:[#allocation2 + $0x120] sm:$0x1] %vm898_vm2, %v32534_v6  ;;  %v1293_v29 = vld [vmem:[#allocation2 + $0x9] sm:$0xff]  ;;  %v339_v33 = vcombine.high %v227_v25, %v227_v25  ;;  %v28377_v34 = vld [vmem:[%s28364_s21 + $0x18] sm:$0xff]  ;;  %24153 = vmatprep.mubr.msk.f32.mxu0 %vm889_vm0, %v1292_v28  ;;  %v248_v35 = vrot.slane %v225_v22, %v28367_v23  ;;  %v297_v37 = vrot.slane %v226_v24, %v28367_v23 }
  0x18   : > { %912 = vst.msk [vmem:[#allocation2 + $0x138] sm:$0x1] %vm898_vm2, %v32534_v6  ;;  %913 = vst.msk [vmem:[#allocation2 + $0x150] sm:$0x1] %vm898_vm2, %v32534_v6  ;;  %v28385_v38 = vrot.slane %v227_v25, %v28367_v23  ;;  %v255_v39 = vrot.slane %v241_v31, %v28367_v23  ;;  %v304_v40 = vrot.slane %v290_v32, %v28367_v23  ;;  %24154 = vmatmul.mubr.msk.f32.vlgmr.msra.gmra.mrb[0].mxu0 %vm889_vm0, %v1293_v29  ;;  %vm7365_vm3 = vcmask 523264  }
  0x19   : > { %914 = vst.msk [vmem:[#allocation2 + $0x168] sm:$0x1] %vm898_vm2, %v32534_v6  ;;  %915 = vst.msk [vmem:[#allocation2 + $0x180] sm:$0x1] %vm898_vm2, %v32534_v6  ;;  %v28390_v41 = vrot.slane %v339_v33, %v28367_v23  ;;  %v28394_v42 = vrot.slane %v28377_v34, %v28367_v23  ;;  %v256_v43 = vcombine.high %v248_v35, %v248_v35  ;;  %26532 = vmatpush3.bf16.msra.mxu0 %v26529_v19  ;;  %vm7370_vm4 = vcmask 517120  }
  0x1a   : > { %916 = vst.msk [vmem:[#allocation2 + $0x198] sm:$0x1] %vm898_vm2, %v32534_v6  ;;  %918 = vst.msk [vmem:[#allocation2 + $0x29] sm:$0x1] %vm898_vm2, %v32534_v6  ;;  %v264_v44 = vrot.slane %v248_v35, %v28367_v23  ;;  %v305_v45 = vcombine.high %v297_v37, %v297_v37  ;;  %v313_v46 = vrot.slane %v297_v37, %v28367_v23  ;;  %26534 = vmatprep.subr.bf16.mxu0 %v26533_v26  ;;  %vm7378_vm5 = vcmask 516096  }
  0x1b   : > { %919 = vst.msk [vmem:[#allocation2 + $0x41] sm:$0x1] %vm898_vm2, %v32534_v6  ;;  %920 = vst.msk [vmem:[#allocation2 + $0x59] sm:$0x1] %vm898_vm2, %v32534_v6  ;;  %v257_v47 = vcombine.high %v255_v39, %v255_v39  ;;  %v271_v48 = vrot.slane %v255_v39, %v28367_v23  ;;  %v306_v49 = vcombine.high %v304_v40, %v304_v40 }
  0x1c   : > { %921 = vst.msk [vmem:[#allocation2 + $0x71] sm:$0x1] %vm898_vm2, %v32534_v6  ;;  %922 = vst.msk [vmem:[#allocation2 + $0x89] sm:$0x1] %vm898_vm2, %v32534_v6  ;;  %v320_v50 = vrot.slane %v304_v40, %v28367_v23  ;;  %v278_v51 = vrot.slane %v256_v43, %v28367_v23  ;;  %v286_v52 = vcombine.high %v264_v44, %v264_v44 }
  0x1d   : > { %923 = vst.msk [vmem:[#allocation2 + $0xa1] sm:$0x1] %vm898_vm2, %v32534_v6  ;;  %924 = vst.msk [vmem:[#allocation2 + $0xb9] sm:$0x1] %vm898_vm2, %v32534_v6  ;;  %v636_v53 = vrot.slane %v264_v44, %v28381_v36  ;;  %v327_v54 = vrot.slane %v305_v45, %v28367_v23  ;;  %v285_v55 = vrot.slane %v257_v47, %v28367_v23  ;;  %26536 = vmatpush3.bf16.msra.mxu0 %v26533_v26 }
  0x1e   : > { %925 = vst.msk [vmem:[#allocation2 + $0xd1] sm:$0x1] %vm898_vm2, %v32534_v6  ;;  %926 = vst.msk [vmem:[#allocation2 + $0xe9] sm:$0x1] %vm898_vm2, %v32534_v6  ;;  %v287_v56 = vcombine.high %v271_v48, %v271_v48  ;;  %v652_v57 = vrot.slane %v271_v48, %v28381_v36  ;;  %v335_v58 = vcombine.high %v313_v46, %v313_v46  ;;  %26538 = vmatprep.subr.bf16.mxu0 %v28371_v27 }
  0x1f   : > { %927 = vst.msk [vmem:[#allocation2 + $0x101] sm:$0x1] %vm898_vm2, %v32534_v6  ;;  %928 = vst.msk [vmem:[#allocation2 + $0x119] sm:$0x1] %vm898_vm2, %v32534_v6  ;;  %v288_v59 = vcombine.high %v278_v51, %v278_v51  ;;  %v640_v60 = vrot.slane %v278_v51, %v28381_v36  ;;  %v644_v61 = vrot.slane %v286_v52, %v28381_v36 }
  0x20   : > { %929 = vst.msk [vmem:[#allocation2 + $0x131] sm:$0x1] %vm898_vm2, %v32534_v6  ;;  %930 = vst.msk [vmem:[#allocation2 + $0x149] sm:$0x1] %vm898_vm2, %v32534_v6  ;;  %v337_v62 = vcombine.high %v327_v54, %v327_v54  ;;  %v289_v63 = vcombine.high %v285_v55, %v285_v55  ;;  %v656_v0 = vrot.slane %v285_v55, %v28381_v36 }
  0x21   : > { %931 = vst.msk [vmem:[#allocation2 + $0x161] sm:$0x1] %vm898_vm2, %v32534_v6  ;;  %932 = vst.msk [vmem:[#allocation2 + $0x179] sm:$0x1] %vm898_vm2, %v32534_v6  ;;  %v660_v1 = vrot.slane %v287_v56, %v28381_v36  ;;  %v668_v2 = vrot.slane %v313_v46, %v28381_v36  ;;  %v648_v3 = vrot.slane %v288_v59, %v28381_v36 }
  0x22   : > { %933 = vst.msk [vmem:[#allocation2 + $0x191] sm:$0x1] %vm898_vm2, %v32534_v6  ;;  %934 = vst.msk [vmem:[#allocation2 + $0x1a9] sm:$0x1] %vm898_vm2, %v32534_v6  ;;  %v935_v4 = vcombine.low %v636_v53, %v640_v60  ;;  %v672_v5 = vrot.slane %v327_v54, %v28381_v36  ;;  %v676_v7 = vrot.slane %v335_v58, %v28381_v36 }
  0x23   : > { %32604 = vst [vmem:[#allocation4_spill] sm:$0xff] %v28367_v23  ;;  %32605 = vst [vmem:[#allocation5_spill] sm:$0xff] %v28374_v30  ;;  %v664_v8 = vrot.slane %v289_v63, %v28381_v36  ;;  %v952_v9 = vcombine.low %v652_v57, %v656_v0  ;;  %v680_v10 = vrot.slane %v337_v62, %v28381_v36 }
  0x24   : > { %32606 = vst [vmem:[#allocation6_spill] sm:$0xff] %v28381_v36  ;;  %v334_v11 = vrot.slane %v306_v49, %v28367_v23  ;;  %v936_v12 = vcombine.low %v644_v61, %v648_v3  ;;  %v943_v13 = vrot.slane %v935_v4, %v28374_v30  ;;  %v969_v14 = vcombine.low %v668_v2, %v672_v5 }
  0x25   : > { %v336_v15 = vcombine.high %v320_v50, %v320_v50  ;;  %v953_v16 = vcombine.low %v660_v1, %v664_v8  ;;  %v960_v17 = vrot.slane %v952_v9, %v28374_v30  ;;  %v970_v18 = vcombine.low %v676_v7, %v680_v10  ;;  %v229_v1 = vld [vmem:[%s28364_s21 + $0x20] sm:$0xff] }
  0x26   : > { %v338_v19 = vcombine.high %v334_v11, %v334_v11  ;;  %v950_v20 = vrot.slane %v936_v12, %v28374_v30  ;;  %v977_v21 = vrot.slane %v969_v14, %v28374_v30  ;;  %v684_v22 = vrot.slane %v320_v50, %v28381_v36 }
  0x27   : > { %v688_v24 = vrot.slane %v334_v11, %v28381_v36  ;;  %v967_v25 = vrot.slane %v953_v16, %v28374_v30  ;;  %v984_v26 = vrot.slane %v970_v18, %v28374_v30  ;;  %v692_v28 = vrot.slane %v336_v15, %v28381_v36 }
  0x28   : > { %v696_v29 = vrot.slane %v338_v19, %v28381_v36  ;;  %v951_v31 = vcombine.low %v943_v13, %v950_v20  ;;  %v354_v33 = vcombine.high %v28385_v38, %v28385_v38  ;;  %v362_v35 = vrot.slane %v28385_v38, %v28367_v23 }
  0x29   : > { %v986_v32 = vcombine.low %v684_v22, %v688_v24  ;;  %v968_v37 = vcombine.low %v960_v17, %v967_v25  ;;  %v985_v39 = vcombine.low %v977_v21, %v984_v26  ;;  %v355_v43 = vcombine.high %v28390_v41, %v28390_v41 }
  0x2a   : > { %v987_v40 = vcombine.low %v692_v28, %v696_v29  ;;  %1224 = vst.msk [vmem:[#allocation2 + $0x19] sm:$0xff] %vm889_vm0, %v951_v31  ;;  %1226 = vst.msk [vmem:[#allocation2 + $0x31] sm:$0xff] %vm889_vm0, %v951_v31  ;;  %v376_v45 = vrot.slane %v354_v33, %v28367_v23  ;;  %v384_v46 = vcombine.high %v362_v35, %v362_v35 }
  0x2b   : > { %v994_v44 = vrot.slane %v986_v32, %v28374_v30  ;;  %v700_v47 = vrot.slane %v362_v35, %v28381_v36  ;;  %1225 = vst.msk [vmem:[#allocation2 + $0x21] sm:$0xff] %vm889_vm0, %v968_v37  ;;  %1227 = vst.msk [vmem:[#allocation2 + $0x39] sm:$0xff] %vm889_vm0, %v968_v37  ;;  %v369_v48 = vrot.slane %v28390_v41, %v28367_v23 }
  0x2c   : > { %1228 = vst.msk [vmem:[#allocation2 + $0x49] sm:$0xff] %vm889_vm0, %v985_v39  ;;  %1230 = vst.msk [vmem:[#allocation2 + $0x61] sm:$0xff] %vm889_vm0, %v985_v39  ;;  %v1001_v38 = vrot.slane %v987_v40, %v28374_v30  ;;  %v383_v49 = vrot.slane %v355_v43, %v28367_v23  ;;  %v403_v50 = vcombine.high %v28394_v42, %v28394_v42 }
  0x2d   : > { %v386_v51 = vcombine.high %v376_v45, %v376_v45  ;;  %v704_v52 = vrot.slane %v376_v45, %v28381_v36  ;;  %v708_v53 = vrot.slane %v384_v46, %v28381_v36  ;;  %v411_v54 = vrot.slane %v28394_v42, %v28367_v23 }
  0x2e   : > { %v1002_v55 = vcombine.low %v994_v44, %v1001_v38  ;;  %v385_v56 = vcombine.high %v369_v48, %v369_v48  ;;  %v387_v57 = vcombine.high %v383_v49, %v383_v49  ;;  %v716_v58 = vrot.slane %v369_v48, %v28381_v36 }
  0x2f   : > { %v712_v41 = vrot.slane %v386_v51, %v28381_v36  ;;  %v1003_v59 = vcombine.low %v700_v47, %v704_v52  ;;  %v720_v60 = vrot.slane %v383_v49, %v28381_v36  ;;  %v425_v61 = vrot.slane %v403_v50, %v28367_v23  ;;  %v230_v47 = vld [vmem:[%s28364_s21 + $0x28] sm:$0xff] }
  0x30   : > { %1229 = vst.msk [vmem:[#allocation2 + $0x51] sm:$0xff] %vm889_vm0, %v1002_v55  ;;  %1231 = vst.msk [vmem:[#allocation2 + $0x69] sm:$0xff] %vm889_vm0, %v1002_v55  ;;  %v724_v62 = vrot.slane %v385_v56, %v28381_v36  ;;  %v728_v42 = vrot.slane %v387_v57, %v28381_v36  ;;  %v433_v63 = vcombine.high %v411_v54, %v411_v54 }
  0x31   : > { %v732_v0 = vrot.slane %v411_v54, %v28381_v36  ;;  %v1004_v2 = vcombine.low %v708_v53, %v712_v41  ;;  %v1011_v3 = vrot.slane %v1003_v59, %v28374_v30  ;;  %v1020_v4 = vcombine.low %v716_v58, %v720_v60  ;;  %v1294_v7 = vld [vmem:[#allocation2 + $0x19] sm:$0xff]  ;;  %v1296_v8 = vld [vmem:[#allocation2 + $0x31] sm:$0xff] }
  0x32   : > { %v435_v5 = vcombine.high %v425_v61, %v425_v61  ;;  %v1021_v9 = vcombine.low %v724_v62, %v728_v42  ;;  %v736_v10 = vrot.slane %v425_v61, %v28381_v36  ;;  %v740_v11 = vrot.slane %v433_v63, %v28381_v36  ;;  %24156 = vmatprep.mubr.msk.f32.mxu0 %vm889_vm0, %v1294_v7  ;;  %v1295_v13 = vld [vmem:[#allocation2 + $0x21] sm:$0xff] }
  0x33   : > { %v388_v12 = vcombine.high %v28377_v34, %v28377_v34  ;;  %v1018_v14 = vrot.slane %v1004_v2, %v28374_v30  ;;  %v1028_v15 = vrot.slane %v1020_v4, %v28374_v30  ;;  %v444_v17 = vrot.slane %v229_v1, %v28367_v23  ;;  %24157 = vmatmul.mubr.msk.f32.gmra.mrb[2].mxu0 %vm889_vm0, %v1295_v13  ;;  %v1297_v34 = vld [vmem:[#allocation2 + $0x39] sm:$0xff]  ;;  %v1298_v28 = vld [vmem:[#allocation2 + $0x49] sm:$0xff]  ;;  %v28497_v52 = vld [vmem:[#allocation2 + $0x61] sm:$0xff] }
  0x34   : > { %v744_v16 = vrot.slane %v435_v5, %v28381_v36  ;;  %v1035_v18 = vrot.slane %v1021_v9, %v28374_v30  ;;  %v1037_v19 = vcombine.low %v732_v0, %v736_v10  ;;  %v437_v21 = vcombine.high %v229_v1, %v229_v1  ;;  %24159 = vmatprep.mubr.msk.f32.mxu0 %vm889_vm0, %v1296_v8  ;;  %v28837_v6 = vld [vmem:[#allocation2 + $0x1a] sm:$0xff] }
  0x35   : > { %v402_v20 = vrot.slane %v388_v12, %v28367_v23  ;;  %v1019_v22 = vcombine.low %v1011_v3, %v1018_v14  ;;  %v452_v25 = vcombine.high %v444_v17, %v444_v17  ;;  %v460_v26 = vrot.slane %v444_v17, %v28367_v23 }
  0x36   : > { %v1038_v24 = vcombine.low %v740_v11, %v744_v16  ;;  %v1036_v29 = vcombine.low %v1028_v15, %v1035_v18  ;;  %v1045_v31 = vrot.slane %v1037_v19, %v28374_v30  ;;  %v451_v46 = vrot.slane %v437_v21, %v28367_v23 }
  0x37   : > { %v404_v32 = vcombine.high %v402_v20, %v402_v20  ;;  %v418_v33 = vrot.slane %v402_v20, %v28367_v23  ;;  %1232 = vst.msk [vmem:[#allocation2 + $0x79] sm:$0xff] %vm889_vm0, %v1019_v22  ;;  %1234 = vst.msk [vmem:[#allocation2 + $0x91] sm:$0xff] %vm889_vm0, %v1019_v22  ;;  %v474_v37 = vrot.slane %v452_v25, %v28367_v23  ;;  %24160 = vmatmul.mubr.msk.f32.gmra.mrb[4].mxu0 %vm889_vm0, %v1297_v34  ;;  %v28493_v38 = vld [vmem:[#allocation2 + $0x51] sm:$0xff]  ;;  %v28512_v63 = vld [vmem:[#allocation2 + $0x69] sm:$0xff] }
  0x38   : > { %v1052_v35 = vrot.slane %v1038_v24, %v28374_v30  ;;  %v482_v39 = vcombine.high %v460_v26, %v460_v26  ;;  %v764_v40 = vrot.slane %v460_v26, %v28381_v36  ;;  %1233 = vst.msk [vmem:[#allocation2 + $0x81] sm:$0xff] %vm889_vm0, %v1036_v29  ;;  %1235 = vst.msk [vmem:[#allocation2 + $0x99] sm:$0xff] %vm889_vm0, %v1036_v29  ;;  %24162 = vmatprep.mubr.msk.f32.mxu0 %vm889_vm0, %v1298_v28  ;;  %v231_v22 = vld [vmem:[%s28364_s21 + $0x30] sm:$0xff] }
  0x39   : > { %v432_v43 = vrot.slane %v404_v32, %v28367_v23  ;;  %v434_v44 = vcombine.high %v418_v33, %v418_v33  ;;  %v748_v45 = vrot.slane %v418_v33, %v28381_v36  ;;  %v484_v49 = vcombine.high %v474_v37, %v474_v37 }
  0x3a   : > { %v1053_v48 = vcombine.low %v1045_v31, %v1052_v35  ;;  %v768_v50 = vrot.slane %v474_v37, %v28381_v36  ;;  %v772_v51 = vrot.slane %v482_v39, %v28381_v36  ;;  %v453_v56 = vcombine.high %v451_v46, %v451_v46 }
  0x3b   : > { %v436_v53 = vcombine.high %v432_v43, %v432_v43  ;;  %v752_v54 = vrot.slane %v432_v43, %v28381_v36  ;;  %v756_v55 = vrot.slane %v434_v44, %v28381_v36  ;;  %v776_v57 = vrot.slane %v484_v49, %v28381_v36  ;;  %24163 = vmatmul.mubr.msk.f32.gmra.mrb[6].mxu0 %vm889_vm0, %v28493_v38 }
  0x3c   : > { %1236 = vst.msk [vmem:[#allocation2 + $0xa9] sm:$0xff] %vm889_vm0, %v1053_v48  ;;  %1238 = vst.msk [vmem:[#allocation2 + $0xc1] sm:$0xff] %vm889_vm0, %v1053_v48  ;;  %v1071_v58 = vcombine.low %v764_v40, %v768_v50  ;;  %v467_v41 = vrot.slane %v451_v46, %v28367_v23  ;;  %v493_v59 = vrot.slane %v230_v47, %v28367_v23  ;;  %24165 = vmatprep.mubr.msk.f32.mxu0 %vm889_vm0, %v28497_v52 }
  0x3d   : > { %v760_v60 = vrot.slane %v436_v53, %v28381_v36  ;;  %v1054_v61 = vcombine.low %v748_v45, %v752_v54  ;;  %v481_v62 = vrot.slane %v453_v56, %v28367_v23  ;;  %v486_v42 = vcombine.high %v230_v47, %v230_v47 }
  0x3e   : > { %v1072_v0 = vcombine.low %v772_v51, %v776_v57  ;;  %v1079_v1 = vrot.slane %v1071_v58, %v28374_v30  ;;  %v483_v2 = vcombine.high %v467_v41, %v467_v41  ;;  %v780_v3 = vrot.slane %v467_v41, %v28381_v36  ;;  %v28516_v4 = vld [vmem:[#allocation2 + $0x79] sm:$0xff]  ;;  %v28535_v24 = vld [vmem:[#allocation2 + $0x91] sm:$0xff] }
  0x3f   : > { %v1055_v5 = vcombine.low %v756_v55, %v760_v60  ;;  %v1062_v7 = vrot.slane %v1054_v61, %v28374_v30  ;;  %v485_v8 = vcombine.high %v481_v62, %v481_v62  ;;  %v784_v9 = vrot.slane %v481_v62, %v28381_v36  ;;  %24166 = vmatmul.mubr.msk.f32.gmra.mrb[8].mxu0 %vm889_vm0, %v28512_v63  ;;  %v28530_v18 = vld [vmem:[#allocation2 + $0x81] sm:$0xff]  ;;  %v28552_v44 = vld [vmem:[#allocation2 + $0x99] sm:$0xff] }
  0x40   : > { %v1086_v10 = vrot.slane %v1072_v0, %v28374_v30  ;;  %v788_v11 = vrot.slane %v483_v2, %v28381_v36  ;;  %v501_v12 = vcombine.high %v493_v59, %v493_v59  ;;  %v509_v13 = vrot.slane %v493_v59, %v28367_v23  ;;  %24168 = vmatprep.mubr.msk.f32.mxu0 %vm889_vm0, %v28516_v4  ;;  %v28560_v55 = vld [vmem:[%s28364_s21 + $0x38] sm:$0xff] }
  0x41   : > { %v1069_v14 = vrot.slane %v1055_v5, %v28374_v30  ;;  %v792_v15 = vrot.slane %v485_v8, %v28381_v36  ;;  %v1088_v16 = vcombine.low %v780_v3, %v784_v9  ;;  %v500_v17 = vrot.slane %v486_v42, %v28367_v23 }
  0x42   : > { %v1087_v19 = vcombine.low %v1079_v1, %v1086_v10  ;;  %v523_v20 = vrot.slane %v501_v12, %v28367_v23  ;;  %v531_v21 = vcombine.high %v509_v13, %v509_v13  ;;  %v796_v34 = vrot.slane %v509_v13, %v28381_v36 }
  0x43   : > { %v1070_v25 = vcombine.low %v1062_v7, %v1069_v14  ;;  %v1089_v26 = vcombine.low %v788_v11, %v792_v15  ;;  %v1096_v28 = vrot.slane %v1088_v16, %v28374_v30  ;;  %v502_v29 = vcombine.high %v500_v17, %v500_v17  ;;  %24169 = vmatmul.mubr.msk.f32.gmra.mrb[10].mxu0 %vm889_vm0, %v28530_v18  ;;  %v28556_v49 = vld [vmem:[#allocation2 + $0xa9] sm:$0xff]  ;;  %v28578_v3 = vld [vmem:[#allocation2 + $0xc1] sm:$0xff] }
  0x44   : > { %1240 = vst.msk [vmem:[#allocation2 + $0xd9] sm:$0xff] %vm889_vm0, %v1087_v19  ;;  %1242 = vst.msk [vmem:[#allocation2 + $0xf1] sm:$0xff] %vm889_vm0, %v1087_v19  ;;  %v533_v31 = vcombine.high %v523_v20, %v523_v20  ;;  %v800_v32 = vrot.slane %v523_v20, %v28381_v36  ;;  %v804_v33 = vrot.slane %v531_v21, %v28381_v36  ;;  %24171 = vmatprep.mubr.msk.f32.mxu0 %vm889_vm0, %v28535_v24 }
  0x45   : > { %v516_v35 = vrot.slane %v500_v17, %v28367_v23  ;;  %1237 = vst.msk [vmem:[#allocation2 + $0xb1] sm:$0xff] %vm889_vm0, %v1070_v25  ;;  %1239 = vst.msk [vmem:[#allocation2 + $0xc9] sm:$0xff] %vm889_vm0, %v1070_v25  ;;  %v1103_v37 = vrot.slane %v1089_v26, %v28374_v30  ;;  %v530_v39 = vrot.slane %v502_v29, %v28367_v23 }
  0x46   : > { %v542_v40 = vrot.slane %v231_v22, %v28367_v23  ;;  %v535_v43 = vcombine.high %v231_v22, %v231_v22  ;;  %v808_v45 = vrot.slane %v533_v31, %v28381_v36  ;;  %v1105_v46 = vcombine.low %v796_v34, %v800_v32 }
  0x47   : > { %v532_v47 = vcombine.high %v516_v35, %v516_v35  ;;  %v812_v48 = vrot.slane %v516_v35, %v28381_v36  ;;  %v1104_v50 = vcombine.low %v1096_v28, %v1103_v37  ;;  %v534_v51 = vcombine.high %v530_v39, %v530_v39  ;;  %24172 = vmatmul.mubr.msk.f32.gmra.mrb[12].mxu0 %vm889_vm0, %v28552_v44 }
  0x48   : > { %v816_v53 = vrot.slane %v530_v39, %v28381_v36  ;;  %v550_v54 = vcombine.high %v542_v40, %v542_v40  ;;  %v1106_v56 = vcombine.low %v804_v33, %v808_v45  ;;  %v1113_v57 = vrot.slane %v1105_v46, %v28374_v30  ;;  %24174 = vmatprep.mubr.msk.f32.mxu0 %vm889_vm0, %v28556_v49 }
  0x49   : > { %v820_v58 = vrot.slane %v532_v47, %v28381_v36  ;;  %v558_v41 = vrot.slane %v542_v40, %v28367_v23  ;;  %1241 = vst.msk [vmem:[#allocation2 + $0xe1] sm:$0xff] %vm889_vm0, %v1104_v50  ;;  %1243 = vst.msk [vmem:[#allocation2 + $0xf9] sm:$0xff] %vm889_vm0, %v1104_v50  ;;  %v824_v59 = vrot.slane %v534_v51, %v28381_v36 }
  0x4a   : > { %v1122_v60 = vcombine.low %v812_v48, %v816_v53  ;;  %v572_v61 = vrot.slane %v550_v54, %v28367_v23  ;;  %v549_v62 = vrot.slane %v535_v43, %v28367_v23  ;;  %v1120_v42 = vrot.slane %v1106_v56, %v28374_v30 }
  0x4b   : > { %v580_v0 = vcombine.high %v558_v41, %v558_v41  ;;  %v828_v1 = vrot.slane %v558_v41, %v28381_v36  ;;  %v591_v2 = vrot.slane %v28560_v55, %v28367_v23  ;;  %v1123_v5 = vcombine.low %v820_v58, %v824_v59  ;;  %v28599_v26 = vld [vmem:[#allocation2 + $0xd9] sm:$0xff]  ;;  %v28620_v54 = vld [vmem:[#allocation2 + $0xf1] sm:$0xff] }
  0x4c   : > { %v1130_v7 = vrot.slane %v1122_v60, %v28374_v30  ;;  %v582_v8 = vcombine.high %v572_v61, %v572_v61  ;;  %v832_v9 = vrot.slane %v572_v61, %v28381_v36  ;;  %v28582_v10 = vld [vmem:[#allocation2 + $0xb1] sm:$0xff]  ;;  %v1121_v11 = vcombine.low %v1113_v57, %v1120_v42  ;;  %v28592_v20 = vld [vmem:[#allocation2 + $0xc9] sm:$0xff] }
  0x4d   : > { %v836_v12 = vrot.slane %v580_v0, %v28381_v36  ;;  %v551_v13 = vcombine.high %v549_v62, %v549_v62  ;;  %v565_v14 = vrot.slane %v549_v62, %v28367_v23  ;;  %24175 = vmatmul.mubr.msk.f32.gmra.mrb[14].mxu0 %vm889_vm0, %v28582_v10  ;;  %v1137_v15 = vrot.slane %v1123_v5, %v28374_v30 }
  0x4e   : > { %v840_v16 = vrot.slane %v582_v8, %v28381_v36  ;;  %v1139_v17 = vcombine.low %v828_v1, %v832_v9  ;;  %v599_v19 = vcombine.high %v591_v2, %v591_v2  ;;  %24177 = vmatprep.mubr.msk.f32.mxu0 %vm889_vm0, %v28578_v3  ;;  %1244 = vst.msk [vmem:[#allocation2 + $0x109] sm:$0xff] %vm889_vm0, %v1121_v11  ;;  %1246 = vst.msk [vmem:[#allocation2 + $0x121] sm:$0xff] %vm889_vm0, %v1121_v11 }
  0x4f   : > { %v579_v21 = vrot.slane %v551_v13, %v28367_v23  ;;  %v581_v34 = vcombine.high %v565_v14, %v565_v14  ;;  %v844_v22 = vrot.slane %v565_v14, %v28381_v36  ;;  %v607_v25 = vrot.slane %v591_v2, %v28367_v23 }
  0x50   : > { %v1138_v28 = vcombine.low %v1130_v7, %v1137_v15  ;;  %v1140_v29 = vcombine.low %v836_v12, %v840_v16  ;;  %v1147_v31 = vrot.slane %v1139_v17, %v28374_v30  ;;  %v621_v32 = vrot.slane %v599_v19, %v28367_v23  ;;  %v28614_v47 = vld [vmem:[#allocation2 + $0xe1] sm:$0xff]  ;;  %v28632_v62 = vld [vmem:[#allocation2 + $0xf9] sm:$0xff] }
  0x51   : > { %v583_v33 = vcombine.high %v579_v21, %v579_v21  ;;  %v848_v35 = vrot.slane %v579_v21, %v28381_v36  ;;  %v852_v37 = vrot.slane %v581_v34, %v28381_v36  ;;  %v629_v39 = vcombine.high %v607_v25, %v607_v25  ;;  %24178 = vmatmul.mubr.msk.f32.gmra.mrb[16].mxu0 %vm889_vm0, %v28592_v20 }
  0x52   : > { %1245 = vst.msk [vmem:[#allocation2 + $0x111] sm:$0xff] %vm889_vm0, %v1138_v28  ;;  %1247 = vst.msk [vmem:[#allocation2 + $0x129] sm:$0xff] %vm889_vm0, %v1138_v28  ;;  %v1154_v40 = vrot.slane %v1140_v29, %v28374_v30  ;;  %v631_v43 = vcombine.high %v621_v32, %v621_v32  ;;  %v860_v45 = vrot.slane %v607_v25, %v28381_v36  ;;  %24180 = vmatprep.mubr.msk.f32.mxu0 %vm889_vm0, %v28599_v26 }
  0x53   : > { %v864_v46 = vrot.slane %v621_v32, %v28381_v36  ;;  %v856_v48 = vrot.slane %v583_v33, %v28381_v36  ;;  %v1156_v50 = vcombine.low %v844_v22, %v848_v35  ;;  %v868_v51 = vrot.slane %v629_v39, %v28381_v36 }
  0x54   : > { %v584_v53 = vcombine.high %v28560_v55, %v28560_v55  ;;  %v1155_v56 = vcombine.low %v1147_v31, %v1154_v40  ;;  %v872_v57 = vrot.slane %v631_v43, %v28381_v36  ;;  %v1256_v40 = vld [vmem:[#allocation2] sm:$0xff]  ;;  %v21118_v43 = vld [vmem:[%s32529_s1 + $0x50] sm:$0xff] }
  0x55   : > { %v1173_v58 = vcombine.low %v860_v45, %v864_v46  ;;  %v1157_v41 = vcombine.low %v852_v37, %v856_v48  ;;  %v1164_v59 = vrot.slane %v1156_v50, %v28374_v30  ;;  %24181 = vmatmul.mubr.msk.f32.gmra.mrb[18].mxu0 %vm889_vm0, %v28614_v47  ;;  %v28636_v2 = vld [vmem:[#allocation2 + $0x109] sm:$0xff]  ;;  %v28651_v17 = vld [vmem:[#allocation2 + $0x121] sm:$0xff]  ;;  %v21119_v45 = vld [vmem:[%s32529_s1 + $0x58] sm:$0xff] }
  0x56   : > { %v598_v60 = vrot.slane %v584_v53, %v28367_v23  ;;  %1248 = vst.msk [vmem:[#allocation2 + $0x139] sm:$0xff] %vm889_vm0, %v1155_v56  ;;  %1250 = vst.msk [vmem:[#allocation2 + $0x151] sm:$0xff] %vm889_vm0, %v1155_v56  ;;  %v1174_v61 = vcombine.low %v868_v51, %v872_v57  ;;  %24183 = vmatprep.mubr.msk.f32.mxu0 %vm889_vm0, %v28620_v54  ;;  %v1257_v46 = vld [vmem:[#allocation2 + $0x8] sm:$0xff]  ;;  %v28699_v48 = vld [vmem:[#allocation2 + $0x18] sm:$0xff]  ;;  %v26541_v50 = vpack.c.bf16 %v21119_v45, %v21118_v43 }
  0x57   : > { %v1181_v55 = vrot.slane %v1173_v58, %v28374_v30  ;;  %v1171_v42 = vrot.slane %v1157_v41, %v28374_v30  ;;  %v21152_v51 = vld [vmem:[%s32529_s1 + $0x60] sm:$0xff]  ;;  %v21153_v53 = vld [vmem:[%s32529_s1 + $0x68] sm:$0xff]  ;;  %v28713_v57 = vld [vmem:[#allocation2 + $0x30] sm:$0xff] }
  0x58   : > { %v600_v0 = vcombine.high %v598_v60, %v598_v60  ;;  %v614_v1 = vrot.slane %v598_v60, %v28367_v23  ;;  %v1188_v5 = vrot.slane %v1174_v61, %v28374_v30  ;;  %v28711_v56 = vld [vmem:[#allocation2 + $0x20] sm:$0xff]  ;;  %v28715_v58 = vpack.c.bf16 %v21153_v53, %v21152_v51  ;;  %v28721_v41 = vld [vmem:[#allocation2 + $0x38] sm:$0xff]  ;;  %v28738_v61 = vld [vmem:[#allocation2 + $0x68] sm:$0xff] }
  0x59   : > { %v1172_v7 = vcombine.low %v1164_v59, %v1171_v42  ;;  %24184 = vmatmul.mubr.msk.f32.gmra.mrb[20].mxu0 %vm889_vm0, %v28632_v62  ;;  %v28645_v13 = vld [vmem:[#allocation2 + $0x111] sm:$0xff]  ;;  %v28660_v34 = vld [vmem:[#allocation2 + $0x129] sm:$0xff]  ;;  %v28732_v60 = vld [vmem:[#allocation2 + $0x60] sm:$0xff] }
  0x5a   : > { %v628_v8 = vrot.slane %v600_v0, %v28367_v23  ;;  %v630_v9 = vcombine.high %v614_v1, %v614_v1  ;;  %v876_v11 = vrot.slane %v614_v1, %v28381_v36  ;;  %v1189_v12 = vcombine.low %v1181_v55, %v1188_v5  ;;  %24186 = vmatprep.mubr.msk.f32.mxu0 %vm889_vm0, %v28636_v2  ;;  %v28730_v59 = vld [vmem:[#allocation2 + $0x50] sm:$0xff]  ;;  %v28740_v55 = vld [vmem:[#allocation2 + $0x78] sm:$0xff]  ;;  %v28746_v42 = vld [vmem:[#allocation2 + $0x80] sm:$0xff] }
  0x5b   : > { %1249 = vst.msk [vmem:[#allocation2 + $0x141] sm:$0xff] %vm889_vm0, %v1172_v7  ;;  %1251 = vst.msk [vmem:[#allocation2 + $0x159] sm:$0xff] %vm889_vm0, %v1172_v7  ;;  %v28748_v0 = vld [vmem:[#allocation2 + $0x90] sm:$0xff]  ;;  %v28754_v1 = vld [vmem:[#allocation2 + $0x98] sm:$0xff] }
  0x5c   : > { %v632_v14 = vcombine.high %v628_v8, %v628_v8  ;;  %v880_v15 = vrot.slane %v628_v8, %v28381_v36  ;;  %v884_v16 = vrot.slane %v630_v9, %v28381_v36  ;;  %1252 = vst.msk [vmem:[#allocation2 + $0x169] sm:$0xff] %vm889_vm0, %v1189_v12  ;;  %1254 = vst.msk [vmem:[#allocation2 + $0x181] sm:$0xff] %vm889_vm0, %v1189_v12  ;;  %v28756_v5 = vld [vmem:[#allocation2 + $0xa8] sm:$0xff]  ;;  %v28762_v7 = vld [vmem:[#allocation2 + $0xb0] sm:$0xff] }
  0x5d   : > { %24187 = vmatmul.mubr.msk.f32.gmra.mrb[22].mxu0 %vm889_vm0, %v28645_v13  ;;  %v28663_v28 = vld [vmem:[#allocation2 + $0x139] sm:$0xff]  ;;  %v28672_v33 = vld [vmem:[#allocation2 + $0x151] sm:$0xff]  ;;  %v28770_v9 = vld [vmem:[#allocation2 + $0xc8] sm:$0xff] }
  0x5e   : > { %v888_v19 = vrot.slane %v632_v14, %v28381_v36  ;;  %v1190_v21 = vcombine.low %v876_v11, %v880_v15  ;;  %24189 = vmatprep.mubr.msk.f32.mxu0 %vm889_vm0, %v28651_v17  ;;  %v28764_v8 = vld [vmem:[#allocation2 + $0xc0] sm:$0xff]  ;;  %v28772_v11 = vld [vmem:[#allocation2 + $0xd8] sm:$0xff]  ;;  %v28780_v14 = vld [vmem:[#allocation2 + $0xf0] sm:$0xff] }
  0x5f   : > { %v28778_v12 = vld [vmem:[#allocation2 + $0xe0] sm:$0xff]  ;;  %v28786_v15 = vld [vmem:[#allocation2 + $0xf8] sm:$0xff]  ;;  %v1972_v53 = vld [vmem:[#allocation2 + $0xa] sm:$0xff] }
  0x60   : > { %v1191_v22 = vcombine.low %v884_v16, %v888_v19  ;;  %v1198_v25 = vrot.slane %v1190_v21, %v28374_v30  ;;  %v28788_v16 = vld [vmem:[#allocation2 + $0x108] sm:$0xff]  ;;  %v28794_v19 = vld [vmem:[#allocation2 + $0x110] sm:$0xff]  ;;  %v28796_v21 = vld [vmem:[#allocation2 + $0x120] sm:$0xff] }
  0x61   : > { %24190 = vmatmul.mubr.msk.f32.gmra.mrb[24].mxu0 %vm889_vm0, %v28660_v34  ;;  %v21155_v51 = vld [vmem:[%s32529_s1 + $0x78] sm:$0xff]  ;;  %v21188_v36 = vld [vmem:[%s32529_s1 + $0x80] sm:$0xff]  ;;  %v21189_v23 = vld [vmem:[%s32529_s1 + $0x88] sm:$0xff] }
  0x62   : > { %v1205_v29 = vrot.slane %v1191_v22, %v28374_v30  ;;  %24192 = vmatprep.mubr.msk.f32.mxu0 %vm889_vm0, %v28663_v28  ;;  %v28670_v31 = vld [vmem:[#allocation2 + $0x141] sm:$0xff]  ;;  %v28680_v35 = vld [vmem:[#allocation2 + $0x159] sm:$0xff] }
  0x63   : > { %v28682_v37 = vld [vmem:[#allocation2 + $0x169] sm:$0xff] }
  0x64   : > { %v1206_v32 = vcombine.low %v1198_v25, %v1205_v29  ;;  %v28802_v22 = vld [vmem:[#allocation2 + $0x128] sm:$0xff]  ;;  %v28804_v25 = vld [vmem:[#allocation2 + $0x138] sm:$0xff]  ;;  %v28810_v29 = vld [vmem:[#allocation2 + $0x140] sm:$0xff] }
  0x65   : > { %24193 = vmatmul.mubr.msk.f32.gmra.mrb[26].mxu0 %vm889_vm0, %v28670_v31  ;;  %v28820_v43 = vld [vmem:[#allocation2 + $0x168] sm:$0xff] }
  0x66   : > { %1253 = vst.msk [vmem:[#allocation2 + $0x171] sm:$0xff] %vm889_vm0, %v1206_v32  ;;  %1255 = vst.msk [vmem:[#allocation2 + $0x189] sm:$0xff] %vm889_vm0, %v1206_v32  ;;  %24195 = vmatprep.mubr.msk.f32.mxu0 %vm889_vm0, %v28672_v33  ;;  %v28812_v32 = vld [vmem:[#allocation2 + $0x150] sm:$0xff] }
  0x69   : > { %24196 = vmatmul.mubr.msk.f32.gmra.mrb[28].mxu0 %vm889_vm0, %v28680_v35 }
  0x6a   : > { %24198 = vmatprep.mubr.msk.f32.mxu0 %vm889_vm0, %v28682_v37 }
  0x6d   : > { %v28688_v39 = vld [vmem:[#allocation2 + $0x171] sm:$0xff] }
  0x6e   : > { %32607 = vst [vmem:[#allocation7_spill] sm:$0xff] %v28688_v39  ;;  %24199 = vmatmul.mubr.msk.f32.gmra.mrb[30].mxu0 %vm889_vm0, %v28688_v39  ;;  %v28826_v45 = vld [vmem:[#allocation2 + $0x170] sm:$0xff] }
  0x6f   : > { %24209 = vmatprep.mubr.msk.f32.mxu0 %vm889_vm0, %v1256_v40  ;;  %v28818_v40 = vld [vmem:[#allocation2 + $0x158] sm:$0xff]  ;;  %32608 = vst [vmem:[#allocation8_spill] sm:$0xff] %v28826_v45 }
  0x70   : > { %v28851_v39 = vld [vmem:[#allocation2 + $0x32] sm:$0xff] }
  0x72   : > { %24210 = vmatmul.mubr.msk.f32.vlgmr.msra.gmra.mrb[0].mxu0 %vm889_vm0, %v1257_v46  ;;  %v1971_v46 = vld [vmem:[#allocation2 + $0x2] sm:$0xff] }
  0x73   : > { %26540 = vmatpush3.bf16.msra.mxu0 %v28371_v27  ;;  %24212 = vmatprep.mubr.msk.f32.mxu0 %vm889_vm0, %v28699_v48  ;;  %v28723_v27 = vld [vmem:[#allocation2 + $0x48] sm:$0xff] }
  0x74   : > { %26542 = vmatprep.subr.bf16.mxu0 %v26541_v50 }
  0x76   : > { %24213 = vmatmul.mubr.msk.f32.gmra.mrb[2].mxu0 %vm889_vm0, %v28711_v56 }
  0x77   : > { %24215 = vmatprep.mubr.msk.f32.mxu0 %vm889_vm0, %v28713_v57  ;;  %26544 = vmatpush3.bf16.msra.mxu0 %v26541_v50  ;;  %v21154_v50 = vld [vmem:[%s32529_s1 + $0x70] sm:$0xff] }
  0x78   : > { %26546 = vmatprep.subr.bf16.mxu0 %v28715_v58  ;;  %v26549_v30 = vpack.c.bf16 %v21155_v51, %v21154_v50  ;;  %v28853_v50 = vpack.c.bf16 %v21189_v23, %v21188_v36  ;;  %v28859_v51 = vld [vmem:[#allocation2 + $0x3a] sm:$0xff]  ;;  %v28868_v23 = vld [vmem:[#allocation2 + $0x52] sm:$0xff]  ;;  %v28870_v36 = vld [vmem:[#allocation2 + $0x62] sm:$0xff] }
  0x79   : > { %32609 = vst [vmem:[#allocation9_spill] sm:$0xff] %v28859_v51  ;;  %32611 = vst [vmem:[#allocation11_spill] sm:$0xff] %v28868_v23 }
  0x7a   : > { %24216 = vmatmul.mubr.msk.f32.gmra.mrb[4].mxu0 %vm889_vm0, %v28721_v41  ;;  %32612 = vst [vmem:[#allocation12_spill] sm:$0xff] %v28870_v36 }
  0x7b   : > { %24218 = vmatprep.mubr.msk.f32.mxu0 %vm889_vm0, %v28723_v27 }
  0x7e   : > { %24219 = vmatmul.mubr.msk.f32.gmra.mrb[6].mxu0 %vm889_vm0, %v28730_v59 }
  0x7f   : > { %24221 = vmatprep.mubr.msk.f32.mxu0 %vm889_vm0, %v28732_v60 }
  0x82   : > { %24222 = vmatmul.mubr.msk.f32.gmra.mrb[8].mxu0 %vm889_vm0, %v28738_v61 }
  0x83   : > { %24224 = vmatprep.mubr.msk.f32.mxu0 %vm889_vm0, %v28740_v55 }
  0x86   : > { %24225 = vmatmul.mubr.msk.f32.gmra.mrb[10].mxu0 %vm889_vm0, %v28746_v42 }
  0x87   : > { %24227 = vmatprep.mubr.msk.f32.mxu0 %vm889_vm0, %v28748_v0 }
  0x8a   : > { %24228 = vmatmul.mubr.msk.f32.gmra.mrb[12].mxu0 %vm889_vm0, %v28754_v1 }
  0x8b   : > { %24230 = vmatprep.mubr.msk.f32.mxu0 %vm889_vm0, %v28756_v5 }
  0x8e   : > { %24231 = vmatmul.mubr.msk.f32.gmra.mrb[14].mxu0 %vm889_vm0, %v28762_v7 }
  0x8f   : > { %24233 = vmatprep.mubr.msk.f32.mxu0 %vm889_vm0, %v28764_v8 }
  0x92   : > { %24234 = vmatmul.mubr.msk.f32.gmra.mrb[16].mxu0 %vm889_vm0, %v28770_v9 }
  0x93   : > { %24236 = vmatprep.mubr.msk.f32.mxu0 %vm889_vm0, %v28772_v11 }
  0x96   : > { %24237 = vmatmul.mubr.msk.f32.gmra.mrb[18].mxu0 %vm889_vm0, %v28778_v12 }
  0x97   : > { %24239 = vmatprep.mubr.msk.f32.mxu0 %vm889_vm0, %v28780_v14 }
  0x9a   : > { %24240 = vmatmul.mubr.msk.f32.gmra.mrb[20].mxu0 %vm889_vm0, %v28786_v15 }
  0x9b   : > { %24242 = vmatprep.mubr.msk.f32.mxu0 %vm889_vm0, %v28788_v16 }
  0x9e   : > { %24243 = vmatmul.mubr.msk.f32.gmra.mrb[22].mxu0 %vm889_vm0, %v28794_v19 }
  0x9f   : > { %24245 = vmatprep.mubr.msk.f32.mxu0 %vm889_vm0, %v28796_v21 }
  0xa2   : > { %24246 = vmatmul.mubr.msk.f32.gmra.mrb[24].mxu0 %vm889_vm0, %v28802_v22 }
  0xa3   : > { %24248 = vmatprep.mubr.msk.f32.mxu0 %vm889_vm0, %v28804_v25 }
  0xa6   : > { %24249 = vmatmul.mubr.msk.f32.gmra.mrb[26].mxu0 %vm889_vm0, %v28810_v29 }
  0xa7   : > { %24251 = vmatprep.mubr.msk.f32.mxu0 %vm889_vm0, %v28812_v32 }
  0xaa   : > { %24252 = vmatmul.mubr.msk.f32.gmra.mrb[28].mxu0 %vm889_vm0, %v28818_v40 }
  0xab   : > { %24254 = vmatprep.mubr.msk.f32.mxu0 %vm889_vm0, %v28820_v43 }
  0xae   : > { %24255 = vmatmul.mubr.msk.f32.gmra.mrb[30].mxu0 %vm889_vm0, %v28826_v45 }
  0xaf   : > { %24265 = vmatprep.mubr.msk.f32.mxu0 %vm889_vm0, %v1971_v46  ;;  %v28849_v46 = vld [vmem:[#allocation2 + $0x22] sm:$0xff] }
  0xb2   : > { %24266 = vmatmul.mubr.msk.f32.vlgmr.msra.gmra.mrb[0].mxu0 %vm889_vm0, %v1972_v53  ;;  %v28878_v53 = vld [vmem:[#allocation2 + $0x7a] sm:$0xff] }
  0xb3   : > { %26548 = vmatpush3.bf16.msra.mxu0 %v28715_v58  ;;  %24268 = vmatprep.mubr.msk.f32.mxu0 %vm889_vm0, %v28837_v6  ;;  %v28861_v58 = vld [vmem:[#allocation2 + $0x4a] sm:$0xff]  ;;  %32614 = vst [vmem:[#allocation14_spill] sm:$0xff] %v28878_v53 }
  0xb4   : > { %26550 = vmatprep.subr.bf16.mxu0 %v26549_v30  ;;  %32610 = vst [vmem:[#allocation10_spill] sm:$0xff] %v28861_v58 }
  0xb6   : > { %24269 = vmatmul.mubr.msk.f32.gmra.mrb[2].mxu0 %vm889_vm0, %v28849_v46 }
  0xb7   : > { %24271 = vmatprep.mubr.msk.f32.mxu0 %vm889_vm0, %v28851_v39  ;;  %26552 = vmatpush3.bf16.msra.mxu0 %v26549_v30  ;;  %v28876_v30 = vld [vmem:[#allocation2 + $0x6a] sm:$0xff] }
  0xb8   : > { %26554 = vmatprep.subr.bf16.mxu0 %v28853_v50  ;;  %32613 = vst [vmem:[#allocation13_spill] sm:$0xff] %v28876_v30 }
  0xba   : > { %24272 = vmatmul.mubr.msk.f32.gmra.mrb[4].mxu0 %vm889_vm0, %v28859_v51  ;;  %v28886_v51 = vld [vmem:[#allocation2 + $0x92] sm:$0xff] }
  0xbb   : > { %24274 = vmatprep.mubr.msk.f32.mxu0 %vm889_vm0, %v28861_v58  ;;  %v28884_v58 = vld [vmem:[#allocation2 + $0x82] sm:$0xff]  ;;  %32616 = vst [vmem:[#allocation16_spill] sm:$0xff] %v28886_v51 }
  0xbc   : > { %32615 = vst [vmem:[#allocation15_spill] sm:$0xff] %v28884_v58 }
  0xbe   : > { %24275 = vmatmul.mubr.msk.f32.gmra.mrb[6].mxu0 %vm889_vm0, %v28868_v23  ;;  %v28894_v23 = vld [vmem:[#allocation2 + $0xaa] sm:$0xff] }
  0xbf   : > { %24277 = vmatprep.mubr.msk.f32.mxu0 %vm889_vm0, %v28870_v36  ;;  %v28892_v36 = vld [vmem:[#allocation2 + $0x9a] sm:$0xff]  ;;  %32618 = vst [vmem:[#allocation18_spill] sm:$0xff] %v28894_v23 }
  0xc0   : > { %32617 = vst [vmem:[#allocation17_spill] sm:$0xff] %v28892_v36 }
  0xc2   : > { %24278 = vmatmul.mubr.msk.f32.gmra.mrb[8].mxu0 %vm889_vm0, %v28876_v30  ;;  %v28902_v30 = vld [vmem:[#allocation2 + $0xc2] sm:$0xff] }
  0xc3   : > { %24280 = vmatprep.mubr.msk.f32.mxu0 %vm889_vm0, %v28878_v53  ;;  %v28900_v53 = vld [vmem:[#allocation2 + $0xb2] sm:$0xff]  ;;  %32620 = vst [vmem:[#allocation20_spill] sm:$0xff] %v28902_v30 }
  0xc4   : > { %32619 = vst [vmem:[#allocation19_spill] sm:$0xff] %v28900_v53 }
  0xc6   : > { %24281 = vmatmul.mubr.msk.f32.gmra.mrb[10].mxu0 %vm889_vm0, %v28884_v58  ;;  %v28910_v58 = vld [vmem:[#allocation2 + $0xda] sm:$0xff] }
  0xc7   : > { %24283 = vmatprep.mubr.msk.f32.mxu0 %vm889_vm0, %v28886_v51  ;;  %v28908_v51 = vld [vmem:[#allocation2 + $0xca] sm:$0xff]  ;;  %32622 = vst [vmem:[#allocation22_spill] sm:$0xff] %v28910_v58 }
  0xc8   : > { %32621 = vst [vmem:[#allocation21_spill] sm:$0xff] %v28908_v51 }
  0xca   : > { %24284 = vmatmul.mubr.msk.f32.gmra.mrb[12].mxu0 %vm889_vm0, %v28892_v36  ;;  %v28918_v36 = vld [vmem:[#allocation2 + $0xf2] sm:$0xff] }
  0xcb   : > { %24286 = vmatprep.mubr.msk.f32.mxu0 %vm889_vm0, %v28894_v23  ;;  %v28916_v23 = vld [vmem:[#allocation2 + $0xe2] sm:$0xff]  ;;  %32624 = vst [vmem:[#allocation24_spill] sm:$0xff] %v28918_v36 }
  0xcc   : > { %32623 = vst [vmem:[#allocation23_spill] sm:$0xff] %v28916_v23 }
  0xce   : > { %24287 = vmatmul.mubr.msk.f32.gmra.mrb[14].mxu0 %vm889_vm0, %v28900_v53  ;;  %v28926_v53 = vld [vmem:[#allocation2 + $0x10a] sm:$0xff] }
  0xcf   : > { %24289 = vmatprep.mubr.msk.f32.mxu0 %vm889_vm0, %v28902_v30  ;;  %v28924_v30 = vld [vmem:[#allocation2 + $0xfa] sm:$0xff]  ;;  %32626 = vst [vmem:[#allocation26_spill] sm:$0xff] %v28926_v53 }
  0xd0   : > { %32625 = vst [vmem:[#allocation25_spill] sm:$0xff] %v28924_v30 }
  0xd2   : > { %24290 = vmatmul.mubr.msk.f32.gmra.mrb[16].mxu0 %vm889_vm0, %v28908_v51  ;;  %v28934_v51 = vld [vmem:[#allocation2 + $0x122] sm:$0xff] }
  0xd3   : > { %24292 = vmatprep.mubr.msk.f32.mxu0 %vm889_vm0, %v28910_v58  ;;  %v28932_v58 = vld [vmem:[#allocation2 + $0x112] sm:$0xff]  ;;  %32628 = vst [vmem:[#allocation28_spill] sm:$0xff] %v28934_v51 }
  0xd4   : > { %32627 = vst [vmem:[#allocation27_spill] sm:$0xff] %v28932_v58 }
  0xd6   : > { %24293 = vmatmul.mubr.msk.f32.gmra.mrb[18].mxu0 %vm889_vm0, %v28916_v23  ;;  %v28942_v23 = vld [vmem:[#allocation2 + $0x13a] sm:$0xff] }
  0xd7   : > { %24295 = vmatprep.mubr.msk.f32.mxu0 %vm889_vm0, %v28918_v36  ;;  %v28940_v36 = vld [vmem:[#allocation2 + $0x12a] sm:$0xff]  ;;  %32630 = vst [vmem:[#allocation30_spill] sm:$0xff] %v28942_v23 }
  0xd8   : > { %32629 = vst [vmem:[#allocation29_spill] sm:$0xff] %v28940_v36 }
  0xda   : > { %24296 = vmatmul.mubr.msk.f32.gmra.mrb[20].mxu0 %vm889_vm0, %v28924_v30  ;;  %v28950_v30 = vld [vmem:[#allocation2 + $0x152] sm:$0xff] }
  0xdb   : > { %24298 = vmatprep.mubr.msk.f32.mxu0 %vm889_vm0, %v28926_v53  ;;  %v28948_v53 = vld [vmem:[#allocation2 + $0x142] sm:$0xff]  ;;  %32632 = vst [vmem:[#allocation32_spill] sm:$0xff] %v28950_v30 }
  0xdc   : > { %32631 = vst [vmem:[#allocation31_spill] sm:$0xff] %v28948_v53 }
  0xde   : > { %24299 = vmatmul.mubr.msk.f32.gmra.mrb[22].mxu0 %vm889_vm0, %v28932_v58  ;;  %v28958_v58 = vld [vmem:[#allocation2 + $0x16a] sm:$0xff] }
  0xdf   : > { %24301 = vmatprep.mubr.msk.f32.mxu0 %vm889_vm0, %v28934_v51  ;;  %v28956_v51 = vld [vmem:[#allocation2 + $0x15a] sm:$0xff]  ;;  %32634 = vst [vmem:[#allocation34_spill] sm:$0xff] %v28958_v58 }
  0xe0   : > { %32633 = vst [vmem:[#allocation33_spill] sm:$0xff] %v28956_v51 }
  0xe2   : > { %24302 = vmatmul.mubr.msk.f32.gmra.mrb[24].mxu0 %vm889_vm0, %v28940_v36  ;;  %v21190_v36 = vld [vmem:[%s32529_s1 + $0x90] sm:$0xff] }
  0xe3   : > { %24304 = vmatprep.mubr.msk.f32.mxu0 %vm889_vm0, %v28942_v23  ;;  %v28964_v23 = vld [vmem:[#allocation2 + $0x172] sm:$0xff] }
  0xe4   : > { %32635 = vst [vmem:[#allocation35_spill] sm:$0xff] %v28964_v23 }
  0xe6   : > { %24305 = vmatmul.mubr.msk.f32.gmra.mrb[26].mxu0 %vm889_vm0, %v28948_v53  ;;  %v21225_v53 = vld [vmem:[%s32529_s1 + $0xa8] sm:$0xff] }
  0xe7   : > { %24307 = vmatprep.mubr.msk.f32.mxu0 %vm889_vm0, %v28950_v30  ;;  %v21191_v30 = vld [vmem:[%s32529_s1 + $0x98] sm:$0xff] }
  0xea   : > { %24308 = vmatmul.mubr.msk.f32.gmra.mrb[28].mxu0 %vm889_vm0, %v28956_v51  ;;  %v26557_v51 = vpack.c.bf16 %v21191_v30, %v21190_v36  ;;  %v2752_v36 = vld [vmem:[#allocation2 + $0x21] sm:$0xff]  ;;  %v29056_v30 = vld [vmem:[#allocation2 + $0x31] sm:$0xff] }
  0xeb   : > { %24310 = vmatprep.mubr.msk.f32.mxu0 %vm889_vm0, %v28958_v58  ;;  %v21224_v58 = vld [vmem:[%s32529_s1 + $0xa0] sm:$0xff] }
  0xee   : > { %24311 = vmatmul.mubr.msk.f32.gmra.mrb[30].mxu0 %vm889_vm0, %v28964_v23  ;;  %v26561_v23 = vpack.c.bf16 %v21225_v53, %v21224_v58  ;;  %v21227_v58 = vld [vmem:[%s32529_s1 + $0xb8] sm:$0xff] }
  0xef   : > { %24321 = vmatprep.mubr.msk.f32.mxu0 %vm889_vm0, %v28699_v48  ;;  %v29039_v48 = vld [vmem:[#allocation2 + $0x180] sm:$0xff] }
  0xf0   : > { %32636 = vst [vmem:[#allocation36_spill] sm:$0xff] %v29039_v48 }
  0xf2   : > { %24322 = vmatmul.mubr.msk.f32.vlgmr.msra.gmra.mrb[0].mxu0 %vm889_vm0, %v28711_v56  ;;  %v29045_v56 = vld [vmem:[#allocation2 + $0x188] sm:$0xff] }
  0xf3   : > { %26556 = vmatpush3.bf16.msra.mxu0 %v28853_v50  ;;  %24324 = vmatprep.mubr.msk.f32.mxu0 %vm889_vm0, %v28713_v57  ;;  %32637 = vst [vmem:[#allocation37_spill] sm:$0xff] %v29045_v56  ;;  %v2751_v50 = vld [vmem:[#allocation2 + $0x19] sm:$0xff] }
  0xf4   : > { %26558 = vmatprep.subr.bf16.mxu0 %v26557_v51 }
  0xf6   : > { %24325 = vmatmul.mubr.msk.f32.gmra.mrb[2].mxu0 %vm889_vm0, %v28721_v41 }
  0xf7   : > { %24327 = vmatprep.mubr.msk.f32.mxu0 %vm889_vm0, %v28723_v27  ;;  %26560 = vmatpush3.bf16.msra.mxu0 %v26557_v51  ;;  %v21226_v51 = vld [vmem:[%s32529_s1 + $0xb0] sm:$0xff] }
  0xf8   : > { %26562 = vmatprep.subr.bf16.mxu0 %v26561_v23  ;;  %v26565_v53 = vpack.c.bf16 %v21227_v58, %v21226_v51  ;;  %v32659_v58 = vld [vmem:[#allocation29_spill] sm:$0xff] }
  0xfa   : > { %24328 = vmatmul.mubr.msk.f32.gmra.mrb[4].mxu0 %vm889_vm0, %v28730_v59 }
  0xfb   : > { %24330 = vmatprep.mubr.msk.f32.mxu0 %vm889_vm0, %v28732_v60 }
  0xfe   : > { %24331 = vmatmul.mubr.msk.f32.gmra.mrb[6].mxu0 %vm889_vm0, %v28738_v61 }
  0xff   : > { %24333 = vmatprep.mubr.msk.f32.mxu0 %vm889_vm0, %v28740_v55 }
 0x102   : > { %24334 = vmatmul.mubr.msk.f32.gmra.mrb[8].mxu0 %vm889_vm0, %v28746_v42 }
 0x103   : > { %24336 = vmatprep.mubr.msk.f32.mxu0 %vm889_vm0, %v28748_v0 }
 0x106   : > { %24337 = vmatmul.mubr.msk.f32.gmra.mrb[10].mxu0 %vm889_vm0, %v28754_v1 }
 0x107   : > { %24339 = vmatprep.mubr.msk.f32.mxu0 %vm889_vm0, %v28756_v5 }
 0x10a   : > { %24340 = vmatmul.mubr.msk.f32.gmra.mrb[12].mxu0 %vm889_vm0, %v28762_v7 }
 0x10b   : > { %24342 = vmatprep.mubr.msk.f32.mxu0 %vm889_vm0, %v28764_v8 }
 0x10e   : > { %24343 = vmatmul.mubr.msk.f32.gmra.mrb[14].mxu0 %vm889_vm0, %v28770_v9 }
 0x10f   : > { %24345 = vmatprep.mubr.msk.f32.mxu0 %vm889_vm0, %v28772_v11 }
 0x112   : > { %24346 = vmatmul.mubr.msk.f32.gmra.mrb[16].mxu0 %vm889_vm0, %v28778_v12 }
 0x113   : > { %24348 = vmatprep.mubr.msk.f32.mxu0 %vm889_vm0, %v28780_v14 }
 0x116   : > { %24349 = vmatmul.mubr.msk.f32.gmra.mrb[18].mxu0 %vm889_vm0, %v28786_v15 }
 0x117   : > { %24351 = vmatprep.mubr.msk.f32.mxu0 %vm889_vm0, %v28788_v16 }
 0x11a   : > { %24352 = vmatmul.mubr.msk.f32.gmra.mrb[20].mxu0 %vm889_vm0, %v28794_v19 }
 0x11b   : > { %24354 = vmatprep.mubr.msk.f32.mxu0 %vm889_vm0, %v28796_v21 }
 0x11e   : > { %24355 = vmatmul.mubr.msk.f32.gmra.mrb[22].mxu0 %vm889_vm0, %v28802_v22 }
 0x11f   : > { %24357 = vmatprep.mubr.msk.f32.mxu0 %vm889_vm0, %v28804_v25 }
 0x122   : > { %24358 = vmatmul.mubr.msk.f32.gmra.mrb[24].mxu0 %vm889_vm0, %v28810_v29 }
 0x123   : > { %24360 = vmatprep.mubr.msk.f32.mxu0 %vm889_vm0, %v28812_v32 }
 0x126   : > { %24361 = vmatmul.mubr.msk.f32.gmra.mrb[26].mxu0 %vm889_vm0, %v28818_v40 }
 0x127   : > { %24363 = vmatprep.mubr.msk.f32.mxu0 %vm889_vm0, %v28820_v43 }
 0x12a   : > { %24364 = vmatmul.mubr.msk.f32.gmra.mrb[28].mxu0 %vm889_vm0, %v28826_v45  ;;  %v21261_v45 = vld [vmem:[%s32529_s1 + $0xc8] sm:$0xff] }
 0x12b   : > { %24366 = vmatprep.mubr.msk.f32.mxu0 %vm889_vm0, %v29039_v48  ;;  %v21260_v48 = vld [vmem:[%s32529_s1 + $0xc0] sm:$0xff] }
 0x12c   : > { %v26569_v51 = vpack.c.bf16 %v21261_v45, %v21260_v48  ;;  %v32655_v45 = vld [vmem:[#allocation25_spill] sm:$0xff]  ;;  %v32658_v48 = vld [vmem:[#allocation28_spill] sm:$0xff] }
 0x12e   : > { %24367 = vmatmul.mubr.msk.f32.gmra.mrb[30].mxu0 %vm889_vm0, %v29045_v56  ;;  %v29067_v56 = vld [vmem:[#allocation2 + $0x39] sm:$0xff] }
 0x12f   : > { %24377 = vmatprep.mubr.msk.f32.mxu0 %vm889_vm0, %v2751_v50  ;;  %v29069_v50 = vld [vmem:[#allocation2 + $0x49] sm:$0xff] }
 0x132   : > { %24378 = vmatmul.mubr.msk.f32.vlgmr.msra.gmra.mrb[0].mxu0 %vm889_vm0, %v2752_v36  ;;  %v32660_v36 = vld [vmem:[#allocation30_spill] sm:$0xff] }
 0x133   : > { %26564 = vmatpush3.bf16.msra.mxu0 %v26561_v23  ;;  %24380 = vmatprep.mubr.msk.f32.mxu0 %vm889_vm0, %v29056_v30  ;;  %v32657_v23 = vld [vmem:[#allocation27_spill] sm:$0xff] }
 0x134   : > { %26566 = vmatprep.subr.bf16.mxu0 %v26565_v53 }
 0x136   : > { %24381 = vmatmul.mubr.msk.f32.gmra.mrb[2].mxu0 %vm889_vm0, %v29067_v56 }
 0x137   : > { %24383 = vmatprep.mubr.msk.f32.mxu0 %vm889_vm0, %v29069_v50  ;;  %26568 = vmatpush3.bf16.msra.mxu0 %v26565_v53  ;;  %v32661_v53 = vld [vmem:[#allocation31_spill] sm:$0xff] }
 0x138   : > { %26570 = vmatprep.subr.bf16.mxu0 %v26569_v51 }
 0x13a   : > { %24384 = vmatmul.mubr.msk.f32.gmra.mrb[4].mxu0 %vm889_vm0, %v28493_v38  ;;  %v29123_v38 = vld [vmem:[#allocation2 + $0x181] sm:$0xff] }
 0x13b   : > { %24386 = vmatprep.mubr.msk.f32.mxu0 %vm889_vm0, %v28497_v52  ;;  %v32638_v52 = vld [vmem:[#allocation7_spill] sm:$0xff] }
 0x13e   : > { %24387 = vmatmul.mubr.msk.f32.gmra.mrb[6].mxu0 %vm889_vm0, %v28512_v63  ;;  %v29129_v63 = vld [vmem:[#allocation2 + $0x189] sm:$0xff] }
 0x13f   : > { %24389 = vmatprep.mubr.msk.f32.mxu0 %vm889_vm0, %v28516_v4  ;;  %v21262_v4 = vld [vmem:[%s32529_s1 + $0xd0] sm:$0xff] }
 0x142   : > { %24390 = vmatmul.mubr.msk.f32.gmra.mrb[8].mxu0 %vm889_vm0, %v28530_v18  ;;  %v21263_v18 = vld [vmem:[%s32529_s1 + $0xd8] sm:$0xff] }
 0x143   : > { %24392 = vmatprep.mubr.msk.f32.mxu0 %vm889_vm0, %v28535_v24  ;;  %v26573_v24 = vpack.c.bf16 %v21263_v18, %v21262_v4  ;;  %v32663_v4 = vld [vmem:[#allocation33_spill] sm:$0xff]  ;;  %v32664_v18 = vld [vmem:[#allocation34_spill] sm:$0xff] }
 0x146   : > { %24393 = vmatmul.mubr.msk.f32.gmra.mrb[10].mxu0 %vm889_vm0, %v28552_v44  ;;  %v21296_v44 = vld [vmem:[%s32529_s1 + $0xe0] sm:$0xff] }
 0x147   : > { %24395 = vmatprep.mubr.msk.f32.mxu0 %vm889_vm0, %v28556_v49  ;;  %v21297_v49 = vld [vmem:[%s32529_s1 + $0xe8] sm:$0xff] }
 0x14a   : > { %24396 = vmatmul.mubr.msk.f32.gmra.mrb[12].mxu0 %vm889_vm0, %v28582_v10  ;;  %v32639_v10 = vld [vmem:[#allocation9_spill] sm:$0xff] }
 0x14b   : > { %24398 = vmatprep.mubr.msk.f32.mxu0 %vm889_vm0, %v28578_v3  ;;  %v26577_v3 = vpack.c.bf16 %v21297_v49, %v21296_v44  ;;  %v32666_v44 = vld [vmem:[#allocation35_spill] sm:$0xff]  ;;  %v29209_v49 = vld [vmem:[#allocation2 + $0x18a] sm:$0xff] }
 0x14c   : > { %32667 = vst [vmem:[#allocation9_spill] sm:$0xff] %v29209_v49 }
 0x14e   : > { %24399 = vmatmul.mubr.msk.f32.gmra.mrb[14].mxu0 %vm889_vm0, %v28592_v20  ;;  %v32641_v20 = vld [vmem:[#allocation11_spill] sm:$0xff] }
 0x14f   : > { %24401 = vmatprep.mubr.msk.f32.mxu0 %vm889_vm0, %v28599_v26  ;;  %v32642_v26 = vld [vmem:[#allocation12_spill] sm:$0xff] }
 0x152   : > { %24402 = vmatmul.mubr.msk.f32.gmra.mrb[16].mxu0 %vm889_vm0, %v28614_v47  ;;  %v32643_v47 = vld [vmem:[#allocation13_spill] sm:$0xff] }
 0x153   : > { %24404 = vmatprep.mubr.msk.f32.mxu0 %vm889_vm0, %v28620_v54  ;;  %v32644_v54 = vld [vmem:[#allocation14_spill] sm:$0xff] }
 0x156   : > { %24405 = vmatmul.mubr.msk.f32.gmra.mrb[18].mxu0 %vm889_vm0, %v28632_v62  ;;  %v32645_v62 = vld [vmem:[#allocation15_spill] sm:$0xff] }
 0x157   : > { %24407 = vmatprep.mubr.msk.f32.mxu0 %vm889_vm0, %v28636_v2  ;;  %v32646_v2 = vld [vmem:[#allocation16_spill] sm:$0xff] }
 0x15a   : > { %24408 = vmatmul.mubr.msk.f32.gmra.mrb[20].mxu0 %vm889_vm0, %v28645_v13  ;;  %v32647_v13 = vld [vmem:[#allocation17_spill] sm:$0xff] }
 0x15b   : > { %24410 = vmatprep.mubr.msk.f32.mxu0 %vm889_vm0, %v28651_v17  ;;  %v32648_v17 = vld [vmem:[#allocation18_spill] sm:$0xff] }
 0x15e   : > { %24411 = vmatmul.mubr.msk.f32.gmra.mrb[22].mxu0 %vm889_vm0, %v28660_v34  ;;  %v32649_v34 = vld [vmem:[#allocation19_spill] sm:$0xff] }
 0x15f   : > { %24413 = vmatprep.mubr.msk.f32.mxu0 %vm889_vm0, %v28663_v28  ;;  %v32650_v28 = vld [vmem:[#allocation20_spill] sm:$0xff] }
 0x162   : > { %24414 = vmatmul.mubr.msk.f32.gmra.mrb[24].mxu0 %vm889_vm0, %v28670_v31  ;;  %v32651_v31 = vld [vmem:[#allocation21_spill] sm:$0xff] }
 0x163   : > { %24416 = vmatprep.mubr.msk.f32.mxu0 %vm889_vm0, %v28672_v33  ;;  %v32652_v33 = vld [vmem:[#allocation22_spill] sm:$0xff] }
 0x166   : > { %24417 = vmatmul.mubr.msk.f32.gmra.mrb[26].mxu0 %vm889_vm0, %v28680_v35  ;;  %v32653_v35 = vld [vmem:[#allocation23_spill] sm:$0xff] }
 0x167   : > { %24419 = vmatprep.mubr.msk.f32.mxu0 %vm889_vm0, %v28682_v37  ;;  %v32654_v37 = vld [vmem:[#allocation24_spill] sm:$0xff] }
 0x16a   : > { %24420 = vmatmul.mubr.msk.f32.gmra.mrb[28].mxu0 %vm889_vm0, %v32638_v52 }
 0x16b   : > { %24422 = vmatprep.mubr.msk.f32.mxu0 %vm889_vm0, %v29123_v38 }
 0x16e   : > { %24423 = vmatmul.mubr.msk.f32.gmra.mrb[30].mxu0 %vm889_vm0, %v29129_v63 }
 0x16f   : > { %24433 = vmatprep.mubr.msk.f32.mxu0 %vm889_vm0, %v28837_v6  ;;  %v32640_v6 = vld [vmem:[#allocation10_spill] sm:$0xff] }
 0x172   : > { %24434 = vmatmul.mubr.msk.f32.vlgmr.msra.gmra.mrb[0].mxu0 %vm889_vm0, %v28849_v46  ;;  %v32656_v46 = vld [vmem:[#allocation26_spill] sm:$0xff] }
 0x173   : > { %26572 = vmatpush3.bf16.msra.mxu0 %v26569_v51  ;;  %24436 = vmatprep.mubr.msk.f32.mxu0 %vm889_vm0, %v28851_v39  ;;  %v32662_v51 = vld [vmem:[#allocation32_spill] sm:$0xff] }
 0x174   : > { %26574 = vmatprep.subr.bf16.mxu0 %v26573_v24 }
 0x176   : > { %24437 = vmatmul.mubr.msk.f32.gmra.mrb[2].mxu0 %vm889_vm0, %v32639_v10 }
 0x177   : > { %24439 = vmatprep.mubr.msk.f32.mxu0 %vm889_vm0, %v32640_v6  ;;  %26576 = vmatpush3.bf16.msra.mxu0 %v26573_v24  ;;  %v29203_v24 = vld [vmem:[#allocation2 + $0x182] sm:$0xff] }
 0x178   : > { %26578 = vmatprep.subr.bf16.mxu0 %v26577_v3  ;;  %32665 = vst [vmem:[#allocation7_spill] sm:$0xff] %v29203_v24 }
 0x17a   : > { %24440 = vmatmul.mubr.msk.f32.gmra.mrb[4].mxu0 %vm889_vm0, %v32641_v20 }
 0x17b   : > { %24442 = vmatprep.mubr.msk.f32.mxu0 %vm889_vm0, %v32642_v26 }
 0x17e   : > { %24443 = vmatmul.mubr.msk.f32.gmra.mrb[6].mxu0 %vm889_vm0, %v32643_v47 }
 0x17f   : > { %24445 = vmatprep.mubr.msk.f32.mxu0 %vm889_vm0, %v32644_v54 }
 0x182   : > { %24446 = vmatmul.mubr.msk.f32.gmra.mrb[8].mxu0 %vm889_vm0, %v32645_v62 }
 0x183   : > { %24448 = vmatprep.mubr.msk.f32.mxu0 %vm889_vm0, %v32646_v2 }
 0x186   : > { %24449 = vmatmul.mubr.msk.f32.gmra.mrb[10].mxu0 %vm889_vm0, %v32647_v13 }
 0x187   : > { %24451 = vmatprep.mubr.msk.f32.mxu0 %vm889_vm0, %v32648_v17 }
 0x18a   : > { %24452 = vmatmul.mubr.msk.f32.gmra.mrb[12].mxu0 %vm889_vm0, %v32649_v34 }
 0x18b   : > { %24454 = vmatprep.mubr.msk.f32.mxu0 %vm889_vm0, %v32650_v28 }
 0x18e   : > { %24455 = vmatmul.mubr.msk.f32.gmra.mrb[14].mxu0 %vm889_vm0, %v32651_v31 }
 0x18f   : > { %24457 = vmatprep.mubr.msk.f32.mxu0 %vm889_vm0, %v32652_v33 }
 0x192   : > { %24458 = vmatmul.mubr.msk.f32.gmra.mrb[16].mxu0 %vm889_vm0, %v32653_v35 }
 0x193   : > { %24460 = vmatprep.mubr.msk.f32.mxu0 %vm889_vm0, %v32654_v37 }
 0x196   : > { %24461 = vmatmul.mubr.msk.f32.gmra.mrb[18].mxu0 %vm889_vm0, %v32655_v45 }
 0x197   : > { %24463 = vmatprep.mubr.msk.f32.mxu0 %vm889_vm0, %v32656_v46 }
 0x19a   : > { %24464 = vmatmul.mubr.msk.f32.gmra.mrb[20].mxu0 %vm889_vm0, %v32657_v23 }
 0x19b   : > { %24466 = vmatprep.mubr.msk.f32.mxu0 %vm889_vm0, %v32658_v48 }
 0x19e   : > { %24467 = vmatmul.mubr.msk.f32.gmra.mrb[22].mxu0 %vm889_vm0, %v32659_v58 }
 0x19f   : > { %24469 = vmatprep.mubr.msk.f32.mxu0 %vm889_vm0, %v32660_v36 }
 0x1a2   : > { %24470 = vmatmul.mubr.msk.f32.gmra.mrb[24].mxu0 %vm889_vm0, %v32661_v53 }
 0x1a3   : > { %24472 = vmatprep.mubr.msk.f32.mxu0 %vm889_vm0, %v32662_v51  ;;  %v21298_v51 = vld [vmem:[%s32529_s1 + $0xf0] sm:$0xff] }
 0x1a6   : > { %24473 = vmatmul.mubr.msk.f32.gmra.mrb[26].mxu0 %vm889_vm0, %v32663_v4  ;;  %v21299_v4 = vld [vmem:[%s32529_s1 + $0xf8] sm:$0xff] }
 0x1a7   : > { %24475 = vmatprep.mubr.msk.f32.mxu0 %vm889_vm0, %v32664_v18  ;;  %v21333_v18 = vld [vmem:[%s32529_s1 + $0x108] sm:$0xff] }
 0x1aa   : > { %24476 = vmatmul.mubr.msk.f32.gmra.mrb[28].mxu0 %vm889_vm0, %v32666_v44  ;;  %v26581_v44 = vpack.c.bf16 %v21299_v4, %v21298_v51  ;;  %v3948_v51 = vld [vmem:[#allocation2 + $0x169] sm:$0xff]  ;;  %v3952_v4 = vld [vmem:[#allocation2 + $0x199] sm:$0xff] }
 0x1ab   : > { %24478 = vmatprep.mubr.msk.f32.mxu0 %vm889_vm0, %v29203_v24  ;;  %v21332_v24 = vld [vmem:[%s32529_s1 + $0x100] sm:$0xff] }
 0x1ae   : > { %24479 = vmatmul.mubr.msk.f32.gmra.mrb[30].mxu0 %vm889_vm0, %v29209_v49  ;;  %v26585_v49 = vpack.c.bf16 %v21333_v18, %v21332_v24  ;;  %v3953_v18 = vld [vmem:[#allocation2 + $0x1a1] sm:$0xff] }
 0x1af   : > { %24489 = vmatprep.mubr.msk.f32.mxu0 %vm889_vm0, %v28713_v57  ;;  %v32668_v57 = vld [vmem:[#allocation8_spill] sm:$0xff] }
 0x1b2   : > { %24490 = vmatmul.mubr.msk.f32.vlgmr.msra.gmra.mrb[0].mxu0 %vm889_vm0, %v28721_v41  ;;  %v32669_v41 = vld [vmem:[#allocation36_spill] sm:$0xff] }
 0x1b3   : > { %26580 = vmatpush3.bf16.msra.mxu0 %v26577_v3  ;;  %24492 = vmatprep.mubr.msk.f32.mxu0 %vm889_vm0, %v28723_v27  ;;  %v3562_v27 = vld [vmem:[#allocation2 + $0x198] sm:$0xff] }
 0x1b4   : > { %26582 = vmatprep.subr.bf16.mxu0 %v26581_v44  ;;  %v3947_v3 = vld [vmem:[#allocation2 + $0x159] sm:$0xff] }
 0x1b6   : > { %24493 = vmatmul.mubr.msk.f32.gmra.mrb[2].mxu0 %vm889_vm0, %v28730_v59  ;;  %v32670_v59 = vld [vmem:[#allocation37_spill] sm:$0xff] }
 0x1b7   : > { %24495 = vmatprep.mubr.msk.f32.mxu0 %vm889_vm0, %v28732_v60  ;;  %26584 = vmatpush3.bf16.msra.mxu0 %v26581_v44  ;;  %v3563_v60 = vld [vmem:[#allocation2 + $0x1a0] sm:$0xff] }
 0x1b8   : > { %26586 = vmatprep.subr.bf16.mxu0 %v26585_v49 }
 0x1ba   : > { %24496 = vmatmul.mubr.msk.f32.gmra.mrb[4].mxu0 %vm889_vm0, %v28738_v61  ;;  %v21334_v61 = vld [vmem:[%s32529_s1 + $0x110] sm:$0xff] }
 0x1bb   : > { %24498 = vmatprep.mubr.msk.f32.mxu0 %vm889_vm0, %v28740_v55  ;;  %v21335_v55 = vld [vmem:[%s32529_s1 + $0x118] sm:$0xff] }
 0x1be   : > { %24499 = vmatmul.mubr.msk.f32.gmra.mrb[6].mxu0 %vm889_vm0, %v28746_v42  ;;  %v26589_v42 = vpack.c.bf16 %v21335_v55, %v21334_v61 }
 0x1bf   : > { %24501 = vmatprep.mubr.msk.f32.mxu0 %vm889_vm0, %v28748_v0  ;;  %v3925_v0 = vld [vmem:[#allocation2 + $0x51] sm:$0xff] }
 0x1c2   : > { %24502 = vmatmul.mubr.msk.f32.gmra.mrb[8].mxu0 %vm889_vm0, %v28754_v1  ;;  %v3926_v1 = vld [vmem:[#allocation2 + $0x61] sm:$0xff] }
 0x1c3   : > { %24504 = vmatprep.mubr.msk.f32.mxu0 %vm889_vm0, %v28756_v5  ;;  %v3927_v5 = vld [vmem:[#allocation2 + $0x69] sm:$0xff] }
 0x1c6   : > { %24505 = vmatmul.mubr.msk.f32.gmra.mrb[10].mxu0 %vm889_vm0, %v28762_v7  ;;  %v3928_v7 = vld [vmem:[#allocation2 + $0x79] sm:$0xff] }
 0x1c7   : > { %24507 = vmatprep.mubr.msk.f32.mxu0 %vm889_vm0, %v28764_v8  ;;  %v3929_v8 = vld [vmem:[#allocation2 + $0x81] sm:$0xff] }
 0x1ca   : > { %24508 = vmatmul.mubr.msk.f32.gmra.mrb[12].mxu0 %vm889_vm0, %v28770_v9  ;;  %v3930_v9 = vld [vmem:[#allocation2 + $0x91] sm:$0xff] }
 0x1cb   : > { %24510 = vmatprep.mubr.msk.f32.mxu0 %vm889_vm0, %v28772_v11  ;;  %v3931_v11 = vld [vmem:[#allocation2 + $0x99] sm:$0xff] }
 0x1ce   : > { %24511 = vmatmul.mubr.msk.f32.gmra.mrb[14].mxu0 %vm889_vm0, %v28778_v12  ;;  %v3932_v12 = vld [vmem:[#allocation2 + $0xa9] sm:$0xff] }
 0x1cf   : > { %24513 = vmatprep.mubr.msk.f32.mxu0 %vm889_vm0, %v28780_v14  ;;  %v3933_v14 = vld [vmem:[#allocation2 + $0xb1] sm:$0xff] }
 0x1d2   : > { %24514 = vmatmul.mubr.msk.f32.gmra.mrb[16].mxu0 %vm889_vm0, %v28786_v15  ;;  %v3934_v15 = vld [vmem:[#allocation2 + $0xc1] sm:$0xff] }
 0x1d3   : > { %24516 = vmatprep.mubr.msk.f32.mxu0 %vm889_vm0, %v28788_v16  ;;  %v3935_v16 = vld [vmem:[#allocation2 + $0xc9] sm:$0xff] }
 0x1d6   : > { %24517 = vmatmul.mubr.msk.f32.gmra.mrb[18].mxu0 %vm889_vm0, %v28794_v19  ;;  %v3936_v19 = vld [vmem:[#allocation2 + $0xd9] sm:$0xff] }
 0x1d7   : > { %24519 = vmatprep.mubr.msk.f32.mxu0 %vm889_vm0, %v28796_v21  ;;  %v3937_v21 = vld [vmem:[#allocation2 + $0xe1] sm:$0xff] }
 0x1da   : > { %24520 = vmatmul.mubr.msk.f32.gmra.mrb[20].mxu0 %vm889_vm0, %v28802_v22  ;;  %v3938_v22 = vld [vmem:[#allocation2 + $0xf1] sm:$0xff] }
 0x1db   : > { %24522 = vmatprep.mubr.msk.f32.mxu0 %vm889_vm0, %v28804_v25  ;;  %v3939_v25 = vld [vmem:[#allocation2 + $0xf9] sm:$0xff] }
 0x1de   : > { %24523 = vmatmul.mubr.msk.f32.gmra.mrb[22].mxu0 %vm889_vm0, %v28810_v29  ;;  %v3940_v29 = vld [vmem:[#allocation2 + $0x109] sm:$0xff] }
 0x1df   : > { %24525 = vmatprep.mubr.msk.f32.mxu0 %vm889_vm0, %v28812_v32  ;;  %v3941_v32 = vld [vmem:[#allocation2 + $0x111] sm:$0xff] }
 0x1e2   : > { %24526 = vmatmul.mubr.msk.f32.gmra.mrb[24].mxu0 %vm889_vm0, %v28818_v40  ;;  %v3942_v40 = vld [vmem:[#allocation2 + $0x121] sm:$0xff] }
 0x1e3   : > { %24528 = vmatprep.mubr.msk.f32.mxu0 %vm889_vm0, %v28820_v43  ;;  %v3943_v43 = vld [vmem:[#allocation2 + $0x129] sm:$0xff] }
 0x1e6   : > { %24529 = vmatmul.mubr.msk.f32.gmra.mrb[26].mxu0 %vm889_vm0, %v32668_v57 }
 0x1e7   : > { %24531 = vmatprep.mubr.msk.f32.mxu0 %vm889_vm0, %v32669_v41  ;;  %v32678_v41 = vld [vmem:[#allocation4_spill] sm:$0xff] }
 0x1ea   : > { %24532 = vmatmul.mubr.msk.f32.gmra.mrb[28].mxu0 %vm889_vm0, %v32670_v59 }
 0x1eb   : > { %24534 = vmatprep.mubr.msk.f32.mxu0 %vm889_vm0, %v3562_v27 }
 0x1ee   : > { %24535 = vmatmul.mubr.msk.f32.gmra.mrb[30].mxu0 %vm889_vm0, %v3563_v60 }
 0x1ef   : > { %24545 = vmatprep.mubr.msk.f32.mxu0 %vm889_vm0, %v29056_v30  ;;  %v3945_v30 = vld [vmem:[#allocation2 + $0x141] sm:$0xff] }
 0x1f2   : > { %24546 = vmatmul.mubr.msk.f32.vlgmr.msra.gmra.mrb[0].mxu0 %vm889_vm0, %v29067_v56  ;;  %v3944_v56 = vld [vmem:[#allocation2 + $0x139] sm:$0xff] }
 0x1f3   : > { %26588 = vmatpush3.bf16.msra.mxu0 %v26585_v49  ;;  %24548 = vmatprep.mubr.msk.f32.mxu0 %vm889_vm0, %v29069_v50  ;;  %v3946_v50 = vld [vmem:[#allocation2 + $0x151] sm:$0xff] }
 0x1f4   : > { %26590 = vmatprep.subr.bf16.mxu0 %v26589_v42 }
 0x1f6   : > { %24549 = vmatmul.mubr.msk.f32.gmra.mrb[2].mxu0 %vm889_vm0, %v3925_v0 }
 0x1f7   : > { %24551 = vmatprep.mubr.msk.f32.mxu0 %vm889_vm0, %v3926_v1  ;;  %26592 = vmatpush3.bf16.msra.mxu0 %v26589_v42 }
 0x1fa   : > { %24552 = vmatmul.mubr.msk.f32.gmra.mrb[4].mxu0 %vm889_vm0, %v3927_v5 }
 0x1fb   : > { %24554 = vmatprep.mubr.msk.f32.mxu0 %vm889_vm0, %v3928_v7 }
 0x1fe   : > { %24555 = vmatmul.mubr.msk.f32.gmra.mrb[6].mxu0 %vm889_vm0, %v3929_v8 }
 0x1ff   : > { %24557 = vmatprep.mubr.msk.f32.mxu0 %vm889_vm0, %v3930_v9 }
 0x202   : > { %24558 = vmatmul.mubr.msk.f32.gmra.mrb[8].mxu0 %vm889_vm0, %v3931_v11 }
 0x203   : > { %24560 = vmatprep.mubr.msk.f32.mxu0 %vm889_vm0, %v3932_v12 }
 0x206   : > { %24561 = vmatmul.mubr.msk.f32.gmra.mrb[10].mxu0 %vm889_vm0, %v3933_v14 }
 0x207   : > { %24563 = vmatprep.mubr.msk.f32.mxu0 %vm889_vm0, %v3934_v15 }
 0x20a   : > { %24564 = vmatmul.mubr.msk.f32.gmra.mrb[12].mxu0 %vm889_vm0, %v3935_v16 }
 0x20b   : > { %24566 = vmatprep.mubr.msk.f32.mxu0 %vm889_vm0, %v3936_v19  ;;  %v32679_v19 = vld [vmem:[#allocation6_spill] sm:$0xff] }
 0x20e   : > { %24567 = vmatmul.mubr.msk.f32.gmra.mrb[14].mxu0 %vm889_vm0, %v3937_v21 }
 0x20f   : > { %24569 = vmatprep.mubr.msk.f32.mxu0 %vm889_vm0, %v3938_v22 }
 0x212   : > { %24570 = vmatmul.mubr.msk.f32.gmra.mrb[16].mxu0 %vm889_vm0, %v3939_v25 }
 0x213   : > { %24572 = vmatprep.mubr.msk.f32.mxu0 %vm889_vm0, %v3940_v29 }
 0x216   : > { %24573 = vmatmul.mubr.msk.f32.gmra.mrb[18].mxu0 %vm889_vm0, %v3941_v32 }
 0x217   : > { %24575 = vmatprep.mubr.msk.f32.mxu0 %vm889_vm0, %v3942_v40 }
 0x21a   : > { %24576 = vmatmul.mubr.msk.f32.gmra.mrb[20].mxu0 %vm889_vm0, %v3943_v43 }
 0x21b   : > { %24578 = vmatprep.mubr.msk.f32.mxu0 %vm889_vm0, %v3944_v56 }
 0x21e   : > { %24579 = vmatmul.mubr.msk.f32.gmra.mrb[22].mxu0 %vm889_vm0, %v3945_v30 }
 0x21f   : > { %24581 = vmatprep.mubr.msk.f32.mxu0 %vm889_vm0, %v3946_v50 }
 0x222   : > { %24582 = vmatmul.mubr.msk.f32.gmra.mrb[24].mxu0 %vm889_vm0, %v3947_v3 }
 0x223   : > { %24584 = vmatprep.mubr.msk.f32.mxu0 %vm889_vm0, %v3948_v51 }
 0x226   : > { %24585 = vmatmul.mubr.msk.f32.gmra.mrb[26].mxu0 %vm889_vm0, %v32638_v52  ;;  %v32673_v52 = vld [vmem:[#allocation34_spill] sm:$0xff] }
 0x227   : > { %24587 = vmatprep.mubr.msk.f32.mxu0 %vm889_vm0, %v29123_v38  ;;  %v32672_v38 = vld [vmem:[#allocation33_spill] sm:$0xff] }
 0x22a   : > { %24588 = vmatmul.mubr.msk.f32.gmra.mrb[28].mxu0 %vm889_vm0, %v29129_v63  ;;  %v32674_v63 = vld [vmem:[#allocation35_spill] sm:$0xff] }
 0x22b   : > { %24590 = vmatprep.mubr.msk.f32.mxu0 %vm889_vm0, %v3952_v4 }
 0x22e   : > { %24591 = vmatmul.mubr.msk.f32.gmra.mrb[30].mxu0 %vm889_vm0, %v3953_v18 }
 0x22f   : > { %24601 = vmatprep.mubr.msk.f32.mxu0 %vm889_vm0, %v28851_v39  ;;  %v32671_v39 = vld [vmem:[#allocation32_spill] sm:$0xff] }
 0x232   : > { %24602 = vmatmul.mubr.msk.f32.vlgmr.msra.gmra.mrb[0].mxu0 %vm889_vm0, %v32639_v10  ;;  %v32675_v10 = vld [vmem:[#allocation7_spill] sm:$0xff] }
 0x233   : > { %24604 = vmatprep.mubr.msk.f32.mxu0 %vm889_vm0, %v32640_v6  ;;  %v4342_v6 = vld [vmem:[#allocation2 + $0x19a] sm:$0xff] }
 0x236   : > { %24605 = vmatmul.mubr.msk.f32.gmra.mrb[2].mxu0 %vm889_vm0, %v32641_v20  ;;  %v32676_v20 = vld [vmem:[#allocation9_spill] sm:$0xff] }
 0x237   : > { %24607 = vmatprep.mubr.msk.f32.mxu0 %vm889_vm0, %v32642_v26  ;;  %v4343_v26 = vld [vmem:[#allocation2 + $0x1a2] sm:$0xff] }
 0x23a   : > { %24608 = vmatmul.mubr.msk.f32.gmra.mrb[4].mxu0 %vm889_vm0, %v32643_v47  ;;  %v32677_v47 = vmov 0.0  }
 0x23b   : > { %24610 = vmatprep.mubr.msk.f32.mxu0 %vm889_vm0, %v32644_v54  ;;  %7366 = vst.msk [vmem:[#allocation3] sm:$0xff] %vm7365_vm3, %v32677_v47  ;;  %7367 = vst.msk [vmem:[#allocation3 + $0x8] sm:$0xff] %vm7365_vm3, %v32677_v47  ;;  %v21369_v54 = vld [vmem:[%s32531_s3 + $0x40] sm:$0xff] }
 0x23c   : > { %7368 = vst.msk [vmem:[#allocation3 + $0x10] sm:$0xff] %vm7365_vm3, %v32677_v47  ;;  %7369 = vst.msk [vmem:[#allocation3 + $0x18] sm:$0xff] %vm7365_vm3, %v32677_v47 }
 0x23d   : > { %7373 = vst.msk [vmem:[#allocation3 + $0x528] sm:$0xff] %vm7365_vm3, %v32677_v47  ;;  %7374 = vst.msk [vmem:[#allocation3 + $0x530] sm:$0xff] %vm7365_vm3, %v32677_v47 }
 0x23e   : > { %24611 = vmatmul.mubr.msk.f32.gmra.mrb[6].mxu0 %vm889_vm0, %v32645_v62  ;;  %7375 = vst.msk [vmem:[#allocation3 + $0x538] sm:$0xff] %vm7365_vm3, %v32677_v47  ;;  %7376 = vst.msk [vmem:[#allocation3 + $0x540] sm:$0xff] %vm7365_vm3, %v32677_v47  ;;  %v21370_v62 = vld [vmem:[%s32531_s3 + $0x48] sm:$0xff] }
 0x23f   : > { %24613 = vmatprep.mubr.msk.f32.mxu0 %vm889_vm0, %v32646_v2  ;;  %v26593_v2 = vpack.c.bf16 %v21370_v62, %v21369_v54  ;;  %7371 = vst.msk [vmem:[#allocation3 + $0x20] sm:$0x3] %vm7370_vm4, %v32677_v47  ;;  %7377 = vst.msk [vmem:[#allocation3 + $0x548] sm:$0x3] %vm7370_vm4, %v32677_v47 }
 0x240   : > { %7393 = vst.msk [vmem:[#allocation3 + $0x230] sm:$0x1] %vm7378_vm5, %v32677_v47  ;;  %7379 = vst.msk [vmem:[#allocation3] sm:$0x1] %vm7378_vm5, %v32677_v47 }
 0x241   : > { %26594 = vmatprep.subr.bf16.mxu0 %v26593_v2  ;;  %7380 = vst.msk [vmem:[#allocation3 + $0x28] sm:$0x1] %vm7378_vm5, %v32677_v47  ;;  %7381 = vst.msk [vmem:[#allocation3 + $0x50] sm:$0x1] %vm7378_vm5, %v32677_v47 }
 0x242   : > { %24614 = vmatmul.mubr.msk.f32.gmra.mrb[8].mxu0 %vm889_vm0, %v32647_v13  ;;  %v21371_v13 = vld [vmem:[%s32531_s3 + $0x50] sm:$0xff]  ;;  %7382 = vst.msk [vmem:[#allocation3 + $0x78] sm:$0x1] %vm7378_vm5, %v32677_v47  ;;  %7383 = vst.msk [vmem:[#allocation3 + $0xa0] sm:$0x1] %vm7378_vm5, %v32677_v47 }
 0x243   : > { %24616 = vmatprep.mubr.msk.f32.mxu0 %vm889_vm0, %v32648_v17  ;;  %26596 = vmatpush3.bf16.msra.mxu0 %v26593_v2  ;;  %v21372_v17 = vld [vmem:[%s32531_s3 + $0x58] sm:$0xff]  ;;  %7384 = vst.msk [vmem:[#allocation3 + $0xc8] sm:$0x1] %vm7378_vm5, %v32677_v47  ;;  %7385 = vst.msk [vmem:[#allocation3 + $0xf0] sm:$0x1] %vm7378_vm5, %v32677_v47 }
 0x244   : > { %7386 = vst.msk [vmem:[#allocation3 + $0x118] sm:$0x1] %vm7378_vm5, %v32677_v47  ;;  %7387 = vst.msk [vmem:[#allocation3 + $0x140] sm:$0x1] %vm7378_vm5, %v32677_v47 }
 0x245   : > { %7388 = vst.msk [vmem:[#allocation3 + $0x168] sm:$0x1] %vm7378_vm5, %v32677_v47  ;;  %7389 = vst.msk [vmem:[#allocation3 + $0x190] sm:$0x1] %vm7378_vm5, %v32677_v47 }
 0x246   : > { %24617 = vmatmul.mubr.msk.f32.gmra.mrb[10].mxu0 %vm889_vm0, %v32649_v34  ;;  %v26597_v34 = vpack.c.bf16 %v21372_v17, %v21371_v13  ;;  %7390 = vst.msk [vmem:[#allocation3 + $0x1b8] sm:$0x1] %vm7378_vm5, %v32677_v47  ;;  %7391 = vst.msk [vmem:[#allocation3 + $0x1e0] sm:$0x1] %vm7378_vm5, %v32677_v47 }
 0x247   : > { %24619 = vmatprep.mubr.msk.f32.mxu0 %vm889_vm0, %v32650_v28  ;;  %v21373_v28 = vld [vmem:[%s32531_s3 + $0x60] sm:$0xff]  ;;  %7392 = vst.msk [vmem:[#allocation3 + $0x208] sm:$0x1] %vm7378_vm5, %v32677_v47  ;;  %7394 = vst.msk [vmem:[#allocation3 + $0x258] sm:$0x1] %vm7378_vm5, %v32677_v47 }
 0x248   : > { %26598 = vmatprep.subr.bf16.mxu0 %v26597_v34  ;;  %7395 = vst.msk [vmem:[#allocation3 + $0x280] sm:$0x1] %vm7378_vm5, %v32677_v47  ;;  %7396 = vst.msk [vmem:[#allocation3 + $0x2a8] sm:$0x1] %vm7378_vm5, %v32677_v47 }
 0x249   : > { %26600 = vmatpush3.bf16.msra.mxu0 %v26597_v34  ;;  %7397 = vst.msk [vmem:[#allocation3 + $0x2d0] sm:$0x1] %vm7378_vm5, %v32677_v47  ;;  %7398 = vst.msk [vmem:[#allocation3 + $0x2f8] sm:$0x1] %vm7378_vm5, %v32677_v47 }
 0x24a   : > { %24620 = vmatmul.mubr.msk.f32.gmra.mrb[12].mxu0 %vm889_vm0, %v32651_v31  ;;  %v21374_v31 = vld [vmem:[%s32531_s3 + $0x68] sm:$0xff]  ;;  %7399 = vst.msk [vmem:[#allocation3 + $0x320] sm:$0x1] %vm7378_vm5, %v32677_v47  ;;  %7400 = vst.msk [vmem:[#allocation3 + $0x348] sm:$0x1] %vm7378_vm5, %v32677_v47 }
 0x24b   : > { %24622 = vmatprep.mubr.msk.f32.mxu0 %vm889_vm0, %v32652_v33  ;;  %v26601_v33 = vpack.c.bf16 %v21374_v31, %v21373_v28  ;;  %v32680_v28 = vld [vmem:[#allocation5_spill] sm:$0xff]  ;;  %7401 = vst.msk [vmem:[#allocation3 + $0x370] sm:$0x1] %vm7378_vm5, %v32677_v47  ;;  %7402 = vst.msk [vmem:[#allocation3 + $0x398] sm:$0x1] %vm7378_vm5, %v32677_v47 }
 0x24c   : > { %7403 = vst.msk [vmem:[#allocation3 + $0x3c0] sm:$0x1] %vm7378_vm5, %v32677_v47  ;;  %7404 = vst.msk [vmem:[#allocation3 + $0x3e8] sm:$0x1] %vm7378_vm5, %v32677_v47 }
 0x24d   : > { %26602 = vmatprep.subr.bf16.mxu0 %v26601_v33  ;;  %7405 = vst.msk [vmem:[#allocation3 + $0x410] sm:$0x1] %vm7378_vm5, %v32677_v47  ;;  %7406 = vst.msk [vmem:[#allocation3 + $0x438] sm:$0x1] %vm7378_vm5, %v32677_v47 }
 0x24e   : > { %24623 = vmatmul.mubr.msk.f32.gmra.mrb[14].mxu0 %vm889_vm0, %v32653_v35  ;;  %v21375_v35 = vld [vmem:[%s32531_s3 + $0x70] sm:$0xff]  ;;  %7407 = vst.msk [vmem:[#allocation3 + $0x460] sm:$0x1] %vm7378_vm5, %v32677_v47  ;;  %7408 = vst.msk [vmem:[#allocation3 + $0x488] sm:$0x1] %vm7378_vm5, %v32677_v47 }
 0x24f   : > { %24625 = vmatprep.mubr.msk.f32.mxu0 %vm889_vm0, %v32654_v37  ;;  %26604 = vmatpush3.bf16.msra.mxu0 %v26601_v33  ;;  %v21376_v37 = vld [vmem:[%s32531_s3 + $0x78] sm:$0xff]  ;;  %7409 = vst.msk [vmem:[#allocation3 + $0x4b0] sm:$0x1] %vm7378_vm5, %v32677_v47  ;;  %7410 = vst.msk [vmem:[#allocation3 + $0x4d8] sm:$0x1] %vm7378_vm5, %v32677_v47 }
 0x250   : > { %7411 = vst.msk [vmem:[#allocation3 + $0x500] sm:$0x1] %vm7378_vm5, %v32677_v47  ;;  %7412 = vst.msk [vmem:[#allocation3 + $0x528] sm:$0x1] %vm7378_vm5, %v32677_v47 }
 0x251   : > { %7413 = vst.msk [vmem:[#allocation3 + $0x21] sm:$0x1] %vm7378_vm5, %v32677_v47  ;;  %7414 = vst.msk [vmem:[#allocation3 + $0x49] sm:$0x1] %vm7378_vm5, %v32677_v47 }
 0x252   : > { %24626 = vmatmul.mubr.msk.f32.gmra.mrb[16].mxu0 %vm889_vm0, %v32655_v45  ;;  %v26605_v45 = vpack.c.bf16 %v21376_v37, %v21375_v35  ;;  %7415 = vst.msk [vmem:[#allocation3 + $0x71] sm:$0x1] %vm7378_vm5, %v32677_v47  ;;  %7416 = vst.msk [vmem:[#allocation3 + $0x99] sm:$0x1] %vm7378_vm5, %v32677_v47 }
 0x253   : > { %24628 = vmatprep.mubr.msk.f32.mxu0 %vm889_vm0, %v32656_v46  ;;  %v8864_v46 = vld [vmem:[#allocation3 + $0x1] sm:$0xff]  ;;  %7417 = vst.msk [vmem:[#allocation3 + $0xc1] sm:$0x1] %vm7378_vm5, %v32677_v47  ;;  %7418 = vst.msk [vmem:[#allocation3 + $0xe9] sm:$0x1] %vm7378_vm5, %v32677_v47 }
 0x254   : > { %26606 = vmatprep.subr.bf16.mxu0 %v26605_v45  ;;  %7419 = vst.msk [vmem:[#allocation3 + $0x111] sm:$0x1] %vm7378_vm5, %v32677_v47  ;;  %7420 = vst.msk [vmem:[#allocation3 + $0x139] sm:$0x1] %vm7378_vm5, %v32677_v47 }
 0x255   : > { %26608 = vmatpush3.bf16.msra.mxu0 %v26605_v45  ;;  %7421 = vst.msk [vmem:[#allocation3 + $0x161] sm:$0x1] %vm7378_vm5, %v32677_v47  ;;  %7422 = vst.msk [vmem:[#allocation3 + $0x189] sm:$0x1] %vm7378_vm5, %v32677_v47 }
 0x256   : > { %24629 = vmatmul.mubr.msk.f32.gmra.mrb[18].mxu0 %vm889_vm0, %v32657_v23  ;;  %v8865_v23 = vld [vmem:[#allocation3 + $0x9] sm:$0xff]  ;;  %7423 = vst.msk [vmem:[#allocation3 + $0x1b1] sm:$0x1] %vm7378_vm5, %v32677_v47  ;;  %7424 = vst.msk [vmem:[#allocation3 + $0x1d9] sm:$0x1] %vm7378_vm5, %v32677_v47 }
 0x257   : > { %24631 = vmatprep.mubr.msk.f32.mxu0 %vm889_vm0, %v32658_v48  ;;  %v8866_v48 = vld [vmem:[#allocation3 + $0x11] sm:$0xff]  ;;  %7425 = vst.msk [vmem:[#allocation3 + $0x201] sm:$0x1] %vm7378_vm5, %v32677_v47  ;;  %7426 = vst.msk [vmem:[#allocation3 + $0x229] sm:$0x1] %vm7378_vm5, %v32677_v47 }
 0x258   : > { %7427 = vst.msk [vmem:[#allocation3 + $0x251] sm:$0x1] %vm7378_vm5, %v32677_v47  ;;  %7428 = vst.msk [vmem:[#allocation3 + $0x279] sm:$0x1] %vm7378_vm5, %v32677_v47 }
 0x259   : > { %7429 = vst.msk [vmem:[#allocation3 + $0x2a1] sm:$0x1] %vm7378_vm5, %v32677_v47  ;;  %7430 = vst.msk [vmem:[#allocation3 + $0x2c9] sm:$0x1] %vm7378_vm5, %v32677_v47 }
 0x25a   : > { %24632 = vmatmul.mubr.msk.f32.gmra.mrb[20].mxu0 %vm889_vm0, %v32659_v58  ;;  %v8867_v58 = vld [vmem:[#allocation3 + $0x19] sm:$0xff]  ;;  %7431 = vst.msk [vmem:[#allocation3 + $0x2f1] sm:$0x1] %vm7378_vm5, %v32677_v47  ;;  %7432 = vst.msk [vmem:[#allocation3 + $0x319] sm:$0x1] %vm7378_vm5, %v32677_v47 }
 0x25b   : > { %24634 = vmatprep.mubr.msk.f32.mxu0 %vm889_vm0, %v32660_v36  ;;  %v29442_v36 = vld [vmem:[%s32530_s2] ss:$0 sm:$0xff]  ;;  %7433 = vst.msk [vmem:[#allocation3 + $0x341] sm:$0x1] %vm7378_vm5, %v32677_v47  ;;  %7434 = vst.msk [vmem:[#allocation3 + $0x369] sm:$0x1] %vm7378_vm5, %v32677_v47 }
 0x25c   : > { %7435 = vst.msk [vmem:[#allocation3 + $0x391] sm:$0x1] %vm7378_vm5, %v32677_v47  ;;  %7436 = vst.msk [vmem:[#allocation3 + $0x3b9] sm:$0x1] %vm7378_vm5, %v32677_v47 }
 0x25d   : > { %7437 = vst.msk [vmem:[#allocation3 + $0x3e1] sm:$0x1] %vm7378_vm5, %v32677_v47  ;;  %7438 = vst.msk [vmem:[#allocation3 + $0x409] sm:$0x1] %vm7378_vm5, %v32677_v47 }
 0x25e   : > { %24635 = vmatmul.mubr.msk.f32.gmra.mrb[22].mxu0 %vm889_vm0, %v32661_v53  ;;  %7439 = vst.msk [vmem:[#allocation3 + $0x431] sm:$0x1] %vm7378_vm5, %v32677_v47  ;;  %7440 = vst.msk [vmem:[#allocation3 + $0x459] sm:$0x1] %vm7378_vm5, %v32677_v47 }
 0x25f   : > { %24637 = vmatprep.mubr.msk.f32.mxu0 %vm889_vm0, %v32671_v39  ;;  %7441 = vst.msk [vmem:[#allocation3 + $0x481] sm:$0x1] %vm7378_vm5, %v32677_v47  ;;  %7442 = vst.msk [vmem:[#allocation3 + $0x4a9] sm:$0x1] %vm7378_vm5, %v32677_v47 }
 0x260   : > { %7443 = vst.msk [vmem:[#allocation3 + $0x4d1] sm:$0x1] %vm7378_vm5, %v32677_v47  ;;  %7444 = vst.msk [vmem:[#allocation3 + $0x4f9] sm:$0x1] %vm7378_vm5, %v32677_v47 }
 0x261   : > { %7445 = vst.msk [vmem:[#allocation3 + $0x521] sm:$0x1] %vm7378_vm5, %v32677_v47  ;;  %7446 = vst.msk [vmem:[#allocation3 + $0x549] sm:$0x1] %vm7378_vm5, %v32677_v47 }
 0x262   : > { %24638 = vmatmul.mubr.msk.f32.gmra.mrb[24].mxu0 %vm889_vm0, %v32672_v38 }
 0x263   : > { %24640 = vmatprep.mubr.msk.f32.mxu0 %vm889_vm0, %v32673_v52 }
 0x266   : > { %24641 = vmatmul.mubr.msk.f32.gmra.mrb[26].mxu0 %vm889_vm0, %v32674_v63 }
 0x267   : > { %24643 = vmatprep.mubr.msk.f32.mxu0 %vm889_vm0, %v32675_v10 }
 0x26a   : > { %24644 = vmatmul.mubr.msk.f32.gmra.mrb[28].mxu0 %vm889_vm0, %v32676_v20 }
 0x26b   : > { %24646 = vmatprep.mubr.msk.f32.mxu0 %vm889_vm0, %v4342_v6 }
 0x26e   : > { %24647 = vmatmul.mubr.msk.f32.gmra.mrb[30].mxu0 %vm889_vm0, %v4343_v26 }
 0x26f   : > { %24665 = vmatprep.mubr.msk.f32.mxu0 %vm7365_vm3, %v8864_v46 }
 0x272   : > { %24666 = vmatmul.mubr.msk.f32.vlgmr.msra.gmra.mrb[32].mxu0 %vm7365_vm3, %v8865_v23 }
 0x273   : > { %24668 = vmatprep.mubr.msk.f32.mxu0 %vm7365_vm3, %v8866_v48 }
 0x276   : > { %24669 = vmatmul.mubr.msk.f32.gmra.mrb[34].mxu0 %vm7365_vm3, %v8867_v58 }
 0x305   : > { %v24603_v53 = vpop.f32.mrb[0].mxu0 }
 0x306   : > { %v4710_v24 = vadd.f32 %v24603_v53, %v29442_v36  ;;  %v4511_v44 = vpop.f32.mrb[1].mxu0 }
 0x307   : > { %v4709_v49 = vadd.f32 %v29442_v36, %v4511_v44 }
 0x308   : > { %v4822_v57 = vcombine.high %v4710_v24, %v4710_v24  ;;  %v4829_v27 = vrot.slane %v4710_v24, %v32678_v41 }
 0x309   : > { %v4773_v59 = vcombine.high %v4709_v49, %v4709_v49  ;;  %v4780_v60 = vrot.slane %v4709_v49, %v32678_v41  ;;  %v24606_v61 = vpop.f32.mrb[2].mxu0 }
 0x30a   : > { %v4836_v55 = vrot.slane %v4822_v57, %v32678_v41  ;;  %v4837_v42 = vcombine.high %v4829_v27, %v4829_v27  ;;  %v4845_v0 = vrot.slane %v4829_v27, %v32678_v41  ;;  %v29451_v1 = vadd.f32 %v24606_v61, %v29442_v36  ;;  %v4521_v5 = vpop.f32.mrb[3].mxu0 }
 0x30b   : > { %v4787_v7 = vrot.slane %v4773_v59, %v32678_v41  ;;  %v4788_v8 = vcombine.high %v4780_v60, %v4780_v60  ;;  %v4796_v9 = vrot.slane %v4780_v60, %v32678_v41  ;;  %v29456_v11 = vadd.f32 %v29442_v36, %v4521_v5 }
 0x30c   : > { %v4838_v12 = vcombine.high %v4836_v55, %v4836_v55  ;;  %v4852_v14 = vrot.slane %v4836_v55, %v32678_v41  ;;  %v4859_v15 = vrot.slane %v4837_v42, %v32678_v41  ;;  %v4867_v16 = vcombine.high %v4845_v0, %v4845_v0 }
 0x30d   : > { %v6376_v21 = vrot.slane %v4845_v0, %v32679_v19  ;;  %v4789_v22 = vcombine.high %v4787_v7, %v4787_v7  ;;  %v4803_v25 = vrot.slane %v4787_v7, %v32678_v41  ;;  %v4810_v29 = vrot.slane %v4788_v8, %v32678_v41  ;;  %v29463_v32 = vpop.f32.mrb[4].mxu0 }
 0x30e   : > { %v4866_v40 = vrot.slane %v4838_v12, %v32678_v41  ;;  %v4868_v43 = vcombine.high %v4852_v14, %v4852_v14  ;;  %v4869_v56 = vcombine.high %v4859_v15, %v4859_v15  ;;  %v6380_v30 = vrot.slane %v4859_v15, %v32679_v19  ;;  %v29467_v50 = vpop.f32.mrb[5].mxu0 }
 0x30f   : > { %v6384_v3 = vrot.slane %v4867_v16, %v32679_v19  ;;  %v6392_v51 = vrot.slane %v4852_v14, %v32679_v19  ;;  %v4817_v4 = vrot.slane %v4789_v22, %v32678_v41  ;;  %v4818_v18 = vcombine.high %v4796_v9, %v4796_v9 }
 0x310   : > { %v4870_v39 = vcombine.high %v4866_v40, %v4866_v40  ;;  %v6388_v38 = vrot.slane %v4869_v56, %v32679_v19  ;;  %v6396_v52 = vrot.slane %v4866_v40, %v32679_v19  ;;  %v6400_v63 = vrot.slane %v4868_v43, %v32679_v19 }
 0x311   : > { %v7481_v10 = vcombine.low %v6376_v21, %v6380_v30  ;;  %v4819_v6 = vcombine.high %v4803_v25, %v4803_v25  ;;  %v4820_v20 = vcombine.high %v4810_v29, %v4810_v29  ;;  %v4821_v26 = vcombine.high %v4817_v4, %v4817_v4  ;;  %v29475_v54 = vpop.f32.mrb[6].mxu0 }
 0x312   : > { %v6404_v62 = vrot.slane %v4870_v39, %v32679_v19  ;;  %v7482_v2 = vcombine.low %v6384_v3, %v6388_v38  ;;  %v7498_v13 = vcombine.low %v6392_v51, %v6396_v52  ;;  %v6344_v17 = vrot.slane %v4796_v9, %v32679_v19  ;;  %v29479_v34 = vpop.f32.mrb[7].mxu0 }
 0x313   : > { %v7489_v31 = vrot.slane %v7481_v10, %v32680_v28  ;;  %v6348_v33 = vrot.slane %v4810_v29, %v32679_v19  ;;  %v6352_v35 = vrot.slane %v4818_v18, %v32679_v19  ;;  %v6356_v37 = vrot.slane %v4820_v20, %v32679_v19 }
 0x314   : > { %v7496_v45 = vrot.slane %v7482_v2, %v32680_v28  ;;  %v7499_v46 = vcombine.low %v6400_v63, %v6404_v62  ;;  %v7506_v23 = vrot.slane %v7498_v13, %v32680_v28  ;;  %v6360_v48 = vrot.slane %v4803_v25, %v32679_v19 }
 0x315   : > { %v6364_v58 = vrot.slane %v4817_v4, %v32679_v19  ;;  %v6368_v53 = vrot.slane %v4819_v6, %v32679_v19  ;;  %v6372_v24 = vrot.slane %v4821_v26, %v32679_v19  ;;  %v7447_v44 = vcombine.low %v6344_v17, %v6348_v33  ;;  %v29491_v49 = vpop.f32.mrb[8].mxu0 }
 0x316   : > { %v7497_v57 = vcombine.low %v7489_v31, %v7496_v45  ;;  %v7513_v27 = vrot.slane %v7499_v46, %v32680_v28  ;;  %v7448_v59 = vcombine.low %v6352_v35, %v6356_v37  ;;  %v4920_v60 = vcombine.high %v29451_v1, %v29451_v1  ;;  %v29496_v61 = vpop.f32.mrb[9].mxu0 }
 0x317   : > { %v7455_v55 = vrot.slane %v7447_v44, %v32680_v28  ;;  %v7464_v42 = vcombine.low %v6360_v48, %v6364_v58  ;;  %v7465_v0 = vcombine.low %v6368_v53, %v6372_v24  ;;  %v4927_v5 = vrot.slane %v29451_v1, %v32678_v41 }
 0x318   : > { %v7514_v7 = vcombine.low %v7506_v23, %v7513_v27  ;;  %8602 = vst.msk [vmem:[#allocation3 + $0x39] sm:$0xff] %vm7365_vm3, %v7497_v57  ;;  %8606 = vst.msk [vmem:[#allocation3 + $0x61] sm:$0xff] %vm7365_vm3, %v7497_v57  ;;  %v7462_v8 = vrot.slane %v7448_v59, %v32680_v28  ;;  %v4934_v9 = vrot.slane %v4920_v60, %v32678_v41 }
 0x319   : > { %v4871_v12 = vcombine.high %v29456_v11, %v29456_v11  ;;  %v7472_v14 = vrot.slane %v7464_v42, %v32680_v28  ;;  %v7479_v15 = vrot.slane %v7465_v0, %v32680_v28  ;;  %v4935_v16 = vcombine.high %v4927_v5, %v4927_v5  ;;  %v29510_v1 = vpop.f32.mrb[10].mxu0 }
 0x31a   : > { %v4943_v21 = vrot.slane %v4927_v5, %v32678_v41  ;;  %8603 = vst.msk [vmem:[#allocation3 + $0x41] sm:$0xff] %vm7365_vm3, %v7514_v7  ;;  %8607 = vst.msk [vmem:[#allocation3 + $0x69] sm:$0xff] %vm7365_vm3, %v7514_v7  ;;  %v7463_v22 = vcombine.low %v7455_v55, %v7462_v8  ;;  %v4936_v25 = vcombine.high %v4934_v9, %v4934_v9  ;;  %v29517_v43 = vpop.f32.mrb[11].mxu0 }
 0x31b   : > { %v4950_v29 = vrot.slane %v4934_v9, %v32678_v41  ;;  %v4878_v40 = vrot.slane %v29456_v11, %v32678_v41  ;;  %v7480_v56 = vcombine.low %v7472_v14, %v7479_v15  ;;  %v4957_v30 = vrot.slane %v4935_v16, %v32678_v41 }
 0x31c   : > { %v4965_v3 = vcombine.high %v4943_v21, %v4943_v21  ;;  %v6440_v51 = vrot.slane %v4943_v21, %v32679_v19  ;;  %8600 = vst.msk [vmem:[#allocation3 + $0x29] sm:$0xff] %vm7365_vm3, %v7463_v22  ;;  %8604 = vst.msk [vmem:[#allocation3 + $0x51] sm:$0xff] %vm7365_vm3, %v7463_v22  ;;  %v4964_v4 = vrot.slane %v4936_v25, %v32678_v41 }
 0x31d   : > { %v4966_v18 = vcombine.high %v4950_v29, %v4950_v29  ;;  %v6456_v39 = vrot.slane %v4950_v29, %v32679_v19  ;;  %v4885_v38 = vrot.slane %v4871_v12, %v32678_v41  ;;  %8601 = vst.msk [vmem:[#allocation3 + $0x31] sm:$0xff] %vm7365_vm3, %v7480_v56  ;;  %8605 = vst.msk [vmem:[#allocation3 + $0x59] sm:$0xff] %vm7365_vm3, %v7480_v56  ;;  %v29530_v6 = vpop.f32.mrb[12].mxu0 }
 0x31e   : > { %v4967_v11 = vcombine.high %v4957_v30, %v4957_v30  ;;  %v6444_v52 = vrot.slane %v4957_v30, %v32679_v19  ;;  %v6448_v63 = vrot.slane %v4965_v3, %v32679_v19  ;;  %v4886_v10 = vcombine.high %v4878_v40, %v4878_v40  ;;  %v29534_v13 = vpop.f32.mrb[13].mxu0 }
 0x31f   : > { %v4968_v20 = vcombine.high %v4964_v4, %v4964_v4  ;;  %v6460_v26 = vrot.slane %v4964_v4, %v32679_v19  ;;  %v6464_v62 = vrot.slane %v4966_v18, %v32679_v19  ;;  %v4887_v2 = vcombine.high %v4885_v38, %v4885_v38 }
 0x320   : > { %v6452_v17 = vrot.slane %v4967_v11, %v32679_v19  ;;  %v7549_v31 = vcombine.low %v6440_v51, %v6444_v52  ;;  %v4894_v33 = vrot.slane %v4878_v40, %v32678_v41  ;;  %v4901_v35 = vrot.slane %v4885_v38, %v32678_v41  ;;  %v8870_v40 = vld [vmem:[#allocation3 + $0x39] sm:$0xff] }
 0x321   : > { %v6468_v37 = vrot.slane %v4968_v20, %v32679_v19  ;;  %v7566_v45 = vcombine.low %v6456_v39, %v6460_v26  ;;  %v4908_v46 = vrot.slane %v4886_v10, %v32678_v41  ;;  %v4915_v23 = vrot.slane %v4887_v2, %v32678_v41  ;;  %v29543_v44 = vpop.f32.mrb[14].mxu0  ;;  %v8871_v26 = vld [vmem:[#allocation3 + $0x41] sm:$0xff] }
 0x322   : > { %v7550_v48 = vcombine.low %v6448_v63, %v6452_v17  ;;  %v7557_v58 = vrot.slane %v7549_v31, %v32680_v28  ;;  %v4916_v53 = vcombine.high %v4894_v33, %v4894_v33  ;;  %v4917_v24 = vcombine.high %v4901_v35, %v4901_v35  ;;  %v29546_v55 = vpop.f32.mrb[15].mxu0 }
 0x323   : > { %v7567_v57 = vcombine.low %v6464_v62, %v6468_v37  ;;  %v7574_v27 = vrot.slane %v7566_v45, %v32680_v28  ;;  %v4918_v59 = vcombine.high %v4908_v46, %v4908_v46  ;;  %v4919_v60 = vcombine.high %v4915_v23, %v4915_v23  ;;  %v8868_v8 = vld [vmem:[#allocation3 + $0x29] sm:$0xff]  ;;  %v8872_v17 = vld [vmem:[#allocation3 + $0x51] sm:$0xff] }
 0x324   : > { %v7564_v42 = vrot.slane %v7550_v48, %v32680_v28  ;;  %v6408_v0 = vrot.slane %v4894_v33, %v32679_v19  ;;  %v6412_v5 = vrot.slane %v4908_v46, %v32679_v19  ;;  %v6416_v7 = vrot.slane %v4916_v53, %v32679_v19  ;;  %24671 = vmatprep.mubr.msk.f32.mxu0 %vm7365_vm3, %v8868_v8  ;;  %v8869_v16 = vld [vmem:[#allocation3 + $0x31] sm:$0xff]  ;;  %v8874_v8 = vld [vmem:[#allocation3 + $0x61] sm:$0xff] }
 0x325   : > { %v7581_v9 = vrot.slane %v7567_v57, %v32680_v28  ;;  %v6420_v12 = vrot.slane %v4918_v59, %v32679_v19  ;;  %v6424_v14 = vrot.slane %v4901_v35, %v32679_v19  ;;  %v6428_v15 = vrot.slane %v4915_v23, %v32679_v19  ;;  %24672 = vmatmul.mubr.msk.f32.gmra.mrb[36].mxu0 %vm7365_vm3, %v8869_v16  ;;  %v29560_v56 = vpop.f32.mrb[16].mxu0 }
 0x326   : > { %v7565_v21 = vcombine.low %v7557_v58, %v7564_v42  ;;  %v6432_v22 = vrot.slane %v4917_v24, %v32679_v19  ;;  %v6436_v25 = vrot.slane %v4919_v60, %v32679_v19  ;;  %v7515_v29 = vcombine.low %v6408_v0, %v6412_v5  ;;  %24674 = vmatprep.mubr.msk.f32.mxu0 %vm7365_vm3, %v8870_v40  ;;  %v29565_v18 = vpop.f32.mrb[17].mxu0  ;;  %v8873_v60 = vld [vmem:[#allocation3 + $0x59] sm:$0xff] }
 0x327   : > { %v7582_v30 = vcombine.low %v7574_v27, %v7581_v9  ;;  %v7516_v3 = vcombine.low %v6416_v7, %v6420_v12  ;;  %v7532_v51 = vcombine.low %v6424_v14, %v6428_v15  ;;  %v4714_v4 = vadd.f32 %v29463_v32, %v29442_v36 }
 0x328   : > { %8610 = vst.msk [vmem:[#allocation3 + $0x89] sm:$0xff] %vm7365_vm3, %v7565_v21  ;;  %8614 = vst.msk [vmem:[#allocation3 + $0xb1] sm:$0xff] %vm7365_vm3, %v7565_v21  ;;  %v7523_v39 = vrot.slane %v7515_v29, %v32680_v28  ;;  %v7533_v38 = vcombine.low %v6432_v22, %v6436_v25  ;;  %v4713_v11 = vadd.f32 %v29442_v36, %v29467_v50 }
 0x329   : > { %v29574_v52 = vadd.f32 %v29475_v54, %v29442_v36  ;;  %8611 = vst.msk [vmem:[#allocation3 + $0x91] sm:$0xff] %vm7365_vm3, %v7582_v30  ;;  %8615 = vst.msk [vmem:[#allocation3 + $0xb9] sm:$0xff] %vm7365_vm3, %v7582_v30  ;;  %v7530_v32 = vrot.slane %v7516_v3, %v32680_v28  ;;  %v7540_v63 = vrot.slane %v7532_v51, %v32680_v28  ;;  %24675 = vmatmul.mubr.msk.f32.gmra.mrb[38].mxu0 %vm7365_vm3, %v8871_v26  ;;  %v29586_v31 = vpop.f32.mrb[18].mxu0 }
 0x32a   : > { %v5018_v10 = vcombine.high %v4714_v4, %v4714_v4  ;;  %v5025_v20 = vrot.slane %v4714_v4, %v32678_v41  ;;  %v7547_v62 = vrot.slane %v7533_v38, %v32680_v28  ;;  %v4969_v2 = vcombine.high %v4713_v11, %v4713_v11  ;;  %24677 = vmatprep.mubr.msk.f32.mxu0 %vm7365_vm3, %v8872_v17  ;;  %v29591_v46 = vpop.f32.mrb[19].mxu0 }
 0x32b   : > { %v4976_v50 = vrot.slane %v4713_v11, %v32678_v41  ;;  %v5116_v54 = vcombine.high %v29574_v52, %v29574_v52  ;;  %v7531_v33 = vcombine.low %v7523_v39, %v7530_v32  ;;  %v8875_v39 = vld [vmem:[#allocation3 + $0x69] sm:$0xff] }
 0x32c   : > { %v5032_v35 = vrot.slane %v5018_v10, %v32678_v41  ;;  %v5033_v37 = vcombine.high %v5025_v20, %v5025_v20  ;;  %v5041_v45 = vrot.slane %v5025_v20, %v32678_v41  ;;  %v7548_v23 = vcombine.low %v7540_v63, %v7547_v62 }
 0x32d   : > { %v4983_v48 = vrot.slane %v4969_v2, %v32678_v41  ;;  %v4984_v58 = vcombine.high %v4976_v50, %v4976_v50  ;;  %v4992_v53 = vrot.slane %v4976_v50, %v32678_v41  ;;  %8608 = vst.msk [vmem:[#allocation3 + $0x79] sm:$0xff] %vm7365_vm3, %v7531_v33  ;;  %8612 = vst.msk [vmem:[#allocation3 + $0xa1] sm:$0xff] %vm7365_vm3, %v7531_v33  ;;  %24678 = vmatmul.mubr.msk.f32.gmra.mrb[40].mxu0 %vm7365_vm3, %v8873_v60  ;;  %v29605_v9 = vpop.f32.mrb[20].mxu0 }
 0x32e   : > { %v5034_v24 = vcombine.high %v5032_v35, %v5032_v35  ;;  %v5048_v57 = vrot.slane %v5032_v35, %v32678_v41  ;;  %v5055_v27 = vrot.slane %v5033_v37, %v32678_v41  ;;  %v5063_v59 = vcombine.high %v5041_v45, %v5041_v45  ;;  %8609 = vst.msk [vmem:[#allocation3 + $0x81] sm:$0xff] %vm7365_vm3, %v7548_v23  ;;  %v29610_v21 = vpop.f32.mrb[21].mxu0 }
 0x32f   : > { %8613 = vst.msk [vmem:[#allocation3 + $0xa9] sm:$0xff] %vm7365_vm3, %v7548_v23  ;;  %v6504_v42 = vrot.slane %v5041_v45, %v32679_v19  ;;  %v4985_v0 = vcombine.high %v4983_v48, %v4983_v48  ;;  %v4999_v5 = vrot.slane %v4983_v48, %v32678_v41  ;;  %v5006_v7 = vrot.slane %v4984_v58, %v32678_v41 }
 0x330   : > { %v5062_v12 = vrot.slane %v5034_v24, %v32678_v41  ;;  %v5064_v14 = vcombine.high %v5048_v57, %v5048_v57  ;;  %v5065_v15 = vcombine.high %v5055_v27, %v5055_v27  ;;  %v6508_v16 = vrot.slane %v5055_v27, %v32679_v19  ;;  %24680 = vmatprep.mubr.msk.f32.mxu0 %vm7365_vm3, %v8874_v8 }
 0x331   : > { %v6512_v22 = vrot.slane %v5063_v59, %v32679_v19  ;;  %v6520_v25 = vrot.slane %v5048_v57, %v32679_v19  ;;  %v5013_v29 = vrot.slane %v4985_v0, %v32678_v41  ;;  %v5014_v40 = vcombine.high %v4992_v53, %v4992_v53  ;;  %24681 = vmatmul.mubr.msk.f32.gmra.mrb[42].mxu0 %vm7365_vm3, %v8875_v39  ;;  %v29625_v37 = vpop.f32.mrb[22].mxu0 }
 0x332   : > { %v5066_v30 = vcombine.high %v5062_v12, %v5062_v12  ;;  %v6516_v3 = vrot.slane %v5065_v15, %v32679_v19  ;;  %v6524_v51 = vrot.slane %v5062_v12, %v32679_v19  ;;  %v6528_v4 = vrot.slane %v5064_v14, %v32679_v19  ;;  %v29634_v60 = vpop.f32.mrb[23].mxu0 }
 0x333   : > { %v7617_v38 = vcombine.low %v6504_v42, %v6508_v16  ;;  %v5015_v11 = vcombine.high %v4999_v5, %v4999_v5  ;;  %v5016_v32 = vcombine.high %v5006_v7, %v5006_v7  ;;  %v5017_v63 = vcombine.high %v5013_v29, %v5013_v29  ;;  %v8878_v42 = vld [vmem:[#allocation3 + $0x89] sm:$0xff] }
 0x334   : > { %v6532_v10 = vrot.slane %v5066_v30, %v32679_v19  ;;  %v7618_v20 = vcombine.low %v6512_v22, %v6516_v3  ;;  %v7634_v26 = vcombine.low %v6520_v25, %v6524_v51  ;;  %v6472_v62 = vrot.slane %v4992_v53, %v32679_v19  ;;  %v8876_v35 = vld [vmem:[#allocation3 + $0x79] sm:$0xff] }
 0x335   : > { %v7625_v2 = vrot.slane %v7617_v38, %v32680_v28  ;;  %v6476_v50 = vrot.slane %v5006_v7, %v32679_v19  ;;  %v6480_v17 = vrot.slane %v5014_v40, %v32679_v19  ;;  %v6484_v33 = vrot.slane %v5016_v32, %v32679_v19  ;;  %24683 = vmatprep.mubr.msk.f32.mxu0 %vm7365_vm3, %v8876_v35  ;;  %v8877_v53 = vld [vmem:[#allocation3 + $0x81] sm:$0xff] }
 0x336   : > { %v7632_v45 = vrot.slane %v7618_v20, %v32680_v28  ;;  %v7635_v23 = vcombine.low %v6528_v4, %v6532_v10  ;;  %v7642_v48 = vrot.slane %v7634_v26, %v32680_v28  ;;  %v6488_v58 = vrot.slane %v4999_v5, %v32679_v19  ;;  %24684 = vmatmul.mubr.msk.f32.gmra.mrb[44].mxu0 %vm7365_vm3, %v8877_v53  ;;  %v8879_v53 = vld [vmem:[#allocation3 + $0x91] sm:$0xff] }
 0x337   : > { %v6492_v24 = vrot.slane %v5013_v29, %v32679_v19  ;;  %v6496_v57 = vrot.slane %v5015_v11, %v32679_v19  ;;  %v6500_v27 = vrot.slane %v5017_v63, %v32679_v19  ;;  %v7583_v59 = vcombine.low %v6472_v62, %v6476_v50  ;;  %24686 = vmatprep.mubr.msk.f32.mxu0 %vm7365_vm3, %v8878_v42 }
 0x338   : > { %v7633_v0 = vcombine.low %v7625_v2, %v7632_v45  ;;  %v7649_v7 = vrot.slane %v7635_v23, %v32680_v28  ;;  %v7584_v8 = vcombine.low %v6480_v17, %v6484_v33  ;;  %v5123_v5 = vrot.slane %v29574_v52, %v32678_v41 }
 0x339   : > { %v7591_v12 = vrot.slane %v7583_v59, %v32680_v28  ;;  %v7600_v14 = vcombine.low %v6488_v58, %v6492_v24  ;;  %v7601_v15 = vcombine.low %v6496_v57, %v6500_v27  ;;  %v5130_v16 = vrot.slane %v5116_v54, %v32678_v41  ;;  %v8880_v59 = vld [vmem:[#allocation3 + $0xa1] sm:$0xff] }
 0x33a   : > { %v7650_v22 = vcombine.low %v7642_v48, %v7649_v7  ;;  %8618 = vst.msk [vmem:[#allocation3 + $0xd9] sm:$0xff] %vm7365_vm3, %v7633_v0  ;;  %8622 = vst.msk [vmem:[#allocation3 + $0x101] sm:$0xff] %vm7365_vm3, %v7633_v0  ;;  %v7598_v25 = vrot.slane %v7584_v8, %v32680_v28  ;;  %v5131_v29 = vcombine.high %v5123_v5, %v5123_v5  ;;  %24687 = vmatmul.mubr.msk.f32.gmra.mrb[46].mxu0 %vm7365_vm3, %v8879_v53  ;;  %v8881_v53 = vld [vmem:[#allocation3 + $0xa9] sm:$0xff] }
 0x33b   : > { %v5139_v40 = vrot.slane %v5123_v5, %v32678_v41  ;;  %v7608_v30 = vrot.slane %v7600_v14, %v32680_v28  ;;  %v7615_v3 = vrot.slane %v7601_v15, %v32680_v28  ;;  %v5132_v51 = vcombine.high %v5130_v16, %v5130_v16  ;;  %24689 = vmatprep.mubr.msk.f32.mxu0 %vm7365_vm3, %v8880_v59 }
 0x33c   : > { %v5146_v4 = vrot.slane %v5130_v16, %v32678_v41  ;;  %8619 = vst.msk [vmem:[#allocation3 + $0xe1] sm:$0xff] %vm7365_vm3, %v7650_v22  ;;  %8623 = vst.msk [vmem:[#allocation3 + $0x109] sm:$0xff] %vm7365_vm3, %v7650_v22  ;;  %v7599_v52 = vcombine.low %v7591_v12, %v7598_v25  ;;  %v5153_v54 = vrot.slane %v5131_v29, %v32678_v41  ;;  %v29685_v29 = vpop.f32.mrb[24].mxu0 }
 0x33d   : > { %v5161_v39 = vcombine.high %v5139_v40, %v5139_v40  ;;  %v6568_v38 = vrot.slane %v5139_v40, %v32679_v19  ;;  %v7616_v11 = vcombine.low %v7608_v30, %v7615_v3  ;;  %v5160_v32 = vrot.slane %v5132_v51, %v32678_v41 }
 0x33e   : > { %v5162_v63 = vcombine.high %v5146_v4, %v5146_v4  ;;  %v6584_v10 = vrot.slane %v5146_v4, %v32679_v19  ;;  %8616 = vst.msk [vmem:[#allocation3 + $0xc9] sm:$0xff] %vm7365_vm3, %v7599_v52  ;;  %8620 = vst.msk [vmem:[#allocation3 + $0xf1] sm:$0xff] %vm7365_vm3, %v7599_v52  ;;  %v5163_v20 = vcombine.high %v5153_v54, %v5153_v54  ;;  %24690 = vmatmul.mubr.msk.f32.gmra.mrb[48].mxu0 %vm7365_vm3, %v8881_v53 }
 0x33f   : > { %v6572_v26 = vrot.slane %v5153_v54, %v32679_v19  ;;  %v6576_v62 = vrot.slane %v5161_v39, %v32679_v19  ;;  %v4715_v2 = vadd.f32 %v29442_v36, %v29479_v34  ;;  %8617 = vst.msk [vmem:[#allocation3 + $0xd1] sm:$0xff] %vm7365_vm3, %v7616_v11  ;;  %8621 = vst.msk [vmem:[#allocation3 + $0xf9] sm:$0xff] %vm7365_vm3, %v7616_v11 }
 0x340   : > { %v5164_v50 = vcombine.high %v5160_v32, %v5160_v32  ;;  %v6588_v17 = vrot.slane %v5160_v32, %v32679_v19  ;;  %v6592_v33 = vrot.slane %v5162_v63, %v32679_v19  ;;  %v4718_v35 = vadd.f32 %v29491_v49, %v29442_v36 }
 0x341   : > { %v6580_v45 = vrot.slane %v5163_v20, %v32679_v19  ;;  %v7685_v23 = vcombine.low %v6568_v38, %v6572_v26  ;;  %v5067_v48 = vcombine.high %v4715_v2, %v4715_v2  ;;  %v5074_v58 = vrot.slane %v4715_v2, %v32678_v41 }
 0x342   : > { %v6596_v34 = vrot.slane %v5164_v50, %v32679_v19  ;;  %v7702_v24 = vcombine.low %v6584_v10, %v6588_v17  ;;  %v5214_v57 = vcombine.high %v4718_v35, %v4718_v35  ;;  %v5221_v27 = vrot.slane %v4718_v35, %v32678_v41  ;;  %v29693_v10 = vpop.f32.mrb[25].mxu0 }
 0x343   : > { %v7686_v42 = vcombine.low %v6576_v62, %v6580_v45  ;;  %v7693_v0 = vrot.slane %v7685_v23, %v32680_v28  ;;  %v5081_v49 = vrot.slane %v5067_v48, %v32678_v41  ;;  %v5082_v7 = vcombine.high %v5074_v58, %v5074_v58 }
 0x344   : > { %v7703_v8 = vcombine.low %v6592_v33, %v6596_v34  ;;  %v7710_v5 = vrot.slane %v7702_v24, %v32680_v28  ;;  %v5090_v12 = vrot.slane %v5074_v58, %v32678_v41  ;;  %v5228_v14 = vrot.slane %v5214_v57, %v32678_v41 }
 0x345   : > { %v7700_v15 = vrot.slane %v7686_v42, %v32680_v28  ;;  %v5083_v16 = vcombine.high %v5081_v49, %v5081_v49  ;;  %v5097_v22 = vrot.slane %v5081_v49, %v32678_v41  ;;  %v5104_v25 = vrot.slane %v5082_v7, %v32678_v41  ;;  %v8882_v42 = vld [vmem:[#allocation3 + $0xb1] sm:$0xff] }
 0x346   : > { %v7717_v40 = vrot.slane %v7703_v8, %v32680_v28  ;;  %v5112_v30 = vcombine.high %v5090_v12, %v5090_v12  ;;  %v6536_v3 = vrot.slane %v5090_v12, %v32679_v19  ;;  %v5229_v51 = vcombine.high %v5221_v27, %v5221_v27  ;;  %24692 = vmatprep.mubr.msk.f32.mxu0 %vm7365_vm3, %v8882_v42 }
 0x347   : > { %v7701_v4 = vcombine.low %v7693_v0, %v7700_v15  ;;  %v5111_v52 = vrot.slane %v5083_v16, %v32678_v41  ;;  %v5113_v54 = vcombine.high %v5097_v22, %v5097_v22  ;;  %v5114_v39 = vcombine.high %v5104_v25, %v5104_v25 }
 0x348   : > { %v7718_v38 = vcombine.low %v7710_v5, %v7717_v40  ;;  %v6540_v11 = vrot.slane %v5104_v25, %v32679_v19  ;;  %v6544_v32 = vrot.slane %v5112_v30, %v32679_v19  ;;  %v6552_v63 = vrot.slane %v5097_v22, %v32679_v19 }
 0x349   : > { %8626 = vst.msk [vmem:[#allocation3 + $0x129] sm:$0xff] %vm7365_vm3, %v7701_v4  ;;  %8630 = vst.msk [vmem:[#allocation3 + $0x151] sm:$0xff] %vm7365_vm3, %v7701_v4  ;;  %v5115_v20 = vcombine.high %v5111_v52, %v5111_v52  ;;  %v6548_v26 = vrot.slane %v5114_v39, %v32679_v19  ;;  %v6556_v62 = vrot.slane %v5111_v52, %v32679_v19 }
 0x34a   : > { %v6560_v2 = vrot.slane %v5113_v54, %v32679_v19  ;;  %8627 = vst.msk [vmem:[#allocation3 + $0x131] sm:$0xff] %vm7365_vm3, %v7718_v38  ;;  %8631 = vst.msk [vmem:[#allocation3 + $0x159] sm:$0xff] %vm7365_vm3, %v7718_v38  ;;  %v7651_v50 = vcombine.low %v6536_v3, %v6540_v11  ;;  %v5230_v17 = vcombine.high %v5228_v14, %v5228_v14 }
 0x34b   : > { %v5237_v33 = vrot.slane %v5221_v27, %v32678_v41  ;;  %v5244_v35 = vrot.slane %v5228_v14, %v32678_v41  ;;  %v6564_v45 = vrot.slane %v5115_v20, %v32679_v19  ;;  %v7652_v23 = vcombine.low %v6544_v32, %v6548_v26 }
 0x34c   : > { %v7668_v48 = vcombine.low %v6552_v63, %v6556_v62  ;;  %v5251_v58 = vrot.slane %v5229_v51, %v32678_v41  ;;  %v7659_v34 = vrot.slane %v7651_v50, %v32680_v28  ;;  %v5258_v24 = vrot.slane %v5230_v17, %v32678_v41 }
 0x34d   : > { %v5259_v57 = vcombine.high %v5237_v33, %v5237_v33  ;;  %v5260_v59 = vcombine.high %v5244_v35, %v5244_v35  ;;  %v7666_v27 = vrot.slane %v7652_v23, %v32680_v28  ;;  %v7669_v0 = vcombine.low %v6560_v2, %v6564_v45  ;;  %v29743_v23 = vpop.f32.mrb[26].mxu0 }
 0x34e   : > { %v7676_v49 = vrot.slane %v7668_v48, %v32680_v28  ;;  %v5261_v7 = vcombine.high %v5251_v58, %v5251_v58  ;;  %v5262_v8 = vcombine.high %v5258_v24, %v5258_v24  ;;  %v6632_v5 = vrot.slane %v5237_v33, %v32679_v19 }
 0x34f   : > { %v6636_v12 = vrot.slane %v5251_v58, %v32679_v19  ;;  %v6640_v14 = vrot.slane %v5259_v57, %v32679_v19  ;;  %v7667_v15 = vcombine.low %v7659_v34, %v7666_v27  ;;  %v7683_v16 = vrot.slane %v7669_v0, %v32680_v28 }
 0x350   : > { %v6644_v22 = vrot.slane %v5261_v7, %v32679_v19  ;;  %v6648_v25 = vrot.slane %v5244_v35, %v32679_v19  ;;  %v6652_v40 = vrot.slane %v5258_v24, %v32679_v19  ;;  %v6656_v30 = vrot.slane %v5260_v59, %v32679_v19 }
 0x351   : > { %v6660_v3 = vrot.slane %v5262_v8, %v32679_v19  ;;  %v7753_v51 = vcombine.low %v6632_v5, %v6636_v12  ;;  %v7684_v4 = vcombine.low %v7676_v49, %v7683_v16  ;;  %8624 = vst.msk [vmem:[#allocation3 + $0x119] sm:$0xff] %vm7365_vm3, %v7667_v15  ;;  %8628 = vst.msk [vmem:[#allocation3 + $0x141] sm:$0xff] %vm7365_vm3, %v7667_v15  ;;  %v29756_v8 = vpop.f32.mrb[27].mxu0 }
 0x352   : > { %v7754_v52 = vcombine.low %v6640_v14, %v6644_v22  ;;  %v4717_v54 = vadd.f32 %v29442_v36, %v29496_v61  ;;  %v4720_v39 = vadd.f32 %v29510_v1, %v29442_v36  ;;  %v7770_v11 = vcombine.low %v6648_v25, %v6652_v40 }
 0x353   : > { %v7761_v38 = vrot.slane %v7753_v51, %v32680_v28  ;;  %v7771_v32 = vcombine.low %v6656_v30, %v6660_v3  ;;  %v29730_v63 = vadd.f32 %v29442_v36, %v29517_v43  ;;  %8625 = vst.msk [vmem:[#allocation3 + $0x121] sm:$0xff] %vm7365_vm3, %v7684_v4  ;;  %8629 = vst.msk [vmem:[#allocation3 + $0x149] sm:$0xff] %vm7365_vm3, %v7684_v4 }
 0x354   : > { %v7768_v20 = vrot.slane %v7754_v52, %v32680_v28  ;;  %v5165_v26 = vcombine.high %v4717_v54, %v4717_v54  ;;  %v5172_v61 = vrot.slane %v4717_v54, %v32678_v41  ;;  %v5312_v62 = vcombine.high %v4720_v39, %v4720_v39 }
 0x355   : > { %v7778_v1 = vrot.slane %v7770_v11, %v32680_v28  ;;  %v7785_v2 = vrot.slane %v7771_v32, %v32680_v28  ;;  %v5319_v50 = vrot.slane %v4720_v39, %v32678_v41  ;;  %v5263_v43 = vcombine.high %v29730_v63, %v29730_v63 }
 0x356   : > { %v7769_v17 = vcombine.low %v7761_v38, %v7768_v20  ;;  %v5179_v33 = vrot.slane %v5165_v26, %v32678_v41  ;;  %v5180_v35 = vcombine.high %v5172_v61, %v5172_v61  ;;  %v5188_v45 = vrot.slane %v5172_v61, %v32678_v41 }
 0x357   : > { %v7786_v48 = vcombine.low %v7778_v1, %v7785_v2  ;;  %v5326_v58 = vrot.slane %v5312_v62, %v32678_v41  ;;  %v5327_v53 = vcombine.high %v5319_v50, %v5319_v50  ;;  %v5335_v34 = vrot.slane %v5319_v50, %v32678_v41 }
 0x358   : > { %8634 = vst.msk [vmem:[#allocation3 + $0x179] sm:$0xff] %vm7365_vm3, %v7769_v17  ;;  %8638 = vst.msk [vmem:[#allocation3 + $0x1a1] sm:$0xff] %vm7365_vm3, %v7769_v17  ;;  %v5181_v24 = vcombine.high %v5179_v33, %v5179_v33  ;;  %v5195_v57 = vrot.slane %v5179_v33, %v32678_v41  ;;  %v5202_v59 = vrot.slane %v5180_v35, %v32678_v41 }
 0x359   : > { %v5210_v42 = vcombine.high %v5188_v45, %v5188_v45  ;;  %8635 = vst.msk [vmem:[#allocation3 + $0x181] sm:$0xff] %vm7365_vm3, %v7786_v48  ;;  %8639 = vst.msk [vmem:[#allocation3 + $0x1a9] sm:$0xff] %vm7365_vm3, %v7786_v48  ;;  %v6600_v27 = vrot.slane %v5188_v45, %v32679_v19  ;;  %v5328_v0 = vcombine.high %v5326_v58, %v5326_v58 }
 0x35a   : > { %v5342_v49 = vrot.slane %v5326_v58, %v32678_v41  ;;  %v5349_v7 = vrot.slane %v5327_v53, %v32678_v41  ;;  %v5209_v5 = vrot.slane %v5181_v24, %v32678_v41  ;;  %v5211_v12 = vcombine.high %v5195_v57, %v5195_v57 }
 0x35b   : > { %v5212_v14 = vcombine.high %v5202_v59, %v5202_v59  ;;  %v6604_v15 = vrot.slane %v5202_v59, %v32679_v19  ;;  %v6608_v16 = vrot.slane %v5210_v42, %v32679_v19  ;;  %v6616_v22 = vrot.slane %v5195_v57, %v32679_v19 }
 0x35c   : > { %v5356_v25 = vrot.slane %v5328_v0, %v32678_v41  ;;  %v5357_v40 = vcombine.high %v5335_v34, %v5335_v34  ;;  %v5213_v30 = vcombine.high %v5209_v5, %v5209_v5  ;;  %v6620_v51 = vrot.slane %v5209_v5, %v32679_v19 }
 0x35d   : > { %v6612_v3 = vrot.slane %v5212_v14, %v32679_v19  ;;  %v6624_v4 = vrot.slane %v5211_v12, %v32679_v19  ;;  %v7719_v52 = vcombine.low %v6600_v27, %v6604_v15  ;;  %v5358_v54 = vcombine.high %v5342_v49, %v5342_v49 }
 0x35e   : > { %v5359_v39 = vcombine.high %v5349_v7, %v5349_v7  ;;  %v5360_v38 = vcombine.high %v5356_v25, %v5356_v25  ;;  %v6628_v11 = vrot.slane %v5213_v30, %v32679_v19  ;;  %v7736_v20 = vcombine.low %v6616_v22, %v6620_v51 }
 0x35f   : > { %v7720_v32 = vcombine.low %v6608_v16, %v6612_v3  ;;  %v6696_v26 = vrot.slane %v5335_v34, %v32679_v19  ;;  %v7727_v61 = vrot.slane %v7719_v52, %v32680_v28  ;;  %v6700_v62 = vrot.slane %v5349_v7, %v32679_v19  ;;  %v29783_v7 = vpop.f32.mrb[28].mxu0 }
 0x360   : > { %v6704_v1 = vrot.slane %v5357_v40, %v32679_v19  ;;  %v6708_v2 = vrot.slane %v5359_v39, %v32679_v19  ;;  %v7737_v17 = vcombine.low %v6624_v4, %v6628_v11  ;;  %v7744_v33 = vrot.slane %v7736_v20, %v32680_v28 }
 0x361   : > { %v7734_v50 = vrot.slane %v7720_v32, %v32680_v28  ;;  %v6712_v35 = vrot.slane %v5342_v49, %v32679_v19  ;;  %v6716_v45 = vrot.slane %v5356_v25, %v32679_v19  ;;  %v6720_v48 = vrot.slane %v5358_v54, %v32679_v19 }
 0x362   : > { %v6724_v58 = vrot.slane %v5360_v38, %v32679_v19  ;;  %v7821_v53 = vcombine.low %v6696_v26, %v6700_v62  ;;  %v7751_v24 = vrot.slane %v7737_v17, %v32680_v28  ;;  %v7822_v57 = vcombine.low %v6704_v1, %v6708_v2 }
 0x363   : > { %v7735_v34 = vcombine.low %v7727_v61, %v7734_v50  ;;  %v5270_v59 = vrot.slane %v29730_v63, %v32678_v41  ;;  %v7838_v27 = vcombine.low %v6712_v35, %v6716_v45  ;;  %v5277_v49 = vrot.slane %v5263_v43, %v32678_v41 }
 0x364   : > { %v7829_v42 = vrot.slane %v7821_v53, %v32680_v28  ;;  %v7839_v0 = vcombine.low %v6720_v48, %v6724_v58  ;;  %v7752_v5 = vcombine.low %v7744_v33, %v7751_v24  ;;  %v7836_v12 = vrot.slane %v7822_v57, %v32680_v28 }
 0x365   : > { %8632 = vst.msk [vmem:[#allocation3 + $0x169] sm:$0xff] %vm7365_vm3, %v7735_v34  ;;  %8636 = vst.msk [vmem:[#allocation3 + $0x191] sm:$0xff] %vm7365_vm3, %v7735_v34  ;;  %v5278_v14 = vcombine.high %v5270_v59, %v5270_v59  ;;  %v5286_v15 = vrot.slane %v5270_v59, %v32678_v41  ;;  %v7846_v63 = vrot.slane %v7838_v27, %v32680_v28 }
 0x366   : > { %v7853_v16 = vrot.slane %v7839_v0, %v32680_v28  ;;  %v5279_v22 = vcombine.high %v5277_v49, %v5277_v49  ;;  %v5293_v25 = vrot.slane %v5277_v49, %v32678_v41  ;;  %8633 = vst.msk [vmem:[#allocation3 + $0x171] sm:$0xff] %vm7365_vm3, %v7752_v5  ;;  %8637 = vst.msk [vmem:[#allocation3 + $0x199] sm:$0xff] %vm7365_vm3, %v7752_v5 }
 0x367   : > { %v7837_v43 = vcombine.low %v7829_v42, %v7836_v12  ;;  %v5300_v40 = vrot.slane %v5278_v14, %v32678_v41  ;;  %v5308_v30 = vcombine.high %v5286_v15, %v5286_v15  ;;  %v6664_v3 = vrot.slane %v5286_v15, %v32679_v19 }
 0x368   : > { %v7854_v51 = vcombine.low %v7846_v63, %v7853_v16  ;;  %v5307_v4 = vrot.slane %v5279_v22, %v32678_v41  ;;  %v5309_v52 = vcombine.high %v5293_v25, %v5293_v25  ;;  %v6680_v54 = vrot.slane %v5293_v25, %v32679_v19 }
 0x369   : > { %8642 = vst.msk [vmem:[#allocation3 + $0x1c9] sm:$0xff] %vm7365_vm3, %v7837_v43  ;;  %8646 = vst.msk [vmem:[#allocation3 + $0x1f1] sm:$0xff] %vm7365_vm3, %v7837_v43  ;;  %v5310_v39 = vcombine.high %v5300_v40, %v5300_v40  ;;  %v6668_v38 = vrot.slane %v5300_v40, %v32679_v19  ;;  %v6672_v11 = vrot.slane %v5308_v30, %v32679_v19 }
 0x36a   : > { %v4722_v32 = vadd.f32 %v29530_v6, %v29442_v36  ;;  %8643 = vst.msk [vmem:[#allocation3 + $0x1d1] sm:$0xff] %vm7365_vm3, %v7854_v51  ;;  %8647 = vst.msk [vmem:[#allocation3 + $0x1f9] sm:$0xff] %vm7365_vm3, %v7854_v51  ;;  %v5311_v20 = vcombine.high %v5307_v4, %v5307_v4  ;;  %v6684_v26 = vrot.slane %v5307_v4, %v32679_v19 }
 0x36b   : > { %v6688_v61 = vrot.slane %v5309_v52, %v32679_v19  ;;  %v4721_v62 = vadd.f32 %v29442_v36, %v29534_v13  ;;  %v6676_v1 = vrot.slane %v5310_v39, %v32679_v19  ;;  %v7787_v2 = vcombine.low %v6664_v3, %v6668_v38 }
 0x36c   : > { %v5410_v50 = vcombine.high %v4722_v32, %v4722_v32  ;;  %v5417_v17 = vrot.slane %v4722_v32, %v32678_v41  ;;  %v6692_v6 = vrot.slane %v5311_v20, %v32679_v19  ;;  %v7804_v33 = vcombine.low %v6680_v54, %v6684_v26 }
 0x36d   : > { %v5361_v35 = vcombine.high %v4721_v62, %v4721_v62  ;;  %v5368_v45 = vrot.slane %v4721_v62, %v32678_v41  ;;  %v7788_v48 = vcombine.low %v6672_v11, %v6676_v1  ;;  %v7795_v58 = vrot.slane %v7787_v2, %v32680_v28 }
 0x36e   : > { %v5424_v53 = vrot.slane %v5410_v50, %v32678_v41  ;;  %v5425_v34 = vcombine.high %v5417_v17, %v5417_v17  ;;  %v7805_v24 = vcombine.low %v6688_v61, %v6692_v6  ;;  %v7812_v36 = vrot.slane %v7804_v33, %v32680_v28 }
 0x36f   : > { %v5433_v13 = vrot.slane %v5417_v17, %v32678_v41  ;;  %v5375_v57 = vrot.slane %v5361_v35, %v32678_v41  ;;  %v7802_v59 = vrot.slane %v7788_v48, %v32680_v28  ;;  %v5376_v14 = vcombine.high %v5368_v45, %v5368_v45 }
 0x370   : > { %v5426_v42 = vcombine.high %v5424_v53, %v5424_v53  ;;  %v5440_v27 = vrot.slane %v5424_v53, %v32678_v41  ;;  %v5447_v0 = vrot.slane %v5425_v34, %v32678_v41  ;;  %v7819_v49 = vrot.slane %v7805_v24, %v32680_v28 }
 0x371   : > { %v5455_v5 = vcombine.high %v5433_v13, %v5433_v13  ;;  %v6760_v12 = vrot.slane %v5433_v13, %v32679_v19  ;;  %v7803_v15 = vcombine.low %v7795_v58, %v7802_v59  ;;  %v5377_v39 = vcombine.high %v5375_v57, %v5375_v57 }
 0x372   : > { %v5454_v63 = vrot.slane %v5426_v42, %v32678_v41  ;;  %v5456_v16 = vcombine.high %v5440_v27, %v5440_v27  ;;  %v5457_v22 = vcombine.high %v5447_v0, %v5447_v0  ;;  %v7820_v25 = vcombine.low %v7812_v36, %v7819_v49 }
 0x373   : > { %v6764_v43 = vrot.slane %v5447_v0, %v32679_v19  ;;  %v6768_v40 = vrot.slane %v5455_v5, %v32679_v19  ;;  %v6776_v30 = vrot.slane %v5440_v27, %v32679_v19  ;;  %8640 = vst.msk [vmem:[#allocation3 + $0x1b9] sm:$0xff] %vm7365_vm3, %v7803_v15  ;;  %8644 = vst.msk [vmem:[#allocation3 + $0x1e1] sm:$0xff] %vm7365_vm3, %v7803_v15 }
 0x374   : > { %v5458_v3 = vcombine.high %v5454_v63, %v5454_v63  ;;  %v6772_v51 = vrot.slane %v5457_v22, %v32679_v19  ;;  %v6780_v4 = vrot.slane %v5454_v63, %v32679_v19  ;;  %v6784_v52 = vrot.slane %v5456_v16, %v32679_v19  ;;  %8641 = vst.msk [vmem:[#allocation3 + $0x1c1] sm:$0xff] %vm7365_vm3, %v7820_v25 }
 0x375   : > { %8645 = vst.msk [vmem:[#allocation3 + $0x1e9] sm:$0xff] %vm7365_vm3, %v7820_v25  ;;  %v7889_v54 = vcombine.low %v6760_v12, %v6764_v43  ;;  %v5384_v38 = vrot.slane %v5368_v45, %v32678_v41  ;;  %v5391_v11 = vrot.slane %v5375_v57, %v32678_v41  ;;  %v5398_v61 = vrot.slane %v5376_v14, %v32678_v41  ;;  %v8883_v57 = vld [vmem:[#allocation3 + $0xb9] sm:$0xff]  ;;  %v29858_v12 = vld [vmem:[%s32530_s2] ss:$0 sm:$0xff] }
 0x376   : > { %v6788_v32 = vrot.slane %v5458_v3, %v32679_v19  ;;  %v7890_v20 = vcombine.low %v6768_v40, %v6772_v51  ;;  %v7906_v26 = vcombine.low %v6776_v30, %v6780_v4  ;;  %v5405_v1 = vrot.slane %v5377_v39, %v32678_v41  ;;  %24693 = vmatmul.mubr.msk.f32.gmra.mrb[50].mxu0 %vm7365_vm3, %v8883_v57  ;;  %v8884_v43 = vld [vmem:[#allocation3 + $0xc9] sm:$0xff] }
 0x377   : > { %v7897_v62 = vrot.slane %v7889_v54, %v32680_v28  ;;  %v5406_v2 = vcombine.high %v5384_v38, %v5384_v38  ;;  %v5407_v50 = vcombine.high %v5391_v11, %v5391_v11  ;;  %v5408_v35 = vcombine.high %v5398_v61, %v5398_v61  ;;  %24695 = vmatprep.mubr.msk.f32.mxu0 %vm7365_vm3, %v8884_v43 }
 0x378   : > { %v7904_v17 = vrot.slane %v7890_v20, %v32680_v28  ;;  %v7907_v6 = vcombine.low %v6784_v52, %v6788_v32  ;;  %v7914_v33 = vrot.slane %v7906_v26, %v32680_v28  ;;  %v5409_v45 = vcombine.high %v5405_v1, %v5405_v1  ;;  %v8885_v52 = vld [vmem:[#allocation3 + $0xd1] sm:$0xff]  ;;  %v29881_v32 = vpop.f32.mrb[29].mxu0  ;;  %v8886_v20 = vld [vmem:[#allocation3 + $0xd9] sm:$0xff] }
 0x379   : > { %v6728_v48 = vrot.slane %v5384_v38, %v32679_v19  ;;  %v6732_v58 = vrot.slane %v5398_v61, %v32679_v19  ;;  %v6736_v53 = vrot.slane %v5406_v2, %v32679_v19  ;;  %v6740_v36 = vrot.slane %v5408_v35, %v32679_v19 }
 0x37a   : > { %v7905_v34 = vcombine.low %v7897_v62, %v7904_v17  ;;  %v7921_v24 = vrot.slane %v7907_v6, %v32680_v28  ;;  %v6744_v13 = vrot.slane %v5391_v11, %v32679_v19  ;;  %v6748_v59 = vrot.slane %v5405_v1, %v32679_v19  ;;  %24696 = vmatmul.mubr.msk.f32.gmra.mrb[52].mxu0 %vm7365_vm3, %v8885_v52 }
 0x37b   : > { %v6752_v42 = vrot.slane %v5407_v50, %v32679_v19  ;;  %v6756_v27 = vrot.slane %v5409_v45, %v32679_v19  ;;  %v7855_v0 = vcombine.low %v6728_v48, %v6732_v58  ;;  %v7856_v5 = vcombine.low %v6736_v53, %v6740_v36  ;;  %24698 = vmatprep.mubr.msk.f32.mxu0 %vm7365_vm3, %v8886_v20  ;;  %v8887_v58 = vld [vmem:[#allocation3 + $0xe1] sm:$0xff] }
 0x37c   : > { %v7922_v49 = vcombine.low %v7914_v33, %v7921_v24  ;;  %8650 = vst.msk [vmem:[#allocation3 + $0x219] sm:$0xff] %vm7365_vm3, %v7905_v34  ;;  %8654 = vst.msk [vmem:[#allocation3 + $0x241] sm:$0xff] %vm7365_vm3, %v7905_v34  ;;  %v4724_v14 = vadd.f32 %v29858_v12, %v29543_v44  ;;  %v4723_v15 = vadd.f32 %v29858_v12, %v29546_v55 }
 0x37d   : > { %v7863_v63 = vrot.slane %v7855_v0, %v32680_v28  ;;  %v7872_v16 = vcombine.low %v6744_v13, %v6748_v59  ;;  %v7873_v22 = vcombine.low %v6752_v42, %v6756_v27  ;;  %v29867_v25 = vadd.f32 %v29858_v12, %v29560_v56  ;;  %v8888_v13 = vld [vmem:[#allocation3 + $0xf1] sm:$0xff]  ;;  %v29902_v0 = vpop.f32.mrb[30].mxu0 }
 0x37e   : > { %8651 = vst.msk [vmem:[#allocation3 + $0x221] sm:$0xff] %vm7365_vm3, %v7922_v49  ;;  %8655 = vst.msk [vmem:[#allocation3 + $0x249] sm:$0xff] %vm7365_vm3, %v7922_v49  ;;  %v7870_v40 = vrot.slane %v7856_v5, %v32680_v28  ;;  %v5508_v30 = vcombine.high %v4724_v14, %v4724_v14  ;;  %v5515_v44 = vrot.slane %v4724_v14, %v32678_v41  ;;  %24699 = vmatmul.mubr.msk.f32.gmra.mrb[54].mxu0 %vm7365_vm3, %v8887_v58 }
 0x37f   : > { %v5459_v3 = vcombine.high %v4723_v15, %v4723_v15  ;;  %v7880_v55 = vrot.slane %v7872_v16, %v32680_v28  ;;  %v7887_v51 = vrot.slane %v7873_v22, %v32680_v28  ;;  %v5466_v56 = vrot.slane %v4723_v15, %v32678_v41  ;;  %24701 = vmatprep.mubr.msk.f32.mxu0 %vm7365_vm3, %v8888_v13 }
 0x380   : > { %v5606_v4 = vcombine.high %v29867_v25, %v29867_v25  ;;  %v7871_v54 = vcombine.low %v7863_v63, %v7870_v40  ;;  %v5522_v39 = vrot.slane %v5508_v30, %v32678_v41  ;;  %v5523_v38 = vcombine.high %v5515_v44, %v5515_v44  ;;  %v8889_v40 = vld [vmem:[#allocation3 + $0xf9] sm:$0xff] }
 0x381   : > { %v5531_v11 = vrot.slane %v5515_v44, %v32678_v41  ;;  %v7888_v26 = vcombine.low %v7880_v55, %v7887_v51  ;;  %v5473_v61 = vrot.slane %v5459_v3, %v32678_v41  ;;  %v5474_v62 = vcombine.high %v5466_v56, %v5466_v56  ;;  %v8890_v51 = vld [vmem:[#allocation3 + $0x101] sm:$0xff] }
 0x382   : > { %v5482_v1 = vrot.slane %v5466_v56, %v32678_v41  ;;  %8648 = vst.msk [vmem:[#allocation3 + $0x209] sm:$0xff] %vm7365_vm3, %v7871_v54  ;;  %8652 = vst.msk [vmem:[#allocation3 + $0x231] sm:$0xff] %vm7365_vm3, %v7871_v54  ;;  %v5524_v2 = vcombine.high %v5522_v39, %v5522_v39  ;;  %v5538_v50 = vrot.slane %v5522_v39, %v32678_v41  ;;  %24702 = vmatmul.mubr.msk.f32.gmra.mrb[56].mxu0 %vm7365_vm3, %v8889_v40 }
 0x383   : > { %v5545_v17 = vrot.slane %v5523_v38, %v32678_v41  ;;  %v5553_v6 = vcombine.high %v5531_v11, %v5531_v11  ;;  %8649 = vst.msk [vmem:[#allocation3 + $0x211] sm:$0xff] %vm7365_vm3, %v7888_v26  ;;  %8653 = vst.msk [vmem:[#allocation3 + $0x239] sm:$0xff] %vm7365_vm3, %v7888_v26  ;;  %v6824_v33 = vrot.slane %v5531_v11, %v32679_v19  ;;  %24704 = vmatprep.mubr.msk.f32.mxu0 %vm7365_vm3, %v8890_v51 }
 0x384   : > { %v5475_v35 = vcombine.high %v5473_v61, %v5473_v61  ;;  %v5489_v45 = vrot.slane %v5473_v61, %v32678_v41  ;;  %v5496_v48 = vrot.slane %v5474_v62, %v32678_v41  ;;  %v5552_v53 = vrot.slane %v5524_v2, %v32678_v41 }
 0x385   : > { %v5554_v34 = vcombine.high %v5538_v50, %v5538_v50  ;;  %v5555_v24 = vcombine.high %v5545_v17, %v5545_v17  ;;  %v6828_v36 = vrot.slane %v5545_v17, %v32679_v19  ;;  %v6832_v57 = vrot.slane %v5553_v6, %v32679_v19  ;;  %v8891_v17 = vld [vmem:[#allocation3 + $0x109] sm:$0xff] }
 0x386   : > { %v6840_v59 = vrot.slane %v5538_v50, %v32679_v19  ;;  %v5503_v42 = vrot.slane %v5475_v35, %v32678_v41  ;;  %v5504_v27 = vcombine.high %v5482_v1, %v5482_v1  ;;  %v5556_v49 = vcombine.high %v5552_v53, %v5552_v53  ;;  %24705 = vmatmul.mubr.msk.f32.gmra.mrb[58].mxu0 %vm7365_vm3, %v8891_v17 }
 0x387   : > { %v6836_v5 = vrot.slane %v5555_v24, %v32679_v19  ;;  %v6844_v14 = vrot.slane %v5552_v53, %v32679_v19  ;;  %v6848_v15 = vrot.slane %v5554_v34, %v32679_v19  ;;  %v7957_v63 = vcombine.low %v6824_v33, %v6828_v36 }
 0x388   : > { %v5505_v16 = vcombine.high %v5489_v45, %v5489_v45  ;;  %v5506_v22 = vcombine.high %v5496_v48, %v5496_v48  ;;  %v5507_v43 = vcombine.high %v5503_v42, %v5503_v42  ;;  %v6852_v30 = vrot.slane %v5556_v49, %v32679_v19 }
 0x389   : > { %v7958_v44 = vcombine.low %v6832_v57, %v6836_v5  ;;  %v7974_v3 = vcombine.low %v6840_v59, %v6844_v14  ;;  %v6792_v55 = vrot.slane %v5482_v1, %v32679_v19  ;;  %v7965_v56 = vrot.slane %v7957_v63, %v32680_v28 }
 0x38a   : > { %v6796_v52 = vrot.slane %v5496_v48, %v32679_v19  ;;  %v6800_v54 = vrot.slane %v5504_v27, %v32679_v19  ;;  %v6804_v39 = vrot.slane %v5506_v22, %v32679_v19  ;;  %v7975_v11 = vcombine.low %v6848_v15, %v6852_v30  ;;  %v12583_v61 = vld [vmem:[#allocation3 + $0x218] sm:$0xff] }
 0x38b   : > { %v7972_v38 = vrot.slane %v7958_v44, %v32680_v28  ;;  %v7982_v20 = vrot.slane %v7974_v3, %v32680_v28  ;;  %v6808_v26 = vrot.slane %v5489_v45, %v32679_v19  ;;  %v6812_v62 = vrot.slane %v5503_v42, %v32679_v19  ;;  %25364 = vmatprep.mubr.msk.f32.mxu1 %vm7365_vm3, %v12583_v61  ;;  %v8892_v45 = vld [vmem:[#allocation3 + $0x119] sm:$0xff]  ;;  %v29947_v44 = vpop.f32.mrb[31].mxu0 }
 0x38c   : > { %v6816_v1 = vrot.slane %v5505_v16, %v32679_v19  ;;  %v6820_v2 = vrot.slane %v5507_v43, %v32679_v19  ;;  %v7923_v50 = vcombine.low %v6792_v55, %v6796_v52  ;;  %v7989_v33 = vrot.slane %v7975_v11, %v32680_v28  ;;  %24707 = vmatprep.mubr.msk.f32.mxu0 %vm7365_vm3, %v8892_v45  ;;  %v8894_v16 = vld [vmem:[#allocation3 + $0x129] sm:$0xff]  ;;  %v8895_v11 = vld [vmem:[#allocation3 + $0x131] sm:$0xff] }
 0x38d   : > { %v7973_v6 = vcombine.low %v7965_v56, %v7972_v38  ;;  %v7924_v35 = vcombine.low %v6800_v54, %v6804_v39  ;;  %v5613_v48 = vrot.slane %v29867_v25, %v32678_v41  ;;  %v7940_v53 = vcombine.low %v6808_v26, %v6812_v62 }
 0x38e   : > { %v7931_v58 = vrot.slane %v7923_v50, %v32680_v28  ;;  %v7941_v34 = vcombine.low %v6816_v1, %v6820_v2  ;;  %v5620_v24 = vrot.slane %v5606_v4, %v32678_v41  ;;  %v7990_v36 = vcombine.low %v7982_v20, %v7989_v33  ;;  %v8893_v4 = vld [vmem:[#allocation3 + $0x121] sm:$0xff] }
 0x38f   : > { %8658 = vst.msk [vmem:[#allocation3 + $0x269] sm:$0xff] %vm7365_vm3, %v7973_v6  ;;  %8662 = vst.msk [vmem:[#allocation3 + $0x291] sm:$0xff] %vm7365_vm3, %v7973_v6  ;;  %v7938_v13 = vrot.slane %v7924_v35, %v32680_v28  ;;  %v5621_v57 = vcombine.high %v5613_v48, %v5613_v48  ;;  %v5629_v59 = vrot.slane %v5613_v48, %v32678_v41  ;;  %24708 = vmatmul.mubr.msk.f32.gmra.mrb[60].mxu0 %vm7365_vm3, %v8893_v4 }
 0x390   : > { %v7948_v42 = vrot.slane %v7940_v53, %v32680_v28  ;;  %v7955_v27 = vrot.slane %v7941_v34, %v32680_v28  ;;  %v5622_v49 = vcombine.high %v5620_v24, %v5620_v24  ;;  %v5636_v25 = vrot.slane %v5620_v24, %v32678_v41  ;;  %8659 = vst.msk [vmem:[#allocation3 + $0x271] sm:$0xff] %vm7365_vm3, %v7990_v36  ;;  %v8897_v34 = vld [vmem:[#allocation3 + $0x149] sm:$0xff] }
 0x391   : > { %8663 = vst.msk [vmem:[#allocation3 + $0x299] sm:$0xff] %vm7365_vm3, %v7990_v36  ;;  %v7939_v5 = vcombine.low %v7931_v58, %v7938_v13  ;;  %v5643_v14 = vrot.slane %v5621_v57, %v32678_v41  ;;  %v5651_v15 = vcombine.high %v5629_v59, %v5629_v59  ;;  %v6888_v63 = vrot.slane %v5629_v59, %v32679_v19  ;;  %v8898_v59 = vld [vmem:[#allocation3 + $0x151] sm:$0xff] }
 0x392   : > { %v7956_v22 = vcombine.low %v7948_v42, %v7955_v27  ;;  %v5650_v43 = vrot.slane %v5622_v49, %v32678_v41  ;;  %v5652_v40 = vcombine.high %v5636_v25, %v5636_v25  ;;  %v6904_v30 = vrot.slane %v5636_v25, %v32679_v19  ;;  %24710 = vmatprep.mubr.msk.f32.mxu0 %vm7365_vm3, %v8894_v16 }
 0x393   : > { %8656 = vst.msk [vmem:[#allocation3 + $0x259] sm:$0xff] %vm7365_vm3, %v7939_v5  ;;  %8660 = vst.msk [vmem:[#allocation3 + $0x281] sm:$0xff] %vm7365_vm3, %v7939_v5  ;;  %v5653_v3 = vcombine.high %v5643_v14, %v5643_v14  ;;  %v6892_v55 = vrot.slane %v5643_v14, %v32679_v19  ;;  %v6896_v51 = vrot.slane %v5651_v15, %v32679_v19  ;;  %24711 = vmatmul.mubr.msk.f32.gmra.mrb[62].mxu0 %vm7365_vm3, %v8895_v11 }
 0x394   : > { %v4725_v56 = vadd.f32 %v29858_v12, %v29565_v18  ;;  %8657 = vst.msk [vmem:[#allocation3 + $0x261] sm:$0xff] %vm7365_vm3, %v7956_v22  ;;  %8661 = vst.msk [vmem:[#allocation3 + $0x289] sm:$0xff] %vm7365_vm3, %v7956_v22  ;;  %v5654_v52 = vcombine.high %v5650_v43, %v5650_v43  ;;  %v6908_v54 = vrot.slane %v5650_v43, %v32679_v19  ;;  %v8896_v18 = vld [vmem:[#allocation3 + $0x141] sm:$0xff] }
 0x395   : > { %v6912_v39 = vrot.slane %v5652_v40, %v32679_v19  ;;  %v4728_v38 = vadd.f32 %v29858_v12, %v29586_v31  ;;  %v6900_v20 = vrot.slane %v5653_v3, %v32679_v19  ;;  %v8025_v26 = vcombine.low %v6888_v63, %v6892_v55  ;;  %24713 = vmatprep.mubr.msk.f32.mxu0 %vm7365_vm3, %v8896_v18  ;;  %v8899_v40 = vld [vmem:[#allocation3 + $0x159] sm:$0xff] }
 0x396   : > { %v5557_v61 = vcombine.high %v4725_v56, %v4725_v56  ;;  %v5564_v62 = vrot.slane %v4725_v56, %v32678_v41  ;;  %v6916_v1 = vrot.slane %v5654_v52, %v32679_v19  ;;  %v8042_v2 = vcombine.low %v6904_v30, %v6908_v54  ;;  %v8900_v56 = vld [vmem:[#allocation3 + $0x169] sm:$0xff] }
 0x397   : > { %v5704_v50 = vcombine.high %v4728_v38, %v4728_v38  ;;  %v5711_v17 = vrot.slane %v4728_v38, %v32678_v41  ;;  %v8026_v6 = vcombine.low %v6896_v51, %v6900_v20  ;;  %v8033_v31 = vrot.slane %v8025_v26, %v32680_v28  ;;  %24714 = vmatmul.mubr.msk.f32.gmra.mrb[64].mxu0 %vm7365_vm3, %v8897_v34  ;;  %v21769_v34 = vld [vmem:[%s32531_s3 + $0xc0] sm:$0xff] }
 0x398   : > { %v5571_v33 = vrot.slane %v5557_v61, %v32678_v41  ;;  %v5572_v35 = vcombine.high %v5564_v62, %v5564_v62  ;;  %v8043_v48 = vcombine.low %v6912_v39, %v6916_v1  ;;  %v8050_v45 = vrot.slane %v8042_v2, %v32680_v28  ;;  %24716 = vmatprep.mubr.msk.f32.mxu0 %vm7365_vm3, %v8898_v59 }
 0x399   : > { %v5580_v58 = vrot.slane %v5564_v62, %v32678_v41  ;;  %v5718_v53 = vrot.slane %v5704_v50, %v32678_v41  ;;  %v8040_v24 = vrot.slane %v8026_v6, %v32680_v28  ;;  %v5719_v25 = vcombine.high %v5711_v17, %v5711_v17  ;;  %v8901_v50 = vld [vmem:[#allocation3 + $0x171] sm:$0xff] }
 0x39a   : > { %v5573_v36 = vcombine.high %v5571_v33, %v5571_v33  ;;  %v5587_v13 = vrot.slane %v5571_v33, %v32678_v41  ;;  %v5594_v57 = vrot.slane %v5572_v35, %v32678_v41  ;;  %v8057_v42 = vrot.slane %v8043_v48, %v32680_v28  ;;  %v8902_v35 = vld [vmem:[#allocation3 + $0x179] sm:$0xff] }
 0x39b   : > { %v5602_v27 = vcombine.high %v5580_v58, %v5580_v58  ;;  %v6856_v49 = vrot.slane %v5580_v58, %v32679_v19  ;;  %v8041_v4 = vcombine.low %v8033_v31, %v8040_v24  ;;  %24717 = vmatmul.mubr.msk.f32.gmra.mrb[66].mxu0 %vm7365_vm3, %v8899_v40  ;;  %v5720_v54 = vcombine.high %v5718_v53, %v5718_v53  ;;  %v21770_v24 = vld [vmem:[%s32531_s3 + $0xc8] sm:$0xff] }
 0x39c   : > { %v5601_v5 = vrot.slane %v5573_v36, %v32678_v41  ;;  %v5603_v14 = vcombine.high %v5587_v13, %v5587_v13  ;;  %v5604_v15 = vcombine.high %v5594_v57, %v5594_v57  ;;  %v8058_v63 = vcombine.low %v8050_v45, %v8057_v42  ;;  %24719 = vmatprep.mubr.msk.f32.mxu0 %vm7365_vm3, %v8900_v56 }
 0x39d   : > { %v6860_v16 = vrot.slane %v5594_v57, %v32679_v19  ;;  %v6864_v22 = vrot.slane %v5602_v27, %v32679_v19  ;;  %v6872_v43 = vrot.slane %v5587_v13, %v32679_v19  ;;  %8666 = vst.msk [vmem:[#allocation3 + $0x2b9] sm:$0xff] %vm7365_vm3, %v8041_v4  ;;  %8670 = vst.msk [vmem:[#allocation3 + $0x2e1] sm:$0xff] %vm7365_vm3, %v8041_v4  ;;  %v8903_v4 = vld [vmem:[#allocation3 + $0x181] sm:$0xff] }
 0x39e   : > { %v5605_v30 = vcombine.high %v5601_v5, %v5601_v5  ;;  %v6868_v3 = vrot.slane %v5604_v15, %v32679_v19  ;;  %v6876_v55 = vrot.slane %v5601_v5, %v32679_v19  ;;  %v6880_v51 = vrot.slane %v5603_v14, %v32679_v19  ;;  %8667 = vst.msk [vmem:[#allocation3 + $0x2c1] sm:$0xff] %vm7365_vm3, %v8058_v63 }
 0x39f   : > { %8671 = vst.msk [vmem:[#allocation3 + $0x2e9] sm:$0xff] %vm7365_vm3, %v8058_v63  ;;  %v7991_v52 = vcombine.low %v6856_v49, %v6860_v16  ;;  %v5727_v39 = vrot.slane %v5711_v17, %v32678_v41  ;;  %v5734_v38 = vrot.slane %v5718_v53, %v32678_v41  ;;  %v5741_v61 = vrot.slane %v5719_v25, %v32678_v41  ;;  %v8904_v16 = vld [vmem:[#allocation3 + $0x191] sm:$0xff] }
 0x3a0   : > { %v6884_v11 = vrot.slane %v5605_v30, %v32679_v19  ;;  %v7992_v20 = vcombine.low %v6864_v22, %v6868_v3  ;;  %v8008_v26 = vcombine.low %v6872_v43, %v6876_v55  ;;  %v5748_v18 = vrot.slane %v5720_v54, %v32678_v41  ;;  %24720 = vmatmul.mubr.msk.f32.gmra.mrb[68].mxu0 %vm7365_vm3, %v8901_v50 }
 0x3a1   : > { %v7999_v62 = vrot.slane %v7991_v52, %v32680_v28  ;;  %v5749_v1 = vcombine.high %v5727_v39, %v5727_v39  ;;  %v5750_v2 = vcombine.high %v5734_v38, %v5734_v38  ;;  %v5751_v33 = vcombine.high %v5741_v61, %v5741_v61  ;;  %24722 = vmatprep.mubr.msk.f32.mxu0 %vm7365_vm3, %v8902_v35 }
 0x3a2   : > { %v8006_v6 = vrot.slane %v7992_v20, %v32680_v28  ;;  %v8009_v17 = vcombine.low %v6880_v51, %v6884_v11  ;;  %v8016_v31 = vrot.slane %v8008_v26, %v32680_v28  ;;  %v5752_v48 = vcombine.high %v5748_v18, %v5748_v18 }
 0x3a3   : > { %v6952_v45 = vrot.slane %v5727_v39, %v32679_v19  ;;  %v6956_v58 = vrot.slane %v5741_v61, %v32679_v19  ;;  %v6960_v53 = vrot.slane %v5749_v1, %v32679_v19  ;;  %v6964_v57 = vrot.slane %v5751_v33, %v32679_v19  ;;  %v8905_v39 = vld [vmem:[#allocation3 + $0x199] sm:$0xff] }
 0x3a4   : > { %v8007_v36 = vcombine.low %v7999_v62, %v8006_v6  ;;  %v8023_v13 = vrot.slane %v8009_v17, %v32680_v28  ;;  %v6968_v59 = vrot.slane %v5734_v38, %v32679_v19  ;;  %v6972_v42 = vrot.slane %v5748_v18, %v32679_v19  ;;  %24723 = vmatmul.mubr.msk.f32.gmra.mrb[70].mxu0 %vm7365_vm3, %v8903_v4 }
 0x3a5   : > { %v6976_v27 = vrot.slane %v5750_v2, %v32679_v19  ;;  %v6980_v49 = vrot.slane %v5752_v48, %v32679_v19  ;;  %v8093_v25 = vcombine.low %v6952_v45, %v6956_v58  ;;  %v8094_v14 = vcombine.low %v6960_v53, %v6964_v57  ;;  %24725 = vmatprep.mubr.msk.f32.mxu0 %vm7365_vm3, %v8904_v16  ;;  %v8907_v45 = vld [vmem:[#allocation3 + $0x1a9] sm:$0xff] }
 0x3a6   : > { %v8024_v5 = vcombine.low %v8016_v31, %v8023_v13  ;;  %8664 = vst.msk [vmem:[#allocation3 + $0x2a9] sm:$0xff] %vm7365_vm3, %v8007_v36  ;;  %8668 = vst.msk [vmem:[#allocation3 + $0x2d1] sm:$0xff] %vm7365_vm3, %v8007_v36  ;;  %v4727_v15 = vadd.f32 %v29858_v12, %v29591_v46  ;;  %v30022_v63 = vpack.c.bf16 %v21770_v24, %v21769_v34  ;;  %v8908_v36 = vld [vmem:[#allocation3 + $0x1b9] sm:$0xff] }
 0x3a7   : > { %v8101_v22 = vrot.slane %v8093_v25, %v32680_v28  ;;  %v8110_v43 = vcombine.low %v6968_v59, %v6972_v42  ;;  %v8111_v40 = vcombine.low %v6976_v27, %v6980_v49  ;;  %v4730_v30 = vadd.f32 %v29858_v12, %v29605_v9 }
 0x3a8   : > { %8665 = vst.msk [vmem:[#allocation3 + $0x2b1] sm:$0xff] %vm7365_vm3, %v8024_v5  ;;  %8669 = vst.msk [vmem:[#allocation3 + $0x2d9] sm:$0xff] %vm7365_vm3, %v8024_v5  ;;  %v8108_v46 = vrot.slane %v8094_v14, %v32680_v28  ;;  %v5655_v3 = vcombine.high %v4727_v15, %v4727_v15  ;;  %v5662_v55 = vrot.slane %v4727_v15, %v32678_v41  ;;  %26737 = vmatprep.subr.bf16.mxu1 %v30022_v63 }
 0x3a9   : > { %v30036_v51 = vadd.f32 %v29858_v12, %v29610_v21  ;;  %v8118_v56 = vrot.slane %v8110_v43, %v32680_v28  ;;  %v8125_v9 = vrot.slane %v8111_v40, %v32680_v28  ;;  %26741 = vmatpush3.bf16.msra.mxu1 %v30022_v63  ;;  %v5802_v52 = vcombine.high %v4730_v30, %v4730_v30  ;;  %v8906_v21 = vld [vmem:[#allocation3 + $0x1a1] sm:$0xff] }
 0x3aa   : > { %v5809_v54 = vrot.slane %v4730_v30, %v32678_v41  ;;  %v8109_v38 = vcombine.low %v8101_v22, %v8108_v46  ;;  %v5669_v11 = vrot.slane %v5655_v3, %v32678_v41  ;;  %v5670_v20 = vcombine.high %v5662_v55, %v5662_v55  ;;  %24726 = vmatmul.mubr.msk.f32.gmra.mrb[72].mxu0 %vm7365_vm3, %v8905_v39  ;;  %v8909_v22 = vld [vmem:[#allocation3 + $0x1c1] sm:$0xff]  ;;  %v8910_v3 = vld [vmem:[#allocation3 + $0x1c9] sm:$0xff] }
 0x3ab   : > { %v5678_v26 = vrot.slane %v5662_v55, %v32678_v41  ;;  %v8126_v61 = vcombine.low %v8118_v56, %v8125_v9  ;;  %v5816_v62 = vrot.slane %v5802_v52, %v32678_v41  ;;  %24728 = vmatprep.mubr.msk.f32.mxu0 %vm7365_vm3, %v8906_v21 }
 0x3ac   : > { %v5817_v18 = vcombine.high %v5809_v54, %v5809_v54  ;;  %v5825_v1 = vrot.slane %v5809_v54, %v32678_v41  ;;  %8674 = vst.msk [vmem:[#allocation3 + $0x309] sm:$0xff] %vm7365_vm3, %v8109_v38  ;;  %8678 = vst.msk [vmem:[#allocation3 + $0x331] sm:$0xff] %vm7365_vm3, %v8109_v38  ;;  %v5671_v2 = vcombine.high %v5669_v11, %v5669_v11 }
 0x3ad   : > { %v5685_v50 = vrot.slane %v5669_v11, %v32678_v41  ;;  %v5692_v6 = vrot.slane %v5670_v20, %v32678_v41  ;;  %v5700_v17 = vcombine.high %v5678_v26, %v5678_v26  ;;  %8675 = vst.msk [vmem:[#allocation3 + $0x311] sm:$0xff] %vm7365_vm3, %v8126_v61  ;;  %8679 = vst.msk [vmem:[#allocation3 + $0x339] sm:$0xff] %vm7365_vm3, %v8126_v61 }
 0x3ae   : > { %v6920_v31 = vrot.slane %v5678_v26, %v32679_v19  ;;  %v5818_v33 = vcombine.high %v5816_v62, %v5816_v62  ;;  %v5832_v35 = vrot.slane %v5816_v62, %v32678_v41  ;;  %v5839_v48 = vrot.slane %v5817_v18, %v32678_v41  ;;  %24729 = vmatmul.mubr.msk.f32.gmra.mrb[74].mxu0 %vm7365_vm3, %v8907_v45  ;;  %v21771_v62 = vld [vmem:[%s32531_s3 + $0xd0] sm:$0xff]  ;;  %v21772_v18 = vld [vmem:[%s32531_s3 + $0xd8] sm:$0xff] }
 0x3af   : > { %v5699_v58 = vrot.slane %v5671_v2, %v32678_v41  ;;  %v5701_v53 = vcombine.high %v5685_v50, %v5685_v50  ;;  %v5702_v34 = vcombine.high %v5692_v6, %v5692_v6  ;;  %v6924_v24 = vrot.slane %v5692_v6, %v32679_v19  ;;  %24731 = vmatprep.mubr.msk.f32.mxu0 %vm7365_vm3, %v8908_v36 }
 0x3b0   : > { %v6928_v13 = vrot.slane %v5700_v17, %v32679_v19  ;;  %v6936_v57 = vrot.slane %v5685_v50, %v32679_v19  ;;  %v5846_v59 = vrot.slane %v5818_v33, %v32678_v41  ;;  %v5847_v42 = vcombine.high %v5825_v1, %v5825_v1 }
 0x3b1   : > { %v5703_v27 = vcombine.high %v5699_v58, %v5699_v58  ;;  %v6932_v49 = vrot.slane %v5702_v34, %v32679_v19  ;;  %v6940_v25 = vrot.slane %v5699_v58, %v32679_v19  ;;  %v6944_v4 = vrot.slane %v5701_v53, %v32679_v19 }
 0x3b2   : > { %v8059_v5 = vcombine.low %v6920_v31, %v6924_v24  ;;  %v5848_v14 = vcombine.high %v5832_v35, %v5832_v35  ;;  %v5849_v15 = vcombine.high %v5839_v48, %v5839_v48  ;;  %v5850_v16 = vcombine.high %v5846_v59, %v5846_v59  ;;  %24732 = vmatmul.mubr.msk.f32.gmra.mrb[76].mxu0 %vm7365_vm3, %v8909_v22  ;;  %v8912_v31 = vld [vmem:[#allocation3 + $0x1e1] sm:$0xff] }
 0x3b3   : > { %v6948_v43 = vrot.slane %v5703_v27, %v32679_v19  ;;  %v8060_v40 = vcombine.low %v6928_v13, %v6932_v49  ;;  %v8076_v30 = vcombine.low %v6936_v57, %v6940_v25  ;;  %v7016_v46 = vrot.slane %v5825_v1, %v32679_v19  ;;  %24734 = vmatprep.mubr.msk.f32.mxu0 %vm7365_vm3, %v8910_v3  ;;  %v8911_v1 = vld [vmem:[#allocation3 + $0x1d1] sm:$0xff] }
 0x3b4   : > { %v8067_v55 = vrot.slane %v8059_v5, %v32680_v28  ;;  %v7020_v56 = vrot.slane %v5839_v48, %v32679_v19  ;;  %v7024_v9 = vrot.slane %v5847_v42, %v32679_v19  ;;  %v7028_v52 = vrot.slane %v5849_v15, %v32679_v19  ;;  %v8913_v15 = vld [vmem:[#allocation3 + $0x1e9] sm:$0xff] }
 0x3b5   : > { %v8074_v54 = vrot.slane %v8060_v40, %v32680_v28  ;;  %v8077_v39 = vcombine.low %v6944_v4, %v6948_v43  ;;  %v8084_v38 = vrot.slane %v8076_v30, %v32680_v28  ;;  %v7032_v11 = vrot.slane %v5832_v35, %v32679_v19 }
 0x3b6   : > { %v7036_v20 = vrot.slane %v5846_v59, %v32679_v19  ;;  %v7040_v26 = vrot.slane %v5848_v14, %v32679_v19  ;;  %v7044_v21 = vrot.slane %v5850_v16, %v32679_v19  ;;  %v8161_v61 = vcombine.low %v7016_v46, %v7020_v56  ;;  %24735 = vmatmul.mubr.msk.f32.gmra.mrb[78].mxu0 %vm7365_vm3, %v8911_v1  ;;  %v8916_v1 = vld [vmem:[#allocation3 + $0x209] sm:$0xff] }
 0x3b7   : > { %v8075_v2 = vcombine.low %v8067_v55, %v8074_v54  ;;  %v8091_v50 = vrot.slane %v8077_v39, %v32680_v28  ;;  %v8162_v6 = vcombine.low %v7024_v9, %v7028_v52  ;;  %v5753_v17 = vcombine.high %v30036_v51, %v30036_v51  ;;  %24737 = vmatprep.mubr.msk.f32.mxu0 %vm7365_vm3, %v8912_v31 }
 0x3b8   : > { %v8169_v33 = vrot.slane %v8161_v61, %v32680_v28  ;;  %v8178_v35 = vcombine.low %v7032_v11, %v7036_v20  ;;  %v8179_v48 = vcombine.low %v7040_v26, %v7044_v21  ;;  %v5760_v45 = vrot.slane %v30036_v51, %v32678_v41  ;;  %v8915_v26 = vld [vmem:[#allocation3 + $0x1f9] sm:$0xff] }
 0x3b9   : > { %v8092_v58 = vcombine.low %v8084_v38, %v8091_v50  ;;  %8672 = vst.msk [vmem:[#allocation3 + $0x2f9] sm:$0xff] %vm7365_vm3, %v8075_v2  ;;  %8676 = vst.msk [vmem:[#allocation3 + $0x321] sm:$0xff] %vm7365_vm3, %v8075_v2  ;;  %v8176_v53 = vrot.slane %v8162_v6, %v32680_v28  ;;  %v5767_v34 = vrot.slane %v5753_v17, %v32678_v41 }
 0x3ba   : > { %v30099_v24 = vpack.c.bf16 %v21772_v18, %v21771_v62  ;;  %v8186_v36 = vrot.slane %v8178_v35, %v32680_v28  ;;  %v8193_v13 = vrot.slane %v8179_v48, %v32680_v28  ;;  %v5768_v57 = vcombine.high %v5760_v45, %v5760_v45  ;;  %24738 = vmatmul.mubr.msk.f32.gmra.mrb[80].mxu0 %vm7365_vm3, %v8913_v15 }
 0x3bb   : > { %v5776_v51 = vrot.slane %v5760_v45, %v32678_v41  ;;  %8673 = vst.msk [vmem:[#allocation3 + $0x301] sm:$0xff] %vm7365_vm3, %v8092_v58  ;;  %8677 = vst.msk [vmem:[#allocation3 + $0x329] sm:$0xff] %vm7365_vm3, %v8092_v58  ;;  %v8177_v59 = vcombine.low %v8169_v33, %v8176_v53  ;;  %v5769_v42 = vcombine.high %v5767_v34, %v5767_v34 }
 0x3bc   : > { %v5783_v27 = vrot.slane %v5767_v34, %v32678_v41  ;;  %26738 = vmatprep.subr.bf16.mxu1 %v30099_v24  ;;  %v4732_v49 = vadd.f32 %v29858_v12, %v29625_v37  ;;  %v8194_v25 = vcombine.low %v8186_v36, %v8193_v13  ;;  %v5790_v4 = vrot.slane %v5768_v57, %v32678_v41  ;;  %v8914_v37 = vld [vmem:[#allocation3 + $0x1f1] sm:$0xff] }
 0x3bd   : > { %v5798_v5 = vcombine.high %v5776_v51, %v5776_v51  ;;  %v6984_v14 = vrot.slane %v5776_v51, %v32679_v19  ;;  %26742 = vmatpush3.bf16.msra.mxu1 %v30099_v24  ;;  %8682 = vst.msk [vmem:[#allocation3 + $0x359] sm:$0xff] %vm7365_vm3, %v8177_v59  ;;  %8686 = vst.msk [vmem:[#allocation3 + $0x381] sm:$0xff] %vm7365_vm3, %v8177_v59  ;;  %v5797_v16 = vrot.slane %v5769_v42, %v32678_v41  ;;  %v8917_v36 = vld [vmem:[#allocation3 + $0x211] sm:$0xff] }
 0x3be   : > { %v5799_v22 = vcombine.high %v5783_v27, %v5783_v27  ;;  %v7000_v43 = vrot.slane %v5783_v27, %v32679_v19  ;;  %v5900_v40 = vcombine.high %v4732_v49, %v4732_v49  ;;  %8683 = vst.msk [vmem:[#allocation3 + $0x361] sm:$0xff] %vm7365_vm3, %v8194_v25  ;;  %8687 = vst.msk [vmem:[#allocation3 + $0x389] sm:$0xff] %vm7365_vm3, %v8194_v25  ;;  %24740 = vmatprep.mubr.msk.f32.mxu0 %vm7365_vm3, %v8914_v37  ;;  %v21773_v42 = vld [vmem:[%s32531_s3 + $0xe0] sm:$0xff]  ;;  %v21774_v27 = vld [vmem:[%s32531_s3 + $0xe8] sm:$0xff] }
 0x3bf   : > { %v5800_v30 = vcombine.high %v5790_v4, %v5790_v4  ;;  %v6988_v46 = vrot.slane %v5790_v4, %v32679_v19  ;;  %v6992_v3 = vrot.slane %v5798_v5, %v32679_v19  ;;  %v5907_v55 = vrot.slane %v4732_v49, %v32678_v41  ;;  %24741 = vmatmul.mubr.msk.f32.gmra.mrb[82].mxu0 %vm7365_vm3, %v8915_v26  ;;  %v8918_v49 = vld [vmem:[#allocation3 + $0x219] sm:$0xff] }
 0x3c0   : > { %v5801_v56 = vcombine.high %v5797_v16, %v5797_v16  ;;  %v7004_v9 = vrot.slane %v5797_v16, %v32679_v19  ;;  %v7008_v52 = vrot.slane %v5799_v22, %v32679_v19  ;;  %v5914_v54 = vrot.slane %v5900_v40, %v32678_v41  ;;  %24743 = vmatprep.mubr.msk.f32.mxu0 %vm7365_vm3, %v8916_v1 }
 0x3c1   : > { %v6996_v39 = vrot.slane %v5800_v30, %v32679_v19  ;;  %v8127_v38 = vcombine.low %v6984_v14, %v6988_v46  ;;  %v5915_v11 = vcombine.high %v5907_v55, %v5907_v55  ;;  %v5923_v20 = vrot.slane %v5907_v55, %v32678_v41 }
 0x3c2   : > { %v7012_v21 = vrot.slane %v5801_v56, %v32679_v19  ;;  %v8144_v61 = vcombine.low %v7000_v43, %v7004_v9  ;;  %v5916_v62 = vcombine.high %v5914_v54, %v5914_v54  ;;  %v5930_v18 = vrot.slane %v5914_v54, %v32678_v41 }
 0x3c3   : > { %v8128_v2 = vcombine.low %v6992_v3, %v6996_v39  ;;  %v8135_v50 = vrot.slane %v8127_v38, %v32680_v28  ;;  %v5937_v6 = vrot.slane %v5915_v11, %v32678_v41  ;;  %v5945_v17 = vcombine.high %v5923_v20, %v5923_v20  ;;  %24744 = vmatmul.mubr.msk.f32.gmra.mrb[84].mxu0 %vm7365_vm3, %v8917_v36  ;;  %v8919_v3 = vld [vmem:[#allocation3 + $0x221] sm:$0xff] }
 0x3c4   : > { %v8145_v31 = vcombine.low %v7008_v52, %v7012_v21  ;;  %v8152_v33 = vrot.slane %v8144_v61, %v32680_v28  ;;  %v5944_v35 = vrot.slane %v5916_v62, %v32678_v41  ;;  %v5946_v48 = vcombine.high %v5930_v18, %v5930_v18  ;;  %24746 = vmatprep.mubr.msk.f32.mxu0 %vm7365_vm3, %v8918_v49  ;;  %v8920_v21 = vld [vmem:[#allocation3 + $0x231] sm:$0xff] }
 0x3c5   : > { %v8142_v45 = vrot.slane %v8128_v2, %v32680_v28  ;;  %v5947_v58 = vcombine.high %v5937_v6, %v5937_v6  ;;  %v7080_v53 = vrot.slane %v5923_v20, %v32679_v19  ;;  %v7084_v34 = vrot.slane %v5937_v6, %v32679_v19  ;;  %v8921_v2 = vld [vmem:[#allocation3 + $0x239] sm:$0xff] }
 0x3c6   : > { %v8159_v13 = vrot.slane %v8145_v31, %v32680_v28  ;;  %v5948_v57 = vcombine.high %v5944_v35, %v5944_v35  ;;  %v7088_v51 = vrot.slane %v5945_v17, %v32679_v19  ;;  %v7096_v59 = vrot.slane %v5930_v18, %v32679_v19 }
 0x3c7   : > { %v8143_v25 = vcombine.low %v8135_v50, %v8142_v45  ;;  %v7092_v4 = vrot.slane %v5947_v58, %v32679_v19  ;;  %v7100_v5 = vrot.slane %v5944_v35, %v32679_v19  ;;  %v7104_v14 = vrot.slane %v5946_v48, %v32679_v19  ;;  %24747 = vmatmul.mubr.msk.f32.gmra.mrb[86].mxu0 %vm7365_vm3, %v8919_v3 }
 0x3c8   : > { %v8160_v15 = vcombine.low %v8152_v33, %v8159_v13  ;;  %v7108_v16 = vrot.slane %v5948_v57, %v32679_v19  ;;  %v8229_v22 = vcombine.low %v7080_v53, %v7084_v34  ;;  %v4731_v43 = vadd.f32 %v29858_v12, %v29634_v60  ;;  %24749 = vmatprep.mubr.msk.f32.mxu0 %vm7365_vm3, %v8920_v21  ;;  %v8922_v33 = vld [vmem:[#allocation3 + $0x241] sm:$0xff] }
 0x3c9   : > { %8680 = vst.msk [vmem:[#allocation3 + $0x349] sm:$0xff] %vm7365_vm3, %v8143_v25  ;;  %8684 = vst.msk [vmem:[#allocation3 + $0x371] sm:$0xff] %vm7365_vm3, %v8143_v25  ;;  %v8230_v40 = vcombine.low %v7088_v51, %v7092_v4  ;;  %v8246_v37 = vcombine.low %v7096_v59, %v7100_v5  ;;  %v30159_v30 = vpack.c.bf16 %v21774_v27, %v21773_v42  ;;  %v8923_v27 = vld [vmem:[#allocation3 + $0x249] sm:$0xff] }
 0x3ca   : > { %v4734_v46 = vadd.f32 %v29858_v12, %v29685_v29  ;;  %8681 = vst.msk [vmem:[#allocation3 + $0x351] sm:$0xff] %vm7365_vm3, %v8160_v15  ;;  %8685 = vst.msk [vmem:[#allocation3 + $0x379] sm:$0xff] %vm7365_vm3, %v8160_v15  ;;  %v8237_v55 = vrot.slane %v8229_v22, %v32680_v28  ;;  %v8247_v56 = vcombine.low %v7104_v14, %v7108_v16  ;;  %v8924_v14 = vld [vmem:[#allocation3 + $0x259] sm:$0xff] }
 0x3cb   : > { %v5851_v60 = vcombine.high %v4731_v43, %v4731_v43  ;;  %v5858_v9 = vrot.slane %v4731_v43, %v32678_v41  ;;  %v8244_v52 = vrot.slane %v8230_v40, %v32680_v28  ;;  %v8254_v54 = vrot.slane %v8246_v37, %v32680_v28  ;;  %26739 = vmatprep.subr.bf16.mxu1 %v30159_v30 }
 0x3cc   : > { %v5998_v29 = vcombine.high %v4734_v46, %v4734_v46  ;;  %v6005_v39 = vrot.slane %v4734_v46, %v32678_v41  ;;  %v8261_v38 = vrot.slane %v8247_v56, %v32680_v28  ;;  %26743 = vmatpush3.bf16.msra.mxu1 %v30159_v30  ;;  %24750 = vmatmul.mubr.msk.f32.gmra.mrb[88].mxu0 %vm7365_vm3, %v8921_v2 }
 0x3cd   : > { %v5865_v11 = vrot.slane %v5851_v60, %v32678_v41  ;;  %v5866_v20 = vcombine.high %v5858_v9, %v5858_v9  ;;  %v5874_v26 = vrot.slane %v5858_v9, %v32678_v41  ;;  %v8245_v61 = vcombine.low %v8237_v55, %v8244_v52  ;;  %24752 = vmatprep.mubr.msk.f32.mxu0 %vm7365_vm3, %v8922_v33  ;;  %v8925_v52 = vld [vmem:[#allocation3 + $0x261] sm:$0xff] }
 0x3ce   : > { %v6012_v62 = vrot.slane %v5998_v29, %v32678_v41  ;;  %v6013_v18 = vcombine.high %v6005_v39, %v6005_v39  ;;  %v30178_v1 = vrot.slane %v6005_v39, %v32678_v41  ;;  %v8262_v50 = vcombine.low %v8254_v54, %v8261_v38 }
 0x3cf   : > { %v5867_v6 = vcombine.high %v5865_v11, %v5865_v11  ;;  %v5881_v17 = vrot.slane %v5865_v11, %v32678_v41  ;;  %v5888_v31 = vrot.slane %v5866_v20, %v32678_v41  ;;  %8690 = vst.msk [vmem:[#allocation3 + $0x3a9] sm:$0xff] %vm7365_vm3, %v8245_v61  ;;  %8694 = vst.msk [vmem:[#allocation3 + $0x3d1] sm:$0xff] %vm7365_vm3, %v8245_v61  ;;  %v21775_v11 = vld [vmem:[%s32531_s3 + $0xf0] sm:$0xff]  ;;  %v21776_v20 = vld [vmem:[%s32531_s3 + $0xf8] sm:$0xff] }
 0x3d0   : > { %v5896_v35 = vcombine.high %v5874_v26, %v5874_v26  ;;  %v7048_v48 = vrot.slane %v5874_v26, %v32679_v19  ;;  %v6014_v45 = vcombine.high %v6012_v62, %v6012_v62  ;;  %v6028_v58 = vrot.slane %v6012_v62, %v32678_v41  ;;  %8691 = vst.msk [vmem:[#allocation3 + $0x3b1] sm:$0xff] %vm7365_vm3, %v8262_v50  ;;  %v8926_v26 = vld [vmem:[#allocation3 + $0x269] sm:$0xff] }
 0x3d1   : > { %8695 = vst.msk [vmem:[#allocation3 + $0x3d9] sm:$0xff] %vm7365_vm3, %v8262_v50  ;;  %v5895_v53 = vrot.slane %v5867_v6, %v32678_v41  ;;  %v5897_v34 = vcombine.high %v5881_v17, %v5881_v17  ;;  %v5898_v36 = vcombine.high %v5888_v31, %v5888_v31  ;;  %v7052_v13 = vrot.slane %v5888_v31, %v32679_v19 }
 0x3d2   : > { %v7056_v57 = vrot.slane %v5896_v35, %v32679_v19  ;;  %v7064_v51 = vrot.slane %v5881_v17, %v32679_v19  ;;  %v6035_v59 = vrot.slane %v6013_v18, %v32678_v41  ;;  %v6042_v42 = vrot.slane %v6014_v45, %v32678_v41  ;;  %24753 = vmatmul.mubr.msk.f32.gmra.mrb[90].mxu0 %vm7365_vm3, %v8923_v27  ;;  %v8928_v27 = vld [vmem:[#allocation3 + $0x281] sm:$0xff] }
 0x3d3   : > { %v5899_v49 = vcombine.high %v5895_v53, %v5895_v53  ;;  %v7060_v25 = vrot.slane %v5898_v36, %v32679_v19  ;;  %v7068_v4 = vrot.slane %v5895_v53, %v32679_v19  ;;  %v7072_v5 = vrot.slane %v5897_v34, %v32679_v19  ;;  %24755 = vmatprep.mubr.msk.f32.mxu0 %vm7365_vm3, %v8924_v14  ;;  %v8929_v14 = vld [vmem:[#allocation3 + $0x289] sm:$0xff] }
 0x3d4   : > { %v8195_v15 = vcombine.low %v7048_v48, %v7052_v13  ;;  %v6043_v16 = vcombine.high %v30178_v1, %v30178_v1  ;;  %v6044_v22 = vcombine.high %v6028_v58, %v6028_v58  ;;  %v6045_v43 = vcombine.high %v6035_v59, %v6035_v59  ;;  %v8927_v48 = vld [vmem:[#allocation3 + $0x271] sm:$0xff] }
 0x3d5   : > { %v7076_v40 = vrot.slane %v5899_v49, %v32679_v19  ;;  %v8196_v37 = vcombine.low %v7056_v57, %v7060_v25  ;;  %v8212_v46 = vcombine.low %v7064_v51, %v7068_v4  ;;  %v6046_v3 = vcombine.high %v6042_v42, %v6042_v42 }
 0x3d6   : > { %v8203_v55 = vrot.slane %v8195_v15, %v32680_v28  ;;  %v7144_v56 = vrot.slane %v30178_v1, %v32679_v19  ;;  %v7148_v60 = vrot.slane %v6035_v59, %v32679_v19  ;;  %v7152_v9 = vrot.slane %v6043_v16, %v32679_v19  ;;  %24756 = vmatmul.mubr.msk.f32.gmra.mrb[92].mxu0 %vm7365_vm3, %v8925_v52 }
 0x3d7   : > { %v8210_v54 = vrot.slane %v8196_v37, %v32680_v28  ;;  %v8213_v29 = vcombine.low %v7072_v5, %v7076_v40  ;;  %v8220_v39 = vrot.slane %v8212_v46, %v32680_v28  ;;  %v7156_v38 = vrot.slane %v6045_v43, %v32679_v19  ;;  %24758 = vmatprep.mubr.msk.f32.mxu0 %vm7365_vm3, %v8926_v26  ;;  %v12584_v43 = vld [vmem:[#allocation3 + $0x220] sm:$0xff] }
 0x3d8   : > { %v7160_v21 = vrot.slane %v6028_v58, %v32679_v19  ;;  %v7164_v61 = vrot.slane %v6042_v42, %v32679_v19  ;;  %v7168_v62 = vrot.slane %v6044_v22, %v32679_v19  ;;  %v7172_v18 = vrot.slane %v6046_v3, %v32679_v19 }
 0x3d9   : > { %v8211_v1 = vcombine.low %v8203_v55, %v8210_v54  ;;  %v8227_v2 = vrot.slane %v8213_v29, %v32680_v28  ;;  %v8297_v50 = vcombine.low %v7144_v56, %v7148_v60  ;;  %v8298_v6 = vcombine.low %v7152_v9, %v7156_v38  ;;  %v8930_v55 = vld [vmem:[#allocation3 + $0x291] sm:$0xff] }
 0x3da   : > { %v8314_v17 = vcombine.low %v7160_v21, %v7164_v61  ;;  %v8315_v31 = vcombine.low %v7168_v62, %v7172_v18  ;;  %v4733_v33 = vadd.f32 %v29858_v12, %v29693_v10  ;;  %v30228_v35 = vpack.c.bf16 %v21776_v20, %v21775_v11  ;;  %24759 = vmatmul.mubr.msk.f32.gmra.mrb[94].mxu0 %vm7365_vm3, %v8927_v48  ;;  %v8931_v11 = vld [vmem:[#allocation3 + $0x299] sm:$0xff]  ;;  %v8932_v62 = vld [vmem:[#allocation3 + $0x2a9] sm:$0xff] }
 0x3db   : > { %v8228_v45 = vcombine.low %v8220_v39, %v8227_v2  ;;  %8688 = vst.msk [vmem:[#allocation3 + $0x399] sm:$0xff] %vm7365_vm3, %v8211_v1  ;;  %8692 = vst.msk [vmem:[#allocation3 + $0x3c1] sm:$0xff] %vm7365_vm3, %v8211_v1  ;;  %v8305_v58 = vrot.slane %v8297_v50, %v32680_v28  ;;  %v8312_v53 = vrot.slane %v8298_v6, %v32680_v28  ;;  %24761 = vmatprep.mubr.msk.f32.mxu0 %vm7365_vm3, %v8928_v27 }
 0x3dc   : > { %v4736_v34 = vadd.f32 %v29858_v12, %v29743_v23  ;;  %v8322_v36 = vrot.slane %v8314_v17, %v32680_v28  ;;  %v8329_v10 = vrot.slane %v8315_v31, %v32680_v28  ;;  %v5949_v13 = vcombine.high %v4733_v33, %v4733_v33  ;;  %26740 = vmatprep.subr.bf16.mxu1 %v30228_v35  ;;  %v30248_v12 = vld [vmem:[%s32530_s2] ss:$0 sm:$0xff] }
 0x3dd   : > { %v5956_v57 = vrot.slane %v4733_v33, %v32678_v41  ;;  %8689 = vst.msk [vmem:[#allocation3 + $0x3a1] sm:$0xff] %vm7365_vm3, %v8228_v45  ;;  %8693 = vst.msk [vmem:[#allocation3 + $0x3c9] sm:$0xff] %vm7365_vm3, %v8228_v45  ;;  %v8313_v51 = vcombine.low %v8305_v58, %v8312_v53  ;;  %26744 = vmatpush3.bf16.msra.mxu1 %v30228_v35  ;;  %v30252_v42 = vadd.f32 %v30248_v12, %v29756_v8 }
 0x3de   : > { %v6096_v59 = vcombine.high %v4736_v34, %v4736_v34  ;;  %v6103_v23 = vrot.slane %v4736_v34, %v32678_v41  ;;  %v8330_v49 = vcombine.low %v8322_v36, %v8329_v10  ;;  %v5963_v25 = vrot.slane %v5949_v13, %v32678_v41  ;;  %24762 = vmatmul.mubr.msk.f32.gmra.mrb[96].mxu0 %vm7365_vm3, %v8929_v14  ;;  %v8933_v34 = vld [vmem:[#allocation3 + $0x2b1] sm:$0xff] }
 0x3df   : > { %v5964_v4 = vcombine.high %v5956_v57, %v5956_v57  ;;  %v5972_v5 = vrot.slane %v5956_v57, %v32678_v41  ;;  %8698 = vst.msk [vmem:[#allocation3 + $0x3f9] sm:$0xff] %vm7365_vm3, %v8313_v51  ;;  %8702 = vst.msk [vmem:[#allocation3 + $0x421] sm:$0xff] %vm7365_vm3, %v8313_v51  ;;  %v6047_v22 = vcombine.high %v30252_v42, %v30252_v42  ;;  %24764 = vmatprep.mubr.msk.f32.mxu0 %vm7365_vm3, %v8930_v55  ;;  %v8934_v51 = vld [vmem:[#allocation3 + $0x2b9] sm:$0xff] }
 0x3e0   : > { %v6110_v15 = vrot.slane %v6096_v59, %v32678_v41  ;;  %v6111_v16 = vcombine.high %v6103_v23, %v6103_v23  ;;  %v6119_v8 = vrot.slane %v6103_v23, %v32678_v41  ;;  %8699 = vst.msk [vmem:[#allocation3 + $0x401] sm:$0xff] %vm7365_vm3, %v8330_v49  ;;  %8703 = vst.msk [vmem:[#allocation3 + $0x429] sm:$0xff] %vm7365_vm3, %v8330_v49  ;;  %25365 = vmatmul.mubr.msk.f32.vlgmr.msra.gmra.mrb[0].mxu1 %vm7365_vm3, %v12584_v43 }
 0x3e1   : > { %v5965_v40 = vcombine.high %v5963_v25, %v5963_v25  ;;  %v5979_v37 = vrot.slane %v5963_v25, %v32678_v41  ;;  %v5986_v46 = vrot.slane %v5964_v4, %v32678_v41  ;;  %v5994_v3 = vcombine.high %v5972_v5, %v5972_v5 }
 0x3e2   : > { %v7112_v56 = vrot.slane %v5972_v5, %v32679_v19  ;;  %v6112_v60 = vcombine.high %v6110_v15, %v6110_v15  ;;  %v6126_v9 = vrot.slane %v6110_v15, %v32678_v41  ;;  %v6133_v52 = vrot.slane %v6111_v16, %v32678_v41  ;;  %24765 = vmatmul.mubr.msk.f32.gmra.mrb[98].mxu0 %vm7365_vm3, %v8931_v11  ;;  %v21906_v11 = vld [vmem:[%s32531_s3 + $0x108] sm:$0xff] }
 0x3e3   : > { %v5993_v54 = vrot.slane %v5965_v40, %v32678_v41  ;;  %v5995_v29 = vcombine.high %v5979_v37, %v5979_v37  ;;  %v5996_v39 = vcombine.high %v5986_v46, %v5986_v46  ;;  %v7116_v38 = vrot.slane %v5986_v46, %v32679_v19  ;;  %24767 = vmatprep.mubr.msk.f32.mxu0 %vm7365_vm3, %v8932_v62  ;;  %v8935_v40 = vld [vmem:[#allocation3 + $0x2c1] sm:$0xff]  ;;  %v8937_v62 = vld [vmem:[#allocation3 + $0x2d9] sm:$0xff] }
 0x3e4   : > { %v7120_v20 = vrot.slane %v5994_v3, %v32679_v19  ;;  %v7128_v26 = vrot.slane %v5979_v37, %v32679_v19  ;;  %v6140_v21 = vrot.slane %v6112_v60, %v32678_v41  ;;  %v6141_v61 = vcombine.high %v6119_v8, %v6119_v8 }
 0x3e5   : > { %v5997_v18 = vcombine.high %v5993_v54, %v5993_v54  ;;  %v7124_v1 = vrot.slane %v5996_v39, %v32679_v19  ;;  %v7132_v2 = vrot.slane %v5993_v54, %v32679_v19  ;;  %v7136_v50 = vrot.slane %v5995_v29, %v32679_v19 }
 0x3e6   : > { %v8263_v6 = vcombine.low %v7112_v56, %v7116_v38  ;;  %v6142_v17 = vcombine.high %v6126_v9, %v6126_v9  ;;  %v6143_v31 = vcombine.high %v6133_v52, %v6133_v52  ;;  %v6144_v33 = vcombine.high %v6140_v21, %v6140_v21  ;;  %24768 = vmatmul.mubr.msk.f32.gmra.mrb[100].mxu0 %vm7365_vm3, %v8933_v34  ;;  %v8936_v56 = vld [vmem:[#allocation3 + $0x2d1] sm:$0xff] }
 0x3e7   : > { %v7140_v48 = vrot.slane %v5997_v18, %v32679_v19  ;;  %v8264_v45 = vcombine.low %v7120_v20, %v7124_v1  ;;  %v8280_v58 = vcombine.low %v7128_v26, %v7132_v2  ;;  %v7208_v53 = vrot.slane %v6119_v8, %v32679_v19  ;;  %24770 = vmatprep.mubr.msk.f32.mxu0 %vm7365_vm3, %v8934_v51  ;;  %v21905_v38 = vld [vmem:[%s32531_s3 + $0x100] sm:$0xff] }
 0x3e8   : > { %v8271_v36 = vrot.slane %v8263_v6, %v32680_v28  ;;  %v7212_v10 = vrot.slane %v6133_v52, %v32679_v19  ;;  %v7216_v13 = vrot.slane %v6141_v61, %v32679_v19  ;;  %v7220_v57 = vrot.slane %v6143_v31, %v32679_v19  ;;  %v8938_v6 = vld [vmem:[#allocation3 + $0x2e1] sm:$0xff] }
 0x3e9   : > { %v8278_v59 = vrot.slane %v8264_v45, %v32680_v28  ;;  %v8281_v23 = vcombine.low %v7136_v50, %v7140_v48  ;;  %v8288_v27 = vrot.slane %v8280_v58, %v32680_v28  ;;  %v7224_v49 = vrot.slane %v6126_v9, %v32679_v19 }
 0x3ea   : > { %v7228_v25 = vrot.slane %v6140_v21, %v32679_v19  ;;  %v7232_v4 = vrot.slane %v6142_v17, %v32679_v19  ;;  %v7236_v5 = vrot.slane %v6144_v33, %v32679_v19  ;;  %v8365_v14 = vcombine.low %v7208_v53, %v7212_v10  ;;  %24771 = vmatmul.mubr.msk.f32.gmra.mrb[102].mxu0 %vm7365_vm3, %v8935_v40 }
 0x3eb   : > { %v8279_v15 = vcombine.low %v8271_v36, %v8278_v59  ;;  %v8295_v16 = vrot.slane %v8281_v23, %v32680_v28  ;;  %v8366_v8 = vcombine.low %v7216_v13, %v7220_v57  ;;  %v6054_v43 = vrot.slane %v30252_v42, %v32678_v41  ;;  %24773 = vmatprep.mubr.msk.f32.mxu0 %vm7365_vm3, %v8936_v56  ;;  %v8941_v56 = vld [vmem:[#allocation3 + $0x301] sm:$0xff] }
 0x3ec   : > { %v8373_v37 = vrot.slane %v8365_v14, %v32680_v28  ;;  %v8382_v46 = vcombine.low %v7224_v49, %v7228_v25  ;;  %v8383_v3 = vcombine.low %v7232_v4, %v7236_v5  ;;  %v6061_v55 = vrot.slane %v6047_v22, %v32678_v41  ;;  %v8940_v4 = vld [vmem:[#allocation3 + $0x2f9] sm:$0xff] }
 0x3ed   : > { %v8296_v60 = vcombine.low %v8288_v27, %v8295_v16  ;;  %8696 = vst.msk [vmem:[#allocation3 + $0x3e9] sm:$0xff] %vm7365_vm3, %v8279_v15  ;;  %8700 = vst.msk [vmem:[#allocation3 + $0x411] sm:$0xff] %vm7365_vm3, %v8279_v15  ;;  %v8380_v9 = vrot.slane %v8366_v8, %v32680_v28  ;;  %v6062_v52 = vcombine.high %v6054_v43, %v6054_v43 }
 0x3ee   : > { %v6070_v54 = vrot.slane %v6054_v43, %v32678_v41  ;;  %v8390_v29 = vrot.slane %v8382_v46, %v32680_v28  ;;  %v8397_v42 = vrot.slane %v8383_v3, %v32680_v28  ;;  %v6063_v22 = vcombine.high %v6061_v55, %v6061_v55  ;;  %24774 = vmatmul.mubr.msk.f32.gmra.mrb[104].mxu0 %vm7365_vm3, %v8937_v62 }
 0x3ef   : > { %v6077_v39 = vrot.slane %v6061_v55, %v32678_v41  ;;  %8697 = vst.msk [vmem:[#allocation3 + $0x3f1] sm:$0xff] %vm7365_vm3, %v8296_v60  ;;  %8701 = vst.msk [vmem:[#allocation3 + $0x419] sm:$0xff] %vm7365_vm3, %v8296_v60  ;;  %v8381_v20 = vcombine.low %v8373_v37, %v8380_v9  ;;  %v6084_v26 = vrot.slane %v6062_v52, %v32678_v41  ;;  %24776 = vmatprep.mubr.msk.f32.mxu0 %vm7365_vm3, %v8938_v6 }
 0x3f0   : > { %v6092_v21 = vcombine.high %v6070_v54, %v6070_v54  ;;  %v7176_v61 = vrot.slane %v6070_v54, %v32679_v19  ;;  %v8398_v18 = vcombine.low %v8390_v29, %v8397_v42  ;;  %v6091_v1 = vrot.slane %v6063_v22, %v32678_v41  ;;  %v8942_v29 = vld [vmem:[#allocation3 + $0x309] sm:$0xff] }
 0x3f1   : > { %v6093_v2 = vcombine.high %v6077_v39, %v6077_v39  ;;  %v7192_v50 = vrot.slane %v6077_v39, %v32679_v19  ;;  %8706 = vst.msk [vmem:[#allocation3 + $0x449] sm:$0xff] %vm7365_vm3, %v8381_v20  ;;  %8710 = vst.msk [vmem:[#allocation3 + $0x471] sm:$0xff] %vm7365_vm3, %v8381_v20  ;;  %v6094_v17 = vcombine.high %v6084_v26, %v6084_v26 }
 0x3f2   : > { %v7180_v31 = vrot.slane %v6084_v26, %v32679_v19  ;;  %v30331_v33 = vrot.slane %v6092_v21, %v32679_v19  ;;  %v26657_v48 = vpack.c.bf16 %v21906_v11, %v21905_v38  ;;  %8707 = vst.msk [vmem:[#allocation3 + $0x451] sm:$0xff] %vm7365_vm3, %v8398_v18  ;;  %8711 = vst.msk [vmem:[#allocation3 + $0x479] sm:$0xff] %vm7365_vm3, %v8398_v18  ;;  %v12585_v21 = vld [vmem:[#allocation3 + $0x230] sm:$0xff] }
 0x3f3   : > { %v6095_v45 = vcombine.high %v6091_v1, %v6091_v1  ;;  %v7196_v58 = vrot.slane %v6091_v1, %v32679_v19  ;;  %v30338_v53 = vrot.slane %v6093_v2, %v32679_v19  ;;  %v30342_v34 = vadd.f32 %v30248_v12, %v29783_v7  ;;  %25367 = vmatprep.mubr.msk.f32.mxu1 %vm7365_vm3, %v12585_v21 }
 0x3f4   : > { %v30345_v36 = vrot.slane %v6094_v17, %v32679_v19  ;;  %v30347_v10 = vcombine.low %v7176_v61, %v7180_v31  ;;  %26658 = vmatprep.subr.bf16.mxu1 %v26657_v48  ;;  %v30351_v13 = vadd.f32 %v30248_v12, %v29881_v32  ;;  %v8939_v32 = vld [vmem:[#allocation3 + $0x2e9] sm:$0xff] }
 0x3f5   : > { %v30354_v57 = vrot.slane %v6095_v45, %v32679_v19  ;;  %v30356_v51 = vcombine.low %v7192_v50, %v7196_v58  ;;  %26660 = vmatpush3.bf16.msra.mxu1 %v26657_v48  ;;  %v6194_v7 = vcombine.high %v30342_v34, %v30342_v34  ;;  %v30362_v59 = vrot.slane %v30342_v34, %v32678_v41  ;;  %v12586_v50 = vld [vmem:[#allocation3 + $0x238] sm:$0xff]  ;;  %v12587_v48 = vld [vmem:[#allocation3 + $0x240] sm:$0xff] }
 0x3f6   : > { %v8332_v23 = vcombine.low %v30331_v33, %v30345_v36  ;;  %v8339_v27 = vrot.slane %v30347_v10, %v32680_v28  ;;  %v6145_v49 = vcombine.high %v30351_v13, %v30351_v13  ;;  %v6152_v25 = vrot.slane %v30351_v13, %v32678_v41  ;;  %24777 = vmatmul.mubr.msk.f32.gmra.mrb[106].mxu0 %vm7365_vm3, %v8939_v32  ;;  %v8943_v36 = vld [vmem:[#allocation3 + $0x311] sm:$0xff] }
 0x3f7   : > { %v8349_v5 = vcombine.low %v30338_v53, %v30354_v57  ;;  %v8356_v47 = vrot.slane %v30356_v51, %v32680_v28  ;;  %v6208_v14 = vrot.slane %v6194_v7, %v32678_v41  ;;  %v6209_v15 = vcombine.high %v30362_v59, %v30362_v59  ;;  %24779 = vmatprep.mubr.msk.f32.mxu0 %vm7365_vm3, %v8940_v4  ;;  %v8944_v7 = vld [vmem:[#allocation3 + $0x321] sm:$0xff] }
 0x3f8   : > { %v8346_v16 = vrot.slane %v8332_v23, %v32680_v28  ;;  %v6217_v8 = vrot.slane %v30362_v59, %v32678_v41  ;;  %v6159_v43 = vrot.slane %v6145_v49, %v32678_v41  ;;  %v6160_v40 = vcombine.high %v6152_v25, %v6152_v25  ;;  %25368 = vmatmul.mubr.msk.f32.gmra.mrb[2].mxu1 %vm7365_vm3, %v12586_v50  ;;  %v12588_v49 = vld [vmem:[#allocation3 + $0x248] sm:$0xff] }
 0x3f9   : > { %v8363_v37 = vrot.slane %v8349_v5, %v32680_v28  ;;  %v6210_v46 = vcombine.high %v6208_v14, %v6208_v14  ;;  %v6224_v3 = vrot.slane %v6208_v14, %v32678_v41  ;;  %v6231_v55 = vrot.slane %v6209_v15, %v32678_v41  ;;  %25370 = vmatprep.mubr.msk.f32.mxu1 %vm7365_vm3, %v12587_v48  ;;  %v12589_v14 = vld [vmem:[#allocation3 + $0x258] sm:$0xff]  ;;  %v21907_v15 = vld [vmem:[%s32531_s3 + $0x110] sm:$0xff]  ;;  %v12592_v48 = vld [vmem:[#allocation3 + $0x270] sm:$0xff] }
 0x3fa   : > { %v8347_v60 = vcombine.low %v8339_v27, %v8346_v16  ;;  %v6239_v9 = vcombine.high %v6217_v8, %v6217_v8  ;;  %v7272_v52 = vrot.slane %v6217_v8, %v32679_v19  ;;  %v6161_v54 = vcombine.high %v6159_v43, %v6159_v43  ;;  %24780 = vmatmul.mubr.msk.f32.gmra.mrb[108].mxu0 %vm7365_vm3, %v8941_v56  ;;  %v21908_v16 = vld [vmem:[%s32531_s3 + $0x118] sm:$0xff] }
 0x3fb   : > { %v8364_v42 = vcombine.low %v8356_v47, %v8363_v37  ;;  %v6238_v22 = vrot.slane %v6210_v46, %v32678_v41  ;;  %v6240_v39 = vcombine.high %v6224_v3, %v6224_v3  ;;  %v6241_v38 = vcombine.high %v6231_v55, %v6231_v55  ;;  %24782 = vmatprep.mubr.msk.f32.mxu0 %vm7365_vm3, %v8942_v29  ;;  %v8945_v46 = vld [vmem:[#allocation3 + $0x329] sm:$0xff] }
 0x3fc   : > { %8704 = vst.msk [vmem:[#allocation3 + $0x439] sm:$0xff] %vm7365_vm3, %v8347_v60  ;;  %8708 = vst.msk [vmem:[#allocation3 + $0x461] sm:$0xff] %vm7365_vm3, %v8347_v60  ;;  %v7276_v11 = vrot.slane %v6231_v55, %v32679_v19  ;;  %v7280_v20 = vrot.slane %v6239_v9, %v32679_v19  ;;  %v7288_v26 = vrot.slane %v6224_v3, %v32679_v19  ;;  %25371 = vmatmul.mubr.msk.f32.gmra.mrb[4].mxu1 %vm7365_vm3, %v12588_v49  ;;  %v8946_v9 = vld [vmem:[#allocation3 + $0x331] sm:$0xff] }
 0x3fd   : > { %v6168_v61 = vrot.slane %v6152_v25, %v32678_v41  ;;  %8705 = vst.msk [vmem:[#allocation3 + $0x441] sm:$0xff] %vm7365_vm3, %v8364_v42  ;;  %8709 = vst.msk [vmem:[#allocation3 + $0x469] sm:$0xff] %vm7365_vm3, %v8364_v42  ;;  %v6242_v62 = vcombine.high %v6238_v22, %v6238_v22  ;;  %v7284_v18 = vrot.slane %v6241_v38, %v32679_v19  ;;  %25373 = vmatprep.mubr.msk.f32.mxu1 %vm7365_vm3, %v12589_v14  ;;  %v12590_v42 = vld [vmem:[#allocation3 + $0x260] sm:$0xff] }
 0x3fe   : > { %v7292_v1 = vrot.slane %v6238_v22, %v32679_v19  ;;  %v7296_v2 = vrot.slane %v6240_v39, %v32679_v19  ;;  %v8433_v6 = vcombine.low %v7272_v52, %v7276_v11  ;;  %v6175_v17 = vrot.slane %v6159_v43, %v32678_v41  ;;  %24783 = vmatmul.mubr.msk.f32.gmra.mrb[110].mxu0 %vm7365_vm3, %v8943_v36  ;;  %v21909_v39 = vld [vmem:[%s32531_s3 + $0x120] sm:$0xff]  ;;  %v12593_v36 = vld [vmem:[#allocation3 + $0x280] sm:$0xff] }
 0x3ff   : > { %v6182_v31 = vrot.slane %v6160_v40, %v32678_v41  ;;  %v6189_v33 = vrot.slane %v6161_v54, %v32678_v41  ;;  %v7300_v45 = vrot.slane %v6242_v62, %v32679_v19  ;;  %v8434_v58 = vcombine.low %v7280_v20, %v7284_v18  ;;  %24785 = vmatprep.mubr.msk.f32.mxu0 %vm7365_vm3, %v8944_v7 }
 0x400   : > { %v8450_v53 = vcombine.low %v7288_v26, %v7292_v1  ;;  %v6190_v34 = vcombine.high %v6168_v61, %v6168_v61  ;;  %v8441_v10 = vrot.slane %v8433_v6, %v32680_v28  ;;  %v6191_v13 = vcombine.high %v6175_v17, %v6175_v17  ;;  %25374 = vmatmul.mubr.msk.f32.gmra.mrb[6].mxu1 %vm7365_vm3, %v12590_v42 }
 0x401   : > { %v6192_v57 = vcombine.high %v6182_v31, %v6182_v31  ;;  %v6193_v51 = vcombine.high %v6189_v33, %v6189_v33  ;;  %v8448_v59 = vrot.slane %v8434_v58, %v32680_v28  ;;  %v8451_v32 = vcombine.low %v7296_v2, %v7300_v45 }
 0x402   : > { %v8458_v23 = vrot.slane %v8450_v53, %v32680_v28  ;;  %v7240_v27 = vrot.slane %v6168_v61, %v32679_v19  ;;  %v7244_v25 = vrot.slane %v6182_v31, %v32679_v19  ;;  %v7248_v4 = vrot.slane %v6190_v34, %v32679_v19  ;;  %24786 = vmatmul.mubr.msk.f32.gmra.mrb[112].mxu0 %vm7365_vm3, %v8945_v46 }
 0x403   : > { %v7252_v5 = vrot.slane %v6192_v57, %v32679_v19  ;;  %v7256_v47 = vrot.slane %v6175_v17, %v32679_v19  ;;  %v8449_v8 = vcombine.low %v8441_v10, %v8448_v59  ;;  %v8465_v43 = vrot.slane %v8451_v32, %v32680_v28  ;;  %24788 = vmatprep.mubr.msk.f32.mxu0 %vm7365_vm3, %v8946_v9 }
 0x404   : > { %v7260_v40 = vrot.slane %v6189_v33, %v32679_v19  ;;  %v7264_v37 = vrot.slane %v6191_v13, %v32679_v19  ;;  %v7268_v3 = vrot.slane %v6193_v51, %v32679_v19  ;;  %v8399_v55 = vcombine.low %v7240_v27, %v7244_v25 }
 0x405   : > { %v8400_v56 = vcombine.low %v7248_v4, %v7252_v5  ;;  %v4740_v60 = vadd.f32 %v30248_v12, %v29902_v0  ;;  %v8466_v52 = vcombine.low %v8458_v23, %v8465_v43  ;;  %8714 = vst.msk [vmem:[#allocation3 + $0x499] sm:$0xff] %vm7365_vm3, %v8449_v8  ;;  %8718 = vst.msk [vmem:[#allocation3 + $0x4c1] sm:$0xff] %vm7365_vm3, %v8449_v8  ;;  %v21910_v0 = vld [vmem:[%s32531_s3 + $0x128] sm:$0xff]  ;;  %v12594_v5 = vld [vmem:[#allocation3 + $0x288] sm:$0xff] }
 0x406   : > { %v8416_v54 = vcombine.low %v7256_v47, %v7260_v40  ;;  %v4739_v29 = vadd.f32 %v30248_v12, %v29947_v44  ;;  %v26661_v22 = vpack.c.bf16 %v21908_v16, %v21907_v15  ;;  %v8407_v38 = vrot.slane %v8399_v55, %v32680_v28  ;;  %v12591_v44 = vld [vmem:[#allocation3 + $0x268] sm:$0xff]  ;;  %v12595_v8 = vld [vmem:[#allocation3 + $0x290] sm:$0xff] }
 0x407   : > { %v8414_v11 = vrot.slane %v8400_v56, %v32680_v28  ;;  %v8417_v20 = vcombine.low %v7264_v37, %v7268_v3  ;;  %v6292_v26 = vcombine.high %v4740_v60, %v4740_v60  ;;  %8715 = vst.msk [vmem:[#allocation3 + $0x4a1] sm:$0xff] %vm7365_vm3, %v8466_v52  ;;  %8719 = vst.msk [vmem:[#allocation3 + $0x4c9] sm:$0xff] %vm7365_vm3, %v8466_v52  ;;  %25376 = vmatprep.mubr.msk.f32.mxu1 %vm7365_vm3, %v12591_v44  ;;  %v8947_v3 = vld [vmem:[#allocation3 + $0x339] sm:$0xff]  ;;  %v8948_v52 = vld [vmem:[#allocation3 + $0x349] sm:$0xff] }
 0x408   : > { %v8424_v12 = vrot.slane %v8416_v54, %v32680_v28  ;;  %v6299_v21 = vrot.slane %v4740_v60, %v32678_v41  ;;  %v6243_v61 = vcombine.high %v4739_v29, %v4739_v29  ;;  %v6250_v62 = vrot.slane %v4739_v29, %v32678_v41  ;;  %26662 = vmatprep.subr.bf16.mxu1 %v26661_v22  ;;  %v21912_v44 = vld [vmem:[%s32531_s3 + $0x138] sm:$0xff] }
 0x409   : > { %v8415_v18 = vcombine.low %v8407_v38, %v8414_v11  ;;  %v8431_v1 = vrot.slane %v8417_v20, %v32680_v28  ;;  %v6306_v2 = vrot.slane %v6292_v26, %v32678_v41  ;;  %v26665_v50 = vpack.c.bf16 %v21910_v0, %v21909_v39  ;;  %26664 = vmatpush3.bf16.msra.mxu1 %v26661_v22  ;;  %v12596_v22 = vld [vmem:[#allocation3 + $0x298] sm:$0xff]  ;;  %v12597_v20 = vld [vmem:[#allocation3 + $0x2a8] sm:$0xff]  ;;  %v21911_v26 = vld [vmem:[%s32531_s3 + $0x130] sm:$0xff] }
 0x40a   : > { %v6307_v6 = vcombine.high %v6299_v21, %v6299_v21  ;;  %v6315_v17 = vrot.slane %v6299_v21, %v32678_v41  ;;  %v6257_v31 = vrot.slane %v6243_v61, %v32678_v41  ;;  %v6258_v33 = vcombine.high %v6250_v62, %v6250_v62  ;;  %25377 = vmatmul.mubr.msk.f32.gmra.mrb[8].mxu1 %vm7365_vm3, %v12592_v48 }
 0x40b   : > { %v8432_v45 = vcombine.low %v8424_v12, %v8431_v1  ;;  %8712 = vst.msk [vmem:[#allocation3 + $0x489] sm:$0xff] %vm7365_vm3, %v8415_v18  ;;  %8716 = vst.msk [vmem:[#allocation3 + $0x4b1] sm:$0xff] %vm7365_vm3, %v8415_v18  ;;  %v6308_v58 = vcombine.high %v6306_v2, %v6306_v2  ;;  %v6322_v53 = vrot.slane %v6306_v2, %v32678_v41  ;;  %25379 = vmatprep.mubr.msk.f32.mxu1 %vm7365_vm3, %v12593_v36  ;;  %v8949_v18 = vld [vmem:[#allocation3 + $0x351] sm:$0xff] }
 0x40c   : > { %v6266_v34 = vrot.slane %v6250_v62, %v32678_v41  ;;  %v6329_v10 = vrot.slane %v6307_v6, %v32678_v41  ;;  %v6337_v13 = vcombine.high %v6315_v17, %v6315_v17  ;;  %v7336_v57 = vrot.slane %v6315_v17, %v32679_v19  ;;  %26666 = vmatprep.subr.bf16.mxu1 %v26665_v50  ;;  %v8950_v17 = vld [vmem:[#allocation3 + $0x359] sm:$0xff] }
 0x40d   : > { %v6259_v51 = vcombine.high %v6257_v31, %v6257_v31  ;;  %8713 = vst.msk [vmem:[#allocation3 + $0x491] sm:$0xff] %vm7365_vm3, %v8432_v45  ;;  %8717 = vst.msk [vmem:[#allocation3 + $0x4b9] sm:$0xff] %vm7365_vm3, %v8432_v45  ;;  %v6336_v7 = vrot.slane %v6308_v58, %v32678_v41  ;;  %v6338_v59 = vcombine.high %v6322_v53, %v6322_v53  ;;  %26668 = vmatpush3.bf16.msra.mxu1 %v26665_v50  ;;  %v12598_v58 = vld [vmem:[#allocation3 + $0x2b0] sm:$0xff] }
 0x40e   : > { %v7352_v32 = vrot.slane %v6322_v53, %v32679_v19  ;;  %v6273_v23 = vrot.slane %v6257_v31, %v32678_v41  ;;  %v6339_v27 = vcombine.high %v6329_v10, %v6329_v10  ;;  %v7340_v49 = vrot.slane %v6329_v10, %v32679_v19  ;;  %25380 = vmatmul.mubr.msk.f32.gmra.mrb[10].mxu1 %vm7365_vm3, %v12594_v5  ;;  %v22041_v31 = vld [vmem:[%s32531_s3 + $0x140] sm:$0xff]  ;;  %v12602_v5 = vld [vmem:[#allocation3 + $0x2d8] sm:$0xff] }
 0x40f   : > { %v7344_v25 = vrot.slane %v6337_v13, %v32679_v19  ;;  %v6280_v4 = vrot.slane %v6258_v33, %v32678_v41  ;;  %v6340_v47 = vcombine.high %v6336_v7, %v6336_v7  ;;  %v7356_v14 = vrot.slane %v6336_v7, %v32679_v19  ;;  %25382 = vmatprep.mubr.msk.f32.mxu1 %vm7365_vm3, %v12595_v8  ;;  %v22042_v33 = vld [vmem:[%s32531_s3 + $0x148] sm:$0xff] }
 0x410   : > { %v7360_v15 = vrot.slane %v6338_v59, %v32679_v19  ;;  %v6287_v16 = vrot.slane %v6259_v51, %v32678_v41  ;;  %v7348_v43 = vrot.slane %v6339_v27, %v32679_v19  ;;  %v8501_v40 = vcombine.low %v7336_v57, %v7340_v49  ;;  %24789 = vmatmul.mubr.msk.f32.gmra.mrb[114].mxu0 %vm7365_vm3, %v8947_v3  ;;  %v12599_v57 = vld [vmem:[#allocation3 + $0x2b8] sm:$0xff]  ;;  %v8951_v51 = vld [vmem:[#allocation3 + $0x361] sm:$0xff] }
 0x411   : > { %v6288_v37 = vcombine.high %v6266_v34, %v6266_v34  ;;  %v6289_v46 = vcombine.high %v6273_v23, %v6273_v23  ;;  %v7364_v55 = vrot.slane %v6340_v47, %v32679_v19  ;;  %v8518_v56 = vcombine.low %v7352_v32, %v7356_v14  ;;  %24791 = vmatprep.mubr.msk.f32.mxu0 %vm7365_vm3, %v8948_v52  ;;  %v12600_v27 = vld [vmem:[#allocation3 + $0x2c0] sm:$0xff]  ;;  %v8955_v14 = vld [vmem:[#allocation3 + $0x389] sm:$0xff]  ;;  %v12605_v8 = vld [vmem:[#allocation3 + $0x2f8] sm:$0xff] }
 0x412   : > { %v6290_v60 = vcombine.high %v6280_v4, %v6280_v4  ;;  %v6291_v9 = vcombine.high %v6287_v16, %v6287_v16  ;;  %v8502_v41 = vcombine.low %v7344_v25, %v7348_v43  ;;  %v8509_v54 = vrot.slane %v8501_v40, %v32680_v28  ;;  %25383 = vmatmul.mubr.msk.f32.gmra.mrb[12].mxu1 %vm7365_vm3, %v12596_v22  ;;  %v12601_v25 = vld [vmem:[#allocation3 + $0x2d0] sm:$0xff]  ;;  %v12603_v47 = vld [vmem:[#allocation3 + $0x2e0] sm:$0xff]  ;;  %v12612_v22 = vld [vmem:[#allocation3 + $0x338] sm:$0xff] }
 0x413   : > { %v7304_v29 = vrot.slane %v6266_v34, %v32679_v19  ;;  %v7308_v42 = vrot.slane %v6280_v4, %v32679_v19  ;;  %v8519_v39 = vcombine.low %v7360_v15, %v7364_v55  ;;  %v8526_v0 = vrot.slane %v8518_v56, %v32680_v28  ;;  %25385 = vmatprep.mubr.msk.f32.mxu1 %vm7365_vm3, %v12597_v20  ;;  %v8954_v4 = vld [vmem:[#allocation3 + $0x381] sm:$0xff]  ;;  %v8956_v15 = vld [vmem:[#allocation3 + $0x399] sm:$0xff]  ;;  %v8958_v40 = vld [vmem:[#allocation3 + $0x3a9] sm:$0xff] }
 0x414   : > { %v7312_v38 = vrot.slane %v6288_v37, %v32679_v19  ;;  %v7316_v11 = vrot.slane %v6290_v60, %v32679_v19  ;;  %v8516_v12 = vrot.slane %v8502_v41, %v32680_v28  ;;  %v7320_v21 = vrot.slane %v6273_v23, %v32679_v19  ;;  %24792 = vmatmul.mubr.msk.f32.gmra.mrb[116].mxu0 %vm7365_vm3, %v8949_v18  ;;  %v8952_v23 = vld [vmem:[#allocation3 + $0x371] sm:$0xff]  ;;  %v8957_v43 = vld [vmem:[#allocation3 + $0x3a1] sm:$0xff] }
 0x415   : > { %v7324_v61 = vrot.slane %v6287_v16, %v32679_v19  ;;  %v7328_v62 = vrot.slane %v6289_v46, %v32679_v19  ;;  %v8533_v1 = vrot.slane %v8519_v39, %v32680_v28  ;;  %v7332_v2 = vrot.slane %v6291_v9, %v32679_v19  ;;  %24794 = vmatprep.mubr.msk.f32.mxu0 %vm7365_vm3, %v8950_v17  ;;  %v12604_v16 = vld [vmem:[#allocation3 + $0x2e8] sm:$0xff]  ;;  %v12606_v37 = vld [vmem:[#allocation3 + $0x300] sm:$0xff]  ;;  %v8959_v3 = vld [vmem:[#allocation3 + $0x3b1] sm:$0xff] }
 0x416   : > { %v8467_v50 = vcombine.low %v7304_v29, %v7308_v42  ;;  %v8468_v6 = vcombine.low %v7312_v38, %v7316_v11  ;;  %v8517_v48 = vcombine.low %v8509_v54, %v8516_v12  ;;  %v26669_v53 = vpack.c.bf16 %v21912_v44, %v21911_v26  ;;  %25386 = vmatmul.mubr.msk.f32.gmra.mrb[14].mxu1 %vm7365_vm3, %v12598_v58  ;;  %v12607_v46 = vld [vmem:[#allocation3 + $0x308] sm:$0xff]  ;;  %v12608_v56 = vld [vmem:[#allocation3 + $0x310] sm:$0xff]  ;;  %v12609_v60 = vld [vmem:[#allocation3 + $0x320] sm:$0xff] }
 0x417   : > { %v8484_v45 = vcombine.low %v7320_v21, %v7324_v61  ;;  %v30651_v19 = vpack.c.bf16 %v22042_v33, %v22041_v31  ;;  %v8534_v34 = vcombine.low %v8526_v0, %v8533_v1  ;;  %v8485_v13 = vcombine.low %v7328_v62, %v7332_v2  ;;  %25388 = vmatprep.mubr.msk.f32.mxu1 %vm7365_vm3, %v12599_v57  ;;  %v8960_v55 = vld [vmem:[#allocation3 + $0x3c1] sm:$0xff]  ;;  %v8961_v9 = vld [vmem:[#allocation3 + $0x3c9] sm:$0xff]  ;;  %v8962_v52 = vld [vmem:[#allocation3 + $0x3d1] sm:$0xff] }
 0x418   : > { %v8475_v36 = vrot.slane %v8467_v50, %v32680_v28  ;;  %v8482_v10 = vrot.slane %v8468_v6, %v32680_v28  ;;  %8722 = vst.msk [vmem:[#allocation3 + $0x4e9] sm:$0xff] %vm7365_vm3, %v8517_v48  ;;  %8726 = vst.msk [vmem:[#allocation3 + $0x511] sm:$0xff] %vm7365_vm3, %v8517_v48  ;;  %26670 = vmatprep.subr.bf16.mxu1 %v26669_v53  ;;  %24795 = vmatmul.mubr.msk.f32.gmra.mrb[118].mxu0 %vm7365_vm3, %v8951_v51  ;;  %v12610_v41 = vld [vmem:[#allocation3 + $0x328] sm:$0xff]  ;;  %v12611_v54 = vld [vmem:[#allocation3 + $0x330] sm:$0xff] }
 0x419   : > { %8723 = vst.msk [vmem:[#allocation3 + $0x4f1] sm:$0xff] %vm7365_vm3, %v8534_v34  ;;  %8727 = vst.msk [vmem:[#allocation3 + $0x519] sm:$0xff] %vm7365_vm3, %v8534_v34  ;;  %v8492_v59 = vrot.slane %v8484_v45, %v32680_v28  ;;  %v8499_v32 = vrot.slane %v8485_v13, %v32680_v28  ;;  %26672 = vmatpush3.bf16.msra.mxu1 %v26669_v53  ;;  %24797 = vmatprep.mubr.msk.f32.mxu0 %vm7365_vm3, %v8952_v23  ;;  %v8953_v28 = vld [vmem:[#allocation3 + $0x379] sm:$0xff]  ;;  %v8964_v42 = vld [vmem:[#allocation3 + $0x3e9] sm:$0xff] }
 0x41a   : > { %v8483_v7 = vcombine.low %v8475_v36, %v8482_v10  ;;  %26674 = vmatprep.subr.bf16.mxu1 %v30651_v19  ;;  %25389 = vmatmul.mubr.msk.f32.gmra.mrb[16].mxu1 %vm7365_vm3, %v12600_v27  ;;  %v8963_v29 = vld [vmem:[#allocation3 + $0x3d9] sm:$0xff]  ;;  %v12613_v39 = vld [vmem:[#allocation3 + $0x348] sm:$0xff]  ;;  %v8965_v0 = vld [vmem:[#allocation3 + $0x3f1] sm:$0xff] }
 0x41b   : > { %v8500_v49 = vcombine.low %v8492_v59, %v8499_v32  ;;  %25391 = vmatprep.mubr.msk.f32.mxu1 %vm7365_vm3, %v12601_v25  ;;  %v8966_v38 = vld [vmem:[#allocation3 + $0x3f9] sm:$0xff]  ;;  %v12614_v11 = vld [vmem:[#allocation3 + $0x350] sm:$0xff]  ;;  %v8967_v26 = vld [vmem:[#allocation3 + $0x401] sm:$0xff] }
 0x41c   : > { %8720 = vst.msk [vmem:[#allocation3 + $0x4d9] sm:$0xff] %vm7365_vm3, %v8483_v7  ;;  %8724 = vst.msk [vmem:[#allocation3 + $0x501] sm:$0xff] %vm7365_vm3, %v8483_v7  ;;  %24798 = vmatmul.mubr.msk.f32.gmra.mrb[120].mxu0 %vm7365_vm3, %v8953_v28  ;;  %v12615_v20 = vld [vmem:[#allocation3 + $0x358] sm:$0xff]  ;;  %v12616_v12 = vld [vmem:[#allocation3 + $0x360] sm:$0xff] }
 0x41d   : > { %8721 = vst.msk [vmem:[#allocation3 + $0x4e1] sm:$0xff] %vm7365_vm3, %v8500_v49  ;;  %8725 = vst.msk [vmem:[#allocation3 + $0x509] sm:$0xff] %vm7365_vm3, %v8500_v49  ;;  %24800 = vmatprep.mubr.msk.f32.mxu0 %vm7365_vm3, %v8954_v4  ;;  %v8968_v44 = vld [vmem:[#allocation3 + $0x411] sm:$0xff]  ;;  %v8969_v61 = vld [vmem:[#allocation3 + $0x419] sm:$0xff] }
 0x41e   : > { %25392 = vmatmul.mubr.msk.f32.gmra.mrb[18].mxu1 %vm7365_vm3, %v12602_v5  ;;  %v12617_v21 = vld [vmem:[#allocation3 + $0x370] sm:$0xff]  ;;  %v8970_v62 = vld [vmem:[#allocation3 + $0x421] sm:$0xff]  ;;  %v12618_v18 = vld [vmem:[#allocation3 + $0x378] sm:$0xff] }
 0x41f   : > { %25394 = vmatprep.mubr.msk.f32.mxu1 %vm7365_vm3, %v12603_v47  ;;  %v12619_v1 = vld [vmem:[#allocation3 + $0x380] sm:$0xff]  ;;  %v8971_v2 = vld [vmem:[#allocation3 + $0x429] sm:$0xff]  ;;  %v12621_v17 = vld [vmem:[#allocation3 + $0x398] sm:$0xff] }
 0x420   : > { %24801 = vmatmul.mubr.msk.f32.gmra.mrb[122].mxu0 %vm7365_vm3, %v8955_v14  ;;  %v8972_v50 = vld [vmem:[#allocation3 + $0x439] sm:$0xff]  ;;  %v12620_v6 = vld [vmem:[#allocation3 + $0x388] sm:$0xff]  ;;  %v8975_v58 = vld [vmem:[#allocation3 + $0x451] sm:$0xff] }
 0x421   : > { %24803 = vmatprep.mubr.msk.f32.mxu0 %vm7365_vm3, %v8956_v15  ;;  %v8973_v31 = vld [vmem:[#allocation3 + $0x441] sm:$0xff]  ;;  %v8974_v33 = vld [vmem:[#allocation3 + $0x449] sm:$0xff]  ;;  %v8857_v34 = vld [vmem:[%s32531_s3 + $0x8] sm:$0xff] }
 0x422   : > { %25395 = vmatmul.mubr.msk.f32.gmra.mrb[20].mxu1 %vm7365_vm3, %v12604_v16  ;;  %v12622_v48 = vld [vmem:[#allocation3 + $0x3a0] sm:$0xff]  ;;  %v12623_v45 = vld [vmem:[#allocation3 + $0x3a8] sm:$0xff]  ;;  %v8856_v53 = vld [vmem:[%s32531_s3] sm:$0xff] }
 0x423   : > { %25397 = vmatprep.mubr.msk.f32.mxu1 %vm7365_vm3, %v12605_v8  ;;  %v8976_v36 = vld [vmem:[#allocation3 + $0x461] sm:$0xff]  ;;  %v26609_v10 = vpack.c.bf16 %v8857_v34, %v8856_v53  ;;  %v12624_v13 = vld [vmem:[#allocation3 + $0x3b0] sm:$0xff]  ;;  %v8979_v25 = vld [vmem:[#allocation3 + $0x479] sm:$0xff] }
 0x424   : > { %24804 = vmatmul.mubr.msk.f32.gmra.mrb[124].mxu0 %vm7365_vm3, %v8957_v43  ;;  %v12625_v57 = vld [vmem:[#allocation3 + $0x3c0] sm:$0xff]  ;;  %v8977_v51 = vld [vmem:[#allocation3 + $0x469] sm:$0xff]  ;;  %v8978_v32 = vld [vmem:[#allocation3 + $0x471] sm:$0xff] }
 0x425   : > { %24806 = vmatprep.mubr.msk.f32.mxu0 %vm7365_vm3, %v8958_v40  ;;  %26610 = vmatprep.subr.bf16.mxu0 %v26609_v10  ;;  %v8858_v7 = vld [vmem:[%s32531_s3 + $0x10] sm:$0xff]  ;;  %v8859_v59 = vld [vmem:[%s32531_s3 + $0x18] sm:$0xff]  ;;  %v12627_v49 = vld [vmem:[#allocation3 + $0x3d0] sm:$0xff] }
 0x426   : > { %25398 = vmatmul.mubr.msk.f32.gmra.mrb[22].mxu1 %vm7365_vm3, %v12606_v37  ;;  %26612 = vmatpush3.bf16.msra.mxu0 %v26609_v10  ;;  %v26613_v23 = vpack.c.bf16 %v8859_v59, %v8858_v7  ;;  %v12626_v27 = vld [vmem:[#allocation3 + $0x3c8] sm:$0xff]  ;;  %v8860_v28 = vld [vmem:[%s32531_s3 + $0x20] sm:$0xff]  ;;  %v8861_v4 = vld [vmem:[%s32531_s3 + $0x28] sm:$0xff] }
 0x427   : > { %25400 = vmatprep.mubr.msk.f32.mxu1 %vm7365_vm3, %v12607_v46  ;;  %v8980_v5 = vld [vmem:[#allocation3 + $0x489] sm:$0xff]  ;;  %v26617_v47 = vpack.c.bf16 %v8861_v4, %v8860_v28  ;;  %v12628_v14 = vld [vmem:[#allocation3 + $0x3d8] sm:$0xff]  ;;  %v8862_v8 = vld [vmem:[%s32531_s3 + $0x30] sm:$0xff] }
 0x428   : > { %24807 = vmatmul.mubr.msk.f32.gmra.mrb[126].mxu0 %vm7365_vm3, %v8959_v3  ;;  %26614 = vmatprep.subr.bf16.mxu0 %v26613_v23  ;;  %v12629_v15 = vld [vmem:[#allocation3 + $0x3e8] sm:$0xff]  ;;  %v8981_v16 = vld [vmem:[#allocation3 + $0x491] sm:$0xff]  ;;  %v8982_v40 = vld [vmem:[#allocation3 + $0x499] sm:$0xff] }
 0x429   : > { %24809 = vmatprep.mubr.msk.f32.mxu0 %vm7365_vm3, %v8960_v55  ;;  %v8863_v43 = vld [vmem:[%s32531_s3 + $0x38] sm:$0xff]  ;;  %v12630_v46 = vld [vmem:[#allocation3 + $0x3f0] sm:$0xff]  ;;  %v12631_v3 = vld [vmem:[#allocation3 + $0x3f8] sm:$0xff] }
 0x42a   : > { %25401 = vmatmul.mubr.msk.f32.gmra.mrb[24].mxu1 %vm7365_vm3, %v12608_v56  ;;  %26616 = vmatpush3.bf16.msra.mxu0 %v26613_v23  ;;  %v26621_v37 = vpack.c.bf16 %v8863_v43, %v8862_v8  ;;  %v8983_v55 = vld [vmem:[#allocation3 + $0x4a1] sm:$0xff]  ;;  %v8984_v56 = vld [vmem:[#allocation3 + $0x4b1] sm:$0xff] }
 0x42b   : > { %25403 = vmatprep.mubr.msk.f32.mxu1 %vm7365_vm3, %v12609_v60  ;;  %26618 = vmatprep.subr.bf16.mxu0 %v26617_v47  ;;  %v12632_v60 = vld [vmem:[#allocation3 + $0x400] sm:$0xff]  ;;  %v8736_v34 = vld [vmem:[#allocation3 + $0x50] sm:$0xff]  ;;  %v8739_v59 = vld [vmem:[#allocation3 + $0x68] sm:$0xff] }
 0x42c   : > { %24810 = vmatmul.mubr.msk.f32.gmra.mrb[128].mxu0 %vm7365_vm3, %v8961_v9  ;;  %v12633_v9 = vld [vmem:[#allocation3 + $0x410] sm:$0xff]  ;;  %v8735_v53 = vld [vmem:[#allocation3 + $0x40] sm:$0xff]  ;;  %v12652_v23 = vld [vmem:[#allocation3 + $0x4c8] sm:$0xff] }
 0x42d   : > { %24812 = vmatprep.mubr.msk.f32.mxu0 %vm7365_vm3, %v8962_v52  ;;  %v8985_v52 = vld [vmem:[#allocation3 + $0x4b9] sm:$0xff]  ;;  %v12649_v10 = vld [vmem:[#allocation3 + $0x4b0] sm:$0xff]  ;;  %v12655_v4 = vld [vmem:[#allocation3 + $0x4e8] sm:$0xff] }
 0x42e   : > { %25404 = vmatmul.mubr.msk.f32.gmra.mrb[26].mxu1 %vm7365_vm3, %v12610_v41  ;;  %26620 = vmatpush3.bf16.msra.mxu0 %v26617_v47  ;;  %v8986_v41 = vld [vmem:[#allocation3 + $0x4c1] sm:$0xff]  ;;  %v8746_v8 = vld [vmem:[#allocation3 + $0xb0] sm:$0xff] }
 0x42f   : > { %25406 = vmatprep.mubr.msk.f32.mxu1 %vm7365_vm3, %v12611_v54  ;;  %26622 = vmatprep.subr.bf16.mxu0 %v26621_v37  ;;  %v12634_v54 = vld [vmem:[#allocation3 + $0x418] sm:$0xff]  ;;  %v12651_v7 = vld [vmem:[#allocation3 + $0x4c0] sm:$0xff]  ;;  %v12658_v43 = vld [vmem:[#allocation3 + $0x508] sm:$0xff] }
 0x430   : > { %24813 = vmatmul.mubr.msk.f32.gmra.mrb[130].mxu0 %vm7365_vm3, %v8963_v29  ;;  %v12635_v29 = vld [vmem:[#allocation3 + $0x420] sm:$0xff] }
 0x431   : > { %24815 = vmatprep.mubr.msk.f32.mxu0 %vm7365_vm3, %v8964_v42  ;;  %v8987_v42 = vld [vmem:[#allocation3 + $0x4c9] sm:$0xff]  ;;  %v12654_v28 = vld [vmem:[#allocation3 + $0x4e0] sm:$0xff] }
 0x432   : > { %25407 = vmatmul.mubr.msk.f32.gmra.mrb[28].mxu1 %vm7365_vm3, %v12612_v22  ;;  %26624 = vmatpush3.bf16.msra.mxu0 %v26621_v37  ;;  %v8988_v22 = vld [vmem:[#allocation3 + $0x4d9] sm:$0xff] }
 0x433   : > { %25409 = vmatprep.mubr.msk.f32.mxu1 %vm7365_vm3, %v12613_v39  ;;  %v12636_v39 = vld [vmem:[#allocation3 + $0x428] sm:$0xff]  ;;  %v8744_v47 = vld [vmem:[#allocation3 + $0xa0] sm:$0xff]  ;;  %v8747_v37 = vld [vmem:[#allocation3 + $0xb8] sm:$0xff] }
 0x434   : > { %24816 = vmatmul.mubr.msk.f32.gmra.mrb[132].mxu0 %vm7365_vm3, %v8965_v0  ;;  %v12637_v0 = vld [vmem:[#allocation3 + $0x438] sm:$0xff] }
 0x435   : > { %24818 = vmatprep.mubr.msk.f32.mxu0 %vm7365_vm3, %v8966_v38  ;;  %v8989_v38 = vld [vmem:[#allocation3 + $0x4e1] sm:$0xff] }
 0x436   : > { %25410 = vmatmul.mubr.msk.f32.gmra.mrb[30].mxu1 %vm7365_vm3, %v12614_v11  ;;  %v8990_v11 = vld [vmem:[#allocation3 + $0x4e9] sm:$0xff] }
 0x437   : > { %25412 = vmatprep.mubr.msk.f32.mxu1 %vm7365_vm3, %v12615_v20  ;;  %v12638_v20 = vld [vmem:[#allocation3 + $0x440] sm:$0xff] }
 0x438   : > { %24819 = vmatmul.mubr.msk.f32.gmra.mrb[134].mxu0 %vm7365_vm3, %v8967_v26  ;;  %v12639_v26 = vld [vmem:[#allocation3 + $0x448] sm:$0xff] }
 0x439   : > { %24821 = vmatprep.mubr.msk.f32.mxu0 %vm7365_vm3, %v8968_v44  ;;  %v8728_v44 = vld [vmem:[#allocation3] sm:$0xff] }
 0x43a   : > { %25413 = vmatmul.mubr.msk.f32.gmra.mrb[32].mxu1 %vm7365_vm3, %v12616_v12  ;;  %v8991_v12 = vld [vmem:[#allocation3 + $0x4f1] sm:$0xff] }
 0x43b   : > { %25415 = vmatprep.mubr.msk.f32.mxu1 %vm7365_vm3, %v12617_v21  ;;  %v12640_v21 = vld [vmem:[#allocation3 + $0x450] sm:$0xff] }
 0x43c   : > { %24822 = vmatmul.mubr.msk.f32.gmra.mrb[136].mxu0 %vm7365_vm3, %v8969_v61  ;;  %v8729_v61 = vld [vmem:[#allocation3 + $0x8] sm:$0xff] }
 0x43d   : > { %24824 = vmatprep.mubr.msk.f32.mxu0 %vm7365_vm3, %v8970_v62  ;;  %v12641_v62 = vld [vmem:[#allocation3 + $0x460] sm:$0xff] }
 0x43e   : > { %25416 = vmatmul.mubr.msk.f32.gmra.mrb[34].mxu1 %vm7365_vm3, %v12618_v18  ;;  %v8730_v18 = vld [vmem:[#allocation3 + $0x10] sm:$0xff] }
 0x43f   : > { %25418 = vmatprep.mubr.msk.f32.mxu1 %vm7365_vm3, %v12619_v1  ;;  %v12642_v1 = vld [vmem:[#allocation3 + $0x468] sm:$0xff] }
 0x440   : > { %24825 = vmatmul.mubr.msk.f32.gmra.mrb[138].mxu0 %vm7365_vm3, %v8971_v2  ;;  %v8731_v2 = vld [vmem:[#allocation3 + $0x18] sm:$0xff] }
 0x441   : > { %24827 = vmatprep.mubr.msk.f32.mxu0 %vm7365_vm3, %v8972_v50  ;;  %v12643_v50 = vld [vmem:[#allocation3 + $0x470] sm:$0xff] }
 0x442   : > { %25419 = vmatmul.mubr.msk.f32.gmra.mrb[36].mxu1 %vm7365_vm3, %v12620_v6  ;;  %v8732_v6 = vld [vmem:[#allocation3 + $0x28] sm:$0xff] }
 0x443   : > { %25421 = vmatprep.mubr.msk.f32.mxu1 %vm7365_vm3, %v12621_v17  ;;  %v12644_v17 = vld [vmem:[#allocation3 + $0x478] sm:$0xff] }
 0x444   : > { %24828 = vmatmul.mubr.msk.f32.gmra.mrb[140].mxu0 %vm7365_vm3, %v8973_v31  ;;  %v12645_v31 = vld [vmem:[#allocation3 + $0x488] sm:$0xff] }
 0x445   : > { %24830 = vmatprep.mubr.msk.f32.mxu0 %vm7365_vm3, %v8974_v33  ;;  %v8733_v33 = vld [vmem:[#allocation3 + $0x30] sm:$0xff] }
 0x446   : > { %25422 = vmatmul.mubr.msk.f32.gmra.mrb[38].mxu1 %vm7365_vm3, %v12622_v48  ;;  %v8734_v48 = vld [vmem:[#allocation3 + $0x38] sm:$0xff] }
 0x447   : > { %25424 = vmatprep.mubr.msk.f32.mxu1 %vm7365_vm3, %v12623_v45  ;;  %v12646_v45 = vld [vmem:[#allocation3 + $0x490] sm:$0xff] }
 0x448   : > { %24831 = vmatmul.mubr.msk.f32.gmra.mrb[142].mxu0 %vm7365_vm3, %v8975_v58  ;;  %v12647_v58 = vld [vmem:[#allocation3 + $0x498] sm:$0xff] }
 0x449   : > { %24833 = vmatprep.mubr.msk.f32.mxu0 %vm7365_vm3, %v8976_v36  ;;  %v12648_v36 = vld [vmem:[#allocation3 + $0x4a0] sm:$0xff] }
 0x44a   : > { %25425 = vmatmul.mubr.msk.f32.gmra.mrb[40].mxu1 %vm7365_vm3, %v12624_v13  ;;  %v8737_v13 = vld [vmem:[#allocation3 + $0x58] sm:$0xff] }
 0x44b   : > { %25427 = vmatprep.mubr.msk.f32.mxu1 %vm7365_vm3, %v12625_v57  ;;  %v8738_v57 = vld [vmem:[#allocation3 + $0x60] sm:$0xff] }
 0x44c   : > { %24834 = vmatmul.mubr.msk.f32.gmra.mrb[144].mxu0 %vm7365_vm3, %v8977_v51  ;;  %v12650_v51 = vld [vmem:[#allocation3 + $0x4b8] sm:$0xff] }
 0x44d   : > { %24836 = vmatprep.mubr.msk.f32.mxu0 %vm7365_vm3, %v8978_v32  ;;  %v8740_v32 = vld [vmem:[#allocation3 + $0x78] sm:$0xff] }
 0x44e   : > { %25428 = vmatmul.mubr.msk.f32.gmra.mrb[42].mxu1 %vm7365_vm3, %v12626_v27  ;;  %v12653_v27 = vld [vmem:[#allocation3 + $0x4d8] sm:$0xff] }
 0x44f   : > { %25430 = vmatprep.mubr.msk.f32.mxu1 %vm7365_vm3, %v12627_v49  ;;  %v8741_v49 = vld [vmem:[#allocation3 + $0x80] sm:$0xff] }
 0x450   : > { %24837 = vmatmul.mubr.msk.f32.gmra.mrb[146].mxu0 %vm7365_vm3, %v8979_v25  ;;  %v8742_v25 = vld [vmem:[#allocation3 + $0x88] sm:$0xff] }
 0x451   : > { %24839 = vmatprep.mubr.msk.f32.mxu0 %vm7365_vm3, %v8980_v5  ;;  %v8743_v5 = vld [vmem:[#allocation3 + $0x90] sm:$0xff] }
 0x452   : > { %25431 = vmatmul.mubr.msk.f32.gmra.mrb[44].mxu1 %vm7365_vm3, %v12628_v14  ;;  %v12656_v14 = vld [vmem:[#allocation3 + $0x4f0] sm:$0xff] }
 0x453   : > { %25433 = vmatprep.mubr.msk.f32.mxu1 %vm7365_vm3, %v12629_v15  ;;  %v12657_v15 = vld [vmem:[#allocation3 + $0x500] sm:$0xff] }
 0x454   : > { %24840 = vmatmul.mubr.msk.f32.gmra.mrb[148].mxu0 %vm7365_vm3, %v8981_v16  ;;  %v8745_v16 = vld [vmem:[#allocation3 + $0xa8] sm:$0xff] }
 0x455   : > { %24842 = vmatprep.mubr.msk.f32.mxu0 %vm7365_vm3, %v8982_v40  ;;  %v12659_v40 = vld [vmem:[#allocation3 + $0x510] sm:$0xff] }
 0x456   : > { %25434 = vmatmul.mubr.msk.f32.gmra.mrb[46].mxu1 %vm7365_vm3, %v12630_v46  ;;  %v8748_v46 = vld [vmem:[#allocation3 + $0xc8] sm:$0xff] }
 0x457   : > { %25436 = vmatprep.mubr.msk.f32.mxu1 %vm7365_vm3, %v12631_v3  ;;  %v12660_v3 = vld [vmem:[#allocation3 + $0x518] sm:$0xff] }
 0x458   : > { %24843 = vmatmul.mubr.msk.f32.gmra.mrb[150].mxu0 %vm7365_vm3, %v8983_v55  ;;  %v22043_v55 = vld [vmem:[%s32531_s3 + $0x150] sm:$0xff] }
 0x459   : > { %24845 = vmatprep.mubr.msk.f32.mxu0 %vm7365_vm3, %v8984_v56  ;;  %v22044_v56 = vld [vmem:[%s32531_s3 + $0x158] sm:$0xff] }
 0x45a   : > { %25437 = vmatmul.mubr.msk.f32.gmra.mrb[48].mxu1 %vm7365_vm3, %v12632_v60  ;;  %v13887_v60 = vld [vmem:[#allocation3 + $0x29] sm:$0xff] }
 0x45b   : > { %25439 = vmatprep.mubr.msk.f32.mxu1 %vm7365_vm3, %v12633_v9  ;;  %v8749_v9 = vld [vmem:[#allocation3 + $0xd0] sm:$0xff] }
 0x45c   : > { %24846 = vmatmul.mubr.msk.f32.gmra.mrb[152].mxu0 %vm7365_vm3, %v8985_v52  ;;  %v26677_v52 = vpack.c.bf16 %v22044_v56, %v22043_v55  ;;  %v8776_v55 = vld [vmem:[#allocation3 + $0x1e0] sm:$0xff]  ;;  %v28084_v56 = vld [vmem:[#allocation3 + $0x131] sm:$0xff] }
 0x45d   : > { %24848 = vmatprep.mubr.msk.f32.mxu0 %vm7365_vm3, %v8986_v41  ;;  %v8750_v41 = vld [vmem:[#allocation3 + $0xd8] sm:$0xff] }
 0x45e   : > { %25440 = vmatmul.mubr.msk.f32.gmra.mrb[50].mxu1 %vm7365_vm3, %v12634_v54  ;;  %v13888_v54 = vld [vmem:[#allocation3 + $0x31] sm:$0xff] }
 0x45f   : > { %25442 = vmatprep.mubr.msk.f32.mxu1 %vm7365_vm3, %v12635_v29  ;;  %v22045_v29 = vld [vmem:[%s32531_s3 + $0x160] sm:$0xff] }
 0x460   : > { %24849 = vmatmul.mubr.msk.f32.gmra.mrb[154].mxu0 %vm7365_vm3, %v8987_v42  ;;  %v22046_v42 = vld [vmem:[%s32531_s3 + $0x168] sm:$0xff] }
 0x461   : > { %24851 = vmatprep.mubr.msk.f32.mxu0 %vm7365_vm3, %v8988_v22  ;;  %v13889_v22 = vld [vmem:[#allocation3 + $0x39] sm:$0xff] }
 0x462   : > { %25443 = vmatmul.mubr.msk.f32.gmra.mrb[52].mxu1 %vm7365_vm3, %v12636_v39  ;;  %v8751_v39 = vld [vmem:[#allocation3 + $0xe0] sm:$0xff] }
 0x463   : > { %25445 = vmatprep.mubr.msk.f32.mxu1 %vm7365_vm3, %v12637_v0  ;;  %v8752_v0 = vld [vmem:[#allocation3 + $0xf0] sm:$0xff] }
 0x464   : > { %24852 = vmatmul.mubr.msk.f32.gmra.mrb[156].mxu0 %vm7365_vm3, %v8989_v38  ;;  %v26681_v38 = vpack.c.bf16 %v22046_v42, %v22045_v29  ;;  %v8779_v29 = vld [vmem:[#allocation3 + $0x1f8] sm:$0xff]  ;;  %v8780_v42 = vld [vmem:[#allocation3 + $0x208] sm:$0xff] }
 0x465   : > { %24854 = vmatprep.mubr.msk.f32.mxu0 %vm7365_vm3, %v8990_v11  ;;  %v13890_v11 = vld [vmem:[#allocation3 + $0x41] sm:$0xff] }
 0x466   : > { %25446 = vmatmul.mubr.msk.f32.gmra.mrb[54].mxu1 %vm7365_vm3, %v12638_v20  ;;  %v13891_v20 = vld [vmem:[#allocation3 + $0x51] sm:$0xff] }
 0x467   : > { %25448 = vmatprep.mubr.msk.f32.mxu1 %vm7365_vm3, %v12639_v26  ;;  %v8753_v26 = vld [vmem:[#allocation3 + $0xf8] sm:$0xff] }
 0x468   : > { %24855 = vmatmul.mubr.msk.f32.gmra.mrb[158].mxu0 %vm7365_vm3, %v8991_v12  ;;  %v13893_v12 = vld [vmem:[#allocation3 + $0x61] sm:$0xff] }
 0x469   : > { %24873 = vmatprep.mubr.msk.f32.mxu0 %vm7365_vm3, %v8728_v44  ;;  %v13892_v44 = vld [vmem:[#allocation3 + $0x59] sm:$0xff] }
 0x46a   : > { %25449 = vmatmul.mubr.msk.f32.gmra.mrb[56].mxu1 %vm7365_vm3, %v12640_v21  ;;  %v8755_v21 = vld [vmem:[#allocation3 + $0x108] sm:$0xff] }
 0x46b   : > { %25451 = vmatprep.mubr.msk.f32.mxu1 %vm7365_vm3, %v12641_v62  ;;  %v13894_v62 = vld [vmem:[#allocation3 + $0x69] sm:$0xff] }
 0x46c   : > { %24874 = vmatmul.mubr.msk.f32.vlgmr.msra.gmra.mrb[32].mxu0 %vm7365_vm3, %v8729_v61  ;;  %v8756_v61 = vld [vmem:[#allocation3 + $0x118] sm:$0xff] }
 0x46d   : > { %24876 = vmatprep.mubr.msk.f32.mxu0 %vm7365_vm3, %v8730_v18  ;;  %v13895_v18 = vld [vmem:[#allocation3 + $0x79] sm:$0xff] }
 0x46e   : > { %25452 = vmatmul.mubr.msk.f32.gmra.mrb[58].mxu1 %vm7365_vm3, %v12642_v1  ;;  %v8757_v1 = vld [vmem:[#allocation3 + $0x120] sm:$0xff] }
 0x46f   : > { %25454 = vmatprep.mubr.msk.f32.mxu1 %vm7365_vm3, %v12643_v50  ;;  %v13896_v50 = vld [vmem:[#allocation3 + $0x81] sm:$0xff] }
 0x470   : > { %24877 = vmatmul.mubr.msk.f32.gmra.mrb[34].mxu0 %vm7365_vm3, %v8731_v2  ;;  %v8758_v2 = vld [vmem:[#allocation3 + $0x128] sm:$0xff] }
 0x471   : > { %24879 = vmatprep.mubr.msk.f32.mxu0 %vm7365_vm3, %v8732_v6  ;;  %v13897_v6 = vld [vmem:[#allocation3 + $0x89] sm:$0xff] }
 0x472   : > { %25455 = vmatmul.mubr.msk.f32.gmra.mrb[60].mxu1 %vm7365_vm3, %v12644_v17  ;;  %v8759_v17 = vld [vmem:[#allocation3 + $0x130] sm:$0xff] }
 0x473   : > { %25457 = vmatprep.mubr.msk.f32.mxu1 %vm7365_vm3, %v12645_v31  ;;  %v8760_v31 = vld [vmem:[#allocation3 + $0x140] sm:$0xff] }
 0x474   : > { %24880 = vmatmul.mubr.msk.f32.gmra.mrb[36].mxu0 %vm7365_vm3, %v8733_v33  ;;  %v13898_v33 = vld [vmem:[#allocation3 + $0x91] sm:$0xff] }
 0x475   : > { %24882 = vmatprep.mubr.msk.f32.mxu0 %vm7365_vm3, %v8734_v48  ;;  %v13899_v48 = vld [vmem:[#allocation3 + $0xa1] sm:$0xff] }
 0x476   : > { %25458 = vmatmul.mubr.msk.f32.gmra.mrb[62].mxu1 %vm7365_vm3, %v12646_v45  ;;  %v8761_v45 = vld [vmem:[#allocation3 + $0x148] sm:$0xff] }
 0x477   : > { %25460 = vmatprep.mubr.msk.f32.mxu1 %vm7365_vm3, %v12647_v58  ;;  %v8762_v58 = vld [vmem:[#allocation3 + $0x150] sm:$0xff] }
 0x478   : > { %24883 = vmatmul.mubr.msk.f32.gmra.mrb[38].mxu0 %vm7365_vm3, %v8735_v53  ;;  %v13900_v53 = vld [vmem:[#allocation3 + $0xa9] sm:$0xff] }
 0x479   : > { %24885 = vmatprep.mubr.msk.f32.mxu0 %vm7365_vm3, %v8736_v34  ;;  %v13901_v34 = vld [vmem:[#allocation3 + $0xb1] sm:$0xff] }
 0x47a   : > { %25461 = vmatmul.mubr.msk.f32.gmra.mrb[64].mxu1 %vm7365_vm3, %v12648_v36  ;;  %v8763_v36 = vld [vmem:[#allocation3 + $0x158] sm:$0xff] }
 0x47b   : > { %25463 = vmatprep.mubr.msk.f32.mxu1 %vm7365_vm3, %v12649_v10  ;;  %v8764_v10 = vld [vmem:[#allocation3 + $0x168] sm:$0xff] }
 0x47c   : > { %24886 = vmatmul.mubr.msk.f32.gmra.mrb[40].mxu0 %vm7365_vm3, %v8737_v13  ;;  %v28072_v13 = vld [vmem:[#allocation3 + $0xb9] sm:$0xff] }
 0x47d   : > { %24888 = vmatprep.mubr.msk.f32.mxu0 %vm7365_vm3, %v8738_v57  ;;  %v28073_v57 = vld [vmem:[#allocation3 + $0xc9] sm:$0xff] }
 0x47e   : > { %25464 = vmatmul.mubr.msk.f32.gmra.mrb[66].mxu1 %vm7365_vm3, %v12650_v51  ;;  %v8765_v51 = vld [vmem:[#allocation3 + $0x170] sm:$0xff] }
 0x47f   : > { %25466 = vmatprep.mubr.msk.f32.mxu1 %vm7365_vm3, %v12651_v7  ;;  %v8766_v7 = vld [vmem:[#allocation3 + $0x178] sm:$0xff] }
 0x480   : > { %24889 = vmatmul.mubr.msk.f32.gmra.mrb[42].mxu0 %vm7365_vm3, %v8739_v59  ;;  %v28074_v59 = vld [vmem:[#allocation3 + $0xd1] sm:$0xff] }
 0x481   : > { %24891 = vmatprep.mubr.msk.f32.mxu0 %vm7365_vm3, %v8740_v32  ;;  %v28075_v32 = vld [vmem:[#allocation3 + $0xd9] sm:$0xff] }
 0x482   : > { %25467 = vmatmul.mubr.msk.f32.gmra.mrb[68].mxu1 %vm7365_vm3, %v12652_v23  ;;  %v8767_v23 = vld [vmem:[#allocation3 + $0x180] sm:$0xff] }
 0x483   : > { %25469 = vmatprep.mubr.msk.f32.mxu1 %vm7365_vm3, %v12653_v27  ;;  %v8768_v27 = vld [vmem:[#allocation3 + $0x190] sm:$0xff] }
 0x484   : > { %24892 = vmatmul.mubr.msk.f32.gmra.mrb[44].mxu0 %vm7365_vm3, %v8741_v49  ;;  %v28076_v49 = vld [vmem:[#allocation3 + $0xe1] sm:$0xff] }
 0x485   : > { %24894 = vmatprep.mubr.msk.f32.mxu0 %vm7365_vm3, %v8742_v25  ;;  %v28077_v25 = vld [vmem:[#allocation3 + $0xf1] sm:$0xff] }
 0x486   : > { %25470 = vmatmul.mubr.msk.f32.gmra.mrb[70].mxu1 %vm7365_vm3, %v12654_v28  ;;  %v8769_v28 = vld [vmem:[#allocation3 + $0x198] sm:$0xff] }
 0x487   : > { %25472 = vmatprep.mubr.msk.f32.mxu1 %vm7365_vm3, %v12655_v4  ;;  %v8770_v4 = vld [vmem:[#allocation3 + $0x1a0] sm:$0xff] }
 0x488   : > { %24895 = vmatmul.mubr.msk.f32.gmra.mrb[46].mxu0 %vm7365_vm3, %v8743_v5  ;;  %v28078_v5 = vld [vmem:[#allocation3 + $0xf9] sm:$0xff] }
 0x489   : > { %24897 = vmatprep.mubr.msk.f32.mxu0 %vm7365_vm3, %v8744_v47  ;;  %v28079_v47 = vld [vmem:[#allocation3 + $0x101] sm:$0xff] }
 0x48a   : > { %25473 = vmatmul.mubr.msk.f32.gmra.mrb[72].mxu1 %vm7365_vm3, %v12656_v14  ;;  %v8771_v14 = vld [vmem:[#allocation3 + $0x1a8] sm:$0xff] }
 0x48b   : > { %25475 = vmatprep.mubr.msk.f32.mxu1 %vm7365_vm3, %v12657_v15  ;;  %v8772_v15 = vld [vmem:[#allocation3 + $0x1b8] sm:$0xff] }
 0x48c   : > { %24898 = vmatmul.mubr.msk.f32.gmra.mrb[48].mxu0 %vm7365_vm3, %v8745_v16  ;;  %v28080_v16 = vld [vmem:[#allocation3 + $0x109] sm:$0xff] }
 0x48d   : > { %24900 = vmatprep.mubr.msk.f32.mxu0 %vm7365_vm3, %v8746_v8  ;;  %v28081_v8 = vld [vmem:[#allocation3 + $0x119] sm:$0xff] }
 0x48e   : > { %25476 = vmatmul.mubr.msk.f32.gmra.mrb[74].mxu1 %vm7365_vm3, %v12658_v43  ;;  %v8773_v43 = vld [vmem:[#allocation3 + $0x1c0] sm:$0xff] }
 0x48f   : > { %25478 = vmatprep.mubr.msk.f32.mxu1 %vm7365_vm3, %v12659_v40  ;;  %v8774_v40 = vld [vmem:[#allocation3 + $0x1c8] sm:$0xff] }
 0x490   : > { %24901 = vmatmul.mubr.msk.f32.gmra.mrb[50].mxu0 %vm7365_vm3, %v8747_v37  ;;  %v28082_v37 = vld [vmem:[#allocation3 + $0x121] sm:$0xff] }
 0x491   : > { %24903 = vmatprep.mubr.msk.f32.mxu0 %vm7365_vm3, %v8748_v46  ;;  %v28083_v46 = vld [vmem:[#allocation3 + $0x129] sm:$0xff] }
 0x492   : > { %25479 = vmatmul.mubr.msk.f32.gmra.mrb[76].mxu1 %vm7365_vm3, %v12660_v3  ;;  %v8775_v3 = vld [vmem:[#allocation3 + $0x1d0] sm:$0xff] }
 0x493   : > { %25497 = vmatprep.mubr.msk.f32.mxu1 %vm7365_vm3, %v13887_v60  ;;  %v28085_v60 = vld [vmem:[#allocation3 + $0x141] sm:$0xff] }
 0x494   : > { %24904 = vmatmul.mubr.msk.f32.gmra.mrb[52].mxu0 %vm7365_vm3, %v8749_v9  ;;  %v8777_v9 = vld [vmem:[#allocation3 + $0x1e8] sm:$0xff] }
 0x495   : > { %24906 = vmatprep.mubr.msk.f32.mxu0 %vm7365_vm3, %v8750_v41  ;;  %v28086_v41 = vld [vmem:[#allocation3 + $0x149] sm:$0xff] }
 0x496   : > { %25498 = vmatmul.mubr.msk.f32.vlgmr.msra.gmra.mrb[78].mxu1 %vm7365_vm3, %v13888_v54  ;;  %v28087_v54 = vld [vmem:[#allocation3 + $0x151] sm:$0xff] }
 0x497   : > { %26676 = vmatpush3.bf16.msra.mxu1 %v30651_v19  ;;  %25500 = vmatprep.mubr.msk.f32.mxu1 %vm7365_vm3, %v13889_v22  ;;  %v8754_v19 = vld [vmem:[#allocation3 + $0x100] sm:$0xff] }
 0x498   : > { %26678 = vmatprep.subr.bf16.mxu1 %v26677_v52  ;;  %24907 = vmatmul.mubr.msk.f32.gmra.mrb[54].mxu0 %vm7365_vm3, %v8751_v39  ;;  %v28088_v22 = vld [vmem:[#allocation3 + $0x159] sm:$0xff]  ;;  %v28089_v39 = vld [vmem:[#allocation3 + $0x169] sm:$0xff] }
 0x499   : > { %24909 = vmatprep.mubr.msk.f32.mxu0 %vm7365_vm3, %v8752_v0  ;;  %v8781_v0 = vld [vmem:[#allocation3 + $0x210] sm:$0xff] }
 0x49a   : > { %25501 = vmatmul.mubr.msk.f32.gmra.mrb[80].mxu1 %vm7365_vm3, %v13890_v11  ;;  %v22048_v11 = vld [vmem:[%s32531_s3 + $0x178] sm:$0xff] }
 0x49b   : > { %25503 = vmatprep.mubr.msk.f32.mxu1 %vm7365_vm3, %v13891_v20  ;;  %26680 = vmatpush3.bf16.msra.mxu1 %v26677_v52  ;;  %v8778_v52 = vld [vmem:[#allocation3 + $0x1f0] sm:$0xff]  ;;  %v8782_v20 = vld [vmem:[#allocation3 + $0x218] sm:$0xff] }
 0x49c   : > { %24910 = vmatmul.mubr.msk.f32.gmra.mrb[56].mxu0 %vm7365_vm3, %v8753_v26  ;;  %26682 = vmatprep.subr.bf16.mxu1 %v26681_v38 }
 0x49d   : > { %24912 = vmatprep.mubr.msk.f32.mxu0 %vm7365_vm3, %v8754_v19  ;;  %v28090_v19 = vld [vmem:[#allocation3 + $0x171] sm:$0xff] }
 0x49e   : > { %25504 = vmatmul.mubr.msk.f32.gmra.mrb[82].mxu1 %vm7365_vm3, %v13892_v44  ;;  %v28091_v44 = vld [vmem:[#allocation3 + $0x179] sm:$0xff] }
 0x49f   : > { %25506 = vmatprep.mubr.msk.f32.mxu1 %vm7365_vm3, %v13893_v12  ;;  %26684 = vmatpush3.bf16.msra.mxu1 %v26681_v38  ;;  %v22047_v38 = vld [vmem:[%s32531_s3 + $0x170] sm:$0xff] }
 0x4a0   : > { %24913 = vmatmul.mubr.msk.f32.gmra.mrb[58].mxu0 %vm7365_vm3, %v8755_v21  ;;  %v26685_v26 = vpack.c.bf16 %v22048_v11, %v22047_v38  ;;  %v8783_v12 = vld [vmem:[#allocation3 + $0x220] sm:$0xff]  ;;  %v8784_v21 = vld [vmem:[#allocation3 + $0x230] sm:$0xff] }
 0x4a1   : > { %24915 = vmatprep.mubr.msk.f32.mxu0 %vm7365_vm3, %v8756_v61  ;;  %v28092_v61 = vld [vmem:[#allocation3 + $0x181] sm:$0xff]  ;;  %v28118_v38 = vld [vmem:[#allocation3 + $0x289] sm:$0xff]  ;;  %v28119_v11 = vld [vmem:[#allocation3 + $0x291] sm:$0xff] }
 0x4a2   : > { %25507 = vmatmul.mubr.msk.f32.gmra.mrb[84].mxu1 %vm7365_vm3, %v13894_v62  ;;  %26686 = vmatprep.subr.bf16.mxu1 %v26685_v26  ;;  %v28093_v62 = vld [vmem:[#allocation3 + $0x191] sm:$0xff] }
 0x4a3   : > { %25509 = vmatprep.mubr.msk.f32.mxu1 %vm7365_vm3, %v13895_v18  ;;  %26688 = vmatpush3.bf16.msra.mxu1 %v26685_v26  ;;  %v8785_v18 = vld [vmem:[#allocation3 + $0x238] sm:$0xff]  ;;  %v8812_v26 = vld [vmem:[#allocation3 + $0x348] sm:$0xff] }
 0x4a4   : > { %24916 = vmatmul.mubr.msk.f32.gmra.mrb[60].mxu0 %vm7365_vm3, %v8757_v1  ;;  %v8786_v1 = vld [vmem:[#allocation3 + $0x240] sm:$0xff] }
 0x4a5   : > { %24918 = vmatprep.mubr.msk.f32.mxu0 %vm7365_vm3, %v8758_v2  ;;  %v28094_v2 = vld [vmem:[#allocation3 + $0x199] sm:$0xff] }
 0x4a6   : > { %25510 = vmatmul.mubr.msk.f32.gmra.mrb[86].mxu1 %vm7365_vm3, %v13896_v50  ;;  %v28095_v50 = vld [vmem:[#allocation3 + $0x1a1] sm:$0xff] }
 0x4a7   : > { %25512 = vmatprep.mubr.msk.f32.mxu1 %vm7365_vm3, %v13897_v6  ;;  %v8787_v6 = vld [vmem:[#allocation3 + $0x248] sm:$0xff] }
 0x4a8   : > { %24919 = vmatmul.mubr.msk.f32.gmra.mrb[62].mxu0 %vm7365_vm3, %v8759_v17  ;;  %v8788_v17 = vld [vmem:[#allocation3 + $0x258] sm:$0xff] }
 0x4a9   : > { %24921 = vmatprep.mubr.msk.f32.mxu0 %vm7365_vm3, %v8760_v31  ;;  %v28096_v31 = vld [vmem:[#allocation3 + $0x1a9] sm:$0xff] }
 0x4aa   : > { %25513 = vmatmul.mubr.msk.f32.gmra.mrb[88].mxu1 %vm7365_vm3, %v13898_v33  ;;  %v28097_v33 = vld [vmem:[#allocation3 + $0x1b9] sm:$0xff] }
 0x4ab   : > { %25515 = vmatprep.mubr.msk.f32.mxu1 %vm7365_vm3, %v13899_v48  ;;  %v8789_v48 = vld [vmem:[#allocation3 + $0x260] sm:$0xff] }
 0x4ac   : > { %24922 = vmatmul.mubr.msk.f32.gmra.mrb[64].mxu0 %vm7365_vm3, %v8761_v45  ;;  %v8790_v45 = vld [vmem:[#allocation3 + $0x268] sm:$0xff] }
 0x4ad   : > { %24924 = vmatprep.mubr.msk.f32.mxu0 %vm7365_vm3, %v8762_v58  ;;  %v28098_v58 = vld [vmem:[#allocation3 + $0x1c1] sm:$0xff] }
 0x4ae   : > { %25516 = vmatmul.mubr.msk.f32.gmra.mrb[90].mxu1 %vm7365_vm3, %v13900_v53  ;;  %v28099_v53 = vld [vmem:[#allocation3 + $0x1c9] sm:$0xff] }
 0x4af   : > { %25518 = vmatprep.mubr.msk.f32.mxu1 %vm7365_vm3, %v13901_v34  ;;  %v8791_v34 = vld [vmem:[#allocation3 + $0x270] sm:$0xff] }
 0x4b0   : > { %24925 = vmatmul.mubr.msk.f32.gmra.mrb[66].mxu0 %vm7365_vm3, %v8763_v36  ;;  %v8792_v36 = vld [vmem:[#allocation3 + $0x280] sm:$0xff] }
 0x4b1   : > { %24927 = vmatprep.mubr.msk.f32.mxu0 %vm7365_vm3, %v8764_v10  ;;  %v28100_v10 = vld [vmem:[#allocation3 + $0x1d1] sm:$0xff] }
 0x4b2   : > { %25519 = vmatmul.mubr.msk.f32.gmra.mrb[92].mxu1 %vm7365_vm3, %v28072_v13  ;;  %v28101_v13 = vld [vmem:[#allocation3 + $0x1e1] sm:$0xff] }
 0x4b3   : > { %25521 = vmatprep.mubr.msk.f32.mxu1 %vm7365_vm3, %v28073_v57  ;;  %v8793_v57 = vld [vmem:[#allocation3 + $0x288] sm:$0xff] }
 0x4b4   : > { %24928 = vmatmul.mubr.msk.f32.gmra.mrb[68].mxu0 %vm7365_vm3, %v8765_v51  ;;  %v8794_v51 = vld [vmem:[#allocation3 + $0x290] sm:$0xff] }
 0x4b5   : > { %24930 = vmatprep.mubr.msk.f32.mxu0 %vm7365_vm3, %v8766_v7  ;;  %v28102_v7 = vld [vmem:[#allocation3 + $0x1e9] sm:$0xff] }
 0x4b6   : > { %25522 = vmatmul.mubr.msk.f32.gmra.mrb[94].mxu1 %vm7365_vm3, %v28074_v59  ;;  %v28103_v59 = vld [vmem:[#allocation3 + $0x1f1] sm:$0xff] }
 0x4b7   : > { %25524 = vmatprep.mubr.msk.f32.mxu1 %vm7365_vm3, %v28075_v32  ;;  %v8795_v32 = vld [vmem:[#allocation3 + $0x298] sm:$0xff] }
 0x4b8   : > { %24931 = vmatmul.mubr.msk.f32.gmra.mrb[70].mxu0 %vm7365_vm3, %v8767_v23  ;;  %v8796_v23 = vld [vmem:[#allocation3 + $0x2a8] sm:$0xff] }
 0x4b9   : > { %24933 = vmatprep.mubr.msk.f32.mxu0 %vm7365_vm3, %v8768_v27  ;;  %v28104_v27 = vld [vmem:[#allocation3 + $0x1f9] sm:$0xff] }
 0x4ba   : > { %25525 = vmatmul.mubr.msk.f32.gmra.mrb[96].mxu1 %vm7365_vm3, %v28076_v49  ;;  %v28105_v49 = vld [vmem:[#allocation3 + $0x209] sm:$0xff] }
 0x4bb   : > { %25527 = vmatprep.mubr.msk.f32.mxu1 %vm7365_vm3, %v28077_v25  ;;  %v8797_v25 = vld [vmem:[#allocation3 + $0x2b0] sm:$0xff] }
 0x4bc   : > { %24934 = vmatmul.mubr.msk.f32.gmra.mrb[72].mxu0 %vm7365_vm3, %v8769_v28  ;;  %v8798_v28 = vld [vmem:[#allocation3 + $0x2b8] sm:$0xff] }
 0x4bd   : > { %24936 = vmatprep.mubr.msk.f32.mxu0 %vm7365_vm3, %v8770_v4  ;;  %v28106_v4 = vld [vmem:[#allocation3 + $0x211] sm:$0xff] }
 0x4be   : > { %25528 = vmatmul.mubr.msk.f32.gmra.mrb[98].mxu1 %vm7365_vm3, %v28078_v5  ;;  %v28107_v5 = vld [vmem:[#allocation3 + $0x219] sm:$0xff] }
 0x4bf   : > { %25530 = vmatprep.mubr.msk.f32.mxu1 %vm7365_vm3, %v28079_v47  ;;  %v8799_v47 = vld [vmem:[#allocation3 + $0x2c0] sm:$0xff] }
 0x4c0   : > { %24937 = vmatmul.mubr.msk.f32.gmra.mrb[74].mxu0 %vm7365_vm3, %v8771_v14  ;;  %v8800_v14 = vld [vmem:[#allocation3 + $0x2d0] sm:$0xff] }
 0x4c1   : > { %24939 = vmatprep.mubr.msk.f32.mxu0 %vm7365_vm3, %v8772_v15  ;;  %v28108_v15 = vld [vmem:[#allocation3 + $0x221] sm:$0xff] }
 0x4c2   : > { %25531 = vmatmul.mubr.msk.f32.gmra.mrb[100].mxu1 %vm7365_vm3, %v28080_v16  ;;  %v28109_v16 = vld [vmem:[#allocation3 + $0x231] sm:$0xff] }
 0x4c3   : > { %25533 = vmatprep.mubr.msk.f32.mxu1 %vm7365_vm3, %v28081_v8  ;;  %v8801_v8 = vld [vmem:[#allocation3 + $0x2d8] sm:$0xff] }
 0x4c4   : > { %24940 = vmatmul.mubr.msk.f32.gmra.mrb[76].mxu0 %vm7365_vm3, %v8773_v43  ;;  %v8802_v43 = vld [vmem:[#allocation3 + $0x2e0] sm:$0xff] }
 0x4c5   : > { %24942 = vmatprep.mubr.msk.f32.mxu0 %vm7365_vm3, %v8774_v40  ;;  %v28110_v40 = vld [vmem:[#allocation3 + $0x239] sm:$0xff] }
 0x4c6   : > { %25534 = vmatmul.mubr.msk.f32.gmra.mrb[102].mxu1 %vm7365_vm3, %v28082_v37  ;;  %v28111_v37 = vld [vmem:[#allocation3 + $0x241] sm:$0xff] }
 0x4c7   : > { %25536 = vmatprep.mubr.msk.f32.mxu1 %vm7365_vm3, %v28083_v46  ;;  %v8803_v46 = vld [vmem:[#allocation3 + $0x2e8] sm:$0xff] }
 0x4c8   : > { %24943 = vmatmul.mubr.msk.f32.gmra.mrb[78].mxu0 %vm7365_vm3, %v8775_v3  ;;  %v8804_v3 = vld [vmem:[#allocation3 + $0x2f8] sm:$0xff] }
 0x4c9   : > { %24945 = vmatprep.mubr.msk.f32.mxu0 %vm7365_vm3, %v8776_v55  ;;  %v28112_v55 = vld [vmem:[#allocation3 + $0x249] sm:$0xff] }
 0x4ca   : > { %25537 = vmatmul.mubr.msk.f32.gmra.mrb[104].mxu1 %vm7365_vm3, %v28084_v56  ;;  %v28113_v56 = vld [vmem:[#allocation3 + $0x259] sm:$0xff] }
 0x4cb   : > { %25539 = vmatprep.mubr.msk.f32.mxu1 %vm7365_vm3, %v28085_v60  ;;  %v8805_v60 = vld [vmem:[#allocation3 + $0x300] sm:$0xff] }
 0x4cc   : > { %24946 = vmatmul.mubr.msk.f32.gmra.mrb[80].mxu0 %vm7365_vm3, %v8777_v9  ;;  %v8806_v9 = vld [vmem:[#allocation3 + $0x308] sm:$0xff] }
 0x4cd   : > { %24948 = vmatprep.mubr.msk.f32.mxu0 %vm7365_vm3, %v8778_v52  ;;  %v28114_v52 = vld [vmem:[#allocation3 + $0x261] sm:$0xff] }
 0x4ce   : > { %25540 = vmatmul.mubr.msk.f32.gmra.mrb[106].mxu1 %vm7365_vm3, %v28086_v41  ;;  %v28115_v41 = vld [vmem:[#allocation3 + $0x269] sm:$0xff] }
 0x4cf   : > { %25542 = vmatprep.mubr.msk.f32.mxu1 %vm7365_vm3, %v28087_v54  ;;  %v8807_v54 = vld [vmem:[#allocation3 + $0x310] sm:$0xff] }
 0x4d0   : > { %24949 = vmatmul.mubr.msk.f32.gmra.mrb[82].mxu0 %vm7365_vm3, %v8779_v29  ;;  %v8808_v29 = vld [vmem:[#allocation3 + $0x320] sm:$0xff] }
 0x4d1   : > { %24951 = vmatprep.mubr.msk.f32.mxu0 %vm7365_vm3, %v8780_v42  ;;  %v28116_v42 = vld [vmem:[#allocation3 + $0x271] sm:$0xff] }
 0x4d2   : > { %25543 = vmatmul.mubr.msk.f32.gmra.mrb[108].mxu1 %vm7365_vm3, %v28088_v22  ;;  %v28117_v22 = vld [vmem:[#allocation3 + $0x281] sm:$0xff] }
 0x4d3   : > { %25545 = vmatprep.mubr.msk.f32.mxu1 %vm7365_vm3, %v28089_v39  ;;  %v8809_v39 = vld [vmem:[#allocation3 + $0x328] sm:$0xff] }
 0x4d4   : > { %24952 = vmatmul.mubr.msk.f32.gmra.mrb[84].mxu0 %vm7365_vm3, %v8781_v0  ;;  %v8810_v0 = vld [vmem:[#allocation3 + $0x330] sm:$0xff] }
 0x4d5   : > { %24954 = vmatprep.mubr.msk.f32.mxu0 %vm7365_vm3, %v8782_v20  ;;  %v8811_v20 = vld [vmem:[#allocation3 + $0x338] sm:$0xff] }
 0x4d6   : > { %25546 = vmatmul.mubr.msk.f32.gmra.mrb[110].mxu1 %vm7365_vm3, %v28090_v19  ;;  %v28120_v19 = vld [vmem:[#allocation3 + $0x299] sm:$0xff] }
 0x4d7   : > { %25548 = vmatprep.mubr.msk.f32.mxu1 %vm7365_vm3, %v28091_v44  ;;  %v28121_v44 = vld [vmem:[#allocation3 + $0x2a9] sm:$0xff] }
 0x4d8   : > { %24955 = vmatmul.mubr.msk.f32.gmra.mrb[86].mxu0 %vm7365_vm3, %v8783_v12  ;;  %v8813_v12 = vld [vmem:[#allocation3 + $0x350] sm:$0xff] }
 0x4d9   : > { %24957 = vmatprep.mubr.msk.f32.mxu0 %vm7365_vm3, %v8784_v21  ;;  %v22177_v21 = vld [vmem:[%s32531_s3 + $0x180] sm:$0xff] }
 0x4da   : > { %25549 = vmatmul.mubr.msk.f32.gmra.mrb[112].mxu1 %vm7365_vm3, %v28092_v61  ;;  %v22178_v61 = vld [vmem:[%s32531_s3 + $0x188] sm:$0xff] }
 0x4db   : > { %25551 = vmatprep.mubr.msk.f32.mxu1 %vm7365_vm3, %v28093_v62  ;;  %v8814_v62 = vld [vmem:[#allocation3 + $0x358] sm:$0xff] }
 0x4dc   : > { %24958 = vmatmul.mubr.msk.f32.gmra.mrb[88].mxu0 %vm7365_vm3, %v8785_v18  ;;  %v30970_v18 = vpack.c.bf16 %v22178_v61, %v22177_v21  ;;  %v28149_v21 = vld [vmem:[#allocation3 + $0x3c1] sm:$0xff] }
 0x4dd   : > { %24960 = vmatprep.mubr.msk.f32.mxu0 %vm7365_vm3, %v8786_v1  ;;  %v28122_v1 = vld [vmem:[#allocation3 + $0x2b1] sm:$0xff]  ;;  %v8841_v61 = vld [vmem:[#allocation3 + $0x468] sm:$0xff] }
 0x4de   : > { %25552 = vmatmul.mubr.msk.f32.gmra.mrb[114].mxu1 %vm7365_vm3, %v28094_v2  ;;  %26690 = vmatprep.subr.bf16.mxu1 %v30970_v18  ;;  %v28123_v2 = vld [vmem:[#allocation3 + $0x2b9] sm:$0xff] }
 0x4df   : > { %25554 = vmatprep.mubr.msk.f32.mxu1 %vm7365_vm3, %v28095_v50  ;;  %v8815_v50 = vld [vmem:[#allocation3 + $0x360] sm:$0xff] }
 0x4e0   : > { %24961 = vmatmul.mubr.msk.f32.gmra.mrb[90].mxu0 %vm7365_vm3, %v8787_v6  ;;  %v8816_v6 = vld [vmem:[#allocation3 + $0x370] sm:$0xff] }
 0x4e1   : > { %24963 = vmatprep.mubr.msk.f32.mxu0 %vm7365_vm3, %v8788_v17  ;;  %v28124_v17 = vld [vmem:[#allocation3 + $0x2c1] sm:$0xff] }
 0x4e2   : > { %25555 = vmatmul.mubr.msk.f32.gmra.mrb[116].mxu1 %vm7365_vm3, %v28096_v31  ;;  %v28125_v31 = vld [vmem:[#allocation3 + $0x2d1] sm:$0xff] }
 0x4e3   : > { %25557 = vmatprep.mubr.msk.f32.mxu1 %vm7365_vm3, %v28097_v33  ;;  %v8817_v33 = vld [vmem:[#allocation3 + $0x378] sm:$0xff] }
 0x4e4   : > { %24964 = vmatmul.mubr.msk.f32.gmra.mrb[92].mxu0 %vm7365_vm3, %v8789_v48  ;;  %v8818_v48 = vld [vmem:[#allocation3 + $0x380] sm:$0xff] }
 0x4e5   : > { %24966 = vmatprep.mubr.msk.f32.mxu0 %vm7365_vm3, %v8790_v45  ;;  %v28126_v45 = vld [vmem:[#allocation3 + $0x2d9] sm:$0xff] }
 0x4e6   : > { %25558 = vmatmul.mubr.msk.f32.gmra.mrb[118].mxu1 %vm7365_vm3, %v28098_v58  ;;  %v28127_v58 = vld [vmem:[#allocation3 + $0x2e1] sm:$0xff] }
 0x4e7   : > { %25560 = vmatprep.mubr.msk.f32.mxu1 %vm7365_vm3, %v28099_v53  ;;  %v8819_v53 = vld [vmem:[#allocation3 + $0x388] sm:$0xff] }
 0x4e8   : > { %24967 = vmatmul.mubr.msk.f32.gmra.mrb[94].mxu0 %vm7365_vm3, %v8791_v34  ;;  %v8820_v34 = vld [vmem:[#allocation3 + $0x398] sm:$0xff] }
 0x4e9   : > { %24969 = vmatprep.mubr.msk.f32.mxu0 %vm7365_vm3, %v8792_v36  ;;  %v28128_v36 = vld [vmem:[#allocation3 + $0x2e9] sm:$0xff] }
 0x4ea   : > { %25561 = vmatmul.mubr.msk.f32.gmra.mrb[120].mxu1 %vm7365_vm3, %v28100_v10  ;;  %v28129_v10 = vld [vmem:[#allocation3 + $0x2f9] sm:$0xff] }
 0x4eb   : > { %25563 = vmatprep.mubr.msk.f32.mxu1 %vm7365_vm3, %v28101_v13  ;;  %v8821_v13 = vld [vmem:[#allocation3 + $0x3a0] sm:$0xff] }
 0x4ec   : > { %24970 = vmatmul.mubr.msk.f32.gmra.mrb[96].mxu0 %vm7365_vm3, %v8793_v57  ;;  %v8822_v57 = vld [vmem:[#allocation3 + $0x3a8] sm:$0xff] }
 0x4ed   : > { %24972 = vmatprep.mubr.msk.f32.mxu0 %vm7365_vm3, %v8794_v51  ;;  %v28130_v51 = vld [vmem:[#allocation3 + $0x301] sm:$0xff] }
 0x4ee   : > { %25564 = vmatmul.mubr.msk.f32.gmra.mrb[122].mxu1 %vm7365_vm3, %v28102_v7  ;;  %v28131_v7 = vld [vmem:[#allocation3 + $0x309] sm:$0xff] }
 0x4ef   : > { %25566 = vmatprep.mubr.msk.f32.mxu1 %vm7365_vm3, %v28103_v59  ;;  %v8823_v59 = vld [vmem:[#allocation3 + $0x3b0] sm:$0xff] }
 0x4f0   : > { %24973 = vmatmul.mubr.msk.f32.gmra.mrb[98].mxu0 %vm7365_vm3, %v8795_v32  ;;  %v8824_v32 = vld [vmem:[#allocation3 + $0x3c0] sm:$0xff] }
 0x4f1   : > { %24975 = vmatprep.mubr.msk.f32.mxu0 %vm7365_vm3, %v8796_v23  ;;  %v28132_v23 = vld [vmem:[#allocation3 + $0x311] sm:$0xff] }
 0x4f2   : > { %25567 = vmatmul.mubr.msk.f32.gmra.mrb[124].mxu1 %vm7365_vm3, %v28104_v27  ;;  %v28133_v27 = vld [vmem:[#allocation3 + $0x321] sm:$0xff] }
 0x4f3   : > { %25569 = vmatprep.mubr.msk.f32.mxu1 %vm7365_vm3, %v28105_v49  ;;  %v8825_v49 = vld [vmem:[#allocation3 + $0x3c8] sm:$0xff] }
 0x4f4   : > { %24976 = vmatmul.mubr.msk.f32.gmra.mrb[100].mxu0 %vm7365_vm3, %v8797_v25  ;;  %v8826_v25 = vld [vmem:[#allocation3 + $0x3d0] sm:$0xff] }
 0x4f5   : > { %24978 = vmatprep.mubr.msk.f32.mxu0 %vm7365_vm3, %v8798_v28  ;;  %v28134_v28 = vld [vmem:[#allocation3 + $0x329] sm:$0xff] }
 0x4f6   : > { %25570 = vmatmul.mubr.msk.f32.gmra.mrb[126].mxu1 %vm7365_vm3, %v28106_v4  ;;  %v28135_v4 = vld [vmem:[#allocation3 + $0x331] sm:$0xff] }
 0x4f7   : > { %25572 = vmatprep.mubr.msk.f32.mxu1 %vm7365_vm3, %v28107_v5  ;;  %v8827_v5 = vld [vmem:[#allocation3 + $0x3d8] sm:$0xff] }
 0x4f8   : > { %24979 = vmatmul.mubr.msk.f32.gmra.mrb[102].mxu0 %vm7365_vm3, %v8799_v47  ;;  %v8828_v47 = vld [vmem:[#allocation3 + $0x3e8] sm:$0xff] }
 0x4f9   : > { %24981 = vmatprep.mubr.msk.f32.mxu0 %vm7365_vm3, %v8800_v14  ;;  %v28136_v14 = vld [vmem:[#allocation3 + $0x339] sm:$0xff] }
 0x4fa   : > { %25573 = vmatmul.mubr.msk.f32.gmra.mrb[0].mxu1 %vm7365_vm3, %v28108_v15  ;;  %v28137_v15 = vld [vmem:[#allocation3 + $0x349] sm:$0xff] }
 0x4fb   : > { %25575 = vmatprep.mubr.msk.f32.mxu1 %vm7365_vm3, %v28109_v16  ;;  %v8829_v16 = vld [vmem:[#allocation3 + $0x3f0] sm:$0xff] }
 0x4fc   : > { %24982 = vmatmul.mubr.msk.f32.gmra.mrb[104].mxu0 %vm7365_vm3, %v8801_v8  ;;  %v8830_v8 = vld [vmem:[#allocation3 + $0x3f8] sm:$0xff] }
 0x4fd   : > { %24984 = vmatprep.mubr.msk.f32.mxu0 %vm7365_vm3, %v8802_v43  ;;  %v28138_v43 = vld [vmem:[#allocation3 + $0x351] sm:$0xff] }
 0x4fe   : > { %25576 = vmatmul.mubr.msk.f32.gmra.mrb[2].mxu1 %vm7365_vm3, %v28110_v40  ;;  %v28139_v40 = vld [vmem:[#allocation3 + $0x359] sm:$0xff] }
 0x4ff   : > { %25578 = vmatprep.mubr.msk.f32.mxu1 %vm7365_vm3, %v28111_v37  ;;  %v8831_v37 = vld [vmem:[#allocation3 + $0x400] sm:$0xff] }
 0x500   : > { %24985 = vmatmul.mubr.msk.f32.gmra.mrb[106].mxu0 %vm7365_vm3, %v8803_v46  ;;  %v8832_v46 = vld [vmem:[#allocation3 + $0x410] sm:$0xff] }
 0x501   : > { %24987 = vmatprep.mubr.msk.f32.mxu0 %vm7365_vm3, %v8804_v3  ;;  %v28140_v3 = vld [vmem:[#allocation3 + $0x361] sm:$0xff] }
 0x502   : > { %25579 = vmatmul.mubr.msk.f32.gmra.mrb[4].mxu1 %vm7365_vm3, %v28112_v55  ;;  %v28141_v55 = vld [vmem:[#allocation3 + $0x371] sm:$0xff] }
 0x503   : > { %25581 = vmatprep.mubr.msk.f32.mxu1 %vm7365_vm3, %v28113_v56  ;;  %v8833_v56 = vld [vmem:[#allocation3 + $0x418] sm:$0xff] }
 0x504   : > { %24988 = vmatmul.mubr.msk.f32.gmra.mrb[108].mxu0 %vm7365_vm3, %v8805_v60  ;;  %v8834_v60 = vld [vmem:[#allocation3 + $0x420] sm:$0xff] }
 0x505   : > { %24990 = vmatprep.mubr.msk.f32.mxu0 %vm7365_vm3, %v8806_v9  ;;  %v28142_v9 = vld [vmem:[#allocation3 + $0x379] sm:$0xff] }
 0x506   : > { %25582 = vmatmul.mubr.msk.f32.gmra.mrb[6].mxu1 %vm7365_vm3, %v28114_v52  ;;  %v28143_v52 = vld [vmem:[#allocation3 + $0x381] sm:$0xff] }
 0x507   : > { %25584 = vmatprep.mubr.msk.f32.mxu1 %vm7365_vm3, %v28115_v41  ;;  %v8835_v41 = vld [vmem:[#allocation3 + $0x428] sm:$0xff] }
 0x508   : > { %24991 = vmatmul.mubr.msk.f32.gmra.mrb[110].mxu0 %vm7365_vm3, %v8807_v54  ;;  %v8836_v54 = vld [vmem:[#allocation3 + $0x438] sm:$0xff] }
 0x509   : > { %24993 = vmatprep.mubr.msk.f32.mxu0 %vm7365_vm3, %v8808_v29  ;;  %v28144_v29 = vld [vmem:[#allocation3 + $0x389] sm:$0xff] }
 0x50a   : > { %25585 = vmatmul.mubr.msk.f32.gmra.mrb[8].mxu1 %vm7365_vm3, %v28116_v42  ;;  %v28145_v42 = vld [vmem:[#allocation3 + $0x399] sm:$0xff] }
 0x50b   : > { %25587 = vmatprep.mubr.msk.f32.mxu1 %vm7365_vm3, %v28117_v22  ;;  %v8837_v22 = vld [vmem:[#allocation3 + $0x440] sm:$0xff] }
 0x50c   : > { %24994 = vmatmul.mubr.msk.f32.gmra.mrb[112].mxu0 %vm7365_vm3, %v8809_v39  ;;  %v8838_v39 = vld [vmem:[#allocation3 + $0x448] sm:$0xff] }
 0x50d   : > { %24996 = vmatprep.mubr.msk.f32.mxu0 %vm7365_vm3, %v8810_v0  ;;  %v28146_v0 = vld [vmem:[#allocation3 + $0x3a1] sm:$0xff] }
 0x50e   : > { %25588 = vmatmul.mubr.msk.f32.gmra.mrb[10].mxu1 %vm7365_vm3, %v28118_v38  ;;  %v28147_v38 = vld [vmem:[#allocation3 + $0x3a9] sm:$0xff] }
 0x50f   : > { %25590 = vmatprep.mubr.msk.f32.mxu1 %vm7365_vm3, %v28119_v11  ;;  %v8839_v11 = vld [vmem:[#allocation3 + $0x450] sm:$0xff] }
 0x510   : > { %24997 = vmatmul.mubr.msk.f32.gmra.mrb[114].mxu0 %vm7365_vm3, %v8811_v20  ;;  %v21633_v20 = vld [vmem:[%s32531_s3 + $0x80] sm:$0xff] }
 0x511   : > { %24999 = vmatprep.mubr.msk.f32.mxu0 %vm7365_vm3, %v8812_v26  ;;  %v21634_v26 = vld [vmem:[%s32531_s3 + $0x88] sm:$0xff] }
 0x512   : > { %25591 = vmatmul.mubr.msk.f32.gmra.mrb[12].mxu1 %vm7365_vm3, %v28120_v19  ;;  %v8840_v19 = vld [vmem:[#allocation3 + $0x460] sm:$0xff] }
 0x513   : > { %25593 = vmatprep.mubr.msk.f32.mxu1 %vm7365_vm3, %v28121_v44  ;;  %v26625_v44 = vpack.c.bf16 %v21634_v26, %v21633_v20  ;;  %v28173_v20 = vld [vmem:[#allocation3 + $0x4b1] sm:$0xff]  ;;  %v31123_v26 = vld [vmem:[#allocation3 + $0x5a] sm:$0xff] }
 0x514   : > { %25000 = vmatmul.mubr.msk.f32.gmra.mrb[116].mxu0 %vm7365_vm3, %v8813_v12  ;;  %v28148_v12 = vld [vmem:[#allocation3 + $0x3b1] sm:$0xff] }
 0x515   : > { %25002 = vmatprep.mubr.msk.f32.mxu0 %vm7365_vm3, %v8814_v62  ;;  %26626 = vmatprep.subr.bf16.mxu0 %v26625_v44  ;;  %v21635_v62 = vld [vmem:[%s32531_s3 + $0x90] sm:$0xff] }
 0x516   : > { %25594 = vmatmul.mubr.msk.f32.gmra.mrb[14].mxu1 %vm7365_vm3, %v28122_v1  ;;  %26628 = vmatpush3.bf16.msra.mxu0 %v26625_v44  ;;  %v21636_v1 = vld [vmem:[%s32531_s3 + $0x98] sm:$0xff]  ;;  %v28174_v44 = vld [vmem:[#allocation3 + $0x4b9] sm:$0xff] }
 0x517   : > { %25596 = vmatprep.mubr.msk.f32.mxu1 %vm7365_vm3, %v28123_v2  ;;  %v8842_v2 = vld [vmem:[#allocation3 + $0x470] sm:$0xff] }
 0x518   : > { %25003 = vmatmul.mubr.msk.f32.gmra.mrb[118].mxu0 %vm7365_vm3, %v8815_v50  ;;  %v26629_v50 = vpack.c.bf16 %v21636_v1, %v21635_v62  ;;  %v28177_v62 = vld [vmem:[#allocation3 + $0x4d9] sm:$0xff]  ;;  %v31143_v1 = vld [vmem:[#allocation3 + $0x82] sm:$0xff] }
 0x519   : > { %25005 = vmatprep.mubr.msk.f32.mxu0 %vm7365_vm3, %v8816_v6  ;;  %v28150_v6 = vld [vmem:[#allocation3 + $0x3c9] sm:$0xff] }
 0x51a   : > { %25597 = vmatmul.mubr.msk.f32.gmra.mrb[16].mxu1 %vm7365_vm3, %v28124_v17  ;;  %26630 = vmatprep.subr.bf16.mxu0 %v26629_v50  ;;  %v28151_v17 = vld [vmem:[#allocation3 + $0x3d1] sm:$0xff] }
 0x51b   : > { %25599 = vmatprep.mubr.msk.f32.mxu1 %vm7365_vm3, %v28125_v31  ;;  %v8843_v31 = vld [vmem:[#allocation3 + $0x478] sm:$0xff]  ;;  %26632 = vmatpush3.bf16.msra.mxu0 %v26629_v50  ;;  %v28178_v50 = vld [vmem:[#allocation3 + $0x4e1] sm:$0xff] }
 0x51c   : > { %25006 = vmatmul.mubr.msk.f32.gmra.mrb[120].mxu0 %vm7365_vm3, %v8817_v33  ;;  %v21637_v33 = vld [vmem:[%s32531_s3 + $0xa0] sm:$0xff] }
 0x51d   : > { %25008 = vmatprep.mubr.msk.f32.mxu0 %vm7365_vm3, %v8818_v48  ;;  %v21638_v48 = vld [vmem:[%s32531_s3 + $0xa8] sm:$0xff] }
 0x51e   : > { %25600 = vmatmul.mubr.msk.f32.gmra.mrb[18].mxu1 %vm7365_vm3, %v28126_v45  ;;  %v8844_v45 = vld [vmem:[#allocation3 + $0x488] sm:$0xff] }
 0x51f   : > { %25602 = vmatprep.mubr.msk.f32.mxu1 %vm7365_vm3, %v28127_v58  ;;  %v26633_v58 = vpack.c.bf16 %v21638_v48, %v21637_v33  ;;  %v28180_v33 = vld [vmem:[#allocation3 + $0x4f1] sm:$0xff]  ;;  %v14011_v48 = vld [vmem:[#allocation3 + $0x501] sm:$0xff] }
 0x520   : > { %25009 = vmatmul.mubr.msk.f32.gmra.mrb[122].mxu0 %vm7365_vm3, %v8819_v53  ;;  %v28152_v53 = vld [vmem:[#allocation3 + $0x3d9] sm:$0xff] }
 0x521   : > { %25011 = vmatprep.mubr.msk.f32.mxu0 %vm7365_vm3, %v8820_v34  ;;  %26634 = vmatprep.subr.bf16.mxu0 %v26633_v58  ;;  %v28153_v34 = vld [vmem:[#allocation3 + $0x3e9] sm:$0xff] }
 0x522   : > { %25603 = vmatmul.mubr.msk.f32.gmra.mrb[20].mxu1 %vm7365_vm3, %v28128_v36  ;;  %v8845_v36 = vld [vmem:[#allocation3 + $0x490] sm:$0xff]  ;;  %26636 = vmatpush3.bf16.msra.mxu0 %v26633_v58 }
 0x523   : > { %25605 = vmatprep.mubr.msk.f32.mxu1 %vm7365_vm3, %v28129_v10  ;;  %v21639_v10 = vld [vmem:[%s32531_s3 + $0xb0] sm:$0xff]  ;;  %v31165_v58 = vld [vmem:[#allocation3 + $0xb2] sm:$0xff] }
 0x524   : > { %25012 = vmatmul.mubr.msk.f32.gmra.mrb[124].mxu0 %vm7365_vm3, %v8821_v13  ;;  %v21640_v13 = vld [vmem:[%s32531_s3 + $0xb8] sm:$0xff] }
 0x525   : > { %25014 = vmatprep.mubr.msk.f32.mxu0 %vm7365_vm3, %v8822_v57  ;;  %v8846_v57 = vld [vmem:[#allocation3 + $0x498] sm:$0xff] }
 0x526   : > { %25606 = vmatmul.mubr.msk.f32.gmra.mrb[22].mxu1 %vm7365_vm3, %v28130_v51  ;;  %v26637_v51 = vpack.c.bf16 %v21640_v13, %v21639_v10  ;;  %v31175_v10 = vld [vmem:[#allocation3 + $0xca] sm:$0xff]  ;;  %v14014_v13 = vld [vmem:[#allocation3 + $0x519] sm:$0xff] }
 0x527   : > { %25608 = vmatprep.mubr.msk.f32.mxu1 %vm7365_vm3, %v28131_v7  ;;  %v28154_v7 = vld [vmem:[#allocation3 + $0x3f1] sm:$0xff] }
 0x528   : > { %25015 = vmatmul.mubr.msk.f32.gmra.mrb[126].mxu0 %vm7365_vm3, %v8823_v59  ;;  %26638 = vmatprep.subr.bf16.mxu0 %v26637_v51  ;;  %v28155_v59 = vld [vmem:[#allocation3 + $0x3f9] sm:$0xff] }
 0x529   : > { %25017 = vmatprep.mubr.msk.f32.mxu0 %vm7365_vm3, %v8824_v32  ;;  %v8847_v32 = vld [vmem:[#allocation3 + $0x4a0] sm:$0xff]  ;;  %26640 = vmatpush3.bf16.msra.mxu0 %v26637_v51  ;;  %v22180_v51 = vld [vmem:[%s32531_s3 + $0x198] sm:$0xff] }
 0x52a   : > { %25609 = vmatmul.mubr.msk.f32.gmra.mrb[24].mxu1 %vm7365_vm3, %v28132_v23  ;;  %v8848_v23 = vld [vmem:[#allocation3 + $0x4b0] sm:$0xff]  ;;  %26642 = vmatprep.subr.bf16.mxu0 %v30022_v63 }
 0x52b   : > { %25611 = vmatprep.mubr.msk.f32.mxu1 %vm7365_vm3, %v28133_v27  ;;  %v28156_v27 = vld [vmem:[#allocation3 + $0x401] sm:$0xff] }
 0x52c   : > { %25018 = vmatmul.mubr.msk.f32.gmra.mrb[128].mxu0 %vm7365_vm3, %v8825_v49  ;;  %v28157_v49 = vld [vmem:[#allocation3 + $0x411] sm:$0xff] }
 0x52d   : > { %25020 = vmatprep.mubr.msk.f32.mxu0 %vm7365_vm3, %v8826_v25  ;;  %v8849_v25 = vld [vmem:[#allocation3 + $0x4b8] sm:$0xff] }
 0x52e   : > { %25612 = vmatmul.mubr.msk.f32.gmra.mrb[26].mxu1 %vm7365_vm3, %v28134_v28  ;;  %v8850_v28 = vld [vmem:[#allocation3 + $0x4c0] sm:$0xff] }
 0x52f   : > { %25614 = vmatprep.mubr.msk.f32.mxu1 %vm7365_vm3, %v28135_v4  ;;  %v28158_v4 = vld [vmem:[#allocation3 + $0x419] sm:$0xff] }
 0x530   : > { %25021 = vmatmul.mubr.msk.f32.gmra.mrb[130].mxu0 %vm7365_vm3, %v8827_v5  ;;  %v28159_v5 = vld [vmem:[#allocation3 + $0x421] sm:$0xff] }
 0x531   : > { %25023 = vmatprep.mubr.msk.f32.mxu0 %vm7365_vm3, %v8828_v47  ;;  %v8851_v47 = vld [vmem:[#allocation3 + $0x4c8] sm:$0xff] }
 0x532   : > { %25615 = vmatmul.mubr.msk.f32.gmra.mrb[28].mxu1 %vm7365_vm3, %v28136_v14  ;;  %v8852_v14 = vld [vmem:[#allocation3 + $0x4d8] sm:$0xff] }
 0x533   : > { %25617 = vmatprep.mubr.msk.f32.mxu1 %vm7365_vm3, %v28137_v15  ;;  %v28160_v15 = vld [vmem:[#allocation3 + $0x429] sm:$0xff] }
 0x534   : > { %25024 = vmatmul.mubr.msk.f32.gmra.mrb[132].mxu0 %vm7365_vm3, %v8829_v16  ;;  %v28161_v16 = vld [vmem:[#allocation3 + $0x439] sm:$0xff] }
 0x535   : > { %25026 = vmatprep.mubr.msk.f32.mxu0 %vm7365_vm3, %v8830_v8  ;;  %v8853_v8 = vld [vmem:[#allocation3 + $0x4e0] sm:$0xff] }
 0x536   : > { %25618 = vmatmul.mubr.msk.f32.gmra.mrb[30].mxu1 %vm7365_vm3, %v28138_v43  ;;  %v8854_v43 = vld [vmem:[#allocation3 + $0x4e8] sm:$0xff] }
 0x537   : > { %25620 = vmatprep.mubr.msk.f32.mxu1 %vm7365_vm3, %v28139_v40  ;;  %v28162_v40 = vld [vmem:[#allocation3 + $0x441] sm:$0xff] }
 0x538   : > { %25027 = vmatmul.mubr.msk.f32.gmra.mrb[134].mxu0 %vm7365_vm3, %v8831_v37  ;;  %v11179_v37 = vld [vmem:[#allocation3 + $0x2] sm:$0xff] }
 0x539   : > { %25029 = vmatprep.mubr.msk.f32.mxu0 %vm7365_vm3, %v8832_v46  ;;  %v28163_v46 = vld [vmem:[#allocation3 + $0x449] sm:$0xff] }
 0x53a   : > { %25621 = vmatmul.mubr.msk.f32.gmra.mrb[32].mxu1 %vm7365_vm3, %v28140_v3  ;;  %v8855_v3 = vld [vmem:[#allocation3 + $0x4f0] sm:$0xff] }
 0x53b   : > { %25623 = vmatprep.mubr.msk.f32.mxu1 %vm7365_vm3, %v28141_v55  ;;  %v11180_v55 = vld [vmem:[#allocation3 + $0xa] sm:$0xff] }
 0x53c   : > { %25030 = vmatmul.mubr.msk.f32.gmra.mrb[136].mxu0 %vm7365_vm3, %v8833_v56  ;;  %v28164_v56 = vld [vmem:[#allocation3 + $0x451] sm:$0xff] }
 0x53d   : > { %25032 = vmatprep.mubr.msk.f32.mxu0 %vm7365_vm3, %v8834_v60  ;;  %v11181_v60 = vld [vmem:[#allocation3 + $0x12] sm:$0xff] }
 0x53e   : > { %25624 = vmatmul.mubr.msk.f32.gmra.mrb[34].mxu1 %vm7365_vm3, %v28142_v9  ;;  %v28165_v9 = vld [vmem:[#allocation3 + $0x461] sm:$0xff] }
 0x53f   : > { %25626 = vmatprep.mubr.msk.f32.mxu1 %vm7365_vm3, %v28143_v52  ;;  %v11182_v52 = vld [vmem:[#allocation3 + $0x1a] sm:$0xff] }
 0x540   : > { %25033 = vmatmul.mubr.msk.f32.gmra.mrb[138].mxu0 %vm7365_vm3, %v8835_v41  ;;  %v28166_v41 = vld [vmem:[#allocation3 + $0x469] sm:$0xff] }
 0x541   : > { %25035 = vmatprep.mubr.msk.f32.mxu0 %vm7365_vm3, %v8836_v54  ;;  %v28167_v54 = vld [vmem:[#allocation3 + $0x471] sm:$0xff] }
 0x542   : > { %25627 = vmatmul.mubr.msk.f32.gmra.mrb[36].mxu1 %vm7365_vm3, %v28144_v29  ;;  %v31091_v29 = vld [vmem:[#allocation3 + $0x2a] sm:$0xff] }
 0x543   : > { %25629 = vmatprep.mubr.msk.f32.mxu1 %vm7365_vm3, %v28145_v42  ;;  %v28168_v42 = vld [vmem:[#allocation3 + $0x479] sm:$0xff] }
 0x544   : > { %25036 = vmatmul.mubr.msk.f32.gmra.mrb[140].mxu0 %vm7365_vm3, %v8837_v22  ;;  %v31100_v22 = vld [vmem:[#allocation3 + $0x32] sm:$0xff] }
 0x545   : > { %25038 = vmatprep.mubr.msk.f32.mxu0 %vm7365_vm3, %v8838_v39  ;;  %v31102_v39 = vld [vmem:[#allocation3 + $0x3a] sm:$0xff] }
 0x546   : > { %25630 = vmatmul.mubr.msk.f32.gmra.mrb[38].mxu1 %vm7365_vm3, %v28146_v0  ;;  %v28171_v0 = vld [vmem:[#allocation3 + $0x499] sm:$0xff] }
 0x547   : > { %25632 = vmatprep.mubr.msk.f32.mxu1 %vm7365_vm3, %v28147_v38  ;;  %v31112_v38 = vld [vmem:[#allocation3 + $0x42] sm:$0xff] }
 0x548   : > { %25039 = vmatmul.mubr.msk.f32.gmra.mrb[142].mxu0 %vm7365_vm3, %v8839_v11  ;;  %v31114_v11 = vld [vmem:[#allocation3 + $0x52] sm:$0xff] }
 0x549   : > { %25041 = vmatprep.mubr.msk.f32.mxu0 %vm7365_vm3, %v8840_v19  ;;  %v31125_v19 = vld [vmem:[#allocation3 + $0x62] sm:$0xff] }
 0x54a   : > { %25633 = vmatmul.mubr.msk.f32.gmra.mrb[40].mxu1 %vm7365_vm3, %v28148_v12  ;;  %v31133_v12 = vld [vmem:[#allocation3 + $0x6a] sm:$0xff] }
 0x54b   : > { %25635 = vmatprep.mubr.msk.f32.mxu1 %vm7365_vm3, %v28149_v21  ;;  %v31135_v21 = vld [vmem:[#allocation3 + $0x7a] sm:$0xff] }
 0x54c   : > { %25042 = vmatmul.mubr.msk.f32.gmra.mrb[144].mxu0 %vm7365_vm3, %v8841_v61  ;;  %v28176_v61 = vld [vmem:[#allocation3 + $0x4c9] sm:$0xff] }
 0x54d   : > { %25044 = vmatprep.mubr.msk.f32.mxu0 %vm7365_vm3, %v8842_v2  ;;  %v31145_v2 = vld [vmem:[#allocation3 + $0x8a] sm:$0xff] }
 0x54e   : > { %25636 = vmatmul.mubr.msk.f32.gmra.mrb[42].mxu1 %vm7365_vm3, %v28150_v6  ;;  %v28179_v6 = vld [vmem:[#allocation3 + $0x4e9] sm:$0xff] }
 0x54f   : > { %25638 = vmatprep.mubr.msk.f32.mxu1 %vm7365_vm3, %v28151_v17  ;;  %v31153_v17 = vld [vmem:[#allocation3 + $0x92] sm:$0xff] }
 0x550   : > { %25045 = vmatmul.mubr.msk.f32.gmra.mrb[146].mxu0 %vm7365_vm3, %v8843_v31  ;;  %v31155_v31 = vld [vmem:[#allocation3 + $0xa2] sm:$0xff] }
 0x551   : > { %25047 = vmatprep.mubr.msk.f32.mxu0 %vm7365_vm3, %v8844_v45  ;;  %v31163_v45 = vld [vmem:[#allocation3 + $0xaa] sm:$0xff] }
 0x552   : > { %25639 = vmatmul.mubr.msk.f32.gmra.mrb[44].mxu1 %vm7365_vm3, %v28152_v53  ;;  %v14012_v53 = vld [vmem:[#allocation3 + $0x509] sm:$0xff] }
 0x553   : > { %25641 = vmatprep.mubr.msk.f32.mxu1 %vm7365_vm3, %v28153_v34  ;;  %v14013_v34 = vld [vmem:[#allocation3 + $0x511] sm:$0xff] }
 0x554   : > { %25048 = vmatmul.mubr.msk.f32.gmra.mrb[148].mxu0 %vm7365_vm3, %v8845_v36  ;;  %v31173_v36 = vld [vmem:[#allocation3 + $0xba] sm:$0xff] }
 0x555   : > { %25050 = vmatprep.mubr.msk.f32.mxu0 %vm7365_vm3, %v8846_v57  ;;  %v22179_v57 = vld [vmem:[%s32531_s3 + $0x190] sm:$0xff] }
 0x556   : > { %25642 = vmatmul.mubr.msk.f32.gmra.mrb[46].mxu1 %vm7365_vm3, %v28154_v7  ;;  %v15258_v7 = vld [vmem:[#allocation3 + $0xd2] sm:$0xff] }
 0x557   : > { %25644 = vmatprep.mubr.msk.f32.mxu1 %vm7365_vm3, %v28155_v59  ;;  %v15259_v59 = vld [vmem:[#allocation3 + $0xda] sm:$0xff] }
 0x558   : > { %25051 = vmatmul.mubr.msk.f32.gmra.mrb[150].mxu0 %vm7365_vm3, %v8847_v32  ;;  %v26693_v32 = vpack.c.bf16 %v22180_v51, %v22179_v57  ;;  %v15313_v57 = vld [vmem:[#allocation3 + $0x2fa] sm:$0xff]  ;;  %v15314_v51 = vld [vmem:[#allocation3 + $0x302] sm:$0xff] }
 0x559   : > { %25053 = vmatprep.mubr.msk.f32.mxu0 %vm7365_vm3, %v8848_v23  ;;  %v22181_v23 = vld [vmem:[%s32531_s3 + $0x1a0] sm:$0xff] }
 0x55a   : > { %25645 = vmatmul.mubr.msk.f32.gmra.mrb[48].mxu1 %vm7365_vm3, %v28156_v27  ;;  %v22182_v27 = vld [vmem:[%s32531_s3 + $0x1a8] sm:$0xff] }
 0x55b   : > { %25647 = vmatprep.mubr.msk.f32.mxu1 %vm7365_vm3, %v28157_v49  ;;  %v15260_v49 = vld [vmem:[#allocation3 + $0xe2] sm:$0xff] }
 0x55c   : > { %25054 = vmatmul.mubr.msk.f32.gmra.mrb[152].mxu0 %vm7365_vm3, %v8849_v25  ;;  %v15261_v25 = vld [vmem:[#allocation3 + $0xf2] sm:$0xff] }
 0x55d   : > { %25056 = vmatprep.mubr.msk.f32.mxu0 %vm7365_vm3, %v8850_v28  ;;  %v26697_v28 = vpack.c.bf16 %v22182_v27, %v22181_v23  ;;  %v15318_v23 = vld [vmem:[#allocation3 + $0x32a] sm:$0xff]  ;;  %v15319_v27 = vld [vmem:[#allocation3 + $0x332] sm:$0xff] }
 0x55e   : > { %25648 = vmatmul.mubr.msk.f32.gmra.mrb[50].mxu1 %vm7365_vm3, %v28158_v4  ;;  %v15262_v4 = vld [vmem:[#allocation3 + $0xfa] sm:$0xff] }
 0x55f   : > { %25650 = vmatprep.mubr.msk.f32.mxu1 %vm7365_vm3, %v28159_v5  ;;  %v15264_v5 = vld [vmem:[#allocation3 + $0x10a] sm:$0xff] }
 0x560   : > { %25057 = vmatmul.mubr.msk.f32.gmra.mrb[154].mxu0 %vm7365_vm3, %v8851_v47  ;;  %v15265_v47 = vld [vmem:[#allocation3 + $0x11a] sm:$0xff] }
 0x561   : > { %25059 = vmatprep.mubr.msk.f32.mxu0 %vm7365_vm3, %v8852_v14  ;;  %v15266_v14 = vld [vmem:[#allocation3 + $0x122] sm:$0xff] }
 0x562   : > { %25651 = vmatmul.mubr.msk.f32.gmra.mrb[52].mxu1 %vm7365_vm3, %v28160_v15  ;;  %v15267_v15 = vld [vmem:[#allocation3 + $0x12a] sm:$0xff] }
 0x563   : > { %25653 = vmatprep.mubr.msk.f32.mxu1 %vm7365_vm3, %v28161_v16  ;;  %v15268_v16 = vld [vmem:[#allocation3 + $0x132] sm:$0xff] }
 0x564   : > { %25060 = vmatmul.mubr.msk.f32.gmra.mrb[156].mxu0 %vm7365_vm3, %v8853_v8  ;;  %v15269_v8 = vld [vmem:[#allocation3 + $0x142] sm:$0xff] }
 0x565   : > { %25062 = vmatprep.mubr.msk.f32.mxu0 %vm7365_vm3, %v8854_v43  ;;  %v15270_v43 = vld [vmem:[#allocation3 + $0x14a] sm:$0xff] }
 0x566   : > { %25654 = vmatmul.mubr.msk.f32.gmra.mrb[54].mxu1 %vm7365_vm3, %v28162_v40  ;;  %v15271_v40 = vld [vmem:[#allocation3 + $0x152] sm:$0xff] }
 0x567   : > { %25656 = vmatprep.mubr.msk.f32.mxu1 %vm7365_vm3, %v28163_v46  ;;  %v15273_v46 = vld [vmem:[#allocation3 + $0x16a] sm:$0xff] }
 0x568   : > { %25063 = vmatmul.mubr.msk.f32.gmra.mrb[158].mxu0 %vm7365_vm3, %v8855_v3  ;;  %v15274_v3 = vld [vmem:[#allocation3 + $0x172] sm:$0xff] }
 0x569   : > { %25081 = vmatprep.mubr.msk.f32.mxu0 %vm7365_vm3, %v11179_v37  ;;  %v15272_v37 = vld [vmem:[#allocation3 + $0x15a] sm:$0xff] }
 0x56a   : > { %25657 = vmatmul.mubr.msk.f32.gmra.mrb[56].mxu1 %vm7365_vm3, %v28164_v56  ;;  %v15276_v56 = vld [vmem:[#allocation3 + $0x182] sm:$0xff] }
 0x56b   : > { %25659 = vmatprep.mubr.msk.f32.mxu1 %vm7365_vm3, %v28165_v9  ;;  %v15278_v9 = vld [vmem:[#allocation3 + $0x19a] sm:$0xff] }
 0x56c   : > { %25082 = vmatmul.mubr.msk.f32.vlgmr.msra.gmra.mrb[32].mxu0 %vm7365_vm3, %v11180_v55  ;;  %v15275_v55 = vld [vmem:[#allocation3 + $0x17a] sm:$0xff] }
 0x56d   : > { %25084 = vmatprep.mubr.msk.f32.mxu0 %vm7365_vm3, %v11181_v60  ;;  %26644 = vmatpush3.bf16.msra.mxu0 %v30022_v63  ;;  %v28169_v63 = vld [vmem:[#allocation3 + $0x489] sm:$0xff]  ;;  %v15277_v60 = vld [vmem:[#allocation3 + $0x192] sm:$0xff] }
 0x56e   : > { %25660 = vmatmul.mubr.msk.f32.gmra.mrb[58].mxu1 %vm7365_vm3, %v28166_v41  ;;  %26646 = vmatprep.subr.bf16.mxu0 %v30099_v24  ;;  %v15280_v41 = vld [vmem:[#allocation3 + $0x1aa] sm:$0xff] }
 0x56f   : > { %25662 = vmatprep.mubr.msk.f32.mxu1 %vm7365_vm3, %v28167_v54  ;;  %v15281_v54 = vld [vmem:[#allocation3 + $0x1ba] sm:$0xff] }
 0x570   : > { %25085 = vmatmul.mubr.msk.f32.gmra.mrb[34].mxu0 %vm7365_vm3, %v11182_v52  ;;  %v15279_v52 = vld [vmem:[#allocation3 + $0x1a2] sm:$0xff] }
 0x571   : > { %25087 = vmatprep.mubr.msk.f32.mxu0 %vm7365_vm3, %v31091_v29  ;;  %26648 = vmatpush3.bf16.msra.mxu0 %v30099_v24  ;;  %v28170_v24 = vld [vmem:[#allocation3 + $0x491] sm:$0xff] }
 0x572   : > { %25663 = vmatmul.mubr.msk.f32.gmra.mrb[60].mxu1 %vm7365_vm3, %v28168_v42  ;;  %26650 = vmatprep.subr.bf16.mxu0 %v30159_v30  ;;  %v15283_v42 = vld [vmem:[#allocation3 + $0x1ca] sm:$0xff] }
 0x573   : > { %25665 = vmatprep.mubr.msk.f32.mxu1 %vm7365_vm3, %v28169_v63  ;;  %v15284_v63 = vld [vmem:[#allocation3 + $0x1d2] sm:$0xff] }
 0x574   : > { %25088 = vmatmul.mubr.msk.f32.gmra.mrb[36].mxu0 %vm7365_vm3, %v31100_v22 }
 0x575   : > { %25090 = vmatprep.mubr.msk.f32.mxu0 %vm7365_vm3, %v31102_v39  ;;  %26652 = vmatpush3.bf16.msra.mxu0 %v30159_v30  ;;  %v28172_v30 = vld [vmem:[#allocation3 + $0x4a1] sm:$0xff] }
 0x576   : > { %25666 = vmatmul.mubr.msk.f32.gmra.mrb[62].mxu1 %vm7365_vm3, %v28170_v24  ;;  %26654 = vmatprep.subr.bf16.mxu0 %v30228_v35  ;;  %v15287_v24 = vld [vmem:[#allocation3 + $0x1f2] sm:$0xff] }
 0x577   : > { %25668 = vmatprep.mubr.msk.f32.mxu1 %vm7365_vm3, %v28171_v0  ;;  %v15288_v0 = vld [vmem:[#allocation3 + $0x1fa] sm:$0xff] }
 0x578   : > { %25091 = vmatmul.mubr.msk.f32.gmra.mrb[38].mxu0 %vm7365_vm3, %v31112_v38 }
 0x579   : > { %25093 = vmatprep.mubr.msk.f32.mxu0 %vm7365_vm3, %v31114_v11  ;;  %26656 = vmatpush3.bf16.msra.mxu0 %v30228_v35  ;;  %v28175_v35 = vld [vmem:[#allocation3 + $0x4c1] sm:$0xff] }
 0x57a   : > { %25669 = vmatmul.mubr.msk.f32.gmra.mrb[64].mxu1 %vm7365_vm3, %v28172_v30  ;;  %v22183_v30 = vld [vmem:[%s32531_s3 + $0x1b0] sm:$0xff] }
 0x57b   : > { %25671 = vmatprep.mubr.msk.f32.mxu1 %vm7365_vm3, %v28173_v20  ;;  %v22184_v20 = vld [vmem:[%s32531_s3 + $0x1b8] sm:$0xff] }
 0x57c   : > { %25094 = vmatmul.mubr.msk.f32.gmra.mrb[40].mxu0 %vm7365_vm3, %v31123_v26 }
 0x57d   : > { %25096 = vmatprep.mubr.msk.f32.mxu0 %vm7365_vm3, %v31125_v19 }
 0x57e   : > { %25672 = vmatmul.mubr.msk.f32.gmra.mrb[66].mxu1 %vm7365_vm3, %v28174_v44  ;;  %v15292_v44 = vld [vmem:[#allocation3 + $0x222] sm:$0xff] }
 0x57f   : > { %25674 = vmatprep.mubr.msk.f32.mxu1 %vm7365_vm3, %v28175_v35  ;;  %v15293_v35 = vld [vmem:[#allocation3 + $0x232] sm:$0xff] }
 0x580   : > { %25097 = vmatmul.mubr.msk.f32.gmra.mrb[42].mxu0 %vm7365_vm3, %v31133_v12 }
 0x581   : > { %25099 = vmatprep.mubr.msk.f32.mxu0 %vm7365_vm3, %v31135_v21 }
 0x582   : > { %25675 = vmatmul.mubr.msk.f32.gmra.mrb[68].mxu1 %vm7365_vm3, %v28176_v61  ;;  %v15296_v61 = vld [vmem:[#allocation3 + $0x24a] sm:$0xff] }
 0x583   : > { %25677 = vmatprep.mubr.msk.f32.mxu1 %vm7365_vm3, %v28177_v62  ;;  %v15297_v62 = vld [vmem:[#allocation3 + $0x25a] sm:$0xff] }
 0x584   : > { %25100 = vmatmul.mubr.msk.f32.gmra.mrb[44].mxu0 %vm7365_vm3, %v31143_v1 }
 0x585   : > { %25102 = vmatprep.mubr.msk.f32.mxu0 %vm7365_vm3, %v31145_v2 }
 0x586   : > { %25678 = vmatmul.mubr.msk.f32.gmra.mrb[70].mxu1 %vm7365_vm3, %v28178_v50  ;;  %v15300_v50 = vld [vmem:[#allocation3 + $0x272] sm:$0xff] }
 0x587   : > { %25680 = vmatprep.mubr.msk.f32.mxu1 %vm7365_vm3, %v28179_v6  ;;  %v15301_v6 = vld [vmem:[#allocation3 + $0x282] sm:$0xff] }
 0x588   : > { %25103 = vmatmul.mubr.msk.f32.gmra.mrb[46].mxu0 %vm7365_vm3, %v31153_v17 }
 0x589   : > { %25105 = vmatprep.mubr.msk.f32.mxu0 %vm7365_vm3, %v31155_v31 }
 0x58a   : > { %25681 = vmatmul.mubr.msk.f32.gmra.mrb[72].mxu1 %vm7365_vm3, %v28180_v33  ;;  %v15304_v33 = vld [vmem:[#allocation3 + $0x29a] sm:$0xff] }
 0x58b   : > { %25683 = vmatprep.mubr.msk.f32.mxu1 %vm7365_vm3, %v14011_v48  ;;  %v15305_v48 = vld [vmem:[#allocation3 + $0x2aa] sm:$0xff] }
 0x58c   : > { %25106 = vmatmul.mubr.msk.f32.gmra.mrb[48].mxu0 %vm7365_vm3, %v31163_v45 }
 0x58d   : > { %25108 = vmatprep.mubr.msk.f32.mxu0 %vm7365_vm3, %v31165_v58 }
 0x58e   : > { %25684 = vmatmul.mubr.msk.f32.gmra.mrb[74].mxu1 %vm7365_vm3, %v14012_v53  ;;  %v15308_v53 = vld [vmem:[#allocation3 + $0x2c2] sm:$0xff] }
 0x58f   : > { %25686 = vmatprep.mubr.msk.f32.mxu1 %vm7365_vm3, %v14013_v34  ;;  %v15309_v34 = vld [vmem:[#allocation3 + $0x2d2] sm:$0xff] }
 0x590   : > { %25109 = vmatmul.mubr.msk.f32.gmra.mrb[50].mxu0 %vm7365_vm3, %v31173_v36 }
 0x591   : > { %25111 = vmatprep.mubr.msk.f32.mxu0 %vm7365_vm3, %v31175_v10 }
 0x592   : > { %25687 = vmatmul.mubr.msk.f32.gmra.mrb[76].mxu1 %vm7365_vm3, %v14014_v13  ;;  %v15312_v13 = vld [vmem:[#allocation3 + $0x2ea] sm:$0xff] }
 0x593   : > { %25705 = vmatprep.mubr.msk.f32.mxu1 %vm7365_vm3, %v31091_v29  ;;  %v15282_v29 = vld [vmem:[#allocation3 + $0x1c2] sm:$0xff] }
 0x594   : > { %25112 = vmatmul.mubr.msk.f32.gmra.mrb[52].mxu0 %vm7365_vm3, %v15258_v7 }
 0x595   : > { %25114 = vmatprep.mubr.msk.f32.mxu0 %vm7365_vm3, %v15259_v59 }
 0x596   : > { %25706 = vmatmul.mubr.msk.f32.vlgmr.msra.gmra.mrb[78].mxu1 %vm7365_vm3, %v31100_v22  ;;  %v15285_v22 = vld [vmem:[#allocation3 + $0x1e2] sm:$0xff] }
 0x597   : > { %26692 = vmatpush3.bf16.msra.mxu1 %v30970_v18  ;;  %25708 = vmatprep.mubr.msk.f32.mxu1 %vm7365_vm3, %v31102_v39  ;;  %v15263_v18 = vld [vmem:[#allocation3 + $0x102] sm:$0xff]  ;;  %v15286_v39 = vld [vmem:[#allocation3 + $0x1ea] sm:$0xff] }
 0x598   : > { %26694 = vmatprep.subr.bf16.mxu1 %v26693_v32  ;;  %25115 = vmatmul.mubr.msk.f32.gmra.mrb[54].mxu0 %vm7365_vm3, %v15260_v49 }
 0x599   : > { %25117 = vmatprep.mubr.msk.f32.mxu0 %vm7365_vm3, %v15261_v25 }
 0x59a   : > { %25709 = vmatmul.mubr.msk.f32.gmra.mrb[80].mxu1 %vm7365_vm3, %v31112_v38  ;;  %v15289_v38 = vld [vmem:[#allocation3 + $0x20a] sm:$0xff] }
 0x59b   : > { %25711 = vmatprep.mubr.msk.f32.mxu1 %vm7365_vm3, %v31114_v11  ;;  %26696 = vmatpush3.bf16.msra.mxu1 %v26693_v32  ;;  %v15290_v11 = vld [vmem:[#allocation3 + $0x212] sm:$0xff]  ;;  %v15317_v32 = vld [vmem:[#allocation3 + $0x322] sm:$0xff] }
 0x59c   : > { %25118 = vmatmul.mubr.msk.f32.gmra.mrb[56].mxu0 %vm7365_vm3, %v15262_v4  ;;  %26698 = vmatprep.subr.bf16.mxu1 %v26697_v28 }
 0x59d   : > { %25120 = vmatprep.mubr.msk.f32.mxu0 %vm7365_vm3, %v15263_v18 }
 0x59e   : > { %25712 = vmatmul.mubr.msk.f32.gmra.mrb[82].mxu1 %vm7365_vm3, %v31123_v26  ;;  %v15291_v26 = vld [vmem:[#allocation3 + $0x21a] sm:$0xff] }
 0x59f   : > { %25714 = vmatprep.mubr.msk.f32.mxu1 %vm7365_vm3, %v31125_v19  ;;  %26700 = vmatpush3.bf16.msra.mxu1 %v26697_v28  ;;  %v26701_v19 = vpack.c.bf16 %v22184_v20, %v22183_v30  ;;  %v15322_v28 = vld [vmem:[#allocation3 + $0x352] sm:$0xff]  ;;  %v15349_v30 = vld [vmem:[#allocation3 + $0x462] sm:$0xff]  ;;  %v15350_v20 = vld [vmem:[#allocation3 + $0x46a] sm:$0xff] }
 0x5a0   : > { %25121 = vmatmul.mubr.msk.f32.gmra.mrb[58].mxu0 %vm7365_vm3, %v15264_v5 }
 0x5a1   : > { %25123 = vmatprep.mubr.msk.f32.mxu0 %vm7365_vm3, %v15265_v47  ;;  %26702 = vmatprep.subr.bf16.mxu1 %v26701_v19 }
 0x5a2   : > { %25715 = vmatmul.mubr.msk.f32.gmra.mrb[84].mxu1 %vm7365_vm3, %v31133_v12  ;;  %v15294_v12 = vld [vmem:[#allocation3 + $0x23a] sm:$0xff] }
 0x5a3   : > { %25717 = vmatprep.mubr.msk.f32.mxu1 %vm7365_vm3, %v31135_v21  ;;  %26704 = vmatpush3.bf16.msra.mxu1 %v26701_v19  ;;  %v15295_v21 = vld [vmem:[#allocation3 + $0x242] sm:$0xff]  ;;  %v15352_v19 = vld [vmem:[#allocation3 + $0x47a] sm:$0xff] }
 0x5a4   : > { %25124 = vmatmul.mubr.msk.f32.gmra.mrb[60].mxu0 %vm7365_vm3, %v15266_v14 }
 0x5a5   : > { %25126 = vmatprep.mubr.msk.f32.mxu0 %vm7365_vm3, %v15267_v15 }
 0x5a6   : > { %25718 = vmatmul.mubr.msk.f32.gmra.mrb[86].mxu1 %vm7365_vm3, %v31143_v1  ;;  %v15298_v1 = vld [vmem:[#allocation3 + $0x262] sm:$0xff] }
 0x5a7   : > { %25720 = vmatprep.mubr.msk.f32.mxu1 %vm7365_vm3, %v31145_v2  ;;  %v15299_v2 = vld [vmem:[#allocation3 + $0x26a] sm:$0xff] }
 0x5a8   : > { %25127 = vmatmul.mubr.msk.f32.gmra.mrb[62].mxu0 %vm7365_vm3, %v15268_v16 }
 0x5a9   : > { %25129 = vmatprep.mubr.msk.f32.mxu0 %vm7365_vm3, %v15269_v8 }
 0x5aa   : > { %25721 = vmatmul.mubr.msk.f32.gmra.mrb[88].mxu1 %vm7365_vm3, %v31153_v17  ;;  %v15302_v17 = vld [vmem:[#allocation3 + $0x28a] sm:$0xff] }
 0x5ab   : > { %25723 = vmatprep.mubr.msk.f32.mxu1 %vm7365_vm3, %v31155_v31  ;;  %v15303_v31 = vld [vmem:[#allocation3 + $0x292] sm:$0xff] }
 0x5ac   : > { %25130 = vmatmul.mubr.msk.f32.gmra.mrb[64].mxu0 %vm7365_vm3, %v15270_v43 }
 0x5ad   : > { %25132 = vmatprep.mubr.msk.f32.mxu0 %vm7365_vm3, %v15271_v40 }
 0x5ae   : > { %25724 = vmatmul.mubr.msk.f32.gmra.mrb[90].mxu1 %vm7365_vm3, %v31163_v45  ;;  %v15306_v45 = vld [vmem:[#allocation3 + $0x2b2] sm:$0xff] }
 0x5af   : > { %25726 = vmatprep.mubr.msk.f32.mxu1 %vm7365_vm3, %v31165_v58  ;;  %v15307_v58 = vld [vmem:[#allocation3 + $0x2ba] sm:$0xff] }
 0x5b0   : > { %25133 = vmatmul.mubr.msk.f32.gmra.mrb[66].mxu0 %vm7365_vm3, %v15272_v37 }
 0x5b1   : > { %25135 = vmatprep.mubr.msk.f32.mxu0 %vm7365_vm3, %v15273_v46 }
 0x5b2   : > { %25727 = vmatmul.mubr.msk.f32.gmra.mrb[92].mxu1 %vm7365_vm3, %v31173_v36  ;;  %v15310_v36 = vld [vmem:[#allocation3 + $0x2da] sm:$0xff] }
 0x5b3   : > { %25729 = vmatprep.mubr.msk.f32.mxu1 %vm7365_vm3, %v31175_v10  ;;  %v15311_v10 = vld [vmem:[#allocation3 + $0x2e2] sm:$0xff] }
 0x5b4   : > { %25136 = vmatmul.mubr.msk.f32.gmra.mrb[68].mxu0 %vm7365_vm3, %v15274_v3 }
 0x5b5   : > { %25138 = vmatprep.mubr.msk.f32.mxu0 %vm7365_vm3, %v15275_v55 }
 0x5b6   : > { %25730 = vmatmul.mubr.msk.f32.gmra.mrb[94].mxu1 %vm7365_vm3, %v15258_v7  ;;  %v15315_v7 = vld [vmem:[#allocation3 + $0x30a] sm:$0xff] }
 0x5b7   : > { %25732 = vmatprep.mubr.msk.f32.mxu1 %vm7365_vm3, %v15259_v59  ;;  %v15316_v59 = vld [vmem:[#allocation3 + $0x312] sm:$0xff] }
 0x5b8   : > { %25139 = vmatmul.mubr.msk.f32.gmra.mrb[70].mxu0 %vm7365_vm3, %v15276_v56 }
 0x5b9   : > { %25141 = vmatprep.mubr.msk.f32.mxu0 %vm7365_vm3, %v15277_v60 }
 0x5ba   : > { %25733 = vmatmul.mubr.msk.f32.gmra.mrb[96].mxu1 %vm7365_vm3, %v15260_v49  ;;  %v15320_v49 = vld [vmem:[#allocation3 + $0x33a] sm:$0xff] }
 0x5bb   : > { %25735 = vmatprep.mubr.msk.f32.mxu1 %vm7365_vm3, %v15261_v25  ;;  %v15321_v25 = vld [vmem:[#allocation3 + $0x34a] sm:$0xff] }
 0x5bc   : > { %25142 = vmatmul.mubr.msk.f32.gmra.mrb[72].mxu0 %vm7365_vm3, %v15278_v9 }
 0x5bd   : > { %25144 = vmatprep.mubr.msk.f32.mxu0 %vm7365_vm3, %v15279_v52 }
 0x5be   : > { %25736 = vmatmul.mubr.msk.f32.gmra.mrb[98].mxu1 %vm7365_vm3, %v15262_v4  ;;  %v22313_v4 = vld [vmem:[%s32531_s3 + $0x1c0] sm:$0xff] }
 0x5bf   : > { %25738 = vmatprep.mubr.msk.f32.mxu1 %vm7365_vm3, %v15263_v18  ;;  %v22314_v18 = vld [vmem:[%s32531_s3 + $0x1c8] sm:$0xff] }
 0x5c0   : > { %25145 = vmatmul.mubr.msk.f32.gmra.mrb[74].mxu0 %vm7365_vm3, %v15280_v41 }
 0x5c1   : > { %25147 = vmatprep.mubr.msk.f32.mxu0 %vm7365_vm3, %v15281_v54 }
 0x5c2   : > { %25739 = vmatmul.mubr.msk.f32.gmra.mrb[100].mxu1 %vm7365_vm3, %v15264_v5  ;;  %v15323_v5 = vld [vmem:[#allocation3 + $0x35a] sm:$0xff] }
 0x5c3   : > { %25741 = vmatprep.mubr.msk.f32.mxu1 %vm7365_vm3, %v15265_v47  ;;  %v31354_v47 = vpack.c.bf16 %v22314_v18, %v22313_v4  ;;  %v31508_v4 = vld [vmem:[#allocation3 + $0xd8] sm:$0xff]  ;;  %v15366_v18 = vld [vmem:[#allocation3 + $0x50a] sm:$0xff] }
 0x5c4   : > { %25148 = vmatmul.mubr.msk.f32.gmra.mrb[76].mxu0 %vm7365_vm3, %v15282_v29 }
 0x5c5   : > { %25150 = vmatprep.mubr.msk.f32.mxu0 %vm7365_vm3, %v15283_v42  ;;  %26706 = vmatprep.subr.bf16.mxu1 %v31354_v47 }
 0x5c6   : > { %25742 = vmatmul.mubr.msk.f32.gmra.mrb[102].mxu1 %vm7365_vm3, %v15266_v14  ;;  %v15324_v14 = vld [vmem:[#allocation3 + $0x362] sm:$0xff] }
 0x5c7   : > { %25744 = vmatprep.mubr.msk.f32.mxu1 %vm7365_vm3, %v15267_v15  ;;  %v15325_v15 = vld [vmem:[#allocation3 + $0x372] sm:$0xff] }
 0x5c8   : > { %25151 = vmatmul.mubr.msk.f32.gmra.mrb[78].mxu0 %vm7365_vm3, %v15284_v63 }
 0x5c9   : > { %25153 = vmatprep.mubr.msk.f32.mxu0 %vm7365_vm3, %v15285_v22 }
 0x5ca   : > { %25745 = vmatmul.mubr.msk.f32.gmra.mrb[104].mxu1 %vm7365_vm3, %v15268_v16  ;;  %v15326_v16 = vld [vmem:[#allocation3 + $0x37a] sm:$0xff] }
 0x5cb   : > { %25747 = vmatprep.mubr.msk.f32.mxu1 %vm7365_vm3, %v15269_v8  ;;  %v15327_v8 = vld [vmem:[#allocation3 + $0x382] sm:$0xff] }
 0x5cc   : > { %25154 = vmatmul.mubr.msk.f32.gmra.mrb[80].mxu0 %vm7365_vm3, %v15286_v39 }
 0x5cd   : > { %25156 = vmatprep.mubr.msk.f32.mxu0 %vm7365_vm3, %v15287_v24 }
 0x5ce   : > { %25748 = vmatmul.mubr.msk.f32.gmra.mrb[106].mxu1 %vm7365_vm3, %v15270_v43  ;;  %v15328_v43 = vld [vmem:[#allocation3 + $0x38a] sm:$0xff] }
 0x5cf   : > { %25750 = vmatprep.mubr.msk.f32.mxu1 %vm7365_vm3, %v15271_v40  ;;  %v15329_v40 = vld [vmem:[#allocation3 + $0x39a] sm:$0xff] }
 0x5d0   : > { %25157 = vmatmul.mubr.msk.f32.gmra.mrb[82].mxu0 %vm7365_vm3, %v15288_v0 }
 0x5d1   : > { %25159 = vmatprep.mubr.msk.f32.mxu0 %vm7365_vm3, %v15289_v38 }
 0x5d2   : > { %25751 = vmatmul.mubr.msk.f32.gmra.mrb[108].mxu1 %vm7365_vm3, %v15272_v37  ;;  %v15330_v37 = vld [vmem:[#allocation3 + $0x3a2] sm:$0xff] }
 0x5d3   : > { %25753 = vmatprep.mubr.msk.f32.mxu1 %vm7365_vm3, %v15273_v46  ;;  %v15331_v46 = vld [vmem:[#allocation3 + $0x3aa] sm:$0xff] }
 0x5d4   : > { %25160 = vmatmul.mubr.msk.f32.gmra.mrb[84].mxu0 %vm7365_vm3, %v15290_v11 }
 0x5d5   : > { %25162 = vmatprep.mubr.msk.f32.mxu0 %vm7365_vm3, %v15291_v26 }
 0x5d6   : > { %25754 = vmatmul.mubr.msk.f32.gmra.mrb[110].mxu1 %vm7365_vm3, %v15274_v3  ;;  %v15332_v3 = vld [vmem:[#allocation3 + $0x3b2] sm:$0xff] }
 0x5d7   : > { %25756 = vmatprep.mubr.msk.f32.mxu1 %vm7365_vm3, %v15275_v55  ;;  %v15333_v55 = vld [vmem:[#allocation3 + $0x3c2] sm:$0xff] }
 0x5d8   : > { %25163 = vmatmul.mubr.msk.f32.gmra.mrb[86].mxu0 %vm7365_vm3, %v15292_v44 }
 0x5d9   : > { %25165 = vmatprep.mubr.msk.f32.mxu0 %vm7365_vm3, %v15293_v35 }
 0x5da   : > { %25757 = vmatmul.mubr.msk.f32.gmra.mrb[112].mxu1 %vm7365_vm3, %v15276_v56  ;;  %v15334_v56 = vld [vmem:[#allocation3 + $0x3ca] sm:$0xff] }
 0x5db   : > { %25759 = vmatprep.mubr.msk.f32.mxu1 %vm7365_vm3, %v15277_v60  ;;  %v15335_v60 = vld [vmem:[#allocation3 + $0x3d2] sm:$0xff] }
 0x5dc   : > { %25166 = vmatmul.mubr.msk.f32.gmra.mrb[88].mxu0 %vm7365_vm3, %v15294_v12 }
 0x5dd   : > { %25168 = vmatprep.mubr.msk.f32.mxu0 %vm7365_vm3, %v15295_v21 }
 0x5de   : > { %25760 = vmatmul.mubr.msk.f32.gmra.mrb[114].mxu1 %vm7365_vm3, %v15278_v9  ;;  %v15336_v9 = vld [vmem:[#allocation3 + $0x3da] sm:$0xff] }
 0x5df   : > { %25762 = vmatprep.mubr.msk.f32.mxu1 %vm7365_vm3, %v15279_v52  ;;  %v15337_v52 = vld [vmem:[#allocation3 + $0x3ea] sm:$0xff] }
 0x5e0   : > { %25169 = vmatmul.mubr.msk.f32.gmra.mrb[90].mxu0 %vm7365_vm3, %v15296_v61 }
 0x5e1   : > { %25171 = vmatprep.mubr.msk.f32.mxu0 %vm7365_vm3, %v15297_v62 }
 0x5e2   : > { %25763 = vmatmul.mubr.msk.f32.gmra.mrb[116].mxu1 %vm7365_vm3, %v15280_v41  ;;  %v15338_v41 = vld [vmem:[#allocation3 + $0x3f2] sm:$0xff] }
 0x5e3   : > { %25765 = vmatprep.mubr.msk.f32.mxu1 %vm7365_vm3, %v15281_v54  ;;  %v15339_v54 = vld [vmem:[#allocation3 + $0x3fa] sm:$0xff] }
 0x5e4   : > { %25172 = vmatmul.mubr.msk.f32.gmra.mrb[92].mxu0 %vm7365_vm3, %v15298_v1 }
 0x5e5   : > { %25174 = vmatprep.mubr.msk.f32.mxu0 %vm7365_vm3, %v15299_v2 }
 0x5e6   : > { %25766 = vmatmul.mubr.msk.f32.gmra.mrb[118].mxu1 %vm7365_vm3, %v15282_v29  ;;  %v15340_v29 = vld [vmem:[#allocation3 + $0x402] sm:$0xff] }
 0x5e7   : > { %25768 = vmatprep.mubr.msk.f32.mxu1 %vm7365_vm3, %v15283_v42  ;;  %v15341_v42 = vld [vmem:[#allocation3 + $0x412] sm:$0xff] }
 0x5e8   : > { %25175 = vmatmul.mubr.msk.f32.gmra.mrb[94].mxu0 %vm7365_vm3, %v15300_v50 }
 0x5e9   : > { %25177 = vmatprep.mubr.msk.f32.mxu0 %vm7365_vm3, %v15301_v6 }
 0x5ea   : > { %25769 = vmatmul.mubr.msk.f32.gmra.mrb[120].mxu1 %vm7365_vm3, %v15284_v63  ;;  %v15342_v63 = vld [vmem:[#allocation3 + $0x41a] sm:$0xff] }
 0x5eb   : > { %25771 = vmatprep.mubr.msk.f32.mxu1 %vm7365_vm3, %v15285_v22  ;;  %v15343_v22 = vld [vmem:[#allocation3 + $0x422] sm:$0xff] }
 0x5ec   : > { %25178 = vmatmul.mubr.msk.f32.gmra.mrb[96].mxu0 %vm7365_vm3, %v15302_v17 }
 0x5ed   : > { %25180 = vmatprep.mubr.msk.f32.mxu0 %vm7365_vm3, %v15303_v31 }
 0x5ee   : > { %25772 = vmatmul.mubr.msk.f32.gmra.mrb[122].mxu1 %vm7365_vm3, %v15286_v39  ;;  %v15344_v39 = vld [vmem:[#allocation3 + $0x42a] sm:$0xff] }
 0x5ef   : > { %25774 = vmatprep.mubr.msk.f32.mxu1 %vm7365_vm3, %v15287_v24  ;;  %v15345_v24 = vld [vmem:[#allocation3 + $0x43a] sm:$0xff] }
 0x5f0   : > { %25181 = vmatmul.mubr.msk.f32.gmra.mrb[98].mxu0 %vm7365_vm3, %v15304_v33 }
 0x5f1   : > { %25183 = vmatprep.mubr.msk.f32.mxu0 %vm7365_vm3, %v15305_v48 }
 0x5f2   : > { %25775 = vmatmul.mubr.msk.f32.gmra.mrb[124].mxu1 %vm7365_vm3, %v15288_v0  ;;  %v15346_v0 = vld [vmem:[#allocation3 + $0x442] sm:$0xff] }
 0x5f3   : > { %25777 = vmatprep.mubr.msk.f32.mxu1 %vm7365_vm3, %v15289_v38  ;;  %v15347_v38 = vld [vmem:[#allocation3 + $0x44a] sm:$0xff] }
 0x5f4   : > { %25184 = vmatmul.mubr.msk.f32.gmra.mrb[100].mxu0 %vm7365_vm3, %v15306_v45 }
 0x5f5   : > { %25186 = vmatprep.mubr.msk.f32.mxu0 %vm7365_vm3, %v15307_v58 }
 0x5f6   : > { %25778 = vmatmul.mubr.msk.f32.gmra.mrb[126].mxu1 %vm7365_vm3, %v15290_v11  ;;  %v15348_v11 = vld [vmem:[#allocation3 + $0x452] sm:$0xff] }
 0x5f7   : > { %25780 = vmatprep.mubr.msk.f32.mxu1 %vm7365_vm3, %v15291_v26  ;;  %v15351_v26 = vld [vmem:[#allocation3 + $0x472] sm:$0xff] }
 0x5f8   : > { %25187 = vmatmul.mubr.msk.f32.gmra.mrb[102].mxu0 %vm7365_vm3, %v15308_v53 }
 0x5f9   : > { %25189 = vmatprep.mubr.msk.f32.mxu0 %vm7365_vm3, %v15309_v34 }
 0x5fa   : > { %25781 = vmatmul.mubr.msk.f32.gmra.mrb[0].mxu1 %vm7365_vm3, %v15292_v44  ;;  %v15353_v44 = vld [vmem:[#allocation3 + $0x48a] sm:$0xff] }
 0x5fb   : > { %25783 = vmatprep.mubr.msk.f32.mxu1 %vm7365_vm3, %v15293_v35  ;;  %v15354_v35 = vld [vmem:[#allocation3 + $0x492] sm:$0xff] }
 0x5fc   : > { %25190 = vmatmul.mubr.msk.f32.gmra.mrb[104].mxu0 %vm7365_vm3, %v15310_v36 }
 0x5fd   : > { %25192 = vmatprep.mubr.msk.f32.mxu0 %vm7365_vm3, %v15311_v10 }
 0x5fe   : > { %25784 = vmatmul.mubr.msk.f32.gmra.mrb[2].mxu1 %vm7365_vm3, %v15294_v12  ;;  %v15355_v12 = vld [vmem:[#allocation3 + $0x49a] sm:$0xff] }
 0x5ff   : > { %25786 = vmatprep.mubr.msk.f32.mxu1 %vm7365_vm3, %v15295_v21  ;;  %v15356_v21 = vld [vmem:[#allocation3 + $0x4a2] sm:$0xff] }
 0x600   : > { %25193 = vmatmul.mubr.msk.f32.gmra.mrb[106].mxu0 %vm7365_vm3, %v15312_v13 }
 0x601   : > { %25195 = vmatprep.mubr.msk.f32.mxu0 %vm7365_vm3, %v15313_v57 }
 0x602   : > { %25787 = vmatmul.mubr.msk.f32.gmra.mrb[4].mxu1 %vm7365_vm3, %v15296_v61  ;;  %v15357_v61 = vld [vmem:[#allocation3 + $0x4b2] sm:$0xff] }
 0x603   : > { %25789 = vmatprep.mubr.msk.f32.mxu1 %vm7365_vm3, %v15297_v62  ;;  %v15358_v62 = vld [vmem:[#allocation3 + $0x4ba] sm:$0xff] }
 0x604   : > { %25196 = vmatmul.mubr.msk.f32.gmra.mrb[108].mxu0 %vm7365_vm3, %v15314_v51 }
 0x605   : > { %25198 = vmatprep.mubr.msk.f32.mxu0 %vm7365_vm3, %v15315_v7 }
 0x606   : > { %25790 = vmatmul.mubr.msk.f32.gmra.mrb[6].mxu1 %vm7365_vm3, %v15298_v1  ;;  %v15359_v1 = vld [vmem:[#allocation3 + $0x4c2] sm:$0xff] }
 0x607   : > { %25792 = vmatprep.mubr.msk.f32.mxu1 %vm7365_vm3, %v15299_v2  ;;  %v15360_v2 = vld [vmem:[#allocation3 + $0x4ca] sm:$0xff] }
 0x608   : > { %25199 = vmatmul.mubr.msk.f32.gmra.mrb[110].mxu0 %vm7365_vm3, %v15316_v59 }
 0x609   : > { %25201 = vmatprep.mubr.msk.f32.mxu0 %vm7365_vm3, %v15317_v32 }
 0x60a   : > { %25793 = vmatmul.mubr.msk.f32.gmra.mrb[8].mxu1 %vm7365_vm3, %v15300_v50  ;;  %v15361_v50 = vld [vmem:[#allocation3 + $0x4da] sm:$0xff] }
 0x60b   : > { %25795 = vmatprep.mubr.msk.f32.mxu1 %vm7365_vm3, %v15301_v6  ;;  %v15362_v6 = vld [vmem:[#allocation3 + $0x4e2] sm:$0xff] }
 0x60c   : > { %25202 = vmatmul.mubr.msk.f32.gmra.mrb[112].mxu0 %vm7365_vm3, %v15318_v23 }
 0x60d   : > { %25204 = vmatprep.mubr.msk.f32.mxu0 %vm7365_vm3, %v15319_v27 }
 0x60e   : > { %25796 = vmatmul.mubr.msk.f32.gmra.mrb[10].mxu1 %vm7365_vm3, %v15302_v17  ;;  %v15363_v17 = vld [vmem:[#allocation3 + $0x4ea] sm:$0xff] }
 0x60f   : > { %25798 = vmatprep.mubr.msk.f32.mxu1 %vm7365_vm3, %v15303_v31  ;;  %v15364_v31 = vld [vmem:[#allocation3 + $0x4f2] sm:$0xff] }
 0x610   : > { %25205 = vmatmul.mubr.msk.f32.gmra.mrb[114].mxu0 %vm7365_vm3, %v15320_v49 }
 0x611   : > { %25207 = vmatprep.mubr.msk.f32.mxu0 %vm7365_vm3, %v15321_v25 }
 0x612   : > { %25799 = vmatmul.mubr.msk.f32.gmra.mrb[12].mxu1 %vm7365_vm3, %v15304_v33  ;;  %v12533_v33 = vld [vmem:[#allocation3 + $0x28] sm:$0xff] }
 0x613   : > { %25801 = vmatprep.mubr.msk.f32.mxu1 %vm7365_vm3, %v15305_v48  ;;  %v12534_v48 = vld [vmem:[#allocation3 + $0x30] sm:$0xff] }
 0x614   : > { %25208 = vmatmul.mubr.msk.f32.gmra.mrb[116].mxu0 %vm7365_vm3, %v15322_v28 }
 0x615   : > { %25210 = vmatprep.mubr.msk.f32.mxu0 %vm7365_vm3, %v15323_v5 }
 0x616   : > { %25802 = vmatmul.mubr.msk.f32.gmra.mrb[14].mxu1 %vm7365_vm3, %v15306_v45  ;;  %v12535_v45 = vld [vmem:[#allocation3 + $0x38] sm:$0xff] }
 0x617   : > { %25804 = vmatprep.mubr.msk.f32.mxu1 %vm7365_vm3, %v15307_v58  ;;  %v12536_v58 = vld [vmem:[#allocation3 + $0x40] sm:$0xff] }
 0x618   : > { %25211 = vmatmul.mubr.msk.f32.gmra.mrb[118].mxu0 %vm7365_vm3, %v15324_v14 }
 0x619   : > { %25213 = vmatprep.mubr.msk.f32.mxu0 %vm7365_vm3, %v15325_v15 }
 0x61a   : > { %25805 = vmatmul.mubr.msk.f32.gmra.mrb[16].mxu1 %vm7365_vm3, %v15308_v53  ;;  %v16596_v53 = vld [vmem:[#allocation3 + $0x50] sm:$0xff] }
 0x61b   : > { %25807 = vmatprep.mubr.msk.f32.mxu1 %vm7365_vm3, %v15309_v34  ;;  %v16597_v34 = vld [vmem:[#allocation3 + $0x58] sm:$0xff] }
 0x61c   : > { %25214 = vmatmul.mubr.msk.f32.gmra.mrb[120].mxu0 %vm7365_vm3, %v15326_v16 }
 0x61d   : > { %25216 = vmatprep.mubr.msk.f32.mxu0 %vm7365_vm3, %v15327_v8 }
 0x61e   : > { %25808 = vmatmul.mubr.msk.f32.gmra.mrb[18].mxu1 %vm7365_vm3, %v15310_v36  ;;  %v16598_v36 = vld [vmem:[#allocation3 + $0x60] sm:$0xff] }
 0x61f   : > { %25810 = vmatprep.mubr.msk.f32.mxu1 %vm7365_vm3, %v15311_v10  ;;  %v31456_v10 = vld [vmem:[#allocation3 + $0x68] sm:$0xff] }
 0x620   : > { %25217 = vmatmul.mubr.msk.f32.gmra.mrb[122].mxu0 %vm7365_vm3, %v15328_v43 }
 0x621   : > { %25219 = vmatprep.mubr.msk.f32.mxu0 %vm7365_vm3, %v15329_v40 }
 0x622   : > { %25811 = vmatmul.mubr.msk.f32.gmra.mrb[20].mxu1 %vm7365_vm3, %v15312_v13  ;;  %v31458_v13 = vld [vmem:[#allocation3 + $0x78] sm:$0xff] }
 0x623   : > { %25813 = vmatprep.mubr.msk.f32.mxu1 %vm7365_vm3, %v15313_v57  ;;  %v31466_v57 = vld [vmem:[#allocation3 + $0x80] sm:$0xff] }
 0x624   : > { %25220 = vmatmul.mubr.msk.f32.gmra.mrb[124].mxu0 %vm7365_vm3, %v15330_v37 }
 0x625   : > { %25222 = vmatprep.mubr.msk.f32.mxu0 %vm7365_vm3, %v15331_v46 }
 0x626   : > { %25814 = vmatmul.mubr.msk.f32.gmra.mrb[22].mxu1 %vm7365_vm3, %v15314_v51  ;;  %v31468_v51 = vld [vmem:[#allocation3 + $0x88] sm:$0xff] }
 0x627   : > { %25816 = vmatprep.mubr.msk.f32.mxu1 %vm7365_vm3, %v15315_v7  ;;  %v31476_v7 = vld [vmem:[#allocation3 + $0x90] sm:$0xff] }
 0x628   : > { %25223 = vmatmul.mubr.msk.f32.gmra.mrb[126].mxu0 %vm7365_vm3, %v15332_v3 }
 0x629   : > { %25225 = vmatprep.mubr.msk.f32.mxu0 %vm7365_vm3, %v15333_v55 }
 0x62a   : > { %25817 = vmatmul.mubr.msk.f32.gmra.mrb[24].mxu1 %vm7365_vm3, %v15316_v59  ;;  %v31478_v59 = vld [vmem:[#allocation3 + $0xa0] sm:$0xff] }
 0x62b   : > { %25819 = vmatprep.mubr.msk.f32.mxu1 %vm7365_vm3, %v15317_v32  ;;  %v31486_v32 = vld [vmem:[#allocation3 + $0xa8] sm:$0xff] }
 0x62c   : > { %25226 = vmatmul.mubr.msk.f32.gmra.mrb[128].mxu0 %vm7365_vm3, %v15334_v56 }
 0x62d   : > { %25228 = vmatprep.mubr.msk.f32.mxu0 %vm7365_vm3, %v15335_v60 }
 0x62e   : > { %25820 = vmatmul.mubr.msk.f32.gmra.mrb[26].mxu1 %vm7365_vm3, %v15318_v23  ;;  %v31488_v23 = vld [vmem:[#allocation3 + $0xb0] sm:$0xff] }
 0x62f   : > { %25822 = vmatprep.mubr.msk.f32.mxu1 %vm7365_vm3, %v15319_v27  ;;  %v31496_v27 = vld [vmem:[#allocation3 + $0xb8] sm:$0xff] }
 0x630   : > { %25229 = vmatmul.mubr.msk.f32.gmra.mrb[130].mxu0 %vm7365_vm3, %v15336_v9 }
 0x631   : > { %25231 = vmatprep.mubr.msk.f32.mxu0 %vm7365_vm3, %v15337_v52 }
 0x632   : > { %25823 = vmatmul.mubr.msk.f32.gmra.mrb[28].mxu1 %vm7365_vm3, %v15320_v49  ;;  %v31498_v49 = vld [vmem:[#allocation3 + $0xc8] sm:$0xff] }
 0x633   : > { %25825 = vmatprep.mubr.msk.f32.mxu1 %vm7365_vm3, %v15321_v25  ;;  %v15365_v25 = vld [vmem:[#allocation3 + $0x502] sm:$0xff] }
 0x634   : > { %25232 = vmatmul.mubr.msk.f32.gmra.mrb[132].mxu0 %vm7365_vm3, %v15338_v41 }
 0x635   : > { %25234 = vmatprep.mubr.msk.f32.mxu0 %vm7365_vm3, %v15339_v54 }
 0x636   : > { %25826 = vmatmul.mubr.msk.f32.gmra.mrb[30].mxu1 %vm7365_vm3, %v15322_v28  ;;  %v31506_v28 = vld [vmem:[#allocation3 + $0xd0] sm:$0xff] }
 0x637   : > { %25828 = vmatprep.mubr.msk.f32.mxu1 %vm7365_vm3, %v15323_v5  ;;  %v15367_v5 = vld [vmem:[#allocation3 + $0x512] sm:$0xff] }
 0x638   : > { %25235 = vmatmul.mubr.msk.f32.gmra.mrb[134].mxu0 %vm7365_vm3, %v15340_v29 }
 0x639   : > { %25237 = vmatprep.mubr.msk.f32.mxu0 %vm7365_vm3, %v15341_v42 }
 0x63a   : > { %25829 = vmatmul.mubr.msk.f32.gmra.mrb[32].mxu1 %vm7365_vm3, %v15324_v14  ;;  %v31516_v14 = vld [vmem:[#allocation3 + $0xe0] sm:$0xff] }
 0x63b   : > { %25831 = vmatprep.mubr.msk.f32.mxu1 %vm7365_vm3, %v15325_v15  ;;  %v31518_v15 = vld [vmem:[#allocation3 + $0xf0] sm:$0xff] }
 0x63c   : > { %25238 = vmatmul.mubr.msk.f32.gmra.mrb[136].mxu0 %vm7365_vm3, %v15342_v63 }
 0x63d   : > { %25240 = vmatprep.mubr.msk.f32.mxu0 %vm7365_vm3, %v15343_v22 }
 0x63e   : > { %25832 = vmatmul.mubr.msk.f32.gmra.mrb[34].mxu1 %vm7365_vm3, %v15326_v16  ;;  %v15368_v16 = vld [vmem:[#allocation3 + $0x51a] sm:$0xff] }
 0x63f   : > { %25834 = vmatprep.mubr.msk.f32.mxu1 %vm7365_vm3, %v15327_v8  ;;  %v22315_v8 = vld [vmem:[%s32531_s3 + $0x1d0] sm:$0xff] }
 0x640   : > { %25241 = vmatmul.mubr.msk.f32.gmra.mrb[138].mxu0 %vm7365_vm3, %v15344_v39 }
 0x641   : > { %25243 = vmatprep.mubr.msk.f32.mxu0 %vm7365_vm3, %v15345_v24 }
 0x642   : > { %25835 = vmatmul.mubr.msk.f32.gmra.mrb[36].mxu1 %vm7365_vm3, %v15328_v43  ;;  %v22316_v43 = vld [vmem:[%s32531_s3 + $0x1d8] sm:$0xff] }
 0x643   : > { %25837 = vmatprep.mubr.msk.f32.mxu1 %vm7365_vm3, %v15329_v40  ;;  %v31532_v40 = vld [vmem:[#allocation3 + $0xf8] sm:$0xff] }
 0x644   : > { %25244 = vmatmul.mubr.msk.f32.gmra.mrb[140].mxu0 %vm7365_vm3, %v15346_v0 }
 0x645   : > { %25246 = vmatprep.mubr.msk.f32.mxu0 %vm7365_vm3, %v15347_v38 }
 0x646   : > { %25838 = vmatmul.mubr.msk.f32.gmra.mrb[38].mxu1 %vm7365_vm3, %v15330_v37  ;;  %v31534_v37 = vld [vmem:[#allocation3 + $0x100] sm:$0xff] }
 0x647   : > { %25840 = vmatprep.mubr.msk.f32.mxu1 %vm7365_vm3, %v15331_v46  ;;  %v26709_v46 = vpack.c.bf16 %v22316_v43, %v22315_v8 }
 0x648   : > { %25247 = vmatmul.mubr.msk.f32.gmra.mrb[142].mxu0 %vm7365_vm3, %v15348_v11 }
 0x649   : > { %25249 = vmatprep.mubr.msk.f32.mxu0 %vm7365_vm3, %v15349_v30 }
 0x64a   : > { %25841 = vmatmul.mubr.msk.f32.gmra.mrb[40].mxu1 %vm7365_vm3, %v15332_v3  ;;  %v22317_v3 = vld [vmem:[%s32531_s3 + $0x1e0] sm:$0xff] }
 0x64b   : > { %25843 = vmatprep.mubr.msk.f32.mxu1 %vm7365_vm3, %v15333_v55  ;;  %v22318_v55 = vld [vmem:[%s32531_s3 + $0x1e8] sm:$0xff] }
 0x64c   : > { %25250 = vmatmul.mubr.msk.f32.gmra.mrb[144].mxu0 %vm7365_vm3, %v15350_v20 }
 0x64d   : > { %25252 = vmatprep.mubr.msk.f32.mxu0 %vm7365_vm3, %v15351_v26 }
 0x64e   : > { %25844 = vmatmul.mubr.msk.f32.gmra.mrb[42].mxu1 %vm7365_vm3, %v15334_v56  ;;  %v31549_v56 = vld [vmem:[#allocation3 + $0x108] sm:$0xff] }
 0x64f   : > { %25846 = vmatprep.mubr.msk.f32.mxu1 %vm7365_vm3, %v15335_v60  ;;  %v31551_v60 = vld [vmem:[#allocation3 + $0x118] sm:$0xff] }
 0x650   : > { %25253 = vmatmul.mubr.msk.f32.gmra.mrb[146].mxu0 %vm7365_vm3, %v15352_v19 }
 0x651   : > { %25255 = vmatprep.mubr.msk.f32.mxu0 %vm7365_vm3, %v15353_v44 }
 0x652   : > { %25847 = vmatmul.mubr.msk.f32.gmra.mrb[44].mxu1 %vm7365_vm3, %v15336_v9  ;;  %v26713_v9 = vpack.c.bf16 %v22318_v55, %v22317_v3 }
 0x653   : > { %25849 = vmatprep.mubr.msk.f32.mxu1 %vm7365_vm3, %v15337_v52  ;;  %v31563_v52 = vld [vmem:[#allocation3 + $0x128] sm:$0xff] }
 0x654   : > { %25256 = vmatmul.mubr.msk.f32.gmra.mrb[148].mxu0 %vm7365_vm3, %v15354_v35 }
 0x655   : > { %25258 = vmatprep.mubr.msk.f32.mxu0 %vm7365_vm3, %v15355_v12 }
 0x656   : > { %25850 = vmatmul.mubr.msk.f32.gmra.mrb[46].mxu1 %vm7365_vm3, %v15338_v41  ;;  %v31573_v41 = vld [vmem:[#allocation3 + $0x130] sm:$0xff] }
 0x657   : > { %25852 = vmatprep.mubr.msk.f32.mxu1 %vm7365_vm3, %v15339_v54  ;;  %v31575_v54 = vld [vmem:[#allocation3 + $0x140] sm:$0xff] }
 0x658   : > { %25259 = vmatmul.mubr.msk.f32.gmra.mrb[150].mxu0 %vm7365_vm3, %v15356_v21 }
 0x659   : > { %25261 = vmatprep.mubr.msk.f32.mxu0 %vm7365_vm3, %v15357_v61 }
 0x65a   : > { %25853 = vmatmul.mubr.msk.f32.gmra.mrb[48].mxu1 %vm7365_vm3, %v15340_v29  ;;  %v31585_v29 = vld [vmem:[#allocation3 + $0x148] sm:$0xff] }
 0x65b   : > { %25855 = vmatprep.mubr.msk.f32.mxu1 %vm7365_vm3, %v15341_v42 }
 0x65c   : > { %25262 = vmatmul.mubr.msk.f32.gmra.mrb[152].mxu0 %vm7365_vm3, %v15358_v62 }
 0x65d   : > { %25264 = vmatprep.mubr.msk.f32.mxu0 %vm7365_vm3, %v15359_v1 }
 0x65e   : > { %25856 = vmatmul.mubr.msk.f32.gmra.mrb[50].mxu1 %vm7365_vm3, %v15342_v63  ;;  %v31589_v63 = vld [vmem:[#allocation3 + $0x150] sm:$0xff] }
 0x65f   : > { %25858 = vmatprep.mubr.msk.f32.mxu1 %vm7365_vm3, %v15343_v22 }
 0x660   : > { %25265 = vmatmul.mubr.msk.f32.gmra.mrb[154].mxu0 %vm7365_vm3, %v15360_v2 }
 0x661   : > { %25267 = vmatprep.mubr.msk.f32.mxu0 %vm7365_vm3, %v15361_v50 }
 0x662   : > { %25859 = vmatmul.mubr.msk.f32.gmra.mrb[52].mxu1 %vm7365_vm3, %v15344_v39  ;;  %v31601_v39 = vld [vmem:[#allocation3 + $0x158] sm:$0xff] }
 0x663   : > { %25861 = vmatprep.mubr.msk.f32.mxu1 %vm7365_vm3, %v15345_v24 }
 0x664   : > { %25268 = vmatmul.mubr.msk.f32.gmra.mrb[156].mxu0 %vm7365_vm3, %v15362_v6 }
 0x665   : > { %25270 = vmatprep.mubr.msk.f32.mxu0 %vm7365_vm3, %v15363_v17 }
 0x666   : > { %25862 = vmatmul.mubr.msk.f32.gmra.mrb[54].mxu1 %vm7365_vm3, %v15346_v0  ;;  %v31605_v0 = vld [vmem:[#allocation3 + $0x168] sm:$0xff] }
 0x667   : > { %25864 = vmatprep.mubr.msk.f32.mxu1 %vm7365_vm3, %v15347_v38 }
 0x668   : > { %25271 = vmatmul.mubr.msk.f32.gmra.mrb[158].mxu0 %vm7365_vm3, %v15364_v31 }
 0x669   : > { %25289 = vmatprep.mubr.msk.f32.mxu0 %vm7365_vm3, %v12533_v33 }
 0x66a   : > { %25865 = vmatmul.mubr.msk.f32.gmra.mrb[56].mxu1 %vm7365_vm3, %v15348_v11  ;;  %v31617_v11 = vld [vmem:[#allocation3 + $0x170] sm:$0xff] }
 0x66b   : > { %25867 = vmatprep.mubr.msk.f32.mxu1 %vm7365_vm3, %v15349_v30 }
 0x66c   : > { %25290 = vmatmul.mubr.msk.f32.vlgmr.msra.gmra.mrb[32].mxu0 %vm7365_vm3, %v12534_v48  ;;  %v16634_v48 = vld [vmem:[#allocation3 + $0x1c8] sm:$0xff] }
 0x66d   : > { %25292 = vmatprep.mubr.msk.f32.mxu0 %vm7365_vm3, %v12535_v45 }
 0x66e   : > { %25868 = vmatmul.mubr.msk.f32.gmra.mrb[58].mxu1 %vm7365_vm3, %v15350_v20  ;;  %v31621_v20 = vld [vmem:[#allocation3 + $0x178] sm:$0xff] }
 0x66f   : > { %25870 = vmatprep.mubr.msk.f32.mxu1 %vm7365_vm3, %v15351_v26 }
 0x670   : > { %25293 = vmatmul.mubr.msk.f32.gmra.mrb[34].mxu0 %vm7365_vm3, %v12536_v58  ;;  %v16635_v58 = vld [vmem:[#allocation3 + $0x1d0] sm:$0xff] }
 0x671   : > { %25295 = vmatprep.mubr.msk.f32.mxu0 %vm7365_vm3, %v16596_v53 }
 0x672   : > { %25871 = vmatmul.mubr.msk.f32.gmra.mrb[60].mxu1 %vm7365_vm3, %v15352_v19  ;;  %v31633_v19 = vld [vmem:[#allocation3 + $0x180] sm:$0xff] }
 0x673   : > { %25873 = vmatprep.mubr.msk.f32.mxu1 %vm7365_vm3, %v15353_v44 }
 0x674   : > { %25296 = vmatmul.mubr.msk.f32.gmra.mrb[36].mxu0 %vm7365_vm3, %v16597_v34 }
 0x675   : > { %25298 = vmatprep.mubr.msk.f32.mxu0 %vm7365_vm3, %v16598_v36 }
 0x676   : > { %25874 = vmatmul.mubr.msk.f32.gmra.mrb[62].mxu1 %vm7365_vm3, %v15354_v35  ;;  %v31637_v35 = vld [vmem:[#allocation3 + $0x190] sm:$0xff] }
 0x677   : > { %25876 = vmatprep.mubr.msk.f32.mxu1 %vm7365_vm3, %v15355_v12 }
 0x678   : > { %25299 = vmatmul.mubr.msk.f32.gmra.mrb[38].mxu0 %vm7365_vm3, %v31456_v10 }
 0x679   : > { %25301 = vmatprep.mubr.msk.f32.mxu0 %vm7365_vm3, %v31458_v13 }
 0x67a   : > { %25877 = vmatmul.mubr.msk.f32.gmra.mrb[64].mxu1 %vm7365_vm3, %v15356_v21  ;;  %v31649_v21 = vld [vmem:[#allocation3 + $0x198] sm:$0xff] }
 0x67b   : > { %25879 = vmatprep.mubr.msk.f32.mxu1 %vm7365_vm3, %v15357_v61 }
 0x67c   : > { %25302 = vmatmul.mubr.msk.f32.gmra.mrb[40].mxu0 %vm7365_vm3, %v31466_v57 }
 0x67d   : > { %25304 = vmatprep.mubr.msk.f32.mxu0 %vm7365_vm3, %v31468_v51 }
 0x67e   : > { %25880 = vmatmul.mubr.msk.f32.gmra.mrb[66].mxu1 %vm7365_vm3, %v15358_v62  ;;  %v31653_v62 = vld [vmem:[#allocation3 + $0x1a0] sm:$0xff] }
 0x67f   : > { %25882 = vmatprep.mubr.msk.f32.mxu1 %vm7365_vm3, %v15359_v1 }
 0x680   : > { %25305 = vmatmul.mubr.msk.f32.gmra.mrb[42].mxu0 %vm7365_vm3, %v31476_v7 }
 0x681   : > { %25307 = vmatprep.mubr.msk.f32.mxu0 %vm7365_vm3, %v31478_v59 }
 0x682   : > { %25883 = vmatmul.mubr.msk.f32.gmra.mrb[68].mxu1 %vm7365_vm3, %v15360_v2  ;;  %v16631_v2 = vld [vmem:[#allocation3 + $0x1a8] sm:$0xff] }
 0x683   : > { %25885 = vmatprep.mubr.msk.f32.mxu1 %vm7365_vm3, %v15361_v50 }
 0x684   : > { %25308 = vmatmul.mubr.msk.f32.gmra.mrb[44].mxu0 %vm7365_vm3, %v31486_v32 }
 0x685   : > { %25310 = vmatprep.mubr.msk.f32.mxu0 %vm7365_vm3, %v31488_v23 }
 0x686   : > { %25886 = vmatmul.mubr.msk.f32.gmra.mrb[70].mxu1 %vm7365_vm3, %v15362_v6  ;;  %v16632_v6 = vld [vmem:[#allocation3 + $0x1b8] sm:$0xff] }
 0x687   : > { %25888 = vmatprep.mubr.msk.f32.mxu1 %vm7365_vm3, %v15363_v17 }
 0x688   : > { %25311 = vmatmul.mubr.msk.f32.gmra.mrb[46].mxu0 %vm7365_vm3, %v31496_v27 }
 0x689   : > { %25313 = vmatprep.mubr.msk.f32.mxu0 %vm7365_vm3, %v31498_v49 }
 0x68a   : > { %25889 = vmatmul.mubr.msk.f32.gmra.mrb[72].mxu1 %vm7365_vm3, %v15364_v31  ;;  %v16633_v31 = vld [vmem:[#allocation3 + $0x1c0] sm:$0xff] }
 0x68b   : > { %25891 = vmatprep.mubr.msk.f32.mxu1 %vm7365_vm3, %v15365_v25 }
 0x68c   : > { %25314 = vmatmul.mubr.msk.f32.gmra.mrb[48].mxu0 %vm7365_vm3, %v31506_v28 }
 0x68d   : > { %25316 = vmatprep.mubr.msk.f32.mxu0 %vm7365_vm3, %v31508_v4 }
 0x68e   : > { %25892 = vmatmul.mubr.msk.f32.gmra.mrb[74].mxu1 %vm7365_vm3, %v15366_v18 }
 0x68f   : > { %25894 = vmatprep.mubr.msk.f32.mxu1 %vm7365_vm3, %v15367_v5  ;;  %v22319_v5 = vld [vmem:[%s32531_s3 + $0x1f0] sm:$0xff] }
 0x690   : > { %25317 = vmatmul.mubr.msk.f32.gmra.mrb[50].mxu0 %vm7365_vm3, %v31516_v14 }
 0x691   : > { %25319 = vmatprep.mubr.msk.f32.mxu0 %vm7365_vm3, %v31518_v15 }
 0x692   : > { %25895 = vmatmul.mubr.msk.f32.gmra.mrb[76].mxu1 %vm7365_vm3, %v15368_v16 }
 0x693   : > { %25913 = vmatprep.mubr.msk.f32.mxu1 %vm7365_vm3, %v16596_v53 }
 0x694   : > { %25320 = vmatmul.mubr.msk.f32.gmra.mrb[52].mxu0 %vm7365_vm3, %v31532_v40 }
 0x695   : > { %25322 = vmatprep.mubr.msk.f32.mxu0 %vm7365_vm3, %v31534_v37 }
 0x696   : > { %25914 = vmatmul.mubr.msk.f32.vlgmr.msra.gmra.mrb[78].mxu1 %vm7365_vm3, %v16597_v34  ;;  %v16636_v34 = vld [vmem:[#allocation3 + $0x1e0] sm:$0xff] }
 0x697   : > { %26708 = vmatpush3.bf16.msra.mxu1 %v31354_v47  ;;  %25916 = vmatprep.mubr.msk.f32.mxu1 %vm7365_vm3, %v16598_v36  ;;  %v31561_v47 = vld [vmem:[#allocation3 + $0x120] sm:$0xff] }
 0x698   : > { %26710 = vmatprep.subr.bf16.mxu1 %v26709_v46  ;;  %25323 = vmatmul.mubr.msk.f32.gmra.mrb[54].mxu0 %vm7365_vm3, %v31549_v56 }
 0x699   : > { %25325 = vmatprep.mubr.msk.f32.mxu0 %vm7365_vm3, %v31551_v60 }
 0x69a   : > { %25917 = vmatmul.mubr.msk.f32.gmra.mrb[80].mxu1 %vm7365_vm3, %v31456_v10  ;;  %v16637_v10 = vld [vmem:[#allocation3 + $0x1e8] sm:$0xff] }
 0x69b   : > { %25919 = vmatprep.mubr.msk.f32.mxu1 %vm7365_vm3, %v31458_v13  ;;  %26712 = vmatpush3.bf16.msra.mxu1 %v26709_v46 }
 0x69c   : > { %25326 = vmatmul.mubr.msk.f32.gmra.mrb[56].mxu0 %vm7365_vm3, %v31561_v47  ;;  %26714 = vmatprep.subr.bf16.mxu1 %v26713_v9 }
 0x69d   : > { %25328 = vmatprep.mubr.msk.f32.mxu0 %vm7365_vm3, %v31563_v52 }
 0x69e   : > { %25920 = vmatmul.mubr.msk.f32.gmra.mrb[82].mxu1 %vm7365_vm3, %v31466_v57  ;;  %v16638_v57 = vld [vmem:[#allocation3 + $0x1f0] sm:$0xff] }
 0x69f   : > { %25922 = vmatprep.mubr.msk.f32.mxu1 %vm7365_vm3, %v31468_v51  ;;  %26716 = vmatpush3.bf16.msra.mxu1 %v26713_v9 }
 0x6a0   : > { %25329 = vmatmul.mubr.msk.f32.gmra.mrb[58].mxu0 %vm7365_vm3, %v31573_v41 }
 0x6a1   : > { %25331 = vmatprep.mubr.msk.f32.mxu0 %vm7365_vm3, %v31575_v54 }
 0x6a2   : > { %25923 = vmatmul.mubr.msk.f32.gmra.mrb[84].mxu1 %vm7365_vm3, %v31476_v7  ;;  %v16639_v7 = vld [vmem:[#allocation3 + $0x1f8] sm:$0xff] }
 0x6a3   : > { %25925 = vmatprep.mubr.msk.f32.mxu1 %vm7365_vm3, %v31478_v59  ;;  %v31587_v42 = vpop.f32.mrb[82].mxu0 }
 0x6a4   : > { %v31591_v22 = vpop.f32.mrb[83].mxu0  ;;  %25332 = vmatmul.mubr.msk.f32.gmra.mrb[60].mxu0 %vm7365_vm3, %v31585_v29 }
 0x6a5   : > { %25334 = vmatprep.mubr.msk.f32.mxu0 %vm7365_vm3, %v31589_v63 }
 0x6a6   : > { %25926 = vmatmul.mubr.msk.f32.gmra.mrb[86].mxu1 %vm7365_vm3, %v31486_v32  ;;  %v16640_v32 = vld [vmem:[#allocation3 + $0x208] sm:$0xff] }
 0x6a7   : > { %25928 = vmatprep.mubr.msk.f32.mxu1 %vm7365_vm3, %v31488_v23  ;;  %v31603_v24 = vpop.f32.mrb[84].mxu0 }
 0x6a8   : > { %32681 = vst [vmem:[#allocation10_spill] sm:$0xff] %v31603_v24  ;;  %v31607_v38 = vpop.f32.mrb[85].mxu0  ;;  %25335 = vmatmul.mubr.msk.f32.gmra.mrb[62].mxu0 %vm7365_vm3, %v31601_v39 }
 0x6a9   : > { %32682 = vst [vmem:[#allocation11_spill] sm:$0xff] %v31607_v38  ;;  %25337 = vmatprep.mubr.msk.f32.mxu0 %vm7365_vm3, %v31605_v0 }
 0x6aa   : > { %25929 = vmatmul.mubr.msk.f32.gmra.mrb[88].mxu1 %vm7365_vm3, %v31496_v27  ;;  %v16641_v27 = vld [vmem:[#allocation3 + $0x210] sm:$0xff] }
 0x6ab   : > { %25931 = vmatprep.mubr.msk.f32.mxu1 %vm7365_vm3, %v31498_v49  ;;  %v31619_v30 = vpop.f32.mrb[86].mxu0 }
 0x6ac   : > { %32683 = vst [vmem:[#allocation12_spill] sm:$0xff] %v31619_v30  ;;  %v31623_v26 = vpop.f32.mrb[87].mxu0  ;;  %25338 = vmatmul.mubr.msk.f32.gmra.mrb[64].mxu0 %vm7365_vm3, %v31617_v11 }
 0x6ad   : > { %32684 = vst [vmem:[#allocation13_spill] sm:$0xff] %v31623_v26  ;;  %25340 = vmatprep.mubr.msk.f32.mxu0 %vm7365_vm3, %v31621_v20  ;;  %v17988_v26 = vld [vmem:[#allocation3 + $0x1c9] sm:$0xff] }
 0x6ae   : > { %25932 = vmatmul.mubr.msk.f32.gmra.mrb[90].mxu1 %vm7365_vm3, %v31506_v28 }
 0x6af   : > { %25934 = vmatprep.mubr.msk.f32.mxu1 %vm7365_vm3, %v31508_v4  ;;  %v31635_v44 = vpop.f32.mrb[88].mxu0 }
 0x6b0   : > { %32685 = vst [vmem:[#allocation14_spill] sm:$0xff] %v31635_v44  ;;  %v31639_v12 = vpop.f32.mrb[89].mxu0  ;;  %25341 = vmatmul.mubr.msk.f32.gmra.mrb[66].mxu0 %vm7365_vm3, %v31633_v19  ;;  %v17964_v44 = vld [vmem:[#allocation3 + $0xd9] sm:$0xff] }
 0x6b1   : > { %32686 = vst [vmem:[#allocation15_spill] sm:$0xff] %v31639_v12  ;;  %25343 = vmatprep.mubr.msk.f32.mxu0 %vm7365_vm3, %v31637_v35 }
 0x6b2   : > { %25935 = vmatmul.mubr.msk.f32.gmra.mrb[92].mxu1 %vm7365_vm3, %v31516_v14  ;;  %v22320_v14 = vld [vmem:[%s32531_s3 + $0x1f8] sm:$0xff] }
 0x6b3   : > { %25937 = vmatprep.mubr.msk.f32.mxu1 %vm7365_vm3, %v31518_v15  ;;  %v31651_v61 = vpop.f32.mrb[90].mxu0  ;;  %v26717_v16 = vpack.c.bf16 %v22320_v14, %v22319_v5  ;;  %v16653_v5 = vld [vmem:[#allocation3 + $0x288] sm:$0xff]  ;;  %v16654_v14 = vld [vmem:[#allocation3 + $0x290] sm:$0xff] }
 0x6b4   : > { %32687 = vst [vmem:[#allocation16_spill] sm:$0xff] %v31651_v61  ;;  %v31655_v1 = vpop.f32.mrb[91].mxu0  ;;  %25344 = vmatmul.mubr.msk.f32.gmra.mrb[68].mxu0 %vm7365_vm3, %v31649_v21 }
 0x6b5   : > { %32688 = vst [vmem:[#allocation17_spill] sm:$0xff] %v31655_v1  ;;  %25346 = vmatprep.mubr.msk.f32.mxu0 %vm7365_vm3, %v31653_v62  ;;  %26718 = vmatprep.subr.bf16.mxu1 %v26717_v16  ;;  %v17954_v1 = vld [vmem:[#allocation3 + $0x79] sm:$0xff] }
 0x6b6   : > { %25938 = vmatmul.mubr.msk.f32.gmra.mrb[94].mxu1 %vm7365_vm3, %v31532_v40 }
 0x6b7   : > { %25940 = vmatprep.mubr.msk.f32.mxu1 %vm7365_vm3, %v31534_v37  ;;  %v31665_v50 = vpop.f32.mrb[92].mxu0  ;;  %26720 = vmatpush3.bf16.msra.mxu1 %v26717_v16 }
 0x6b8   : > { %32689 = vst [vmem:[#allocation18_spill] sm:$0xff] %v31665_v50  ;;  %v31667_v17 = vpop.f32.mrb[93].mxu0  ;;  %25347 = vmatmul.mubr.msk.f32.gmra.mrb[70].mxu0 %vm7365_vm3, %v16631_v2  ;;  %v17953_v50 = vld [vmem:[#allocation3 + $0x69] sm:$0xff] }
 0x6b9   : > { %32690 = vst [vmem:[#allocation19_spill] sm:$0xff] %v31667_v17  ;;  %25349 = vmatprep.mubr.msk.f32.mxu0 %vm7365_vm3, %v16632_v6  ;;  %v22454_v17 = vld [vmem:[%s32531_s3 + $0x228] sm:$0xff] }
 0x6ba   : > { %25941 = vmatmul.mubr.msk.f32.gmra.mrb[96].mxu1 %vm7365_vm3, %v31549_v56 }
 0x6bb   : > { %25943 = vmatprep.mubr.msk.f32.mxu1 %vm7365_vm3, %v31551_v60  ;;  %v31675_v33 = vpop.f32.mrb[94].mxu0 }
 0x6bc   : > { %32691 = vst [vmem:[#allocation20_spill] sm:$0xff] %v31675_v33  ;;  %v31677_v45 = vpop.f32.mrb[95].mxu0  ;;  %25350 = vmatmul.mubr.msk.f32.gmra.mrb[72].mxu0 %vm7365_vm3, %v16633_v31  ;;  %v22453_v33 = vld [vmem:[%s32531_s3 + $0x220] sm:$0xff] }
 0x6bd   : > { %32692 = vst [vmem:[#allocation21_spill] sm:$0xff] %v31677_v45  ;;  %25352 = vmatprep.mubr.msk.f32.mxu0 %vm7365_vm3, %v16634_v48  ;;  %v17951_v45 = vld [vmem:[#allocation3 + $0x59] sm:$0xff] }
 0x6be   : > { %25944 = vmatmul.mubr.msk.f32.gmra.mrb[98].mxu1 %vm7365_vm3, %v31561_v47 }
 0x6bf   : > { %25946 = vmatprep.mubr.msk.f32.mxu1 %vm7365_vm3, %v31563_v52  ;;  %v31685_v53 = vpop.f32.mrb[96].mxu0 }
 0x6c0   : > { %32693 = vst [vmem:[#allocation22_spill] sm:$0xff] %v31685_v53  ;;  %v31687_v36 = vpop.f32.mrb[97].mxu0  ;;  %25353 = vmatmul.mubr.msk.f32.gmra.mrb[74].mxu0 %vm7365_vm3, %v16635_v58 }
 0x6c1   : > { %32694 = vst [vmem:[#allocation23_spill] sm:$0xff] %v31687_v36  ;;  %25355 = vmatprep.mubr.msk.f32.mxu0 %vm7365_vm3, %v16636_v34  ;;  %v17950_v36 = vld [vmem:[#allocation3 + $0x51] sm:$0xff] }
 0x6c2   : > { %25947 = vmatmul.mubr.msk.f32.gmra.mrb[100].mxu1 %vm7365_vm3, %v31573_v41  ;;  %v16642_v41 = vld [vmem:[#allocation3 + $0x218] sm:$0xff] }
 0x6c3   : > { %25949 = vmatprep.mubr.msk.f32.mxu1 %vm7365_vm3, %v31575_v54  ;;  %v31695_v13 = vpop.f32.mrb[98].mxu0 }
 0x6c4   : > { %32695 = vst [vmem:[#allocation24_spill] sm:$0xff] %v31695_v13  ;;  %v31697_v51 = vpop.f32.mrb[99].mxu0  ;;  %25356 = vmatmul.mubr.msk.f32.gmra.mrb[76].mxu0 %vm7365_vm3, %v16637_v10 }
 0x6c5   : > { %32696 = vst [vmem:[#allocation25_spill] sm:$0xff] %v31697_v51  ;;  %25358 = vmatprep.mubr.msk.f32.mxu0 %vm7365_vm3, %v16638_v57 }
 0x6c6   : > { %25950 = vmatmul.mubr.msk.f32.gmra.mrb[102].mxu1 %vm7365_vm3, %v31585_v29 }
 0x6c7   : > { %25952 = vmatprep.mubr.msk.f32.mxu1 %vm7365_vm3, %v31589_v63  ;;  %v31705_v59 = vpop.f32.mrb[100].mxu0  ;;  %v16643_v63 = vld [vmem:[#allocation3 + $0x220] sm:$0xff] }
 0x6c8   : > { %32697 = vst [vmem:[#allocation26_spill] sm:$0xff] %v31705_v59  ;;  %v31707_v23 = vpop.f32.mrb[101].mxu0  ;;  %25359 = vmatmul.mubr.msk.f32.gmra.mrb[78].mxu0 %vm7365_vm3, %v16639_v7  ;;  %v16722_v59 = vld [vmem:[#allocation3 + $0x538] sm:$0xff] }
 0x6c9   : > { %32698 = vst [vmem:[#allocation27_spill] sm:$0xff] %v31707_v23  ;;  %25361 = vmatprep.mubr.msk.f32.mxu0 %vm7365_vm3, %v16640_v32  ;;  %v16719_v23 = vld [vmem:[#allocation3 + $0x518] sm:$0xff] }
 0x6ca   : > { %25953 = vmatmul.mubr.msk.f32.gmra.mrb[104].mxu1 %vm7365_vm3, %v31601_v39  ;;  %v16644_v39 = vld [vmem:[#allocation3 + $0x230] sm:$0xff] }
 0x6cb   : > { %25955 = vmatprep.mubr.msk.f32.mxu1 %vm7365_vm3, %v31605_v0  ;;  %v31715_v49 = vpop.f32.mrb[102].mxu0 }
 0x6cc   : > { %32699 = vst [vmem:[#allocation28_spill] sm:$0xff] %v31715_v49  ;;  %v31717_v25 = vpop.f32.mrb[103].mxu0  ;;  %25362 = vmatmul.mubr.msk.f32.gmra.mrb[80].mxu0 %vm7365_vm3, %v16641_v27 }
 0x6cd   : > { %32700 = vst [vmem:[#allocation29_spill] sm:$0xff] %v31717_v25  ;;  %v16720_v25 = vld [vmem:[#allocation3 + $0x528] sm:$0xff] }
 0x6ce   : > { %25956 = vmatmul.mubr.msk.f32.gmra.mrb[106].mxu1 %vm7365_vm3, %v31617_v11 }
 0x6cf   : > { %25958 = vmatprep.mubr.msk.f32.mxu1 %vm7365_vm3, %v31621_v20  ;;  %v31724_v28 = vpop.f32.mrb[104].mxu0  ;;  %v16645_v20 = vld [vmem:[#allocation3 + $0x238] sm:$0xff] }
 0x6d0   : > { %32701 = vst [vmem:[#allocation30_spill] sm:$0xff] %v31724_v28  ;;  %v31726_v4 = vpop.f32.mrb[105].mxu0  ;;  %v16717_v28 = vld [vmem:[#allocation3 + $0x508] sm:$0xff] }
 0x6d1   : > { %32702 = vst [vmem:[#allocation31_spill] sm:$0xff] %v31726_v4 }
 0x6d2   : > { %25959 = vmatmul.mubr.msk.f32.gmra.mrb[108].mxu1 %vm7365_vm3, %v31633_v19  ;;  %v16646_v19 = vld [vmem:[#allocation3 + $0x240] sm:$0xff] }
 0x6d3   : > { %25961 = vmatprep.mubr.msk.f32.mxu1 %vm7365_vm3, %v31637_v35  ;;  %v31732_v18 = vpop.f32.mrb[106].mxu0 }
 0x6d4   : > { %32703 = vst [vmem:[#allocation8_spill] sm:$0xff] %v31732_v18  ;;  %v31740_v15 = vpop.f32.mrb[107].mxu0  ;;  %v16715_v18 = vld [vmem:[#allocation3 + $0x4f0] sm:$0xff] }
 0x6d5   : > { %32704 = vst [vmem:[#allocation36_spill] sm:$0xff] %v31740_v15 }
 0x6d6   : > { %25962 = vmatmul.mubr.msk.f32.gmra.mrb[110].mxu1 %vm7365_vm3, %v31649_v21 }
 0x6d7   : > { %25964 = vmatprep.mubr.msk.f32.mxu1 %vm7365_vm3, %v31653_v62  ;;  %v31746_v8 = vpop.f32.mrb[108].mxu0  ;;  %v16647_v62 = vld [vmem:[#allocation3 + $0x248] sm:$0xff] }
 0x6d8   : > { %32705 = vst [vmem:[#allocation37_spill] sm:$0xff] %v31746_v8  ;;  %v31748_v43 = vpop.f32.mrb[109].mxu0  ;;  %v16713_v8 = vld [vmem:[#allocation3 + $0x4e0] sm:$0xff] }
 0x6d9   : > { %32706 = vst [vmem:[#allocation32_spill] sm:$0xff] %v31748_v43 }
 0x6da   : > { %25965 = vmatmul.mubr.msk.f32.gmra.mrb[112].mxu1 %vm7365_vm3, %v16631_v2  ;;  %v16648_v2 = vld [vmem:[#allocation3 + $0x258] sm:$0xff] }
 0x6db   : > { %25967 = vmatprep.mubr.msk.f32.mxu1 %vm7365_vm3, %v16632_v6  ;;  %v31752_v40 = vpop.f32.mrb[110].mxu0 }
 0x6dc   : > { %32707 = vst [vmem:[#allocation33_spill] sm:$0xff] %v31752_v40  ;;  %v31754_v37 = vpop.f32.mrb[111].mxu0  ;;  %v16711_v40 = vld [vmem:[#allocation3 + $0x4c8] sm:$0xff] }
 0x6dd   : > { %32708 = vst [vmem:[#allocation34_spill] sm:$0xff] %v31754_v37 }
 0x6de   : > { %25968 = vmatmul.mubr.msk.f32.gmra.mrb[114].mxu1 %vm7365_vm3, %v16633_v31 }
 0x6df   : > { %25970 = vmatprep.mubr.msk.f32.mxu1 %vm7365_vm3, %v16634_v48  ;;  %v31758_v46 = vpop.f32.mrb[112].mxu0  ;;  %v16649_v48 = vld [vmem:[#allocation3 + $0x260] sm:$0xff] }
 0x6e0   : > { %32709 = vst [vmem:[#allocation35_spill] sm:$0xff] %v31758_v46  ;;  %v31760_v3 = vpop.f32.mrb[113].mxu0  ;;  %v16709_v46 = vld [vmem:[#allocation3 + $0x4b8] sm:$0xff] }
 0x6e1   : > { %32710 = vst [vmem:[#allocation7_spill] sm:$0xff] %v31760_v3 }
 0x6e2   : > { %25971 = vmatmul.mubr.msk.f32.gmra.mrb[116].mxu1 %vm7365_vm3, %v16635_v58  ;;  %v16650_v58 = vld [vmem:[#allocation3 + $0x268] sm:$0xff] }
 0x6e3   : > { %25973 = vmatprep.mubr.msk.f32.mxu1 %vm7365_vm3, %v16636_v34  ;;  %v31764_v55 = vpop.f32.mrb[114].mxu0 }
 0x6e4   : > { %32711 = vst [vmem:[#allocation9_spill] sm:$0xff] %v31764_v55  ;;  %v31766_v56 = vpop.f32.mrb[115].mxu0  ;;  %v16707_v55 = vld [vmem:[#allocation3 + $0x4a0] sm:$0xff] }
 0x6e5   : > { %32712 = vst [vmem:[#allocation4_spill] sm:$0xff] %v31766_v56 }
 0x6e6   : > { %25974 = vmatmul.mubr.msk.f32.gmra.mrb[118].mxu1 %vm7365_vm3, %v16637_v10 }
 0x6e7   : > { %25976 = vmatprep.mubr.msk.f32.mxu1 %vm7365_vm3, %v16638_v57  ;;  %v31770_v60 = vpop.f32.mrb[116].mxu0  ;;  %v16651_v57 = vld [vmem:[#allocation3 + $0x270] sm:$0xff] }
 0x6e8   : > { %32713 = vst [vmem:[#allocation6_spill] sm:$0xff] %v31770_v60  ;;  %v31772_v9 = vpop.f32.mrb[117].mxu0  ;;  %v16705_v60 = vld [vmem:[#allocation3 + $0x490] sm:$0xff] }
 0x6e9   : > { %32714 = vst [vmem:[#allocation5_spill] sm:$0xff] %v31772_v9 }
 0x6ea   : > { %25977 = vmatmul.mubr.msk.f32.gmra.mrb[120].mxu1 %vm7365_vm3, %v16639_v7  ;;  %v16652_v7 = vld [vmem:[#allocation3 + $0x280] sm:$0xff] }
 0x6eb   : > { %25979 = vmatprep.mubr.msk.f32.mxu1 %vm7365_vm3, %v16640_v32  ;;  %v31776_v47 = vpop.f32.mrb[118].mxu0 }
 0x6ec   : > { %32715 = vst [vmem:[#allocation38_spill] sm:$0xff] %v31776_v47  ;;  %v31778_v52 = vpop.f32.mrb[119].mxu0  ;;  %v16703_v47 = vld [vmem:[#allocation3 + $0x478] sm:$0xff] }
 0x6ed   : > { %32716 = vst [vmem:[#allocation39_spill] sm:$0xff] %v31778_v52 }
 0x6ee   : > { %25980 = vmatmul.mubr.msk.f32.gmra.mrb[122].mxu1 %vm7365_vm3, %v16641_v27 }
 0x6ef   : > { %25982 = vmatprep.mubr.msk.f32.mxu1 %vm7365_vm3, %v16642_v41  ;;  %v31782_v54 = vpop.f32.mrb[120].mxu0 }
 0x6f0   : > { %32717 = vst [vmem:[#allocation40_spill] sm:$0xff] %v31782_v54  ;;  %v31784_v29 = vpop.f32.mrb[121].mxu0  ;;  %v16701_v54 = vld [vmem:[#allocation3 + $0x468] sm:$0xff] }
 0x6f1   : > { %32718 = vst [vmem:[#allocation41_spill] sm:$0xff] %v31784_v29 }
 0x6f2   : > { %25983 = vmatmul.mubr.msk.f32.gmra.mrb[124].mxu1 %vm7365_vm3, %v16643_v63  ;;  %v16655_v63 = vld [vmem:[#allocation3 + $0x298] sm:$0xff] }
 0x6f3   : > { %25985 = vmatprep.mubr.msk.f32.mxu1 %vm7365_vm3, %v16644_v39  ;;  %v31788_v0 = vpop.f32.mrb[122].mxu0  ;;  %v16656_v39 = vld [vmem:[#allocation3 + $0x2a8] sm:$0xff] }
 0x6f4   : > { %32719 = vst [vmem:[#allocation42_spill] sm:$0xff] %v31788_v0  ;;  %v31790_v11 = vpop.f32.mrb[123].mxu0  ;;  %v16699_v0 = vld [vmem:[#allocation3 + $0x450] sm:$0xff] }
 0x6f5   : > { %32720 = vst [vmem:[#allocation43_spill] sm:$0xff] %v31790_v11 }
 0x6f6   : > { %25986 = vmatmul.mubr.msk.f32.gmra.mrb[126].mxu1 %vm7365_vm3, %v16645_v20 }
 0x6f7   : > { %25988 = vmatprep.mubr.msk.f32.mxu1 %vm7365_vm3, %v16646_v19  ;;  %v31794_v35 = vpop.f32.mrb[124].mxu0 }
 0x6f8   : > { %32721 = vst [vmem:[#allocation44_spill] sm:$0xff] %v31794_v35  ;;  %v31796_v21 = vpop.f32.mrb[125].mxu0  ;;  %v16697_v35 = vld [vmem:[#allocation3 + $0x440] sm:$0xff] }
 0x6f9   : > { %32722 = vst [vmem:[#allocation45_spill] sm:$0xff] %v31796_v21 }
 0x6fa   : > { %25989 = vmatmul.mubr.msk.f32.gmra.mrb[0].mxu1 %vm7365_vm3, %v16647_v62  ;;  %v16657_v62 = vld [vmem:[#allocation3 + $0x2b0] sm:$0xff] }
 0x6fb   : > { %25991 = vmatprep.mubr.msk.f32.mxu1 %vm7365_vm3, %v16648_v2  ;;  %v31800_v6 = vpop.f32.mrb[126].mxu0  ;;  %v16658_v2 = vld [vmem:[#allocation3 + $0x2b8] sm:$0xff] }
 0x6fc   : > { %32723 = vst [vmem:[#allocation46_spill] sm:$0xff] %v31800_v6  ;;  %v31802_v31 = vpop.f32.mrb[127].mxu0  ;;  %v16695_v6 = vld [vmem:[#allocation3 + $0x428] sm:$0xff] }
 0x6fd   : > { %32724 = vst [vmem:[#allocation47_spill] sm:$0xff] %v31802_v31 }
 0x6fe   : > { %25992 = vmatmul.mubr.msk.f32.gmra.mrb[2].mxu1 %vm7365_vm3, %v16649_v48 }
 0x6ff   : > { %25994 = vmatprep.mubr.msk.f32.mxu1 %vm7365_vm3, %v16650_v58  ;;  %v31806_v34 = vpop.f32.mrb[128].mxu0 }
 0x700   : > { %32725 = vst [vmem:[#allocation48_spill] sm:$0xff] %v31806_v34  ;;  %v31808_v10 = vpop.f32.mrb[129].mxu0  ;;  %v16693_v34 = vld [vmem:[#allocation3 + $0x418] sm:$0xff] }
 0x701   : > { %32726 = vst [vmem:[#allocation49_spill] sm:$0xff] %v31808_v10 }
 0x702   : > { %25995 = vmatmul.mubr.msk.f32.gmra.mrb[4].mxu1 %vm7365_vm3, %v16651_v57  ;;  %v16659_v57 = vld [vmem:[#allocation3 + $0x2c0] sm:$0xff] }
 0x703   : > { %25997 = vmatprep.mubr.msk.f32.mxu1 %vm7365_vm3, %v16652_v7  ;;  %v31812_v32 = vpop.f32.mrb[130].mxu0  ;;  %v16660_v7 = vld [vmem:[#allocation3 + $0x2d0] sm:$0xff] }
 0x704   : > { %32727 = vst [vmem:[#allocation50_spill] sm:$0xff] %v31812_v32  ;;  %v31814_v27 = vpop.f32.mrb[131].mxu0  ;;  %v16691_v32 = vld [vmem:[#allocation3 + $0x400] sm:$0xff] }
 0x705   : > { %32728 = vst [vmem:[#allocation51_spill] sm:$0xff] %v31814_v27 }
 0x706   : > { %25998 = vmatmul.mubr.msk.f32.gmra.mrb[6].mxu1 %vm7365_vm3, %v16653_v5 }
 0x707   : > { %26000 = vmatprep.mubr.msk.f32.mxu1 %vm7365_vm3, %v16654_v14  ;;  %v31818_v16 = vpop.f32.mrb[132].mxu0  ;;  %v22449_v14 = vld [vmem:[%s32531_s3 + $0x200] sm:$0xff] }
 0x708   : > { %32729 = vst [vmem:[#allocation52_spill] sm:$0xff] %v31818_v16  ;;  %v31820_v41 = vpop.f32.mrb[133].mxu0  ;;  %v16689_v16 = vld [vmem:[#allocation3 + $0x3f0] sm:$0xff] }
 0x709   : > { %32730 = vst [vmem:[#allocation53_spill] sm:$0xff] %v31820_v41 }
 0x70a   : > { %26001 = vmatmul.mubr.msk.f32.gmra.mrb[8].mxu1 %vm7365_vm3, %v16655_v63  ;;  %v22450_v63 = vld [vmem:[%s32531_s3 + $0x208] sm:$0xff] }
 0x70b   : > { %26003 = vmatprep.mubr.msk.f32.mxu1 %vm7365_vm3, %v16656_v39  ;;  %v31824_v20 = vpop.f32.mrb[134].mxu0 }
 0x70c   : > { %32731 = vst [vmem:[#allocation54_spill] sm:$0xff] %v31824_v20  ;;  %v31826_v19 = vpop.f32.mrb[135].mxu0  ;;  %v16687_v20 = vld [vmem:[#allocation3 + $0x3d8] sm:$0xff] }
 0x70d   : > { %32732 = vst [vmem:[#allocation55_spill] sm:$0xff] %v31826_v19 }
 0x70e   : > { %26004 = vmatmul.mubr.msk.f32.gmra.mrb[10].mxu1 %vm7365_vm3, %v16657_v62  ;;  %v31846_v62 = vpack.c.bf16 %v22450_v63, %v22449_v14 }
 0x70f   : > { %26006 = vmatprep.mubr.msk.f32.mxu1 %vm7365_vm3, %v16658_v2  ;;  %v31830_v48 = vpop.f32.mrb[136].mxu0  ;;  %v16661_v2 = vld [vmem:[#allocation3 + $0x2d8] sm:$0xff] }
 0x710   : > { %32733 = vst [vmem:[#allocation56_spill] sm:$0xff] %v31830_v48  ;;  %v31832_v58 = vpop.f32.mrb[137].mxu0  ;;  %26722 = vmatprep.subr.bf16.mxu1 %v31846_v62  ;;  %v16664_v48 = vld [vmem:[#allocation3 + $0x2f8] sm:$0xff] }
 0x711   : > { %32734 = vst [vmem:[#allocation57_spill] sm:$0xff] %v31832_v58  ;;  %v16663_v58 = vld [vmem:[#allocation3 + $0x2e8] sm:$0xff] }
 0x712   : > { %26007 = vmatmul.mubr.msk.f32.gmra.mrb[12].mxu1 %vm7365_vm3, %v16659_v57  ;;  %v16662_v57 = vld [vmem:[#allocation3 + $0x2e0] sm:$0xff] }
 0x713   : > { %26009 = vmatprep.mubr.msk.f32.mxu1 %vm7365_vm3, %v16660_v7  ;;  %v31836_v5 = vpop.f32.mrb[138].mxu0 }
 0x714   : > { %32735 = vst [vmem:[#allocation58_spill] sm:$0xff] %v31836_v5  ;;  %v31844_v39 = vpop.f32.mrb[139].mxu0 }
 0x715   : > { %32736 = vst [vmem:[#allocation59_spill] sm:$0xff] %v31844_v39  ;;  %v16666_v39 = vld [vmem:[#allocation3 + $0x308] sm:$0xff] }
 0x716   : > { %26010 = vmatmul.mubr.msk.f32.gmra.mrb[14].mxu1 %vm7365_vm3, %v16661_v2  ;;  %v16665_v2 = vld [vmem:[#allocation3 + $0x300] sm:$0xff] }
 0x717   : > { %26012 = vmatprep.mubr.msk.f32.mxu1 %vm7365_vm3, %v16662_v57  ;;  %v31851_v7 = vpop.f32.mrb[140].mxu0 }
 0x718   : > { %32737 = vst [vmem:[#allocation60_spill] sm:$0xff] %v31851_v7  ;;  %v31853_v5 = vpop.f32.mrb[141].mxu0 }
 0x719   : > { %32738 = vst [vmem:[#allocation61_spill] sm:$0xff] %v31853_v5  ;;  %v16667_v5 = vld [vmem:[#allocation3 + $0x310] sm:$0xff] }
 0x71a   : > { %26013 = vmatmul.mubr.msk.f32.gmra.mrb[16].mxu1 %vm7365_vm3, %v16663_v58  ;;  %v16668_v58 = vld [vmem:[#allocation3 + $0x320] sm:$0xff] }
 0x71b   : > { %26015 = vmatprep.mubr.msk.f32.mxu1 %vm7365_vm3, %v16664_v48  ;;  %v31857_v14 = vpop.f32.mrb[142].mxu0 }
 0x71c   : > { %32739 = vst [vmem:[#allocation62_spill] sm:$0xff] %v31857_v14  ;;  %v31859_v63 = vpop.f32.mrb[143].mxu0 }
 0x71d   : > { %32740 = vst [vmem:[#allocation63_spill] sm:$0xff] %v31859_v63  ;;  %v16669_v63 = vld [vmem:[#allocation3 + $0x328] sm:$0xff] }
 0x71e   : > { %26016 = vmatmul.mubr.msk.f32.gmra.mrb[18].mxu1 %vm7365_vm3, %v16665_v2  ;;  %v16670_v2 = vld [vmem:[#allocation3 + $0x330] sm:$0xff] }
 0x71f   : > { %26018 = vmatprep.mubr.msk.f32.mxu1 %vm7365_vm3, %v16666_v39  ;;  %v31863_v57 = vpop.f32.mrb[144].mxu0 }
 0x720   : > { %32741 = vst [vmem:[#allocation64_spill] sm:$0xff] %v31863_v57  ;;  %v31865_v7 = vpop.f32.mrb[145].mxu0 }
 0x721   : > { %32742 = vst [vmem:[#allocation65_spill] sm:$0xff] %v31865_v7  ;;  %v16671_v7 = vld [vmem:[#allocation3 + $0x338] sm:$0xff] }
 0x722   : > { %26019 = vmatmul.mubr.msk.f32.gmra.mrb[20].mxu1 %vm7365_vm3, %v16667_v5  ;;  %v16672_v5 = vld [vmem:[#allocation3 + $0x348] sm:$0xff] }
 0x723   : > { %26021 = vmatprep.mubr.msk.f32.mxu1 %vm7365_vm3, %v16668_v58  ;;  %v31869_v48 = vpop.f32.mrb[146].mxu0 }
 0x724   : > { %32743 = vst [vmem:[#allocation66_spill] sm:$0xff] %v31869_v48  ;;  %v31871_v14 = vpop.f32.mrb[147].mxu0 }
 0x725   : > { %32744 = vst [vmem:[#allocation67_spill] sm:$0xff] %v31871_v14  ;;  %v16673_v14 = vld [vmem:[#allocation3 + $0x350] sm:$0xff] }
 0x726   : > { %26022 = vmatmul.mubr.msk.f32.gmra.mrb[22].mxu1 %vm7365_vm3, %v16669_v63  ;;  %v16674_v63 = vld [vmem:[#allocation3 + $0x358] sm:$0xff] }
 0x727   : > { %26024 = vmatprep.mubr.msk.f32.mxu1 %vm7365_vm3, %v16670_v2  ;;  %v31875_v39 = vpop.f32.mrb[148].mxu0 }
 0x728   : > { %32745 = vst [vmem:[#allocation68_spill] sm:$0xff] %v31875_v39  ;;  %v31877_v57 = vpop.f32.mrb[149].mxu0 }
 0x729   : > { %32746 = vst [vmem:[#allocation69_spill] sm:$0xff] %v31877_v57  ;;  %v16675_v57 = vld [vmem:[#allocation3 + $0x360] sm:$0xff] }
 0x72a   : > { %26025 = vmatmul.mubr.msk.f32.gmra.mrb[24].mxu1 %vm7365_vm3, %v16671_v7  ;;  %v16676_v7 = vld [vmem:[#allocation3 + $0x370] sm:$0xff] }
 0x72b   : > { %26027 = vmatprep.mubr.msk.f32.mxu1 %vm7365_vm3, %v16672_v5  ;;  %v31881_v58 = vpop.f32.mrb[150].mxu0 }
 0x72c   : > { %32747 = vst [vmem:[#allocation70_spill] sm:$0xff] %v31881_v58  ;;  %v31883_v48 = vpop.f32.mrb[151].mxu0 }
 0x72d   : > { %32748 = vst [vmem:[#allocation71_spill] sm:$0xff] %v31883_v48  ;;  %v16677_v48 = vld [vmem:[#allocation3 + $0x378] sm:$0xff] }
 0x72e   : > { %26028 = vmatmul.mubr.msk.f32.gmra.mrb[26].mxu1 %vm7365_vm3, %v16673_v14  ;;  %v16678_v14 = vld [vmem:[#allocation3 + $0x380] sm:$0xff] }
 0x72f   : > { %26030 = vmatprep.mubr.msk.f32.mxu1 %vm7365_vm3, %v16674_v63  ;;  %v31887_v2 = vpop.f32.mrb[152].mxu0 }
 0x730   : > { %32749 = vst [vmem:[#allocation72_spill] sm:$0xff] %v31887_v2  ;;  %v31889_v39 = vpop.f32.mrb[153].mxu0 }
 0x731   : > { %32750 = vst [vmem:[#allocation73_spill] sm:$0xff] %v31889_v39  ;;  %v16679_v39 = vld [vmem:[#allocation3 + $0x388] sm:$0xff] }
 0x732   : > { %26031 = vmatmul.mubr.msk.f32.gmra.mrb[28].mxu1 %vm7365_vm3, %v16675_v57  ;;  %v16680_v57 = vld [vmem:[#allocation3 + $0x398] sm:$0xff] }
 0x733   : > { %26033 = vmatprep.mubr.msk.f32.mxu1 %vm7365_vm3, %v16676_v7  ;;  %v31893_v5 = vpop.f32.mrb[154].mxu0 }
 0x734   : > { %32751 = vst [vmem:[#allocation74_spill] sm:$0xff] %v31893_v5  ;;  %v31895_v58 = vpop.f32.mrb[155].mxu0 }
 0x735   : > { %32752 = vst [vmem:[#allocation75_spill] sm:$0xff] %v31895_v58  ;;  %v16681_v58 = vld [vmem:[#allocation3 + $0x3a0] sm:$0xff] }
 0x736   : > { %26034 = vmatmul.mubr.msk.f32.gmra.mrb[30].mxu1 %vm7365_vm3, %v16677_v48  ;;  %v16682_v48 = vld [vmem:[#allocation3 + $0x3a8] sm:$0xff] }
 0x737   : > { %26036 = vmatprep.mubr.msk.f32.mxu1 %vm7365_vm3, %v16678_v14  ;;  %v31899_v63 = vpop.f32.mrb[156].mxu0 }
 0x738   : > { %32753 = vst [vmem:[#allocation76_spill] sm:$0xff] %v31899_v63  ;;  %v31901_v2 = vpop.f32.mrb[157].mxu0 }
 0x739   : > { %32754 = vst [vmem:[#allocation77_spill] sm:$0xff] %v31901_v2  ;;  %v16683_v2 = vld [vmem:[#allocation3 + $0x3b0] sm:$0xff] }
 0x73a   : > { %26037 = vmatmul.mubr.msk.f32.gmra.mrb[32].mxu1 %vm7365_vm3, %v16679_v39  ;;  %v16684_v39 = vld [vmem:[#allocation3 + $0x3c0] sm:$0xff] }
 0x73b   : > { %26039 = vmatprep.mubr.msk.f32.mxu1 %vm7365_vm3, %v16680_v57  ;;  %v31905_v7 = vpop.f32.mrb[158].mxu0 }
 0x73c   : > { %32755 = vst [vmem:[#allocation78_spill] sm:$0xff] %v31905_v7  ;;  %v31907_v5 = vpop.f32.mrb[159].mxu0 }
 0x73d   : > { %32756 = vst [vmem:[#allocation79_spill] sm:$0xff] %v31907_v5  ;;  %v16685_v5 = vld [vmem:[#allocation3 + $0x3c8] sm:$0xff] }
 0x73e   : > { %26040 = vmatmul.mubr.msk.f32.gmra.mrb[34].mxu1 %vm7365_vm3, %v16681_v58  ;;  %v16686_v58 = vld [vmem:[#allocation3 + $0x3d0] sm:$0xff] }
 0x73f   : > { %26042 = vmatprep.mubr.msk.f32.mxu1 %vm7365_vm3, %v16682_v48  ;;  %v31911_v14 = vpop.f32.mrb[32].mxu0 }
 0x740   : > { %v31913_v63 = vpop.f32.mrb[33].mxu0 }
 0x742   : > { %26043 = vmatmul.mubr.msk.f32.gmra.mrb[36].mxu1 %vm7365_vm3, %v16683_v2  ;;  %v16688_v2 = vld [vmem:[#allocation3 + $0x3e8] sm:$0xff] }
 0x743   : > { %26045 = vmatprep.mubr.msk.f32.mxu1 %vm7365_vm3, %v16684_v39  ;;  %v31917_v57 = vpop.f32.mrb[34].mxu0 }
 0x744   : > { %v31919_v7 = vpop.f32.mrb[35].mxu0 }
 0x746   : > { %26046 = vmatmul.mubr.msk.f32.gmra.mrb[38].mxu1 %vm7365_vm3, %v16685_v5  ;;  %v16690_v5 = vld [vmem:[#allocation3 + $0x3f8] sm:$0xff] }
 0x747   : > { %26048 = vmatprep.mubr.msk.f32.mxu1 %vm7365_vm3, %v16686_v58  ;;  %v31923_v48 = vpop.f32.mrb[36].mxu0 }
 0x748   : > { %v31925_v19 = vpop.f32.mrb[37].mxu0 }
 0x74a   : > { %26049 = vmatmul.mubr.msk.f32.gmra.mrb[40].mxu1 %vm7365_vm3, %v16687_v20  ;;  %v16692_v20 = vld [vmem:[#allocation3 + $0x410] sm:$0xff] }
 0x74b   : > { %26051 = vmatprep.mubr.msk.f32.mxu1 %vm7365_vm3, %v16688_v2  ;;  %v31929_v39 = vpop.f32.mrb[38].mxu0 }
 0x74c   : > { %v31931_v41 = vpop.f32.mrb[39].mxu0 }
 0x74e   : > { %26052 = vmatmul.mubr.msk.f32.gmra.mrb[42].mxu1 %vm7365_vm3, %v16689_v16  ;;  %v16694_v16 = vld [vmem:[#allocation3 + $0x420] sm:$0xff] }
 0x74f   : > { %26054 = vmatprep.mubr.msk.f32.mxu1 %vm7365_vm3, %v16690_v5  ;;  %v31935_v58 = vpop.f32.mrb[40].mxu0 }
 0x750   : > { %v31937_v27 = vpop.f32.mrb[41].mxu0 }
 0x752   : > { %26055 = vmatmul.mubr.msk.f32.gmra.mrb[44].mxu1 %vm7365_vm3, %v16691_v32  ;;  %v16696_v32 = vld [vmem:[#allocation3 + $0x438] sm:$0xff] }
 0x753   : > { %26057 = vmatprep.mubr.msk.f32.mxu1 %vm7365_vm3, %v16692_v20  ;;  %v31941_v2 = vpop.f32.mrb[42].mxu0 }
 0x754   : > { %v31943_v10 = vpop.f32.mrb[43].mxu0 }
 0x756   : > { %26058 = vmatmul.mubr.msk.f32.gmra.mrb[46].mxu1 %vm7365_vm3, %v16693_v34  ;;  %v16698_v34 = vld [vmem:[#allocation3 + $0x448] sm:$0xff] }
 0x757   : > { %26060 = vmatprep.mubr.msk.f32.mxu1 %vm7365_vm3, %v16694_v16  ;;  %v31947_v5 = vpop.f32.mrb[44].mxu0 }
 0x758   : > { %v31949_v31 = vpop.f32.mrb[45].mxu0 }
 0x75a   : > { %26061 = vmatmul.mubr.msk.f32.gmra.mrb[48].mxu1 %vm7365_vm3, %v16695_v6  ;;  %v16700_v6 = vld [vmem:[#allocation3 + $0x460] sm:$0xff] }
 0x75b   : > { %26063 = vmatprep.mubr.msk.f32.mxu1 %vm7365_vm3, %v16696_v32  ;;  %v31953_v20 = vpop.f32.mrb[46].mxu0 }
 0x75c   : > { %v31955_v21 = vpop.f32.mrb[47].mxu0 }
 0x75e   : > { %26064 = vmatmul.mubr.msk.f32.gmra.mrb[50].mxu1 %vm7365_vm3, %v16697_v35  ;;  %v16702_v35 = vld [vmem:[#allocation3 + $0x470] sm:$0xff] }
 0x75f   : > { %26066 = vmatprep.mubr.msk.f32.mxu1 %vm7365_vm3, %v16698_v34  ;;  %v31959_v16 = vpop.f32.mrb[48].mxu0 }
 0x760   : > { %v31961_v11 = vpop.f32.mrb[49].mxu0 }
 0x762   : > { %26067 = vmatmul.mubr.msk.f32.gmra.mrb[52].mxu1 %vm7365_vm3, %v16699_v0  ;;  %v16704_v0 = vld [vmem:[#allocation3 + $0x488] sm:$0xff] }
 0x763   : > { %26069 = vmatprep.mubr.msk.f32.mxu1 %vm7365_vm3, %v16700_v6  ;;  %v31965_v32 = vpop.f32.mrb[50].mxu0 }
 0x764   : > { %v31967_v29 = vpop.f32.mrb[51].mxu0 }
 0x766   : > { %26070 = vmatmul.mubr.msk.f32.gmra.mrb[54].mxu1 %vm7365_vm3, %v16701_v54  ;;  %v16706_v54 = vld [vmem:[#allocation3 + $0x498] sm:$0xff] }
 0x767   : > { %26072 = vmatprep.mubr.msk.f32.mxu1 %vm7365_vm3, %v16702_v35  ;;  %v31971_v34 = vpop.f32.mrb[52].mxu0 }
 0x768   : > { %v31973_v52 = vpop.f32.mrb[53].mxu0 }
 0x76a   : > { %26073 = vmatmul.mubr.msk.f32.gmra.mrb[56].mxu1 %vm7365_vm3, %v16703_v47  ;;  %v16708_v47 = vld [vmem:[#allocation3 + $0x4b0] sm:$0xff] }
 0x76b   : > { %26075 = vmatprep.mubr.msk.f32.mxu1 %vm7365_vm3, %v16704_v0  ;;  %v31977_v6 = vpop.f32.mrb[54].mxu0 }
 0x76c   : > { %v31979_v9 = vpop.f32.mrb[55].mxu0 }
 0x76e   : > { %26076 = vmatmul.mubr.msk.f32.gmra.mrb[58].mxu1 %vm7365_vm3, %v16705_v60  ;;  %v16710_v60 = vld [vmem:[#allocation3 + $0x4c0] sm:$0xff] }
 0x76f   : > { %26078 = vmatprep.mubr.msk.f32.mxu1 %vm7365_vm3, %v16706_v54  ;;  %v31983_v35 = vpop.f32.mrb[56].mxu0 }
 0x770   : > { %v31985_v56 = vpop.f32.mrb[57].mxu0 }
 0x772   : > { %26079 = vmatmul.mubr.msk.f32.gmra.mrb[60].mxu1 %vm7365_vm3, %v16707_v55  ;;  %v16712_v55 = vld [vmem:[#allocation3 + $0x4d8] sm:$0xff] }
 0x773   : > { %26081 = vmatprep.mubr.msk.f32.mxu1 %vm7365_vm3, %v16708_v47  ;;  %v31989_v0 = vpop.f32.mrb[58].mxu0 }
 0x774   : > { %v31991_v3 = vpop.f32.mrb[59].mxu0 }
 0x776   : > { %26082 = vmatmul.mubr.msk.f32.gmra.mrb[62].mxu1 %vm7365_vm3, %v16709_v46  ;;  %v16714_v46 = vld [vmem:[#allocation3 + $0x4e8] sm:$0xff] }
 0x777   : > { %26084 = vmatprep.mubr.msk.f32.mxu1 %vm7365_vm3, %v16710_v60  ;;  %v31995_v54 = vpop.f32.mrb[60].mxu0 }
 0x778   : > { %v31997_v37 = vpop.f32.mrb[61].mxu0 }
 0x77a   : > { %26085 = vmatmul.mubr.msk.f32.gmra.mrb[64].mxu1 %vm7365_vm3, %v16711_v40  ;;  %v16716_v40 = vld [vmem:[#allocation3 + $0x500] sm:$0xff] }
 0x77b   : > { %26087 = vmatprep.mubr.msk.f32.mxu1 %vm7365_vm3, %v16712_v55  ;;  %v32001_v47 = vpop.f32.mrb[62].mxu0 }
 0x77c   : > { %v32003_v43 = vpop.f32.mrb[63].mxu0 }
 0x77e   : > { %26088 = vmatmul.mubr.msk.f32.gmra.mrb[66].mxu1 %vm7365_vm3, %v16713_v8  ;;  %v16718_v8 = vld [vmem:[#allocation3 + $0x510] sm:$0xff] }
 0x77f   : > { %26090 = vmatprep.mubr.msk.f32.mxu1 %vm7365_vm3, %v16714_v46  ;;  %v32007_v60 = vpop.f32.mrb[64].mxu0 }
 0x780   : > { %v32009_v15 = vpop.f32.mrb[65].mxu0 }
 0x782   : > { %26091 = vmatmul.mubr.msk.f32.gmra.mrb[68].mxu1 %vm7365_vm3, %v16715_v18  ;;  %v16721_v18 = vld [vmem:[#allocation3 + $0x530] sm:$0xff] }
 0x783   : > { %26093 = vmatprep.mubr.msk.f32.mxu1 %vm7365_vm3, %v16716_v40  ;;  %v32013_v55 = vpop.f32.mrb[66].mxu0 }
 0x784   : > { %v32015_v4 = vpop.f32.mrb[67].mxu0 }
 0x786   : > { %26094 = vmatmul.mubr.msk.f32.gmra.mrb[70].mxu1 %vm7365_vm3, %v16717_v28  ;;  %v16723_v28 = vld [vmem:[#allocation3 + $0x540] sm:$0xff] }
 0x787   : > { %26096 = vmatprep.mubr.msk.f32.mxu1 %vm7365_vm3, %v16718_v8  ;;  %v32019_v46 = vpop.f32.mrb[68].mxu0 }
 0x788   : > { %v32021_v49 = vpop.f32.mrb[69].mxu0 }
 0x78a   : > { %26097 = vmatmul.mubr.msk.f32.gmra.mrb[72].mxu1 %vm7365_vm3, %v16719_v23  ;;  %v22451_v23 = vld [vmem:[%s32531_s3 + $0x210] sm:$0xff] }
 0x78b   : > { %26099 = vmatprep.mubr.msk.f32.mxu1 %vm7365_vm3, %v16720_v25  ;;  %v32025_v40 = vpop.f32.mrb[70].mxu0  ;;  %v22452_v25 = vld [vmem:[%s32531_s3 + $0x218] sm:$0xff] }
 0x78c   : > { %v32027_v51 = vpop.f32.mrb[71].mxu0 }
 0x78e   : > { %26100 = vmatmul.mubr.msk.f32.gmra.mrb[74].mxu1 %vm7365_vm3, %v16721_v18 }
 0x78f   : > { %26102 = vmatprep.mubr.msk.f32.mxu1 %vm7365_vm3, %v16722_v59  ;;  %v32031_v8 = vpop.f32.mrb[72].mxu0  ;;  %v26725_v59 = vpack.c.bf16 %v22452_v25, %v22451_v23  ;;  %v26729_v25 = vpack.c.bf16 %v22454_v17, %v22453_v33  ;;  %v17959_v33 = vld [vmem:[#allocation3 + $0xa9] sm:$0xff] }
 0x790   : > { %v32033_v13 = vpop.f32.mrb[73].mxu0 }
 0x792   : > { %26103 = vmatmul.mubr.msk.f32.gmra.mrb[76].mxu1 %vm7365_vm3, %v16723_v28  ;;  %v17952_v28 = vld [vmem:[#allocation3 + $0x61] sm:$0xff] }
 0x793   : > { %26121 = vmatprep.mubr.msk.f32.mxu1 %vm7365_vm3, %v17950_v36  ;;  %v32043_v18 = vpop.f32.mrb[74].mxu0 }
 0x794   : > { %v32045_v53 = vpop.f32.mrb[75].mxu0 }
 0x796   : > { %26122 = vmatmul.mubr.msk.f32.vlgmr.msra.gmra.mrb[78].mxu1 %vm7365_vm3, %v17951_v45 }
 0x797   : > { %26724 = vmatpush3.bf16.msra.mxu1 %v31846_v62  ;;  %26124 = vmatprep.mubr.msk.f32.mxu1 %vm7365_vm3, %v17952_v28  ;;  %v32056_v36 = vpop.f32.mrb[76].mxu0  ;;  %v17955_v62 = vld [vmem:[#allocation3 + $0x81] sm:$0xff]  ;;  %v17956_v28 = vld [vmem:[#allocation3 + $0x89] sm:$0xff] }
 0x798   : > { %26726 = vmatprep.subr.bf16.mxu1 %v26725_v59  ;;  %v32058_v23 = vpop.f32.mrb[77].mxu0 }
 0x79a   : > { %26125 = vmatmul.mubr.msk.f32.gmra.mrb[80].mxu1 %vm7365_vm3, %v17953_v50  ;;  %v17957_v50 = vld [vmem:[#allocation3 + $0x91] sm:$0xff] }
 0x79b   : > { %26127 = vmatprep.mubr.msk.f32.mxu1 %vm7365_vm3, %v17954_v1  ;;  %26728 = vmatpush3.bf16.msra.mxu1 %v26725_v59  ;;  %v32062_v61 = vpop.f32.mrb[78].mxu0  ;;  %v17958_v1 = vld [vmem:[#allocation3 + $0xa1] sm:$0xff]  ;;  %v17960_v59 = vld [vmem:[#allocation3 + $0xb1] sm:$0xff] }
 0x79c   : > { %v32064_v45 = vpop.f32.mrb[79].mxu0  ;;  %26730 = vmatprep.subr.bf16.mxu1 %v26729_v25 }
 0x79e   : > { %26128 = vmatmul.mubr.msk.f32.gmra.mrb[82].mxu1 %vm7365_vm3, %v17955_v62  ;;  %v17961_v62 = vld [vmem:[#allocation3 + $0xb9] sm:$0xff] }
 0x79f   : > { %26130 = vmatprep.mubr.msk.f32.mxu1 %vm7365_vm3, %v17956_v28  ;;  %v32068_v12 = vpop.f32.mrb[80].mxu0  ;;  %26732 = vmatpush3.bf16.msra.mxu1 %v26729_v25  ;;  %v17962_v28 = vld [vmem:[#allocation3 + $0xc9] sm:$0xff]  ;;  %v17963_v25 = vld [vmem:[#allocation3 + $0xd1] sm:$0xff] }
 0x7a0   : > { %v32070_v17 = vpop.f32.mrb[81].mxu0 }
 0x7a2   : > { %26131 = vmatmul.mubr.msk.f32.gmra.mrb[84].mxu1 %vm7365_vm3, %v17957_v50  ;;  %v17965_v50 = vld [vmem:[#allocation3 + $0xe1] sm:$0xff] }
 0x7a3   : > { %26133 = vmatprep.mubr.msk.f32.mxu1 %vm7365_vm3, %v17958_v1  ;;  %v17966_v1 = vld [vmem:[#allocation3 + $0xf1] sm:$0xff] }
 0x7a6   : > { %26134 = vmatmul.mubr.msk.f32.gmra.mrb[86].mxu1 %vm7365_vm3, %v17959_v33  ;;  %v17967_v33 = vld [vmem:[#allocation3 + $0xf9] sm:$0xff] }
 0x7a7   : > { %26136 = vmatprep.mubr.msk.f32.mxu1 %vm7365_vm3, %v17960_v59  ;;  %v17968_v59 = vld [vmem:[#allocation3 + $0x101] sm:$0xff] }
 0x7aa   : > { %26137 = vmatmul.mubr.msk.f32.gmra.mrb[88].mxu1 %vm7365_vm3, %v17961_v62  ;;  %v17969_v62 = vld [vmem:[#allocation3 + $0x109] sm:$0xff] }
 0x7ab   : > { %26139 = vmatprep.mubr.msk.f32.mxu1 %vm7365_vm3, %v17962_v28  ;;  %v17970_v28 = vld [vmem:[#allocation3 + $0x119] sm:$0xff] }
 0x7ae   : > { %26140 = vmatmul.mubr.msk.f32.gmra.mrb[90].mxu1 %vm7365_vm3, %v17963_v25  ;;  %v17971_v25 = vld [vmem:[#allocation3 + $0x121] sm:$0xff] }
 0x7af   : > { %26142 = vmatprep.mubr.msk.f32.mxu1 %vm7365_vm3, %v17964_v44  ;;  %v17972_v44 = vld [vmem:[#allocation3 + $0x129] sm:$0xff] }
 0x7b2   : > { %26143 = vmatmul.mubr.msk.f32.gmra.mrb[92].mxu1 %vm7365_vm3, %v17965_v50  ;;  %v17973_v50 = vld [vmem:[#allocation3 + $0x131] sm:$0xff] }
 0x7b3   : > { %26145 = vmatprep.mubr.msk.f32.mxu1 %vm7365_vm3, %v17966_v1  ;;  %v17974_v1 = vld [vmem:[#allocation3 + $0x141] sm:$0xff] }
 0x7b6   : > { %26146 = vmatmul.mubr.msk.f32.gmra.mrb[94].mxu1 %vm7365_vm3, %v17967_v33  ;;  %v17975_v33 = vld [vmem:[#allocation3 + $0x149] sm:$0xff] }
 0x7b7   : > { %26148 = vmatprep.mubr.msk.f32.mxu1 %vm7365_vm3, %v17968_v59  ;;  %v17976_v59 = vld [vmem:[#allocation3 + $0x151] sm:$0xff] }
 0x7ba   : > { %26149 = vmatmul.mubr.msk.f32.gmra.mrb[96].mxu1 %vm7365_vm3, %v17969_v62  ;;  %v17977_v62 = vld [vmem:[#allocation3 + $0x159] sm:$0xff] }
 0x7bb   : > { %26151 = vmatprep.mubr.msk.f32.mxu1 %vm7365_vm3, %v17970_v28  ;;  %v17978_v28 = vld [vmem:[#allocation3 + $0x169] sm:$0xff] }
 0x7be   : > { %26152 = vmatmul.mubr.msk.f32.gmra.mrb[98].mxu1 %vm7365_vm3, %v17971_v25  ;;  %v17979_v25 = vld [vmem:[#allocation3 + $0x171] sm:$0xff] }
 0x7bf   : > { %26154 = vmatprep.mubr.msk.f32.mxu1 %vm7365_vm3, %v17972_v44  ;;  %v17980_v44 = vld [vmem:[#allocation3 + $0x179] sm:$0xff] }
 0x7c2   : > { %26155 = vmatmul.mubr.msk.f32.gmra.mrb[100].mxu1 %vm7365_vm3, %v17973_v50  ;;  %v17981_v50 = vld [vmem:[#allocation3 + $0x181] sm:$0xff] }
 0x7c3   : > { %26157 = vmatprep.mubr.msk.f32.mxu1 %vm7365_vm3, %v17974_v1  ;;  %v17982_v1 = vld [vmem:[#allocation3 + $0x191] sm:$0xff] }
 0x7c6   : > { %26158 = vmatmul.mubr.msk.f32.gmra.mrb[102].mxu1 %vm7365_vm3, %v17975_v33  ;;  %v22455_v33 = vld [vmem:[%s32531_s3 + $0x230] sm:$0xff] }
 0x7c7   : > { %26160 = vmatprep.mubr.msk.f32.mxu1 %vm7365_vm3, %v17976_v59  ;;  %v22456_v59 = vld [vmem:[%s32531_s3 + $0x238] sm:$0xff] }
 0x7ca   : > { %26161 = vmatmul.mubr.msk.f32.gmra.mrb[104].mxu1 %vm7365_vm3, %v17977_v62  ;;  %v26733_v62 = vpack.c.bf16 %v22456_v59, %v22455_v33  ;;  %v17989_v33 = vld [vmem:[#allocation3 + $0x1d1] sm:$0xff]  ;;  %v17990_v59 = vld [vmem:[#allocation3 + $0x1e1] sm:$0xff] }
 0x7cb   : > { %26163 = vmatprep.mubr.msk.f32.mxu1 %vm7365_vm3, %v17978_v28  ;;  %v17983_v28 = vld [vmem:[#allocation3 + $0x199] sm:$0xff] }
 0x7cc   : > { %26734 = vmatprep.subr.bf16.mxu1 %v26733_v62 }
 0x7cd   : > { %26736 = vmatpush3.bf16.msra.mxu1 %v26733_v62  ;;  %v17992_v62 = vld [vmem:[#allocation3 + $0x1f1] sm:$0xff] }
 0x7ce   : > { %26164 = vmatmul.mubr.msk.f32.gmra.mrb[106].mxu1 %vm7365_vm3, %v17979_v25  ;;  %v17984_v25 = vld [vmem:[#allocation3 + $0x1a1] sm:$0xff] }
 0x7cf   : > { %26166 = vmatprep.mubr.msk.f32.mxu1 %vm7365_vm3, %v17980_v44  ;;  %v17985_v44 = vld [vmem:[#allocation3 + $0x1a9] sm:$0xff] }
 0x7d2   : > { %26167 = vmatmul.mubr.msk.f32.gmra.mrb[108].mxu1 %vm7365_vm3, %v17981_v50  ;;  %v17986_v50 = vld [vmem:[#allocation3 + $0x1b9] sm:$0xff] }
 0x7d3   : > { %26169 = vmatprep.mubr.msk.f32.mxu1 %vm7365_vm3, %v17982_v1  ;;  %v17987_v1 = vld [vmem:[#allocation3 + $0x1c1] sm:$0xff] }
 0x7d6   : > { %26170 = vmatmul.mubr.msk.f32.gmra.mrb[110].mxu1 %vm7365_vm3, %v17983_v28  ;;  %v17991_v28 = vld [vmem:[#allocation3 + $0x1e9] sm:$0xff] }
 0x7d7   : > { %26172 = vmatprep.mubr.msk.f32.mxu1 %vm7365_vm3, %v17984_v25  ;;  %v17993_v25 = vld [vmem:[#allocation3 + $0x1f9] sm:$0xff] }
 0x7da   : > { %26173 = vmatmul.mubr.msk.f32.gmra.mrb[112].mxu1 %vm7365_vm3, %v17985_v44  ;;  %v17994_v44 = vld [vmem:[#allocation3 + $0x209] sm:$0xff] }
 0x7db   : > { %26175 = vmatprep.mubr.msk.f32.mxu1 %vm7365_vm3, %v17986_v50  ;;  %v17995_v50 = vld [vmem:[#allocation3 + $0x211] sm:$0xff] }
 0x7de   : > { %26176 = vmatmul.mubr.msk.f32.gmra.mrb[114].mxu1 %vm7365_vm3, %v17987_v1  ;;  %v17997_v1 = vld [vmem:[#allocation3 + $0x221] sm:$0xff] }
 0x7df   : > { %26178 = vmatprep.mubr.msk.f32.mxu1 %vm7365_vm3, %v17988_v26  ;;  %v17996_v26 = vld [vmem:[#allocation3 + $0x219] sm:$0xff] }
 0x7e2   : > { %26179 = vmatmul.mubr.msk.f32.gmra.mrb[116].mxu1 %vm7365_vm3, %v17989_v33  ;;  %v17998_v33 = vld [vmem:[#allocation3 + $0x231] sm:$0xff] }
 0x7e3   : > { %26181 = vmatprep.mubr.msk.f32.mxu1 %vm7365_vm3, %v17990_v59  ;;  %v17999_v59 = vld [vmem:[#allocation3 + $0x239] sm:$0xff] }
 0x7e6   : > { %26182 = vmatmul.mubr.msk.f32.gmra.mrb[118].mxu1 %vm7365_vm3, %v17991_v28  ;;  %v18000_v28 = vld [vmem:[#allocation3 + $0x241] sm:$0xff] }
 0x7e7   : > { %26184 = vmatprep.mubr.msk.f32.mxu1 %vm7365_vm3, %v17992_v62  ;;  %v18001_v62 = vld [vmem:[#allocation3 + $0x249] sm:$0xff] }
 0x7ea   : > { %26185 = vmatmul.mubr.msk.f32.gmra.mrb[120].mxu1 %vm7365_vm3, %v17993_v25  ;;  %v18002_v25 = vld [vmem:[#allocation3 + $0x259] sm:$0xff] }
 0x7eb   : > { %26187 = vmatprep.mubr.msk.f32.mxu1 %vm7365_vm3, %v17994_v44  ;;  %v18003_v44 = vld [vmem:[#allocation3 + $0x261] sm:$0xff] }
 0x7ee   : > { %26188 = vmatmul.mubr.msk.f32.gmra.mrb[122].mxu1 %vm7365_vm3, %v17995_v50  ;;  %v18004_v50 = vld [vmem:[#allocation3 + $0x269] sm:$0xff] }
 0x7ef   : > { %26190 = vmatprep.mubr.msk.f32.mxu1 %vm7365_vm3, %v17996_v26  ;;  %v18005_v26 = vld [vmem:[#allocation3 + $0x271] sm:$0xff] }
 0x7f2   : > { %26191 = vmatmul.mubr.msk.f32.gmra.mrb[124].mxu1 %vm7365_vm3, %v17997_v1  ;;  %v18006_v1 = vld [vmem:[#allocation3 + $0x281] sm:$0xff] }
 0x7f3   : > { %26193 = vmatprep.mubr.msk.f32.mxu1 %vm7365_vm3, %v17998_v33  ;;  %v18007_v33 = vld [vmem:[#allocation3 + $0x289] sm:$0xff] }
 0x7f6   : > { %26194 = vmatmul.mubr.msk.f32.gmra.mrb[126].mxu1 %vm7365_vm3, %v17999_v59  ;;  %v18008_v59 = vld [vmem:[#allocation3 + $0x291] sm:$0xff] }
 0x7f7   : > { %26196 = vmatprep.mubr.msk.f32.mxu1 %vm7365_vm3, %v18000_v28  ;;  %v18009_v28 = vld [vmem:[#allocation3 + $0x299] sm:$0xff] }
 0x7fa   : > { %26197 = vmatmul.mubr.msk.f32.gmra.mrb[0].mxu1 %vm7365_vm3, %v18001_v62  ;;  %v18010_v62 = vld [vmem:[#allocation3 + $0x2a9] sm:$0xff] }
 0x7fb   : > { %26199 = vmatprep.mubr.msk.f32.mxu1 %vm7365_vm3, %v18002_v25  ;;  %v18011_v25 = vld [vmem:[#allocation3 + $0x2b1] sm:$0xff] }
 0x7fe   : > { %26200 = vmatmul.mubr.msk.f32.gmra.mrb[2].mxu1 %vm7365_vm3, %v18003_v44  ;;  %v18012_v44 = vld [vmem:[#allocation3 + $0x2b9] sm:$0xff] }
 0x7ff   : > { %26202 = vmatprep.mubr.msk.f32.mxu1 %vm7365_vm3, %v18004_v50  ;;  %v18013_v50 = vld [vmem:[#allocation3 + $0x2c1] sm:$0xff] }
 0x802   : > { %26203 = vmatmul.mubr.msk.f32.gmra.mrb[4].mxu1 %vm7365_vm3, %v18005_v26  ;;  %v18014_v26 = vld [vmem:[#allocation3 + $0x2d1] sm:$0xff] }
 0x803   : > { %26205 = vmatprep.mubr.msk.f32.mxu1 %vm7365_vm3, %v18006_v1  ;;  %v18015_v1 = vld [vmem:[#allocation3 + $0x2d9] sm:$0xff] }
 0x806   : > { %26206 = vmatmul.mubr.msk.f32.gmra.mrb[6].mxu1 %vm7365_vm3, %v18007_v33  ;;  %v18016_v33 = vld [vmem:[#allocation3 + $0x2e1] sm:$0xff] }
 0x807   : > { %26208 = vmatprep.mubr.msk.f32.mxu1 %vm7365_vm3, %v18008_v59  ;;  %v18017_v59 = vld [vmem:[#allocation3 + $0x2e9] sm:$0xff] }
 0x80a   : > { %26209 = vmatmul.mubr.msk.f32.gmra.mrb[8].mxu1 %vm7365_vm3, %v18009_v28  ;;  %v18018_v28 = vld [vmem:[#allocation3 + $0x2f9] sm:$0xff] }
 0x80b   : > { %26211 = vmatprep.mubr.msk.f32.mxu1 %vm7365_vm3, %v18010_v62  ;;  %v18019_v62 = vld [vmem:[#allocation3 + $0x301] sm:$0xff] }
 0x80e   : > { %26212 = vmatmul.mubr.msk.f32.gmra.mrb[10].mxu1 %vm7365_vm3, %v18011_v25  ;;  %v18020_v25 = vld [vmem:[#allocation3 + $0x309] sm:$0xff] }
 0x80f   : > { %26214 = vmatprep.mubr.msk.f32.mxu1 %vm7365_vm3, %v18012_v44  ;;  %v18021_v44 = vld [vmem:[#allocation3 + $0x311] sm:$0xff] }
 0x812   : > { %26215 = vmatmul.mubr.msk.f32.gmra.mrb[12].mxu1 %vm7365_vm3, %v18013_v50  ;;  %v18022_v50 = vld [vmem:[#allocation3 + $0x321] sm:$0xff] }
 0x813   : > { %26217 = vmatprep.mubr.msk.f32.mxu1 %vm7365_vm3, %v18014_v26  ;;  %v18023_v26 = vld [vmem:[#allocation3 + $0x329] sm:$0xff] }
 0x816   : > { %26218 = vmatmul.mubr.msk.f32.gmra.mrb[14].mxu1 %vm7365_vm3, %v18015_v1  ;;  %v18024_v1 = vld [vmem:[#allocation3 + $0x331] sm:$0xff] }
 0x817   : > { %26220 = vmatprep.mubr.msk.f32.mxu1 %vm7365_vm3, %v18016_v33  ;;  %v18025_v33 = vld [vmem:[#allocation3 + $0x339] sm:$0xff] }
 0x81a   : > { %26221 = vmatmul.mubr.msk.f32.gmra.mrb[16].mxu1 %vm7365_vm3, %v18017_v59  ;;  %v18026_v59 = vld [vmem:[#allocation3 + $0x349] sm:$0xff] }
 0x81b   : > { %26223 = vmatprep.mubr.msk.f32.mxu1 %vm7365_vm3, %v18018_v28  ;;  %v18027_v28 = vld [vmem:[#allocation3 + $0x351] sm:$0xff] }
 0x81e   : > { %26224 = vmatmul.mubr.msk.f32.gmra.mrb[18].mxu1 %vm7365_vm3, %v18019_v62  ;;  %v18028_v62 = vld [vmem:[#allocation3 + $0x359] sm:$0xff] }
 0x81f   : > { %26226 = vmatprep.mubr.msk.f32.mxu1 %vm7365_vm3, %v18020_v25  ;;  %v18029_v25 = vld [vmem:[#allocation3 + $0x361] sm:$0xff] }
 0x822   : > { %26227 = vmatmul.mubr.msk.f32.gmra.mrb[20].mxu1 %vm7365_vm3, %v18021_v44  ;;  %v18030_v44 = vld [vmem:[#allocation3 + $0x371] sm:$0xff] }
 0x823   : > { %26229 = vmatprep.mubr.msk.f32.mxu1 %vm7365_vm3, %v18022_v50  ;;  %v18031_v50 = vld [vmem:[#allocation3 + $0x379] sm:$0xff] }
 0x826   : > { %26230 = vmatmul.mubr.msk.f32.gmra.mrb[22].mxu1 %vm7365_vm3, %v18023_v26  ;;  %v18032_v26 = vld [vmem:[#allocation3 + $0x381] sm:$0xff] }
 0x827   : > { %26232 = vmatprep.mubr.msk.f32.mxu1 %vm7365_vm3, %v18024_v1  ;;  %v18033_v1 = vld [vmem:[#allocation3 + $0x389] sm:$0xff] }
 0x82a   : > { %26233 = vmatmul.mubr.msk.f32.gmra.mrb[24].mxu1 %vm7365_vm3, %v18025_v33  ;;  %v18034_v33 = vld [vmem:[#allocation3 + $0x399] sm:$0xff] }
 0x82b   : > { %26235 = vmatprep.mubr.msk.f32.mxu1 %vm7365_vm3, %v18026_v59  ;;  %v18035_v59 = vld [vmem:[#allocation3 + $0x3a1] sm:$0xff] }
 0x82e   : > { %26236 = vmatmul.mubr.msk.f32.gmra.mrb[26].mxu1 %vm7365_vm3, %v18027_v28  ;;  %v18036_v28 = vld [vmem:[#allocation3 + $0x3a9] sm:$0xff] }
 0x82f   : > { %26238 = vmatprep.mubr.msk.f32.mxu1 %vm7365_vm3, %v18028_v62  ;;  %v18037_v62 = vld [vmem:[#allocation3 + $0x3b1] sm:$0xff] }
 0x832   : > { %26239 = vmatmul.mubr.msk.f32.gmra.mrb[28].mxu1 %vm7365_vm3, %v18029_v25  ;;  %v18038_v25 = vld [vmem:[#allocation3 + $0x3c1] sm:$0xff] }
 0x833   : > { %26241 = vmatprep.mubr.msk.f32.mxu1 %vm7365_vm3, %v18030_v44  ;;  %v18039_v44 = vld [vmem:[#allocation3 + $0x3c9] sm:$0xff] }
 0x836   : > { %26242 = vmatmul.mubr.msk.f32.gmra.mrb[30].mxu1 %vm7365_vm3, %v18031_v50  ;;  %v18040_v50 = vld [vmem:[#allocation3 + $0x3d1] sm:$0xff] }
 0x837   : > { %26244 = vmatprep.mubr.msk.f32.mxu1 %vm7365_vm3, %v18032_v26  ;;  %v18041_v26 = vld [vmem:[#allocation3 + $0x3d9] sm:$0xff] }
 0x83a   : > { %26245 = vmatmul.mubr.msk.f32.gmra.mrb[32].mxu1 %vm7365_vm3, %v18033_v1  ;;  %v18042_v1 = vld [vmem:[#allocation3 + $0x3e9] sm:$0xff] }
 0x83b   : > { %26247 = vmatprep.mubr.msk.f32.mxu1 %vm7365_vm3, %v18034_v33  ;;  %v18043_v33 = vld [vmem:[#allocation3 + $0x3f1] sm:$0xff] }
 0x83e   : > { %26248 = vmatmul.mubr.msk.f32.gmra.mrb[34].mxu1 %vm7365_vm3, %v18035_v59  ;;  %v18044_v59 = vld [vmem:[#allocation3 + $0x3f9] sm:$0xff] }
 0x83f   : > { %26250 = vmatprep.mubr.msk.f32.mxu1 %vm7365_vm3, %v18036_v28  ;;  %v18045_v28 = vld [vmem:[#allocation3 + $0x401] sm:$0xff] }
 0x842   : > { %26251 = vmatmul.mubr.msk.f32.gmra.mrb[36].mxu1 %vm7365_vm3, %v18037_v62  ;;  %v18046_v62 = vld [vmem:[#allocation3 + $0x411] sm:$0xff] }
 0x843   : > { %26253 = vmatprep.mubr.msk.f32.mxu1 %vm7365_vm3, %v18038_v25  ;;  %v18047_v25 = vld [vmem:[#allocation3 + $0x419] sm:$0xff] }
 0x846   : > { %26254 = vmatmul.mubr.msk.f32.gmra.mrb[38].mxu1 %vm7365_vm3, %v18039_v44  ;;  %v18048_v44 = vld [vmem:[#allocation3 + $0x421] sm:$0xff] }
 0x847   : > { %26256 = vmatprep.mubr.msk.f32.mxu1 %vm7365_vm3, %v18040_v50  ;;  %v18049_v50 = vld [vmem:[#allocation3 + $0x429] sm:$0xff] }
 0x84a   : > { %26257 = vmatmul.mubr.msk.f32.gmra.mrb[40].mxu1 %vm7365_vm3, %v18041_v26  ;;  %v18050_v26 = vld [vmem:[#allocation3 + $0x439] sm:$0xff] }
 0x84b   : > { %26259 = vmatprep.mubr.msk.f32.mxu1 %vm7365_vm3, %v18042_v1  ;;  %v18051_v1 = vld [vmem:[#allocation3 + $0x441] sm:$0xff] }
 0x84e   : > { %26260 = vmatmul.mubr.msk.f32.gmra.mrb[42].mxu1 %vm7365_vm3, %v18043_v33  ;;  %v18052_v33 = vld [vmem:[#allocation3 + $0x449] sm:$0xff] }
 0x84f   : > { %26262 = vmatprep.mubr.msk.f32.mxu1 %vm7365_vm3, %v18044_v59  ;;  %v18053_v59 = vld [vmem:[#allocation3 + $0x451] sm:$0xff] }
 0x852   : > { %26263 = vmatmul.mubr.msk.f32.gmra.mrb[44].mxu1 %vm7365_vm3, %v18045_v28  ;;  %v18054_v28 = vld [vmem:[#allocation3 + $0x461] sm:$0xff] }
 0x853   : > { %26265 = vmatprep.mubr.msk.f32.mxu1 %vm7365_vm3, %v18046_v62  ;;  %v18055_v62 = vld [vmem:[#allocation3 + $0x469] sm:$0xff] }
 0x856   : > { %26266 = vmatmul.mubr.msk.f32.gmra.mrb[46].mxu1 %vm7365_vm3, %v18047_v25  ;;  %v18056_v25 = vld [vmem:[#allocation3 + $0x471] sm:$0xff] }
 0x857   : > { %26268 = vmatprep.mubr.msk.f32.mxu1 %vm7365_vm3, %v18048_v44  ;;  %v18057_v44 = vld [vmem:[#allocation3 + $0x479] sm:$0xff] }
 0x85a   : > { %26269 = vmatmul.mubr.msk.f32.gmra.mrb[48].mxu1 %vm7365_vm3, %v18049_v50  ;;  %v18058_v50 = vld [vmem:[#allocation3 + $0x489] sm:$0xff] }
 0x85b   : > { %26271 = vmatprep.mubr.msk.f32.mxu1 %vm7365_vm3, %v18050_v26  ;;  %v18059_v26 = vld [vmem:[#allocation3 + $0x491] sm:$0xff] }
 0x85e   : > { %26272 = vmatmul.mubr.msk.f32.gmra.mrb[50].mxu1 %vm7365_vm3, %v18051_v1  ;;  %v18060_v1 = vld [vmem:[#allocation3 + $0x499] sm:$0xff] }
 0x85f   : > { %26274 = vmatprep.mubr.msk.f32.mxu1 %vm7365_vm3, %v18052_v33  ;;  %v18061_v33 = vld [vmem:[#allocation3 + $0x4a1] sm:$0xff] }
 0x862   : > { %26275 = vmatmul.mubr.msk.f32.gmra.mrb[52].mxu1 %vm7365_vm3, %v18053_v59  ;;  %v18062_v59 = vld [vmem:[#allocation3 + $0x4b1] sm:$0xff] }
 0x863   : > { %26277 = vmatprep.mubr.msk.f32.mxu1 %vm7365_vm3, %v18054_v28  ;;  %v18063_v28 = vld [vmem:[#allocation3 + $0x4b9] sm:$0xff] }
 0x866   : > { %26278 = vmatmul.mubr.msk.f32.gmra.mrb[54].mxu1 %vm7365_vm3, %v18055_v62  ;;  %v18064_v62 = vld [vmem:[#allocation3 + $0x4c1] sm:$0xff] }
 0x867   : > { %26280 = vmatprep.mubr.msk.f32.mxu1 %vm7365_vm3, %v18056_v25  ;;  %v18065_v25 = vld [vmem:[#allocation3 + $0x4c9] sm:$0xff] }
 0x86a   : > { %26281 = vmatmul.mubr.msk.f32.gmra.mrb[56].mxu1 %vm7365_vm3, %v18057_v44  ;;  %v18066_v44 = vld [vmem:[#allocation3 + $0x4d9] sm:$0xff] }
 0x86b   : > { %26283 = vmatprep.mubr.msk.f32.mxu1 %vm7365_vm3, %v18058_v50  ;;  %v18067_v50 = vld [vmem:[#allocation3 + $0x4e1] sm:$0xff] }
 0x86e   : > { %26284 = vmatmul.mubr.msk.f32.gmra.mrb[58].mxu1 %vm7365_vm3, %v18059_v26  ;;  %v18068_v26 = vld [vmem:[#allocation3 + $0x4e9] sm:$0xff] }
 0x86f   : > { %26286 = vmatprep.mubr.msk.f32.mxu1 %vm7365_vm3, %v18060_v1  ;;  %v18069_v1 = vld [vmem:[#allocation3 + $0x4f1] sm:$0xff] }
 0x872   : > { %26287 = vmatmul.mubr.msk.f32.gmra.mrb[60].mxu1 %vm7365_vm3, %v18061_v33  ;;  %v18070_v33 = vld [vmem:[#allocation3 + $0x501] sm:$0xff] }
 0x873   : > { %26289 = vmatprep.mubr.msk.f32.mxu1 %vm7365_vm3, %v18062_v59  ;;  %v18071_v59 = vld [vmem:[#allocation3 + $0x509] sm:$0xff] }
 0x876   : > { %26290 = vmatmul.mubr.msk.f32.gmra.mrb[62].mxu1 %vm7365_vm3, %v18063_v28  ;;  %v18072_v28 = vld [vmem:[#allocation3 + $0x511] sm:$0xff] }
 0x877   : > { %26292 = vmatprep.mubr.msk.f32.mxu1 %vm7365_vm3, %v18064_v62  ;;  %v18074_v62 = vld [vmem:[#allocation3 + $0x529] sm:$0xff] }
 0x87a   : > { %26293 = vmatmul.mubr.msk.f32.gmra.mrb[64].mxu1 %vm7365_vm3, %v18065_v25  ;;  %v18073_v25 = vld [vmem:[#allocation3 + $0x519] sm:$0xff] }
 0x87b   : > { %26295 = vmatprep.mubr.msk.f32.mxu1 %vm7365_vm3, %v18066_v44  ;;  %v18075_v44 = vld [vmem:[#allocation3 + $0x531] sm:$0xff] }
 0x87e   : > { %26296 = vmatmul.mubr.msk.f32.gmra.mrb[66].mxu1 %vm7365_vm3, %v18067_v50  ;;  %v18076_v50 = vld [vmem:[#allocation3 + $0x539] sm:$0xff] }
 0x87f   : > { %26298 = vmatprep.mubr.msk.f32.mxu1 %vm7365_vm3, %v18068_v26  ;;  %v18077_v26 = vld [vmem:[#allocation3 + $0x541] sm:$0xff] }
 0x882   : > { %26299 = vmatmul.mubr.msk.f32.gmra.mrb[68].mxu1 %vm7365_vm3, %v18069_v1  ;;  %v19304_v1 = vld [vmem:[#allocation3 + $0x52] sm:$0xff] }
 0x883   : > { %26301 = vmatprep.mubr.msk.f32.mxu1 %vm7365_vm3, %v18070_v33  ;;  %v19305_v33 = vld [vmem:[#allocation3 + $0x5a] sm:$0xff] }
 0x886   : > { %26302 = vmatmul.mubr.msk.f32.gmra.mrb[70].mxu1 %vm7365_vm3, %v18071_v59  ;;  %v19306_v59 = vld [vmem:[#allocation3 + $0x62] sm:$0xff] }
 0x887   : > { %26304 = vmatprep.mubr.msk.f32.mxu1 %vm7365_vm3, %v18072_v28  ;;  %v19307_v28 = vld [vmem:[#allocation3 + $0x6a] sm:$0xff] }
 0x88a   : > { %26305 = vmatmul.mubr.msk.f32.gmra.mrb[72].mxu1 %vm7365_vm3, %v18073_v25  ;;  %v19309_v25 = vld [vmem:[#allocation3 + $0x82] sm:$0xff] }
 0x88b   : > { %26307 = vmatprep.mubr.msk.f32.mxu1 %vm7365_vm3, %v18074_v62  ;;  %v19308_v62 = vld [vmem:[#allocation3 + $0x7a] sm:$0xff] }
 0x88e   : > { %26308 = vmatmul.mubr.msk.f32.gmra.mrb[74].mxu1 %vm7365_vm3, %v18075_v44  ;;  %v19310_v44 = vld [vmem:[#allocation3 + $0x8a] sm:$0xff] }
 0x88f   : > { %26310 = vmatprep.mubr.msk.f32.mxu1 %vm7365_vm3, %v18076_v50  ;;  %v19311_v50 = vld [vmem:[#allocation3 + $0x92] sm:$0xff] }
 0x892   : > { %26311 = vmatmul.mubr.msk.f32.gmra.mrb[76].mxu1 %vm7365_vm3, %v18077_v26  ;;  %v19312_v26 = vld [vmem:[#allocation3 + $0xa2] sm:$0xff] }
 0x893   : > { %26329 = vmatprep.mubr.msk.f32.mxu1 %vm7365_vm3, %v19304_v1  ;;  %v19313_v1 = vld [vmem:[#allocation3 + $0xaa] sm:$0xff] }
 0x896   : > { %26330 = vmatmul.mubr.msk.f32.vlgmr.msra.gmra.mrb[78].mxu1 %vm7365_vm3, %v19305_v33  ;;  %v19314_v33 = vld [vmem:[#allocation3 + $0xb2] sm:$0xff] }
 0x897   : > { %26332 = vmatprep.mubr.msk.f32.mxu1 %vm7365_vm3, %v19306_v59  ;;  %v19315_v59 = vld [vmem:[#allocation3 + $0xba] sm:$0xff] }
 0x89a   : > { %26333 = vmatmul.mubr.msk.f32.gmra.mrb[80].mxu1 %vm7365_vm3, %v19307_v28  ;;  %v19316_v28 = vld [vmem:[#allocation3 + $0xca] sm:$0xff] }
 0x89b   : > { %26335 = vmatprep.mubr.msk.f32.mxu1 %vm7365_vm3, %v19308_v62  ;;  %v19317_v62 = vld [vmem:[#allocation3 + $0xd2] sm:$0xff] }
 0x89e   : > { %26336 = vmatmul.mubr.msk.f32.gmra.mrb[82].mxu1 %vm7365_vm3, %v19309_v25  ;;  %v19318_v25 = vld [vmem:[#allocation3 + $0xda] sm:$0xff] }
 0x89f   : > { %26338 = vmatprep.mubr.msk.f32.mxu1 %vm7365_vm3, %v19310_v44  ;;  %v19319_v44 = vld [vmem:[#allocation3 + $0xe2] sm:$0xff] }
 0x8a2   : > { %26339 = vmatmul.mubr.msk.f32.gmra.mrb[84].mxu1 %vm7365_vm3, %v19311_v50  ;;  %v19320_v50 = vld [vmem:[#allocation3 + $0xf2] sm:$0xff] }
 0x8a3   : > { %26341 = vmatprep.mubr.msk.f32.mxu1 %vm7365_vm3, %v19312_v26  ;;  %v19321_v26 = vld [vmem:[#allocation3 + $0xfa] sm:$0xff] }
 0x8a6   : > { %26342 = vmatmul.mubr.msk.f32.gmra.mrb[86].mxu1 %vm7365_vm3, %v19313_v1  ;;  %v19322_v1 = vld [vmem:[#allocation3 + $0x102] sm:$0xff] }
 0x8a7   : > { %26344 = vmatprep.mubr.msk.f32.mxu1 %vm7365_vm3, %v19314_v33  ;;  %v19323_v33 = vld [vmem:[#allocation3 + $0x10a] sm:$0xff] }
 0x8aa   : > { %26345 = vmatmul.mubr.msk.f32.gmra.mrb[88].mxu1 %vm7365_vm3, %v19315_v59  ;;  %v19324_v59 = vld [vmem:[#allocation3 + $0x11a] sm:$0xff] }
 0x8ab   : > { %26347 = vmatprep.mubr.msk.f32.mxu1 %vm7365_vm3, %v19316_v28  ;;  %v19325_v28 = vld [vmem:[#allocation3 + $0x122] sm:$0xff] }
 0x8ae   : > { %26348 = vmatmul.mubr.msk.f32.gmra.mrb[90].mxu1 %vm7365_vm3, %v19317_v62  ;;  %v19326_v62 = vld [vmem:[#allocation3 + $0x12a] sm:$0xff] }
 0x8af   : > { %26350 = vmatprep.mubr.msk.f32.mxu1 %vm7365_vm3, %v19318_v25  ;;  %v19327_v25 = vld [vmem:[#allocation3 + $0x132] sm:$0xff] }
 0x8b2   : > { %26351 = vmatmul.mubr.msk.f32.gmra.mrb[92].mxu1 %vm7365_vm3, %v19319_v44  ;;  %v19328_v44 = vld [vmem:[#allocation3 + $0x142] sm:$0xff] }
 0x8b3   : > { %26353 = vmatprep.mubr.msk.f32.mxu1 %vm7365_vm3, %v19320_v50  ;;  %v19329_v50 = vld [vmem:[#allocation3 + $0x14a] sm:$0xff] }
 0x8b6   : > { %26354 = vmatmul.mubr.msk.f32.gmra.mrb[94].mxu1 %vm7365_vm3, %v19321_v26  ;;  %v19330_v26 = vld [vmem:[#allocation3 + $0x152] sm:$0xff] }
 0x8b7   : > { %26356 = vmatprep.mubr.msk.f32.mxu1 %vm7365_vm3, %v19322_v1  ;;  %v19331_v1 = vld [vmem:[#allocation3 + $0x15a] sm:$0xff] }
 0x8ba   : > { %26357 = vmatmul.mubr.msk.f32.gmra.mrb[96].mxu1 %vm7365_vm3, %v19323_v33  ;;  %v19332_v33 = vld [vmem:[#allocation3 + $0x16a] sm:$0xff] }
 0x8bb   : > { %26359 = vmatprep.mubr.msk.f32.mxu1 %vm7365_vm3, %v19324_v59  ;;  %v28192_v59 = vmov 0  }
 0x8bc   : > { %28037 = vset.pattern.permute.xlu0 %v28192_v59  ;;  %v19340_v59 = vld [vmem:[#allocation3 + $0x1ba] sm:$0xff] }
 0x8be   : > { %26360 = vmatmul.mubr.msk.f32.gmra.mrb[98].mxu1 %vm7365_vm3, %v19325_v28  ;;  %v19333_v28 = vld [vmem:[#allocation3 + $0x172] sm:$0xff] }
 0x8bf   : > { %26362 = vmatprep.mubr.msk.f32.mxu1 %vm7365_vm3, %v19326_v62  ;;  %v19334_v62 = vld [vmem:[#allocation3 + $0x17a] sm:$0xff] }
 0x8c2   : > { %26363 = vmatmul.mubr.msk.f32.gmra.mrb[100].mxu1 %vm7365_vm3, %v19327_v25  ;;  %v20914_v25 = vld [vmem:[%s32532_s4] sm:$0x1f] }
 0x8c3   : > { %26365 = vmatprep.mubr.msk.f32.mxu1 %vm7365_vm3, %v19328_v44  ;;  %20917 = vperm.xlu0 %28037, %v20914_v25   ;;  %v19335_v44 = vld [vmem:[#allocation3 + $0x182] sm:$0xff]  ;;  %v19343_v25 = vld [vmem:[#allocation3 + $0x1d2] sm:$0xff] }
 0x8c6   : > { %26366 = vmatmul.mubr.msk.f32.gmra.mrb[102].mxu1 %vm7365_vm3, %v19329_v50  ;;  %v19336_v50 = vld [vmem:[#allocation3 + $0x192] sm:$0xff] }
 0x8c7   : > { %26368 = vmatprep.mubr.msk.f32.mxu1 %vm7365_vm3, %v19330_v26  ;;  %v19337_v26 = vld [vmem:[#allocation3 + $0x19a] sm:$0xff] }
 0x8ca   : > { %26369 = vmatmul.mubr.msk.f32.gmra.mrb[104].mxu1 %vm7365_vm3, %v19331_v1  ;;  %v19338_v1 = vld [vmem:[#allocation3 + $0x1a2] sm:$0xff] }
 0x8cb   : > { %26371 = vmatprep.mubr.msk.f32.mxu1 %vm7365_vm3, %v19332_v33  ;;  %v19339_v33 = vld [vmem:[#allocation3 + $0x1aa] sm:$0xff] }
 0x8ce   : > { %26372 = vmatmul.mubr.msk.f32.gmra.mrb[106].mxu1 %vm7365_vm3, %v19333_v28  ;;  %v19341_v28 = vld [vmem:[#allocation3 + $0x1c2] sm:$0xff] }
 0x8cf   : > { %26374 = vmatprep.mubr.msk.f32.mxu1 %vm7365_vm3, %v19334_v62  ;;  %v19342_v62 = vld [vmem:[#allocation3 + $0x1ca] sm:$0xff] }
 0x8d2   : > { %26375 = vmatmul.mubr.msk.f32.gmra.mrb[108].mxu1 %vm7365_vm3, %v19335_v44  ;;  %v19344_v44 = vld [vmem:[#allocation3 + $0x1e2] sm:$0xff] }
 0x8d3   : > { %26377 = vmatprep.mubr.msk.f32.mxu1 %vm7365_vm3, %v19336_v50  ;;  %v19345_v50 = vld [vmem:[#allocation3 + $0x1ea] sm:$0xff] }
 0x8d6   : > { %26378 = vmatmul.mubr.msk.f32.gmra.mrb[110].mxu1 %vm7365_vm3, %v19337_v26  ;;  %v19346_v26 = vld [vmem:[#allocation3 + $0x1f2] sm:$0xff] }
 0x8d7   : > { %26380 = vmatprep.mubr.msk.f32.mxu1 %vm7365_vm3, %v19338_v1  ;;  %v19347_v1 = vld [vmem:[#allocation3 + $0x1fa] sm:$0xff] }
 0x8da   : > { %26381 = vmatmul.mubr.msk.f32.gmra.mrb[112].mxu1 %vm7365_vm3, %v19339_v33  ;;  %v19348_v33 = vld [vmem:[#allocation3 + $0x20a] sm:$0xff] }
 0x8db   : > { %26383 = vmatprep.mubr.msk.f32.mxu1 %vm7365_vm3, %v19340_v59  ;;  %v19349_v59 = vld [vmem:[#allocation3 + $0x212] sm:$0xff] }
 0x8de   : > { %26384 = vmatmul.mubr.msk.f32.gmra.mrb[114].mxu1 %vm7365_vm3, %v19341_v28  ;;  %v19350_v28 = vld [vmem:[#allocation3 + $0x21a] sm:$0xff] }
 0x8df   : > { %26386 = vmatprep.mubr.msk.f32.mxu1 %vm7365_vm3, %v19342_v62  ;;  %v19351_v62 = vld [vmem:[#allocation3 + $0x222] sm:$0xff] }
 0x8e2   : > { %26387 = vmatmul.mubr.msk.f32.gmra.mrb[116].mxu1 %vm7365_vm3, %v19343_v25  ;;  %v19352_v25 = vld [vmem:[#allocation3 + $0x232] sm:$0xff] }
 0x8e3   : > { %26389 = vmatprep.mubr.msk.f32.mxu1 %vm7365_vm3, %v19344_v44  ;;  %v19353_v44 = vld [vmem:[#allocation3 + $0x23a] sm:$0xff] }
 0x8e6   : > { %26390 = vmatmul.mubr.msk.f32.gmra.mrb[118].mxu1 %vm7365_vm3, %v19345_v50  ;;  %v19354_v50 = vld [vmem:[#allocation3 + $0x242] sm:$0xff] }
 0x8e7   : > { %26392 = vmatprep.mubr.msk.f32.mxu1 %vm7365_vm3, %v19346_v26  ;;  %v19355_v26 = vld [vmem:[#allocation3 + $0x24a] sm:$0xff] }
 0x8ea   : > { %26393 = vmatmul.mubr.msk.f32.gmra.mrb[120].mxu1 %vm7365_vm3, %v19347_v1  ;;  %v19356_v1 = vld [vmem:[#allocation3 + $0x25a] sm:$0xff] }
 0x8eb   : > { %26395 = vmatprep.mubr.msk.f32.mxu1 %vm7365_vm3, %v19348_v33  ;;  %v19357_v33 = vld [vmem:[#allocation3 + $0x262] sm:$0xff] }
 0x8ee   : > { %26396 = vmatmul.mubr.msk.f32.gmra.mrb[122].mxu1 %vm7365_vm3, %v19349_v59  ;;  %v19358_v59 = vld [vmem:[#allocation3 + $0x26a] sm:$0xff] }
 0x8ef   : > { %26398 = vmatprep.mubr.msk.f32.mxu1 %vm7365_vm3, %v19350_v28  ;;  %v19359_v28 = vld [vmem:[#allocation3 + $0x272] sm:$0xff] }
 0x8f2   : > { %26399 = vmatmul.mubr.msk.f32.gmra.mrb[124].mxu1 %vm7365_vm3, %v19351_v62  ;;  %v19360_v62 = vld [vmem:[#allocation3 + $0x282] sm:$0xff] }
 0x8f3   : > { %26401 = vmatprep.mubr.msk.f32.mxu1 %vm7365_vm3, %v19352_v25  ;;  %v19361_v25 = vld [vmem:[#allocation3 + $0x28a] sm:$0xff] }
 0x8f6   : > { %26402 = vmatmul.mubr.msk.f32.gmra.mrb[126].mxu1 %vm7365_vm3, %v19353_v44  ;;  %v19362_v44 = vld [vmem:[#allocation3 + $0x292] sm:$0xff] }
 0x8f7   : > { %26404 = vmatprep.mubr.msk.f32.mxu1 %vm7365_vm3, %v19354_v50  ;;  %v19363_v50 = vld [vmem:[#allocation3 + $0x29a] sm:$0xff] }
 0x8fa   : > { %26405 = vmatmul.mubr.msk.f32.gmra.mrb[0].mxu1 %vm7365_vm3, %v19355_v26  ;;  %v19364_v26 = vld [vmem:[#allocation3 + $0x2aa] sm:$0xff] }
 0x8fb   : > { %26407 = vmatprep.mubr.msk.f32.mxu1 %vm7365_vm3, %v19356_v1  ;;  %v19365_v1 = vld [vmem:[#allocation3 + $0x2b2] sm:$0xff] }
 0x8fe   : > { %26408 = vmatmul.mubr.msk.f32.gmra.mrb[2].mxu1 %vm7365_vm3, %v19357_v33  ;;  %v19366_v33 = vld [vmem:[#allocation3 + $0x2ba] sm:$0xff] }
 0x8ff   : > { %26410 = vmatprep.mubr.msk.f32.mxu1 %vm7365_vm3, %v19358_v59  ;;  %v19367_v59 = vld [vmem:[#allocation3 + $0x2c2] sm:$0xff] }
 0x902   : > { %26411 = vmatmul.mubr.msk.f32.gmra.mrb[4].mxu1 %vm7365_vm3, %v19359_v28  ;;  %v19368_v28 = vld [vmem:[#allocation3 + $0x2d2] sm:$0xff] }
 0x903   : > { %26413 = vmatprep.mubr.msk.f32.mxu1 %vm7365_vm3, %v19360_v62  ;;  %v19369_v62 = vld [vmem:[#allocation3 + $0x2da] sm:$0xff] }
 0x906   : > { %26414 = vmatmul.mubr.msk.f32.gmra.mrb[6].mxu1 %vm7365_vm3, %v19361_v25  ;;  %v19370_v25 = vld [vmem:[#allocation3 + $0x2e2] sm:$0xff] }
 0x907   : > { %26416 = vmatprep.mubr.msk.f32.mxu1 %vm7365_vm3, %v19362_v44  ;;  %v19371_v44 = vld [vmem:[#allocation3 + $0x2ea] sm:$0xff] }
 0x90a   : > { %26417 = vmatmul.mubr.msk.f32.gmra.mrb[8].mxu1 %vm7365_vm3, %v19363_v50  ;;  %v19372_v50 = vld [vmem:[#allocation3 + $0x2fa] sm:$0xff] }
 0x90b   : > { %26419 = vmatprep.mubr.msk.f32.mxu1 %vm7365_vm3, %v19364_v26  ;;  %v19373_v26 = vld [vmem:[#allocation3 + $0x302] sm:$0xff] }
 0x90e   : > { %26420 = vmatmul.mubr.msk.f32.gmra.mrb[10].mxu1 %vm7365_vm3, %v19365_v1  ;;  %v19374_v1 = vld [vmem:[#allocation3 + $0x30a] sm:$0xff] }
 0x90f   : > { %26422 = vmatprep.mubr.msk.f32.mxu1 %vm7365_vm3, %v19366_v33  ;;  %v19375_v33 = vld [vmem:[#allocation3 + $0x312] sm:$0xff] }
 0x912   : > { %26423 = vmatmul.mubr.msk.f32.gmra.mrb[12].mxu1 %vm7365_vm3, %v19367_v59  ;;  %v19376_v59 = vld [vmem:[#allocation3 + $0x322] sm:$0xff] }
 0x913   : > { %26425 = vmatprep.mubr.msk.f32.mxu1 %vm7365_vm3, %v19368_v28  ;;  %v19377_v28 = vld [vmem:[#allocation3 + $0x32a] sm:$0xff] }
 0x916   : > { %26426 = vmatmul.mubr.msk.f32.gmra.mrb[14].mxu1 %vm7365_vm3, %v19369_v62  ;;  %v19378_v62 = vld [vmem:[#allocation3 + $0x332] sm:$0xff] }
 0x917   : > { %26428 = vmatprep.mubr.msk.f32.mxu1 %vm7365_vm3, %v19370_v25  ;;  %v19379_v25 = vld [vmem:[#allocation3 + $0x33a] sm:$0xff] }
 0x91a   : > { %26429 = vmatmul.mubr.msk.f32.gmra.mrb[16].mxu1 %vm7365_vm3, %v19371_v44  ;;  %v19380_v44 = vld [vmem:[#allocation3 + $0x34a] sm:$0xff] }
 0x91b   : > { %26431 = vmatprep.mubr.msk.f32.mxu1 %vm7365_vm3, %v19372_v50  ;;  %v19381_v50 = vld [vmem:[#allocation3 + $0x352] sm:$0xff] }
 0x91e   : > { %26432 = vmatmul.mubr.msk.f32.gmra.mrb[18].mxu1 %vm7365_vm3, %v19373_v26  ;;  %v19382_v26 = vld [vmem:[#allocation3 + $0x35a] sm:$0xff] }
 0x91f   : > { %26434 = vmatprep.mubr.msk.f32.mxu1 %vm7365_vm3, %v19374_v1  ;;  %v19383_v1 = vld [vmem:[#allocation3 + $0x362] sm:$0xff] }
 0x922   : > { %26435 = vmatmul.mubr.msk.f32.gmra.mrb[20].mxu1 %vm7365_vm3, %v19375_v33  ;;  %v19384_v33 = vld [vmem:[#allocation3 + $0x372] sm:$0xff] }
 0x923   : > { %26437 = vmatprep.mubr.msk.f32.mxu1 %vm7365_vm3, %v19376_v59  ;;  %v19385_v59 = vld [vmem:[#allocation3 + $0x37a] sm:$0xff] }
 0x926   : > { %26438 = vmatmul.mubr.msk.f32.gmra.mrb[22].mxu1 %vm7365_vm3, %v19377_v28  ;;  %v19386_v28 = vld [vmem:[#allocation3 + $0x382] sm:$0xff] }
 0x927   : > { %26440 = vmatprep.mubr.msk.f32.mxu1 %vm7365_vm3, %v19378_v62  ;;  %v19387_v62 = vld [vmem:[#allocation3 + $0x38a] sm:$0xff] }
 0x92a   : > { %26441 = vmatmul.mubr.msk.f32.gmra.mrb[24].mxu1 %vm7365_vm3, %v19379_v25  ;;  %v19388_v25 = vld [vmem:[#allocation3 + $0x39a] sm:$0xff] }
 0x92b   : > { %26443 = vmatprep.mubr.msk.f32.mxu1 %vm7365_vm3, %v19380_v44  ;;  %v19389_v44 = vld [vmem:[#allocation3 + $0x3a2] sm:$0xff] }
 0x92e   : > { %26444 = vmatmul.mubr.msk.f32.gmra.mrb[26].mxu1 %vm7365_vm3, %v19381_v50  ;;  %v19390_v50 = vld [vmem:[#allocation3 + $0x3aa] sm:$0xff] }
 0x92f   : > { %26446 = vmatprep.mubr.msk.f32.mxu1 %vm7365_vm3, %v19382_v26  ;;  %v19391_v26 = vld [vmem:[#allocation3 + $0x3b2] sm:$0xff] }
 0x932   : > { %26447 = vmatmul.mubr.msk.f32.gmra.mrb[28].mxu1 %vm7365_vm3, %v19383_v1  ;;  %v19392_v1 = vld [vmem:[#allocation3 + $0x3c2] sm:$0xff] }
 0x933   : > { %26449 = vmatprep.mubr.msk.f32.mxu1 %vm7365_vm3, %v19384_v33  ;;  %v19393_v33 = vld [vmem:[#allocation3 + $0x3ca] sm:$0xff] }
 0x936   : > { %26450 = vmatmul.mubr.msk.f32.gmra.mrb[30].mxu1 %vm7365_vm3, %v19385_v59  ;;  %v19394_v59 = vld [vmem:[#allocation3 + $0x3d2] sm:$0xff] }
 0x937   : > { %26452 = vmatprep.mubr.msk.f32.mxu1 %vm7365_vm3, %v19386_v28  ;;  %v19395_v28 = vld [vmem:[#allocation3 + $0x3da] sm:$0xff] }
 0x93a   : > { %26453 = vmatmul.mubr.msk.f32.gmra.mrb[32].mxu1 %vm7365_vm3, %v19387_v62  ;;  %v19396_v62 = vld [vmem:[#allocation3 + $0x3ea] sm:$0xff] }
 0x93b   : > { %26455 = vmatprep.mubr.msk.f32.mxu1 %vm7365_vm3, %v19388_v25  ;;  %v19397_v25 = vld [vmem:[#allocation3 + $0x3f2] sm:$0xff] }
 0x93e   : > { %26456 = vmatmul.mubr.msk.f32.gmra.mrb[34].mxu1 %vm7365_vm3, %v19389_v44  ;;  %v19398_v44 = vld [vmem:[#allocation3 + $0x3fa] sm:$0xff] }
 0x93f   : > { %26458 = vmatprep.mubr.msk.f32.mxu1 %vm7365_vm3, %v19390_v50  ;;  %v19399_v50 = vld [vmem:[#allocation3 + $0x402] sm:$0xff] }
 0x942   : > { %26459 = vmatmul.mubr.msk.f32.gmra.mrb[36].mxu1 %vm7365_vm3, %v19391_v26  ;;  %v19400_v26 = vld [vmem:[#allocation3 + $0x412] sm:$0xff] }
 0x943   : > { %26461 = vmatprep.mubr.msk.f32.mxu1 %vm7365_vm3, %v19392_v1  ;;  %v19401_v1 = vld [vmem:[#allocation3 + $0x41a] sm:$0xff] }
 0x946   : > { %26462 = vmatmul.mubr.msk.f32.gmra.mrb[38].mxu1 %vm7365_vm3, %v19393_v33  ;;  %v19402_v33 = vld [vmem:[#allocation3 + $0x422] sm:$0xff] }
 0x947   : > { %26464 = vmatprep.mubr.msk.f32.mxu1 %vm7365_vm3, %v19394_v59  ;;  %v19403_v59 = vld [vmem:[#allocation3 + $0x42a] sm:$0xff] }
 0x94a   : > { %26465 = vmatmul.mubr.msk.f32.gmra.mrb[40].mxu1 %vm7365_vm3, %v19395_v28  ;;  %v19404_v28 = vld [vmem:[#allocation3 + $0x43a] sm:$0xff] }
 0x94b   : > { %26467 = vmatprep.mubr.msk.f32.mxu1 %vm7365_vm3, %v19396_v62  ;;  %v19405_v62 = vld [vmem:[#allocation3 + $0x442] sm:$0xff] }
 0x94e   : > { %26468 = vmatmul.mubr.msk.f32.gmra.mrb[42].mxu1 %vm7365_vm3, %v19397_v25  ;;  %v19406_v25 = vld [vmem:[#allocation3 + $0x44a] sm:$0xff] }
 0x94f   : > { %26470 = vmatprep.mubr.msk.f32.mxu1 %vm7365_vm3, %v19398_v44  ;;  %v19407_v44 = vld [vmem:[#allocation3 + $0x452] sm:$0xff] }
 0x952   : > { %26471 = vmatmul.mubr.msk.f32.gmra.mrb[44].mxu1 %vm7365_vm3, %v19399_v50  ;;  %v19408_v50 = vld [vmem:[#allocation3 + $0x462] sm:$0xff] }
 0x953   : > { %26473 = vmatprep.mubr.msk.f32.mxu1 %vm7365_vm3, %v19400_v26  ;;  %v19409_v26 = vld [vmem:[#allocation3 + $0x46a] sm:$0xff] }
 0x956   : > { %26474 = vmatmul.mubr.msk.f32.gmra.mrb[46].mxu1 %vm7365_vm3, %v19401_v1  ;;  %v19410_v1 = vld [vmem:[#allocation3 + $0x472] sm:$0xff] }
 0x957   : > { %26476 = vmatprep.mubr.msk.f32.mxu1 %vm7365_vm3, %v19402_v33 }
 0x95a   : > { %26477 = vmatmul.mubr.msk.f32.gmra.mrb[48].mxu1 %vm7365_vm3, %v19403_v59  ;;  %v19411_v59 = vld [vmem:[#allocation3 + $0x47a] sm:$0xff] }
 0x95b   : > { %26479 = vmatprep.mubr.msk.f32.mxu1 %vm7365_vm3, %v19404_v28 }
 0x95e   : > { %26480 = vmatmul.mubr.msk.f32.gmra.mrb[50].mxu1 %vm7365_vm3, %v19405_v62 }
 0x95f   : > { %26482 = vmatprep.mubr.msk.f32.mxu1 %vm7365_vm3, %v19406_v25  ;;  %v19412_v25 = vld [vmem:[#allocation3 + $0x48a] sm:$0xff] }
 0x962   : > { %26483 = vmatmul.mubr.msk.f32.gmra.mrb[52].mxu1 %vm7365_vm3, %v19407_v44 }
 0x963   : > { %26485 = vmatprep.mubr.msk.f32.mxu1 %vm7365_vm3, %v19408_v50  ;;  %v19413_v50 = vld [vmem:[#allocation3 + $0x492] sm:$0xff] }
 0x966   : > { %26486 = vmatmul.mubr.msk.f32.gmra.mrb[54].mxu1 %vm7365_vm3, %v19409_v26 }
 0x967   : > { %26488 = vmatprep.mubr.msk.f32.mxu1 %vm7365_vm3, %v19410_v1  ;;  %v19414_v1 = vld [vmem:[#allocation3 + $0x49a] sm:$0xff] }
 0x969   : > { %v26331_v33 = vpop.f32.mrb[78].mxu1 }
 0x96a   : > { %v26745_v28 = vadd.f32 %v26331_v33, %v31911_v14  ;;  %v19891_v62 = vpop.f32.mrb[79].mxu1  ;;  %26489 = vmatmul.mubr.msk.f32.gmra.mrb[56].mxu1 %vm7365_vm3, %v19411_v59  ;;  %v19415_v33 = vld [vmem:[#allocation3 + $0x4a2] sm:$0xff] }
 0x96b   : > { %v26746_v30 = vadd.f32 %v19891_v62, %v31913_v63  ;;  %26491 = vmatprep.mubr.msk.f32.mxu1 %vm7365_vm3, %v19412_v25  ;;  %v19417_v25 = vld [vmem:[#allocation3 + $0x4ba] sm:$0xff] }
 0x96d   : > { %v26334_v44 = vpop.f32.mrb[80].mxu1  ;;  %20658 = vxpose.xlu0.b32.start [1/16] (narrow) %v26746_v30, 8  ;;  %v19416_v30 = vld [vmem:[#allocation3 + $0x4b2] sm:$0xff] }
 0x96e   : > { %v26747_v26 = vadd.f32 %v26334_v44, %v31917_v57  ;;  %v19901_v38 = vpop.f32.mrb[81].mxu1  ;;  %26492 = vmatmul.mubr.msk.f32.gmra.mrb[58].mxu1 %vm7365_vm3, %v19413_v50  ;;  %v19419_v50 = vld [vmem:[#allocation3 + $0x4ca] sm:$0xff] }
 0x96f   : > { %v26748_v24 = vadd.f32 %v19901_v38, %v31919_v7  ;;  %26494 = vmatprep.mubr.msk.f32.mxu1 %vm7365_vm3, %v19414_v1 }
 0x971   : > { %v26337_v14 = vpop.f32.mrb[82].mxu1  ;;  %20659 = vxpose.xlu0.b32.cont [2/16] (narrow) %v26745_v28, 8  ;;  %v19418_v28 = vld [vmem:[#allocation3 + $0x4c2] sm:$0xff] }
 0x972   : > { %v26749_v63 = vadd.f32 %v26337_v14, %v31923_v48  ;;  %v19911_v59 = vpop.f32.mrb[83].mxu1  ;;  %26495 = vmatmul.mubr.msk.f32.gmra.mrb[60].mxu1 %vm7365_vm3, %v19415_v33  ;;  %v19421_v33 = vld [vmem:[#allocation3 + $0x4e2] sm:$0xff] }
 0x973   : > { %v26750_v62 = vadd.f32 %v19911_v59, %v31925_v19  ;;  %26497 = vmatprep.mubr.msk.f32.mxu1 %vm7365_vm3, %v19416_v30 }
 0x975   : > { %v26340_v57 = vpop.f32.mrb[84].mxu1  ;;  %20660 = vxpose.xlu0.b32.cont [3/16] (narrow) %v26748_v24, 8  ;;  %v19420_v24 = vld [vmem:[#allocation3 + $0x4da] sm:$0xff] }
 0x976   : > { %v26751_v38 = vadd.f32 %v26340_v57, %v31929_v39  ;;  %v19921_v7 = vpop.f32.mrb[85].mxu1  ;;  %26498 = vmatmul.mubr.msk.f32.gmra.mrb[62].mxu1 %vm7365_vm3, %v19417_v25  ;;  %v19423_v57 = vld [vmem:[#allocation3 + $0x4f2] sm:$0xff] }
 0x977   : > { %v26752_v44 = vadd.f32 %v19921_v7, %v31931_v41  ;;  %26500 = vmatprep.mubr.msk.f32.mxu1 %vm7365_vm3, %v19418_v28  ;;  %v19425_v28 = vld [vmem:[#allocation3 + $0x50a] sm:$0xff] }
 0x979   : > { %v26343_v48 = vpop.f32.mrb[86].mxu1  ;;  %20661 = vxpose.xlu0.b32.cont [4/16] (narrow) %v26747_v26, 8  ;;  %v19422_v26 = vld [vmem:[#allocation3 + $0x4ea] sm:$0xff] }
 0x97a   : > { %v26753_v19 = vadd.f32 %v26343_v48, %v31935_v58  ;;  %v19931_v1 = vpop.f32.mrb[87].mxu1  ;;  %26501 = vmatmul.mubr.msk.f32.gmra.mrb[64].mxu1 %vm7365_vm3, %v19419_v50  ;;  %v19428_v50 = vld [vmem:[#allocation3 + $0x52a] sm:$0xff] }
 0x97b   : > { %v26754_v14 = vadd.f32 %v19931_v1, %v31937_v27  ;;  %26503 = vmatprep.mubr.msk.f32.mxu1 %vm7365_vm3, %v19420_v24 }
 0x97d   : > { %v26346_v39 = vpop.f32.mrb[88].mxu1  ;;  %20662 = vxpose.xlu0.b32.cont [5/16] (narrow) %v26750_v62, 8  ;;  %v19424_v62 = vld [vmem:[#allocation3 + $0x502] sm:$0xff] }
 0x97e   : > { %v26755_v41 = vadd.f32 %v26346_v39, %v31941_v2  ;;  %v19941_v59 = vpop.f32.mrb[89].mxu1  ;;  %26504 = vmatmul.mubr.msk.f32.gmra.mrb[66].mxu1 %vm7365_vm3, %v19421_v33  ;;  %v19430_v33 = vld [vmem:[#allocation3 + $0x53a] sm:$0xff] }
 0x97f   : > { %v26756_v30 = vadd.f32 %v19941_v59, %v31943_v10  ;;  %26506 = vmatprep.mubr.msk.f32.mxu1 %vm7365_vm3, %v19422_v26 }
 0x981   : > { %v26349_v58 = vpop.f32.mrb[90].mxu1  ;;  %20663 = vxpose.xlu0.b32.cont [6/16] (narrow) %v26749_v63, 8  ;;  %v19426_v63 = vld [vmem:[#allocation3 + $0x512] sm:$0xff] }
 0x982   : > { %v26757_v27 = vadd.f32 %v26349_v58, %v31947_v5  ;;  %v19951_v25 = vpop.f32.mrb[91].mxu1  ;;  %26507 = vmatmul.mubr.msk.f32.gmra.mrb[68].mxu1 %vm7365_vm3, %v19423_v57 }
 0x983   : > { %v26758_v7 = vadd.f32 %v19951_v25, %v31949_v31  ;;  %26509 = vmatprep.mubr.msk.f32.mxu1 %vm7365_vm3, %v19424_v62  ;;  %v19427_v31 = vld [vmem:[#allocation3 + $0x51a] sm:$0xff] }
 0x985   : > { %v26352_v2 = vpop.f32.mrb[92].mxu1  ;;  %20664 = vxpose.xlu0.b32.cont [7/16] (narrow) %v26752_v44, 8  ;;  %v19429_v44 = vld [vmem:[#allocation3 + $0x532] sm:$0xff] }
 0x986   : > { %v32338_v10 = vadd.f32 %v26352_v2, %v31953_v20  ;;  %v19961_v48 = vpop.f32.mrb[93].mxu1  ;;  %26510 = vmatmul.mubr.msk.f32.gmra.mrb[70].mxu1 %vm7365_vm3, %v19425_v28 }
 0x987   : > { %v26760_v5 = vadd.f32 %v19961_v48, %v31955_v21  ;;  %26512 = vmatprep.mubr.msk.f32.mxu1 %vm7365_vm3, %v19426_v63 }
 0x989   : > { %v26355_v1 = vpop.f32.mrb[94].mxu1  ;;  %20665 = vxpose.xlu0.b32.cont [8/16] (narrow) %v26751_v38, 8 }
 0x98a   : > { %v26761_v24 = vadd.f32 %v26355_v1, %v31959_v16  ;;  %v19971_v39 = vpop.f32.mrb[95].mxu1  ;;  %26513 = vmatmul.mubr.msk.f32.gmra.mrb[72].mxu1 %vm7365_vm3, %v19427_v31  ;;  %v19431_v16 = vld [vmem:[#allocation3 + $0x542] sm:$0xff] }
 0x98b   : > { %26515 = vmatprep.mubr.msk.f32.mxu1 %vm7365_vm3, %v19428_v50  ;;  %v26762_v20 = vadd.f32 %v19971_v39, %v31961_v11 }
 0x98d   : > { %v26358_v59 = vpop.f32.mrb[96].mxu1  ;;  %20666 = vxpose.xlu0.b32.cont [9/16] (narrow) %v26754_v14, 8  ;;  %20690 = vxpose.xlu1.b32.start [1/16] (narrow) %v26762_v20, 8 }
 0x98e   : > { %v26763_v21 = vadd.f32 %v26358_v59, %v31965_v32  ;;  %v19981_v26 = vpop.f32.mrb[97].mxu1  ;;  %26516 = vmatmul.mubr.msk.f32.gmra.mrb[74].mxu1 %vm7365_vm3, %v19429_v44 }
 0x98f   : > { %v26764_v38 = vadd.f32 %v19981_v26, %v31967_v29  ;;  %26518 = vmatprep.mubr.msk.f32.mxu1 %vm7365_vm3, %v19430_v33 }
 0x991   : > { %v26361_v58 = vpop.f32.mrb[98].mxu1  ;;  %20667 = vxpose.xlu0.b32.cont [10/16] (narrow) %v26753_v19, 8  ;;  %20691 = vxpose.xlu1.b32.cont [2/16] (narrow) %v26761_v24, 8 }
 0x992   : > { %v26765_v11 = vadd.f32 %v26361_v58, %v31971_v34  ;;  %v19991_v57 = vpop.f32.mrb[99].mxu1  ;;  %26519 = vmatmul.mubr.msk.f32.gmra.mrb[76].mxu1 %vm7365_vm3, %v19431_v16 }
 0x993   : > { %v26766_v14 = vadd.f32 %v19991_v57, %v31973_v52 }
 0x995   : > { %v26364_v25 = vpop.f32.mrb[100].mxu1  ;;  %20668 = vxpose.xlu0.b32.cont [11/16] (narrow) %v26756_v30, 8  ;;  %20692 = vxpose.xlu1.b32.cont [3/16] (narrow) %v26764_v38, 8 }
 0x996   : > { %v26767_v32 = vadd.f32 %v26364_v25, %v31977_v6  ;;  %v20001_v62 = vpop.f32.mrb[101].mxu1 }
 0x997   : > { %v26768_v29 = vadd.f32 %v20001_v62, %v31979_v9 }
 0x999   : > { %v26367_v2 = vpop.f32.mrb[102].mxu1  ;;  %20669 = vxpose.xlu0.b32.cont [12/16] (narrow) %v26755_v41, 8  ;;  %20693 = vxpose.xlu1.b32.cont [4/16] (narrow) %v26763_v21, 8 }
 0x99a   : > { %v26769_v19 = vadd.f32 %v26367_v2, %v31983_v35  ;;  %v20011_v28 = vpop.f32.mrb[103].mxu1  ;;  %v32758_v2 = vld [vmem:[#allocation11_spill] sm:$0xff] }
 0x99b   : > { %v26770_v34 = vadd.f32 %v20011_v28, %v31985_v56 }
 0x99d   : > { %v26370_v48 = vpop.f32.mrb[104].mxu1  ;;  %20670 = vxpose.xlu0.b32.cont [13/16] (narrow) %v26758_v7, 8  ;;  %20694 = vxpose.xlu1.b32.cont [5/16] (narrow) %v26766_v14, 8 }
 0x99e   : > { %v26771_v52 = vadd.f32 %v26370_v48, %v31989_v0  ;;  %v20021_v30 = vpop.f32.mrb[105].mxu1  ;;  %v32760_v48 = vld [vmem:[#allocation13_spill] sm:$0xff] }
 0x99f   : > { %v26772_v63 = vadd.f32 %v20021_v30, %v31991_v3 }
 0x9a1   : > { %v26373_v6 = vpop.f32.mrb[106].mxu1  ;;  %20671 = vxpose.xlu0.b32.cont [14/16] (narrow) %v26757_v27, 8  ;;  %20695 = vxpose.xlu1.b32.cont [6/16] (narrow) %v26765_v11, 8 }
 0x9a2   : > { %v26773_v9 = vadd.f32 %v26373_v6, %v31995_v54  ;;  %v20031_v41 = vpop.f32.mrb[107].mxu1  ;;  %v32762_v6 = vld [vmem:[#allocation15_spill] sm:$0xff] }
 0x9a3   : > { %v26774_v50 = vadd.f32 %v20031_v41, %v31997_v37 }
 0x9a5   : > { %v26376_v35 = vpop.f32.mrb[108].mxu1  ;;  %20672 = vxpose.xlu0.b32.cont [15/16] (narrow) %v26760_v5, 8  ;;  %20696 = vxpose.xlu1.b32.cont [7/16] (narrow) %v26768_v29, 8 }
 0x9a6   : > { %v26775_v56 = vadd.f32 %v26376_v35, %v32001_v47  ;;  %v20041_v7 = vpop.f32.mrb[109].mxu1 }
 0x9a7   : > { %v26776_v1 = vadd.f32 %v20041_v7, %v32003_v43  ;;  %v32764_v7 = vld [vmem:[#allocation17_spill] sm:$0xff] }
 0x9a9   : > { %v26379_v0 = vpop.f32.mrb[110].mxu1  ;;  %20673 = vxpose.xlu0.b32.end [16/16] (narrow) %v32338_v10, 8  ;;  %20697 = vxpose.xlu1.b32.cont [8/16] (narrow) %v26767_v32, 8 }
 0x9aa   : > { %v26777_v3 = vadd.f32 %v26379_v0, %v32007_v60  ;;  %v20051_v27 = vpop.f32.mrb[111].mxu1 }
 0x9ab   : > { %v26778_v54 = vadd.f32 %v20051_v27, %v32009_v15 }
 0x9ad   : > { %v26382_v31 = vpop.f32.mrb[112].mxu1  ;;  %20698 = vxpose.xlu1.b32.cont [9/16] (narrow) %v26770_v34, 8  ;;  %20722 = vxpose.xlu0.b32.start [1/16] (narrow) %v26778_v54, 8 }
 0x9ae   : > { %v26779_v37 = vadd.f32 %v26382_v31, %v32013_v55  ;;  %v20061_v5 = vpop.f32.mrb[113].mxu1  ;;  %v32766_v31 = vld [vmem:[#allocation19_spill] sm:$0xff] }
 0x9af   : > { %v26780_v47 = vadd.f32 %v20061_v5, %v32015_v4 }
 0x9b1   : > { %v26385_v24 = vpop.f32.mrb[114].mxu1  ;;  %20699 = vxpose.xlu1.b32.cont [10/16] (narrow) %v26769_v19, 8  ;;  %20723 = vxpose.xlu0.b32.cont [2/16] (narrow) %v26777_v3, 8  ;;  %v32765_v3 = vld [vmem:[#allocation18_spill] sm:$0xff] }
 0x9b2   : > { %v26781_v43 = vadd.f32 %v26385_v24, %v32019_v46  ;;  %v20071_v10 = vpop.f32.mrb[115].mxu1 }
 0x9b3   : > { %v26782_v39 = vadd.f32 %v20071_v10, %v32021_v49  ;;  %v32768_v10 = vld [vmem:[#allocation21_spill] sm:$0xff] }
 0x9b5   : > { %v26388_v60 = vpop.f32.mrb[116].mxu1  ;;  %20700 = vxpose.xlu1.b32.cont [11/16] (narrow) %v26772_v63, 8  ;;  %20724 = vxpose.xlu0.b32.cont [3/16] (narrow) %v26780_v47, 8  ;;  %v32767_v47 = vld [vmem:[#allocation20_spill] sm:$0xff] }
 0x9b6   : > { %v26783_v15 = vadd.f32 %v26388_v60, %v32025_v40  ;;  %v20081_v20 = vpop.f32.mrb[117].mxu1  ;;  %v32397_v60 = vpop.permute.xlu0 %20917 }
 0x9b7   : > { %v26784_v44 = vadd.f32 %v20081_v20, %v32027_v51  ;;  %v32769_v20 = vld [vmem:[#allocation22_spill] sm:$0xff] }
 0x9b9   : > { %v26391_v55 = vpop.f32.mrb[118].mxu1  ;;  %20701 = vxpose.xlu1.b32.cont [12/16] (narrow) %v26771_v52, 8  ;;  %20725 = vxpose.xlu0.b32.cont [4/16] (narrow) %v26779_v37, 8 }
 0x9ba   : > { %v26785_v4 = vadd.f32 %v26391_v55, %v32031_v8  ;;  %v20091_v33 = vpop.f32.mrb[119].mxu1 }
 0x9bb   : > { %v26786_v59 = vadd.f32 %v20091_v33, %v32033_v13 }
 0x9bd   : > { %v26394_v46 = vpop.f32.mrb[120].mxu1  ;;  %20702 = vxpose.xlu1.b32.cont [13/16] (narrow) %v26774_v50, 8  ;;  %20726 = vxpose.xlu0.b32.cont [5/16] (narrow) %v26782_v39, 8  ;;  %v32763_v50 = vld [vmem:[#allocation16_spill] sm:$0xff] }
 0x9be   : > { %v26787_v49 = vadd.f32 %v26394_v46, %v32043_v18  ;;  %v20101_v21 = vpop.f32.mrb[121].mxu1 }
 0x9bf   : > { %v26788_v26 = vadd.f32 %v20101_v21, %v32045_v53 }
 0x9c1   : > { %v26397_v40 = vpop.f32.mrb[122].mxu1  ;;  %20703 = vxpose.xlu1.b32.cont [14/16] (narrow) %v26773_v9, 8  ;;  %20727 = vxpose.xlu0.b32.cont [6/16] (narrow) %v26781_v43, 8 }
 0x9c2   : > { %v26789_v51 = vadd.f32 %v26397_v40, %v32056_v36  ;;  %v20111_v38 = vpop.f32.mrb[123].mxu1 }
 0x9c3   : > { %v26790_v16 = vadd.f32 %v20111_v38, %v32058_v23 }
 0x9c5   : > { %v26400_v8 = vpop.f32.mrb[124].mxu1  ;;  %20704 = vxpose.xlu1.b32.cont [15/16] (narrow) %v26776_v1, 8  ;;  %20728 = vxpose.xlu0.b32.cont [7/16] (narrow) %v26784_v44, 8 }
 0x9c6   : > { %v26791_v13 = vadd.f32 %v26400_v8, %v32062_v61  ;;  %v20121_v58 = vpop.f32.mrb[125].mxu1 }
 0x9c7   : > { %v26792_v11 = vadd.f32 %v20121_v58, %v32064_v45  ;;  %v32757_v45 = vld [vmem:[#allocation10_spill] sm:$0xff] }
 0x9c9   : > { %v26403_v18 = vpop.f32.mrb[126].mxu1  ;;  %20705 = vxpose.xlu1.b32.end [16/16] (narrow) %v26775_v56, 8  ;;  %20729 = vxpose.xlu0.b32.cont [8/16] (narrow) %v26783_v15, 8 }
 0x9ca   : > { %v26793_v53 = vadd.f32 %v26403_v18, %v32068_v12  ;;  %v20131_v57 = vpop.f32.mrb[127].mxu1  ;;  %v32774_v18 = vld [vmem:[#allocation27_spill] sm:$0xff] }
 0x9cb   : > { %v26794_v14 = vadd.f32 %v20131_v57, %v32070_v17  ;;  %v32759_v17 = vld [vmem:[#allocation12_spill] sm:$0xff] }
 0x9cd   : > { %v26406_v36 = vpop.f32.mrb[0].mxu1  ;;  %20730 = vxpose.xlu0.b32.cont [9/16] (narrow) %v26786_v59, 8  ;;  %20754 = vxpose.xlu1.b32.start [1/16] (narrow) %v26794_v14, 8  ;;  %v32775_v14 = vld [vmem:[#allocation28_spill] sm:$0xff] }
 0x9ce   : > { %v26795_v23 = vadd.f32 %v26406_v36, %v31587_v42  ;;  %v20141_v25 = vpop.f32.mrb[1].mxu1 }
 0x9cf   : > { %v26796_v32 = vadd.f32 %v20141_v25, %v31591_v22  ;;  %v32761_v22 = vld [vmem:[#allocation14_spill] sm:$0xff]  ;;  %v32776_v25 = vld [vmem:[#allocation29_spill] sm:$0xff] }
 0x9d1   : > { %v26409_v61 = vpop.f32.mrb[2].mxu1  ;;  %20731 = vxpose.xlu0.b32.cont [10/16] (narrow) %v26785_v4, 8  ;;  %20755 = vxpose.xlu1.b32.cont [2/16] (narrow) %v26793_v53, 8  ;;  %v32770_v4 = vld [vmem:[#allocation23_spill] sm:$0xff] }
 0x9d2   : > { %v26797_v62 = vadd.f32 %v26409_v61, %v32757_v45  ;;  %v20151_v29 = vpop.f32.mrb[3].mxu1  ;;  %v32777_v45 = vld [vmem:[#allocation30_spill] sm:$0xff] }
 0x9d3   : > { %v26798_v19 = vadd.f32 %v20151_v29, %v32758_v2  ;;  %v32778_v2 = vld [vmem:[#allocation31_spill] sm:$0xff] }
 0x9d5   : > { %v26412_v12 = vpop.f32.mrb[4].mxu1  ;;  %20732 = vxpose.xlu0.b32.cont [11/16] (narrow) %v26788_v26, 8  ;;  %20756 = vxpose.xlu1.b32.cont [3/16] (narrow) %v26796_v32, 8 }
 0x9d6   : > { %v26799_v28 = vadd.f32 %v26412_v12, %v32759_v17  ;;  %v20161_v34 = vpop.f32.mrb[5].mxu1 }
 0x9d7   : > { %v26800_v52 = vadd.f32 %v20161_v34, %v32760_v48  ;;  %v32779_v34 = vld [vmem:[#allocation8_spill] sm:$0xff] }
 0x9d9   : > { %v26415_v42 = vpop.f32.mrb[6].mxu1  ;;  %20733 = vxpose.xlu0.b32.cont [12/16] (narrow) %v26787_v49, 8  ;;  %20757 = vxpose.xlu1.b32.cont [4/16] (narrow) %v26795_v23, 8  ;;  %v32771_v49 = vld [vmem:[#allocation24_spill] sm:$0xff] }
 0x9da   : > { %v26801_v30 = vadd.f32 %v26415_v42, %v32761_v22  ;;  %v20171_v63 = vpop.f32.mrb[7].mxu1  ;;  %v32780_v42 = vld [vmem:[#allocation36_spill] sm:$0xff] }
 0x9db   : > { %v26802_v9 = vadd.f32 %v20171_v63, %v32762_v6  ;;  %v32781_v63 = vld [vmem:[#allocation37_spill] sm:$0xff] }
 0x9dd   : > { %v26418_v41 = vpop.f32.mrb[8].mxu1  ;;  %20734 = vxpose.xlu0.b32.cont [13/16] (narrow) %v26790_v16, 8  ;;  %20758 = vxpose.xlu1.b32.cont [5/16] (narrow) %v26798_v19, 8 }
 0x9de   : > { %v26803_v35 = vadd.f32 %v26418_v41, %v32763_v50  ;;  %v20181_v56 = vpop.f32.mrb[9].mxu1  ;;  %v32782_v41 = vld [vmem:[#allocation32_spill] sm:$0xff] }
 0x9df   : > { %v26804_v1 = vadd.f32 %v20181_v56, %v32764_v7  ;;  %v32783_v56 = vld [vmem:[#allocation33_spill] sm:$0xff] }
 0x9e1   : > { %v26421_v0 = vpop.f32.mrb[10].mxu1  ;;  %20735 = vxpose.xlu0.b32.cont [14/16] (narrow) %v26789_v51, 8  ;;  %20759 = vxpose.xlu1.b32.cont [6/16] (narrow) %v26797_v62, 8  ;;  %v32772_v51 = vld [vmem:[#allocation25_spill] sm:$0xff] }
 0x9e2   : > { %v26805_v27 = vadd.f32 %v26421_v0, %v32765_v3  ;;  %v20191_v54 = vpop.f32.mrb[11].mxu1  ;;  %v32784_v0 = vld [vmem:[#allocation34_spill] sm:$0xff] }
 0x9e3   : > { %v26806_v37 = vadd.f32 %v20191_v54, %v32766_v31  ;;  %v32785_v31 = vld [vmem:[#allocation35_spill] sm:$0xff] }
 0x9e5   : > { %v26424_v5 = vpop.f32.mrb[12].mxu1  ;;  %20736 = vxpose.xlu0.b32.cont [15/16] (narrow) %v26792_v11, 8  ;;  %20760 = vxpose.xlu1.b32.cont [7/16] (narrow) %v26800_v52, 8 }
 0x9e6   : > { %v26807_v24 = vadd.f32 %v26424_v5, %v32767_v47  ;;  %v20201_v43 = vpop.f32.mrb[13].mxu1  ;;  %v32786_v47 = vld [vmem:[#allocation7_spill] sm:$0xff] }
 0x9e7   : > { %v26808_v39 = vadd.f32 %v20201_v43, %v32768_v10 }
 0x9e9   : > { %v26427_v15 = vpop.f32.mrb[14].mxu1  ;;  %20737 = vxpose.xlu0.b32.end [16/16] (narrow) %v26791_v13, 8  ;;  %20761 = vxpose.xlu1.b32.cont [8/16] (narrow) %v26799_v28, 8  ;;  %v32773_v13 = vld [vmem:[#allocation26_spill] sm:$0xff] }
 0x9ea   : > { %v26809_v44 = vadd.f32 %v26427_v15, %v32769_v20  ;;  %v20211_v55 = vpop.f32.mrb[15].mxu1  ;;  %v32787_v15 = vld [vmem:[#allocation9_spill] sm:$0xff] }
 0x9eb   : > { %v26810_v33 = vadd.f32 %v20211_v55, %v32770_v4  ;;  %v32788_v4 = vld [vmem:[#allocation4_spill] sm:$0xff] }
 0x9ed   : > { %v26430_v59 = vpop.f32.mrb[16].mxu1  ;;  %20786 = vxpose.xlu0.b32.start [1/16] (narrow) %v26810_v33, 8  ;;  %20762 = vxpose.xlu1.b32.cont [9/16] (narrow) %v26802_v9, 8  ;;  %v20674_v46 = vpop.trf.xlu0 }
 0x9ee   : > { %v26811_v21 = vadd.f32 %v26430_v59, %v32771_v49  ;;  %v20221_v26 = vpop.f32.mrb[17].mxu1  ;;  %v20920_v40 = vadd.f32 %v32397_v60, %v20674_v46 }
 0x9ef   : > { %v26812_v38 = vadd.f32 %v20221_v26, %v32772_v51  ;;  %v32790_v26 = vld [vmem:[#allocation5_spill] sm:$0xff] }
 0x9f0   : > { %v22585_v16 = vmul.f32 -1.442695, %v20920_v40 }
 0x9f1   : > { %v26433_v8 = vpop.f32.mrb[18].mxu1  ;;  %20787 = vxpose.xlu0.b32.cont [2/16] (narrow) %v26809_v44, 8  ;;  %20763 = vxpose.xlu1.b32.cont [10/16] (narrow) %v26801_v30, 8 }
 0x9f2   : > { %28038 = vpow2.f32 %v22585_v16  ;;  %v26813_v58 = vadd.f32 %v26433_v8, %v32773_v13  ;;  %v20231_v11 = vpop.f32.mrb[19].mxu1  ;;  %v32792_v13 = vld [vmem:[#allocation39_spill] sm:$0xff] }
 0x9f3   : > { %v26814_v53 = vadd.f32 %v20231_v11, %v32774_v18  ;;  %v32793_v18 = vld [vmem:[#allocation40_spill] sm:$0xff] }
 0x9f5   : > { %v26436_v57 = vpop.f32.mrb[20].mxu1  ;;  %20788 = vxpose.xlu0.b32.cont [3/16] (narrow) %v26812_v38, 8  ;;  %20764 = vxpose.xlu1.b32.cont [11/16] (narrow) %v26804_v1, 8  ;;  %v32791_v38 = vld [vmem:[#allocation38_spill] sm:$0xff] }
 0x9f6   : > { %v26815_v36 = vadd.f32 %v26436_v57, %v32775_v14  ;;  %v20241_v23 = vpop.f32.mrb[21].mxu1  ;;  %v32794_v14 = vld [vmem:[#allocation41_spill] sm:$0xff] }
 0x9f7   : > { %v26816_v32 = vadd.f32 %v20241_v23, %v32776_v25 }
 0x9f9   : > { %v26439_v61 = vpop.f32.mrb[22].mxu1  ;;  %20789 = vxpose.xlu0.b32.cont [4/16] (narrow) %v26811_v21, 8  ;;  %20765 = vxpose.xlu1.b32.cont [12/16] (narrow) %v26803_v35, 8 }
 0x9fa   : > { %v26817_v62 = vadd.f32 %v26439_v61, %v32777_v45  ;;  %v20251_v29 = vpop.f32.mrb[23].mxu1  ;;  %v32795_v61 = vld [vmem:[#allocation42_spill] sm:$0xff] }
 0x9fb   : > { %v26818_v19 = vadd.f32 %v20251_v29, %v32778_v2  ;;  %v32796_v29 = vld [vmem:[#allocation43_spill] sm:$0xff] }
 0x9fc   : > { %v28039_v12 = vpop.eup %28038 }
 0x9fd   : > { %v20952_v17 = vadd.f32 1.0, %v28039_v12  ;;  %v26442_v28 = vpop.f32.mrb[24].mxu1  ;;  %20790 = vxpose.xlu0.b32.cont [5/16] (narrow) %v26814_v53, 8  ;;  %20766 = vxpose.xlu1.b32.cont [13/16] (narrow) %v26806_v37, 8  ;;  %v32797_v12 = vld [vmem:[#allocation44_spill] sm:$0xff] }
 0x9fe   : > { %v26819_v48 = vadd.f32 %v26442_v28, %v32779_v34  ;;  %v20261_v52 = vpop.f32.mrb[25].mxu1  ;;  %v32798_v34 = vld [vmem:[#allocation45_spill] sm:$0xff] }
 0x9ff   : > { %28040 = vrcp.f32 %v20952_v17  ;;  %v26820_v22 = vadd.f32 %v20261_v52, %v32780_v42  ;;  %v32799_v42 = vld [vmem:[#allocation46_spill] sm:$0xff] }
 0xa01   : > { %v26445_v30 = vpop.f32.mrb[26].mxu1  ;;  %20791 = vxpose.xlu0.b32.cont [6/16] (narrow) %v26813_v58, 8  ;;  %20767 = vxpose.xlu1.b32.cont [14/16] (narrow) %v26805_v27, 8 }
 0xa02   : > { %v26821_v6 = vadd.f32 %v26445_v30, %v32781_v63  ;;  %v20271_v9 = vpop.f32.mrb[27].mxu1  ;;  %v32800_v63 = vld [vmem:[#allocation47_spill] sm:$0xff] }
 0xa03   : > { %v26822_v50 = vadd.f32 %v20271_v9, %v32782_v41 }
 0xa05   : > { %v26448_v35 = vpop.f32.mrb[28].mxu1  ;;  %20792 = vxpose.xlu0.b32.cont [7/16] (narrow) %v26816_v32, 8  ;;  %20768 = vxpose.xlu1.b32.cont [15/16] (narrow) %v26808_v39, 8 }
 0xa06   : > { %v26823_v7 = vadd.f32 %v26448_v35, %v32783_v56  ;;  %v20281_v1 = vpop.f32.mrb[29].mxu1 }
 0xa07   : > { %v26824_v3 = vadd.f32 %v20281_v1, %v32784_v0  ;;  %v32802_v1 = vld [vmem:[#allocation49_spill] sm:$0xff] }
 0xa09   : > { %v28041_v27 = vpop.eup %28040  ;;  %v26451_v54 = vpop.f32.mrb[30].mxu1  ;;  %20793 = vxpose.xlu0.b32.cont [8/16] (narrow) %v26815_v36, 8  ;;  %20769 = vxpose.xlu1.b32.end [16/16] (narrow) %v26807_v24, 8  ;;  %v32789_v24 = vld [vmem:[#allocation6_spill] sm:$0xff] }
 0xa0a   : > { %20976 = vst [vmem:[%s32420_s30] sm:$0x1f] %v28041_v27  ;;  %v26825_v37 = vadd.f32 %v26451_v54, %v32785_v31  ;;  %v20291_v5 = vpop.f32.mrb[31].mxu1 }
 0xa0b   : > { %v26826_v43 = vadd.f32 %v20291_v5, %v32786_v47  ;;  %v32804_v47 = vld [vmem:[#allocation51_spill] sm:$0xff] }
 0xa0d   : > { %v26454_v10 = vpop.f32.mrb[32].mxu1  ;;  %v20706_v39 = vpop.trf.xlu1  ;;  %20794 = vxpose.xlu0.b32.cont [9/16] (narrow) %v26818_v19, 8  ;;  %20818 = vxpose.xlu1.b32.start [1/16] (narrow) %v26826_v43, 8 }
 0xa0e   : > { %v26827_v20 = vadd.f32 %v26454_v10, %v32787_v15  ;;  %v20921_v44 = vadd.f32 %v32397_v60, %v20706_v39  ;;  %v20301_v55 = vpop.f32.mrb[33].mxu1  ;;  %v32805_v39 = vld [vmem:[#allocation52_spill] sm:$0xff] }
 0xa0f   : > { %v26828_v33 = vadd.f32 %v20301_v55, %v32788_v4 }
 0xa10   : > { %v22586_v59 = vmul.f32 -1.442695, %v20921_v44  ;;  %v32806_v44 = vld [vmem:[#allocation53_spill] sm:$0xff] }
 0xa11   : > { %v26457_v46 = vpop.f32.mrb[34].mxu1  ;;  %20795 = vxpose.xlu0.b32.cont [10/16] (narrow) %v26817_v62, 8  ;;  %20819 = vxpose.xlu1.b32.cont [2/16] (narrow) %v26825_v37, 8 }
 0xa12   : > { %28042 = vpow2.f32 %v22586_v59  ;;  %v26829_v49 = vadd.f32 %v26457_v46, %v32789_v24  ;;  %v20311_v21 = vpop.f32.mrb[35].mxu1  ;;  %v32808_v24 = vld [vmem:[#allocation55_spill] sm:$0xff] }
 0xa13   : > { %v26830_v40 = vadd.f32 %v20311_v21, %v32790_v26  ;;  %v32809_v26 = vld [vmem:[#allocation56_spill] sm:$0xff] }
 0xa15   : > { %v26460_v51 = vpop.f32.mrb[36].mxu1  ;;  %20796 = vxpose.xlu0.b32.cont [11/16] (narrow) %v26820_v22, 8  ;;  %20820 = vxpose.xlu1.b32.cont [3/16] (narrow) %v26828_v33, 8  ;;  %v32807_v33 = vld [vmem:[#allocation54_spill] sm:$0xff] }
 0xa16   : > { %v26831_v16 = vadd.f32 %v26460_v51, %v32791_v38  ;;  %v20321_v8 = vpop.f32.mrb[37].mxu1  ;;  %v32810_v38 = vld [vmem:[#allocation57_spill] sm:$0xff] }
 0xa17   : > { %v26832_v58 = vadd.f32 %v20321_v8, %v32792_v13 }
 0xa19   : > { %v26463_v11 = vpop.f32.mrb[38].mxu1  ;;  %20797 = vxpose.xlu0.b32.cont [12/16] (narrow) %v26819_v48, 8  ;;  %20821 = vxpose.xlu1.b32.cont [4/16] (narrow) %v26827_v20, 8 }
 0xa1a   : > { %v26833_v53 = vadd.f32 %v26463_v11, %v32793_v18  ;;  %v20331_v57 = vpop.f32.mrb[39].mxu1  ;;  %v32811_v11 = vld [vmem:[#allocation58_spill] sm:$0xff] }
 0xa1b   : > { %v26834_v36 = vadd.f32 %v20331_v57, %v32794_v14  ;;  %v32812_v57 = vld [vmem:[#allocation59_spill] sm:$0xff] }
 0xa1c   : > { %v28043_v23 = vpop.eup %28042 }
 0xa1d   : > { %v20953_v25 = vadd.f32 1.0, %v28043_v23  ;;  %v26466_v32 = vpop.f32.mrb[40].mxu1  ;;  %20798 = vxpose.xlu0.b32.cont [13/16] (narrow) %v26822_v50, 8  ;;  %20822 = vxpose.xlu1.b32.cont [5/16] (narrow) %v26830_v40, 8  ;;  %v32813_v23 = vld [vmem:[#allocation60_spill] sm:$0xff] }
 0xa1e   : > { %v26835_v45 = vadd.f32 %v26466_v32, %v32795_v61  ;;  %v20341_v62 = vpop.f32.mrb[41].mxu1  ;;  %v32814_v61 = vld [vmem:[#allocation61_spill] sm:$0xff] }
 0xa1f   : > { %28044 = vrcp.f32 %v20953_v25  ;;  %v26836_v2 = vadd.f32 %v20341_v62, %v32796_v29  ;;  %v32815_v29 = vld [vmem:[#allocation62_spill] sm:$0xff] }
 0xa21   : > { %v26469_v19 = vpop.f32.mrb[42].mxu1  ;;  %20799 = vxpose.xlu0.b32.cont [14/16] (narrow) %v26821_v6, 8  ;;  %20823 = vxpose.xlu1.b32.cont [6/16] (narrow) %v26829_v49, 8  ;;  %v32801_v6 = vld [vmem:[#allocation48_spill] sm:$0xff] }
 0xa22   : > { %v26837_v17 = vadd.f32 %v26469_v19, %v32797_v12  ;;  %v20351_v28 = vpop.f32.mrb[43].mxu1  ;;  %v32816_v12 = vld [vmem:[#allocation63_spill] sm:$0xff] }
 0xa23   : > { %v26838_v48 = vadd.f32 %v20351_v28, %v32798_v34 }
 0xa25   : > { %v26472_v52 = vpop.f32.mrb[44].mxu1  ;;  %20800 = vxpose.xlu0.b32.cont [15/16] (narrow) %v26824_v3, 8  ;;  %20824 = vxpose.xlu1.b32.cont [7/16] (narrow) %v26832_v58, 8  ;;  %v32803_v3 = vld [vmem:[#allocation50_spill] sm:$0xff] }
 0xa26   : > { %v26839_v22 = vadd.f32 %v26472_v52, %v32799_v42  ;;  %v20361_v30 = vpop.f32.mrb[45].mxu1 }
 0xa27   : > { %v26840_v9 = vadd.f32 %v20361_v30, %v32800_v63  ;;  %v32818_v30 = vld [vmem:[#allocation65_spill] sm:$0xff] }
 0xa29   : > { %v28045_v41 = vpop.eup %28044  ;;  %v26475_v50 = vpop.f32.mrb[46].mxu1  ;;  %20801 = vxpose.xlu0.b32.end [16/16] (narrow) %v26823_v7, 8  ;;  %20825 = vxpose.xlu1.b32.cont [8/16] (narrow) %v26831_v16, 8 }
 0xa2a   : > { %20977 = vst [vmem:[%s32420_s30 + $0x8] sm:$0x1f] %v28045_v41  ;;  %v26841_v35 = vadd.f32 %v26475_v50, %v32801_v6  ;;  %v20371_v56 = vpop.f32.mrb[47].mxu1  ;;  %v32819_v50 = vld [vmem:[#allocation66_spill] sm:$0xff] }
 0xa2b   : > { %v26842_v0 = vadd.f32 %v20371_v56, %v32802_v1 }
 0xa2d   : > { %v26478_v27 = vpop.f32.mrb[48].mxu1  ;;  %v20738_v54 = vpop.trf.xlu0  ;;  %20826 = vxpose.xlu1.b32.cont [9/16] (narrow) %v26834_v36, 8 }
 0xa2e   : > { %v32445_v31 = vadd.f32 %v26478_v27, %v32803_v3  ;;  %v20922_v37 = vadd.f32 %v32397_v60, %v20738_v54  ;;  %v20381_v5 = vpop.f32.mrb[49].mxu1  ;;  %v32820_v27 = vld [vmem:[#allocation67_spill] sm:$0xff] }
 0xa2f   : > { %v26844_v43 = vadd.f32 %v20381_v5, %v32804_v47 }
 0xa30   : > { %v22587_v10 = vmul.f32 -1.442695, %v20922_v37 }
 0xa31   : > { %v26481_v7 = vpop.f32.mrb[50].mxu1  ;;  %20827 = vxpose.xlu1.b32.cont [10/16] (narrow) %v26833_v53, 8 }
 0xa32   : > { %28046 = vpow2.f32 %v22587_v10  ;;  %v32450_v15 = vadd.f32 %v26481_v7, %v32805_v39  ;;  %v20391_v20 = vpop.f32.mrb[51].mxu1  ;;  %v32822_v10 = vld [vmem:[#allocation69_spill] sm:$0xff] }
 0xa33   : > { %v32453_v55 = vadd.f32 %v20391_v20, %v32806_v44 }
 0xa35   : > { %v26484_v4 = vpop.f32.mrb[52].mxu1  ;;  %20828 = vxpose.xlu1.b32.cont [11/16] (narrow) %v26836_v2, 8 }
 0xa36   : > { %v32456_v59 = vadd.f32 %v26484_v4, %v32807_v33  ;;  %v20401_v46 = vpop.f32.mrb[53].mxu1  ;;  %v32824_v4 = vld [vmem:[#allocation71_spill] sm:$0xff] }
 0xa37   : > { %v32459_v49 = vadd.f32 %v20401_v46, %v32808_v24  ;;  %v32825_v24 = vld [vmem:[#allocation72_spill] sm:$0xff] }
 0xa39   : > { %v26487_v21 = vpop.f32.mrb[54].mxu1  ;;  %20829 = vxpose.xlu1.b32.cont [12/16] (narrow) %v26835_v45, 8 }
 0xa3a   : > { %v32462_v40 = vadd.f32 %v26487_v21, %v32809_v26  ;;  %v20411_v51 = vpop.f32.mrb[55].mxu1  ;;  %v32826_v26 = vld [vmem:[#allocation73_spill] sm:$0xff] }
 0xa3b   : > { %v32465_v16 = vadd.f32 %v20411_v51, %v32810_v38 }
 0xa3c   : > { %v28047_v8 = vpop.eup %28046 }
 0xa3d   : > { %v20954_v13 = vadd.f32 1.0, %v28047_v8  ;;  %v26490_v58 = vpop.f32.mrb[56].mxu1  ;;  %20830 = vxpose.xlu1.b32.cont [13/16] (narrow) %v26838_v48, 8 }
 0xa3e   : > { %v32468_v18 = vadd.f32 %v26490_v58, %v32811_v11  ;;  %v20421_v53 = vpop.f32.mrb[57].mxu1 }
 0xa3f   : > { %28048 = vrcp.f32 %v20954_v13  ;;  %v32471_v14 = vadd.f32 %v20421_v53, %v32812_v57  ;;  %v32828_v53 = vld [vmem:[#allocation75_spill] sm:$0xff] }
 0xa41   : > { %v26493_v36 = vpop.f32.mrb[58].mxu1  ;;  %20831 = vxpose.xlu1.b32.cont [14/16] (narrow) %v26837_v17, 8  ;;  %v32817_v17 = vld [vmem:[#allocation64_spill] sm:$0xff] }
 0xa42   : > { %v32474_v25 = vadd.f32 %v26493_v36, %v32813_v23  ;;  %v20431_v32 = vpop.f32.mrb[59].mxu1 }
 0xa43   : > { %v32477_v45 = vadd.f32 %v20431_v32, %v32814_v61  ;;  %v32830_v61 = vld [vmem:[#allocation77_spill] sm:$0xff] }
 0xa45   : > { %v26496_v62 = vpop.f32.mrb[60].mxu1  ;;  %20832 = vxpose.xlu1.b32.cont [15/16] (narrow) %v26840_v9, 8 }
 0xa46   : > { %v32480_v2 = vadd.f32 %v26496_v62, %v32815_v29  ;;  %v20441_v19 = vpop.f32.mrb[61].mxu1 }
 0xa47   : > { %v32483_v28 = vadd.f32 %v20441_v19, %v32816_v12 }
 0xa49   : > { %v28049_v34 = vpop.eup %28048  ;;  %v26499_v48 = vpop.f32.mrb[62].mxu1  ;;  %20833 = vxpose.xlu1.b32.end [16/16] (narrow) %v26839_v22, 8  ;;  %v32821_v22 = vld [vmem:[#allocation68_spill] sm:$0xff] }
 0xa4a   : > { %20978 = vst [vmem:[%s32420_s30 + $0x10] sm:$0x1f] %v28049_v34  ;;  %v26857_v52 = vadd.f32 %v26499_v48, %v32817_v17  ;;  %v20451_v42 = vpop.f32.mrb[63].mxu1  ;;  %v32832_v34 = vld [vmem:[#allocation79_spill] sm:$0xff] }
 0xa4b   : > { %v26858_v63 = vadd.f32 %v20451_v42, %v32818_v30 }
 0xa4d   : > { %v26502_v41 = vpop.f32.mrb[64].mxu1  ;;  %20882 = vxpose.xlu0.b32.start [1/16] (narrow) %v26858_v63, 8  ;;  %20850 = vxpose.xlu1.b32.start [1/16] (narrow) %v26842_v0, 8  ;;  %v20770_v9 = vpop.trf.xlu1  ;;  %v32823_v0 = vld [vmem:[#allocation70_spill] sm:$0xff] }
 0xa4e   : > { %v26859_v6 = vadd.f32 %v26502_v41, %v32819_v50  ;;  %v20923_v56 = vadd.f32 %v32397_v60, %v20770_v9  ;;  %v20461_v1 = vpop.f32.mrb[65].mxu1 }
 0xa4f   : > { %v26860_v54 = vadd.f32 %v20461_v1, %v32820_v27 }
 0xa50   : > { %v22588_v3 = vmul.f32 -1.442695, %v20923_v56 }
 0xa51   : > { %v26505_v37 = vpop.f32.mrb[66].mxu1  ;;  %20883 = vxpose.xlu0.b32.cont [2/16] (narrow) %v26857_v52, 8  ;;  %20851 = vxpose.xlu1.b32.cont [2/16] (narrow) %v26841_v35, 8 }
 0xa52   : > { %28050 = vpow2.f32 %v22588_v3  ;;  %v26861_v5 = vadd.f32 %v26505_v37, %v32821_v22  ;;  %v20471_v47 = vpop.f32.mrb[67].mxu1 }
 0xa53   : > { %v26862_v7 = vadd.f32 %v20471_v47, %v32822_v10 }
 0xa55   : > { %v26508_v39 = vpop.f32.mrb[68].mxu1  ;;  %20884 = vxpose.xlu0.b32.cont [3/16] (narrow) %v26860_v54, 8  ;;  %20852 = vxpose.xlu1.b32.cont [3/16] (narrow) %v26844_v43, 8  ;;  %v32827_v43 = vld [vmem:[#allocation74_spill] sm:$0xff] }
 0xa56   : > { %v26863_v20 = vadd.f32 %v26508_v39, %v32823_v0  ;;  %v20481_v44 = vpop.f32.mrb[69].mxu1 }
 0xa57   : > { %v26864_v33 = vadd.f32 %v20481_v44, %v32824_v4 }
 0xa59   : > { %v26511_v46 = vpop.f32.mrb[70].mxu1  ;;  %20885 = vxpose.xlu0.b32.cont [4/16] (narrow) %v26859_v6, 8  ;;  %20853 = vxpose.xlu1.b32.cont [4/16] (narrow) %v32445_v31, 8  ;;  %v32829_v31 = vld [vmem:[#allocation76_spill] sm:$0xff] }
 0xa5a   : > { %v26865_v35 = vadd.f32 %v26511_v46, %v32825_v24  ;;  %v20491_v21 = vpop.f32.mrb[71].mxu1 }
 0xa5b   : > { %v26866_v51 = vadd.f32 %v20491_v21, %v32826_v26 }
 0xa5c   : > { %v28051_v38 = vpop.eup %28050 }
 0xa5d   : > { %v20955_v8 = vadd.f32 1.0, %v28051_v38  ;;  %v26514_v13 = vpop.f32.mrb[72].mxu1  ;;  %20886 = vxpose.xlu0.b32.cont [5/16] (narrow) %v26862_v7, 8  ;;  %20854 = vxpose.xlu1.b32.cont [5/16] (narrow) %v32453_v55, 8  ;;  %v32831_v55 = vld [vmem:[#allocation78_spill] sm:$0xff] }
 0xa5e   : > { %v26867_v58 = vadd.f32 %v26514_v13, %v32827_v43  ;;  %v20501_v11 = vpop.f32.mrb[73].mxu1 }
 0xa5f   : > { %28052 = vrcp.f32 %v20955_v8  ;;  %v26868_v57 = vadd.f32 %v20501_v11, %v32828_v53 }
 0xa61   : > { %v26517_v36 = vpop.f32.mrb[74].mxu1  ;;  %20887 = vxpose.xlu0.b32.cont [6/16] (narrow) %v26861_v5, 8  ;;  %20855 = vxpose.xlu1.b32.cont [6/16] (narrow) %v32450_v15, 8 }
 0xa62   : > { %v26869_v23 = vadd.f32 %v26517_v36, %v32829_v31  ;;  %v20511_v32 = vpop.f32.mrb[75].mxu1 }
 0xa63   : > { %v26870_v62 = vadd.f32 %v20511_v32, %v32830_v61 }
 0xa65   : > { %v26520_v29 = vpop.f32.mrb[76].mxu1  ;;  %20888 = vxpose.xlu0.b32.cont [7/16] (narrow) %v26864_v33, 8  ;;  %20856 = vxpose.xlu1.b32.cont [7/16] (narrow) %v32459_v49, 8 }
 0xa66   : > { %v26871_v19 = vadd.f32 %v26520_v29, %v32831_v55  ;;  %v20521_v12 = vpop.f32.mrb[77].mxu1 }
 0xa67   : > { %v26872_v48 = vadd.f32 %v20521_v12, %v32832_v34 }
 0xa69   : > { %v28053_v17 = vpop.eup %28052  ;;  %20889 = vxpose.xlu0.b32.cont [8/16] (narrow) %v26863_v20, 8  ;;  %20857 = vxpose.xlu1.b32.cont [8/16] (narrow) %v32456_v59, 8 }
 0xa6a   : > { %20979 = vst [vmem:[%s32420_s30 + $0x18] sm:$0x1f] %v28053_v17 }
 0xa6d   : > { %20890 = vxpose.xlu0.b32.cont [9/16] (narrow) %v26866_v51, 8  ;;  %v20802_v15 = vpop.trf.xlu0  ;;  %20858 = vxpose.xlu1.b32.cont [9/16] (narrow) %v32465_v16, 8 }
 0xa6e   : > { %v20924_v52 = vadd.f32 %v32397_v60, %v20802_v15 }
 0xa70   : > { %v22589_v42 = vmul.f32 -1.442695, %v20924_v52 }
 0xa71   : > { %20891 = vxpose.xlu0.b32.cont [10/16] (narrow) %v26865_v35, 8  ;;  %20859 = vxpose.xlu1.b32.cont [10/16] (narrow) %v32462_v40, 8 }
 0xa72   : > { %28054 = vpow2.f32 %v22589_v42 }
 0xa75   : > { %20892 = vxpose.xlu0.b32.cont [11/16] (narrow) %v26868_v57, 8  ;;  %20860 = vxpose.xlu1.b32.cont [11/16] (narrow) %v32471_v14, 8 }
 0xa79   : > { %20893 = vxpose.xlu0.b32.cont [12/16] (narrow) %v26867_v58, 8  ;;  %20861 = vxpose.xlu1.b32.cont [12/16] (narrow) %v32468_v18, 8 }
 0xa7c   : > { %v28055_v59 = vpop.eup %28054 }
 0xa7d   : > { %v20956_v49 = vadd.f32 1.0, %v28055_v59  ;;  %20894 = vxpose.xlu0.b32.cont [13/16] (narrow) %v26870_v62, 8  ;;  %20862 = vxpose.xlu1.b32.cont [13/16] (narrow) %v32477_v45, 8 }
 0xa7f   : > { %28056 = vrcp.f32 %v20956_v49 }
 0xa81   : > { %20895 = vxpose.xlu0.b32.cont [14/16] (narrow) %v26869_v23, 8  ;;  %20863 = vxpose.xlu1.b32.cont [14/16] (narrow) %v32474_v25, 8 }
 0xa85   : > { %20896 = vxpose.xlu0.b32.cont [15/16] (narrow) %v26872_v48, 8  ;;  %20864 = vxpose.xlu1.b32.cont [15/16] (narrow) %v32483_v28, 8 }
 0xa89   : > { %v28057_v40 = vpop.eup %28056  ;;  %20897 = vxpose.xlu0.b32.end [16/16] (narrow) %v26871_v19, 8  ;;  %20865 = vxpose.xlu1.b32.end [16/16] (narrow) %v32480_v2, 8 }
 0xa8a   : > { %20980 = vst [vmem:[%s32420_s30 + $0x20] sm:$0x1f] %v28057_v40 }
 0xa8d   : > { %v20834_v16 = vpop.trf.xlu1 }
 0xa8e   : > { %v20925_v18 = vadd.f32 %v32397_v60, %v20834_v16 }
 0xa90   : > { %v22590_v14 = vmul.f32 -1.442695, %v20925_v18 }
 0xa92   : > { %28058 = vpow2.f32 %v22590_v14 }
 0xa9c   : > { %v28059_v30 = vpop.eup %28058 }
 0xa9d   : > { %v20957_v45 = vadd.f32 1.0, %v28059_v30 }
 0xa9f   : > { %28060 = vrcp.f32 %v20957_v45 }
 0xaa9   : > { %v28061_v63 = vpop.eup %28060 }
 0xaaa   : > { %20981 = vst [vmem:[%s32420_s30 + $0x28] sm:$0x1f] %v28061_v63 }
 0xacd   : > { %v20898_v41 = vpop.trf.xlu0  ;;  %v20866_v25 = vpop.trf.xlu1 }
 0xace   : > { %v20927_v28 = vadd.f32 %v32397_v60, %v20898_v41  ;;  %v20926_v9 = vadd.f32 %v32397_v60, %v20866_v25 }
 0xad0   : > { %v22592_v2 = vmul.f32 -1.442695, %v20927_v28  ;;  %v22591_v50 = vmul.f32 -1.442695, %v20926_v9 }
 0xad2   : > { %28062 = vpow2.f32 %v22592_v2 }
 0xad3   : > { %28064 = vpow2.f32 %v22591_v50 }
 0xadc   : > { %v28063_v6 = vpop.eup %28062 }
 0xadd   : > { %v28065_v56 = vpop.eup %28064  ;;  %v20959_v1 = vadd.f32 1.0, %v28063_v6 }
 0xade   : > { %v20958_v27 = vadd.f32 1.0, %v28065_v56 }
 0xadf   : > { %28066 = vrcp.f32 %v20959_v1 }
 0xae0   : > { %28068 = vrcp.f32 %v20958_v27 }
 0xae9   : > { %v28067_v54 = vpop.eup %28066 }
 0xaea   : > { %v28069_v3 = vpop.eup %28068  ;;  %20983 = vst [vmem:[%s32420_s30 + $0x38] sm:$0x1f] %v28067_v54 }
 0xaeb   : > { %20982 = vst [vmem:[%s32420_s30 + $0x30] sm:$0x1f] %v28069_v3 }
 0xaec PF: > { %s15_s18 = sadd.s32 1, %s28187_s18  }
 0xaed   : > { %p12_p4 = scmp.ge.s32.totalorder %s15_s18, 4  }
 0xaef   :  { %14 = sbr.rel (!%p12_p4) target bundleno = 1 (0x1), region = 92 }

</bundles_post_ra>
